<compile_context>
chip_gen: v7x
topology: tpu7x:2x2x1
jax: 0.10.0
libtpu: 0.0.40
codegen_flags: <defaults>
</compile_context>

<pallas_src>
import jax
import jax.numpy as jnp
import numpy as np
from jax.experimental import pallas as pl
from jax.experimental.pallas import tpu as pltpu

NIN = 32          # vocab size (nin)
N_EMB = 32        # n_emb
N_LATENT = 16     # n_latent
HID = 64          # hidden width of ChannelEncoder/ChannelDecoder MLPs
MAX_TOK_TILE = 2048
THETA_LANES = 128
THETA_ROW_ALIGN = 16   # multiple of the bf16 sublane tile so both f32 and bf16 slabs slice cleanly

FUSED_ORDER = [
    "w_tx1", "txe_b1", "txe_w2", "txe_b2",
    "wj1", "bj1", "w_joint", "b_joint",
    "w_rel1", "ree_b1", "ree_w2", "ree_b2",
    "rx2_w1", "rx2_b1", "w_d2fin", "b_fin",
]


def _channel(z):
    # deterministic power normalization sqrt(d/2) * F.normalize(z, dim=-1, p=2);
    # rsqrt keeps the sqrt/divide on the EUP instead of the VALU.  Always f32.
    d = z.shape[-1]
    ss = jnp.sum(z * z, axis=-1, keepdims=True)
    return (jnp.float32(np.sqrt(d / 2.0)) * z) * jax.lax.rsqrt(jnp.maximum(ss, 1e-24))


def make_fused_kernel(offs, compute_dtype):
    """offs: name -> (row_offset, rows, cols) inside the packed theta slab (static python ints)."""

    def kernel(ids_ref, mask_ref, theta_ref, xhat_ref, nll_ref):
        def W(name):                       # matmul weight, in theta's dtype (f32 or bf16)
            o, r, c = offs[name]
            return theta_ref[o:o + r, :c]

        def Bv(name):                      # bias row, always consumed in f32
            o, _, c = offs[name]
            return theta_ref[o:o + 1, :c].astype(jnp.float32)

        def mm(a, name):                   # MXU matmul; activations cast to the compute dtype
            return jnp.dot(a.astype(compute_dtype), W(name),
                           preferred_element_type=jnp.float32)

        tt = ids_ref.shape[0]
        ids = ids_ref[...]                                        # (TT, 1) int32
        cls32 = jax.lax.broadcasted_iota(jnp.int32, (tt, NIN), 1)

        # ---------- frozen Tx_Relay encoder (embedding @ txe_w1 folded at pack time) ----------
        onehot_x = (ids == cls32).astype(compute_dtype)           # exact gather via MXU
        h0 = jnp.maximum(mm(onehot_x, "w_tx1") + Bv("txe_b1"), 0.0)
        ch_input = mm(h0, "txe_w2") + Bv("txe_b2")
        y1 = _channel(ch_input)            # normalized once; reused for relay link AND S->D link

        # ---------- fused relay_decoder + rx_decoder_1 (shared input y1) ----------
        # wj1 = [rld_w1 | rx1_w1]; the second-layer weights and their downstream linears are folded
        # into one anti-blockdiag (128, 64) matmul:
        #   out64[:, :32] = d1 @ fin_w1 + rx1_b2 @ fin_w1    (S->D logits contribution)
        #   out64[:, 32:] = relay_dec @ txl_w + txl_b        (relay logits; only feeds the argmax)
        h1 = jnp.maximum(mm(y1, "wj1") + Bv("bj1"), 0.0)          # (TT, 128)
        out64 = mm(h1, "w_joint") + Bv("b_joint")                 # (TT, 64)

        # relay hard decision = argmax over lanes 32:64 (pure reduction; no lane-offset slice)
        cls64 = jax.lax.broadcasted_iota(jnp.int32, (tt, 2 * NIN), 1)
        masked = jnp.where(cls64 >= NIN, out64, -jnp.inf)
        mx = jnp.max(masked, axis=-1, keepdims=True)
        hard64 = jnp.min(jnp.where(masked == mx, cls64, 2 * NIN), axis=-1, keepdims=True)
        onehot_hard = ((hard64 - NIN) == cls32).astype(compute_dtype)

        # ---------- relay re-encode -> channel -> rx_decoder_2 (rel_emb@ree_w1, rx2_w2@fin_w2 folded) ----------
        h2 = jnp.maximum(mm(onehot_hard, "w_rel1") + Bv("ree_b1"), 0.0)
        y2 = _channel(mm(h2, "ree_w2") + Bv("ree_b2"))
        h3 = jnp.maximum(mm(y2, "rx2_w1") + Bv("rx2_b1"), 0.0)

        # ---------- final logits: d1-path (already in out64) + d2-path fold + folded bias ----------
        logits = out64[:, :NIN] + mm(h3, "w_d2fin") + Bv("b_fin")  # (TT, nin)
        xhat_ref[...] = logits

        # ---------- masked cross-entropy, one scalar per tile ----------
        # recompute the one-hot compare here instead of keeping onehot_x live across eight matmuls.
        m = jnp.max(logits, axis=-1, keepdims=True)
        lse = m + jnp.log(jnp.sum(jnp.exp(logits - m), axis=-1, keepdims=True))
        picked = jnp.sum(jnp.where(ids == cls32, logits, 0.0), axis=-1, keepdims=True)
        nll_ref[...] = jnp.sum((lse - picked) * mask_ref[...], keepdims=True)   # (1, 1)

    return kernel


# ----------------------------- parameter fusion / packing (hoisted: call once) -----------------------------
def fuse_params(p):
    f = lambda a: jnp.asarray(a, jnp.float32)
    # linear->linear folds (no nonlinearity in between)
    w_tx1 = jnp.dot(f(p["tx_emb"]), f(p["txe_w1"]))                 # (32, 64)
    w_rel1 = jnp.dot(f(p["rel_emb"]), f(p["ree_w1"]))               # (32, 64)
    w_d2fin = jnp.dot(f(p["rx2_w2"]), f(p["fin_w2"]))               # (64, 32)
    b_fin = f(p["fin_b"]) + jnp.dot(f(p["rx2_b2"]), f(p["fin_w2"]))  # (1, 32)
    # anti-blockdiag fold of {relay_decoder.2, rx_decoder_1.2} with their downstream linears
    rld_out = jnp.dot(f(p["rld_w2"]), f(p["txl_w"]))                # (64, 32) -> relay logits
    rx1_out = jnp.dot(f(p["rx1_w2"]), f(p["fin_w1"]))               # (64, 32) -> d1 logits contribution
    z = jnp.zeros((HID, NIN), jnp.float32)
    w_joint = jnp.concatenate(
        [jnp.concatenate([z, rld_out], axis=1),
         jnp.concatenate([rx1_out, z], axis=1)], axis=0)            # (128, 64)
    b_joint = jnp.concatenate(
        [jnp.dot(f(p["rx1_b2"]), f(p["fin_w1"])),
         jnp.dot(f(p["rld_b2"]), f(p["txl_w"])) + f(p["txl_b"])], axis=1)  # (1, 64)
    return {
        "w_tx1": w_tx1, "txe_b1": f(p["txe_b1"]), "txe_w2": f(p["txe_w2"]), "txe_b2": f(p["txe_b2"]),
        "wj1": jnp.concatenate([f(p["rld_w1"]), f(p["rx1_w1"])], axis=1),   # (16, 128)
        "bj1": jnp.concatenate([f(p["rld_b1"]), f(p["rx1_b1"])], axis=1),   # (1, 128)
        "w_joint": w_joint, "b_joint": b_joint,
        "w_rel1": w_rel1, "ree_b1": f(p["ree_b1"]), "ree_w2": f(p["ree_w2"]), "ree_b2": f(p["ree_b2"]),
        "rx2_w1": f(p["rx2_w1"]), "rx2_b1": f(p["rx2_b1"]),
        "w_d2fin": w_d2fin, "b_fin": b_fin,
    }


def pack_theta(fused, dtype):
    """Pack all params into one (rows, 128) slab; row offsets aligned to 16 sublanes (f32- and bf16-safe)."""
    offs = {}
    row = 0
    for name in FUSED_ORDER:
        r, c = fused[name].shape
        assert c <= THETA_LANES
        offs[name] = (row, r, c)
        row += ((r + THETA_ROW_ALIGN - 1) // THETA_ROW_ALIGN) * THETA_ROW_ALIGN
    theta = jnp.zeros((row, THETA_LANES), dtype)
    for name in FUSED_ORDER:
        o, r, c = offs[name]
        theta = theta.at[o:o + r, :c].set(fused[name].astype(dtype))
    return theta, offs


def pack_tx_relay_rx_params(params, use_bf16=False):
    """Fold + pack once per parameter update.  use_bf16=True is the v6e/v7x MXU-native fast path."""
    dtype = jnp.bfloat16 if use_bf16 else jnp.float32
    return pack_theta(fuse_params(params), dtype)


# ----------------------------- per-chip grid heuristic -----------------------------
def _num_tensorcores():
    try:
        kind = getattr(jax.devices()[0], "device_kind", "").lower()
        if "v7" in kind or "tpu7" in kind:   # v7x packs two TensorCores per chip
            return 2
    except Exception:
        pass
    return 1                                  # v5e / v6e: single TensorCore


def _pick_grid(n_tokens):
    n8 = max(8, ((n_tokens + 7) // 8) * 8)
    if _num_tensorcores() >= 2:
        # v7x: keep an even grid >= 2 so ("parallel",) load-balances both TensorCores.
        g = max(2, -(-n8 // MAX_TOK_TILE))
        if g % 2:
            g += 1
        tile = ((-(-n8 // g) + 7) // 8) * 8
    else:
        # v5e / v6e: one big tile; splitting the grid only adds per-step overhead.
        tile = min(MAX_TOK_TILE, n8)
        g = -(-n8 // tile)
    return tile, g


# ----------------------------- forward wrapper -----------------------------
def tx_relay_rx_forward(x, attention_mask, d_sd, d_sr, d_rd, theta, offs):
    del d_sd, d_sr, d_rd  # TODO(synk): unused (deterministic channel, see header note)
    B, T = x.shape
    N = B * T
    tile, G = _pick_grid(N)
    n_pad = G * tile

    ids = jnp.zeros((n_pad,), jnp.int32).at[:N].set(
        x.reshape(-1).astype(jnp.int32)).reshape(n_pad, 1)
    msk = jnp.zeros((n_pad,), jnp.float32).at[:N].set(
        (attention_mask.reshape(-1) == 1).astype(jnp.float32)).reshape(n_pad, 1)

    compute_dtype = jnp.bfloat16 if theta.dtype == jnp.bfloat16 else jnp.float32
    kernel = make_fused_kernel(offs, compute_dtype)

    xhat_flat, nll = pl.pallas_call(
        kernel,
        out_shape=(
            jax.ShapeDtypeStruct((n_pad, NIN), jnp.float32),
            jax.ShapeDtypeStruct((G, 1), jnp.float32),
        ),
        grid_spec=pltpu.PrefetchScalarGridSpec(
            num_scalar_prefetch=0,
            grid=(G,),
            in_specs=[
                pl.BlockSpec((tile, 1), lambda i: (i, 0)),          # token ids
                pl.BlockSpec((tile, 1), lambda i: (i, 0)),          # attention mask
                pl.BlockSpec(theta.shape, lambda i: (0, 0)),        # packed params (resident, ~0.3 MB)
            ],
            out_specs=[
                pl.BlockSpec((tile, NIN), lambda i: (i, 0)),        # logits
                pl.BlockSpec((1, 1), lambda i: (i, 0)),             # per-tile masked NLL sum
            ],
        ),
        compiler_params=pltpu.CompilerParams(dimension_semantics=("parallel",)),
    )(ids, msk, theta)

    denom = jnp.maximum(jnp.sum(msk), 1.0)   # guards the all-zero-mask NaN (reference would NaN)
    loss = jnp.sum(nll) / denom
    return xhat_flat[:N].reshape(B, T, NIN), loss


# ----------------------------- parameter init (deterministic) -----------------------------
def init_params(key):
    def dense(k, fan_in, fan_out):
        kw, kb = jax.random.split(k)
        bound = 1.0 / np.sqrt(fan_in)
        w = jax.random.uniform(kw, (fan_in, fan_out), jnp.float32, -bound, bound)
        b = jax.random.uniform(kb, (1, fan_out), jnp.float32, -bound, bound)
        return w, b

    keys = jax.random.split(key, 16)
    p = {}
    p["tx_emb"] = jax.random.normal(keys[0], (NIN, N_EMB), jnp.float32)
    p["txe_w1"], p["txe_b1"] = dense(keys[1], N_EMB, HID)
    p["txe_w2"], p["txe_b2"] = dense(keys[2], HID, N_LATENT)
    p["rld_w1"], p["rld_b1"] = dense(keys[3], N_LATENT, HID)
    p["rld_w2"], p["rld_b2"] = dense(keys[4], HID, N_EMB)
    p["txl_w"], p["txl_b"] = dense(keys[5], N_EMB, NIN)
    p["rel_emb"] = jax.random.normal(keys[6], (NIN, N_EMB), jnp.float32)
    p["ree_w1"], p["ree_b1"] = dense(keys[7], N_EMB, HID)
    p["ree_w2"], p["ree_b2"] = dense(keys[8], HID, N_LATENT)
    p["rx1_w1"], p["rx1_b1"] = dense(keys[9], N_LATENT, HID)
    p["rx1_w2"], p["rx1_b2"] = dense(keys[10], HID, N_EMB)
    p["rx2_w1"], p["rx2_b1"] = dense(keys[11], N_LATENT, HID)
    p["rx2_w2"], p["rx2_b2"] = dense(keys[12], HID, N_EMB)
    fw, fb = dense(keys[13], 2 * N_EMB, NIN)
    p["fin_w1"], p["fin_w2"], p["fin_b"] = fw[:N_EMB], fw[N_EMB:], fb
    return p


# ----------------------------- pure-JAX reference for validation -----------------------------
def _ref_channel(z):
    d = z.shape[-1]
    norm = jnp.maximum(jnp.sqrt(jnp.sum(z * z, axis=-1, keepdims=True)), 1e-12)
    return jnp.float32(np.sqrt(d / 2.0)) * z / norm


def _ref_mlp(h, w1, b1, w2, b2):
    return jnp.dot(jnp.maximum(jnp.dot(h, w1) + b1, 0.0), w2) + b2


def reference(x, attention_mask, p):
    emb = p["tx_emb"][x]
    ch_input = _ref_mlp(emb, p["txe_w1"], p["txe_b1"], p["txe_w2"], p["txe_b2"])
    dec = _ref_mlp(_ref_channel(ch_input), p["rld_w1"], p["rld_b1"], p["rld_w2"], p["rld_b2"])
    xhat_relay = jnp.dot(dec, p["txl_w"]) + p["txl_b"]
    x_hard = jnp.argmax(xhat_relay, axis=-1)
    x_emb = p["rel_emb"][x_hard]
    y2 = _ref_channel(_ref_mlp(x_emb, p["ree_w1"], p["ree_b1"], p["ree_w2"], p["ree_b2"]))
    y1 = _ref_channel(ch_input)
    d1 = _ref_mlp(y1, p["rx1_w1"], p["rx1_b1"], p["rx1_w2"], p["rx1_b2"])
    d2 = _ref_mlp(y2, p["rx2_w1"], p["rx2_b1"], p["rx2_w2"], p["rx2_b2"])
    fin_w = jnp.concatenate([p["fin_w1"], p["fin_w2"]], axis=0)
    logits = jnp.dot(jnp.concatenate([d1, d2], axis=-1), fin_w) + p["fin_b"]
    B, T = x.shape
    flat = logits.reshape(B * T, NIN)
    labels = x.reshape(B * T)
    msk = (attention_mask.reshape(B * T) == 1)
    lse = jax.scipy.special.logsumexp(flat, axis=-1)
    nll = lse - flat[jnp.arange(B * T), labels]
    loss = jnp.sum(jnp.where(msk, nll, 0.0)) / jnp.sum(msk.astype(jnp.float32))
    return logits, loss


if __name__ == "__main__":
    key = jax.random.PRNGKey(0)
    kx, km, kp = jax.random.split(key, 3)
    B, T = 2, 256                       # 512 tokens -> 1 big tile (v5e/v6e) or 2x256 (v7x)
    x = jax.random.randint(kx, (B, T), 0, NIN, dtype=jnp.int32)
    attention_mask = (jax.random.uniform(km, (B, T)) > 0.2).astype(jnp.int32)
    attention_mask = attention_mask.at[:, 0].set(1)   # guarantee non-empty mask
    params = init_params(kp)
    d_sd, d_sr, d_rd = 1.0, 0.5, 0.5

    # ---- pack once (hoisted out of the per-call forward), then jit the forward ----
    theta, offs = pack_tx_relay_rx_params(params)
    fwd = jax.jit(lambda xx, mm, th: tx_relay_rx_forward(xx, mm, d_sd, d_sr, d_rd, th, offs))
    xhat, loss = fwd(x, attention_mask, theta)
    jax.block_until_ready((xhat, loss))

    xhat_ref, loss_ref = reference(x, attention_mask, params)
    np.testing.assert_allclose(np.asarray(xhat), np.asarray(xhat_ref), rtol=2e-4, atol=2e-4)
    np.testing.assert_allclose(float(loss), float(loss_ref), rtol=2e-4, atol=2e-4)

    # ---- bf16 fast path (v6e/v7x MXU-native).  Numerics differ (the relay argmax can flip on
    #      near-ties), so only a sanity check here rather than the 2e-4 assert. ----
    theta16, offs16 = pack_tx_relay_rx_params(params, use_bf16=True)
    fwd16 = jax.jit(lambda xx, mm, th: tx_relay_rx_forward(xx, mm, d_sd, d_sr, d_rd, th, offs16))
    xhat16, loss16 = fwd16(x, attention_mask, theta16)
    jax.block_until_ready((xhat16, loss16))
    assert np.all(np.isfinite(np.asarray(xhat16))) and np.isfinite(float(loss16))

    print("KERNEL_OK")
</pallas_src>

<mosaic_0001>
module attributes {stable_mosaic.version = 11 : i64} {
  func.func @kernel(%arg0: i32, %arg1: memref<512x1xi32, #tpu.memory_space<vmem>>, %arg2: memref<512x1xf32, #tpu.memory_space<vmem>>, %arg3: memref<544x128xf32, #tpu.memory_space<vmem>>, %arg4: memref<512x32xf32, #tpu.memory_space<vmem>>, %arg5: memref<1x1xf32, #tpu.memory_space<vmem>>) attributes {dimension_semantics = [#tpu.dimension_semantics<parallel>], iteration_bounds = array<i64: 1>, scalar_prefetch = 0 : i64, scratch_operands = 0 : i64, tpu.core_type = #tpu.core_type<tc>, window_params = [{transform_indices = @transform_0, window_bounds = array<i64: 512, 1>}, {transform_indices = @transform_1, window_bounds = array<i64: 512, 1>}, {pipeline_mode = #tpu.pipeline_mode<synchronous>, transform_indices = @transform_2, window_bounds = array<i64: 544, 128>}, {transform_indices = @transform_3, window_bounds = array<i64: 512, 32>}, {transform_indices = @transform_4, window_bounds = array<i64: 1, 1>}]} {
    %c0 = arith.constant 0 : index
    %c0_0 = arith.constant 0 : index
    %0 = vector.load %arg1[%c0, %c0_0] : memref<512x1xi32, #tpu.memory_space<vmem>>, vector<512x1xi32>
    %1 = tpu.iota {dimensions = array<i32: 1>} : vector<512x32xi32>
    %2 = vector.broadcast %0 : vector<512x1xi32> to vector<512x32xi32>
    %3 = arith.cmpi eq, %2, %1 : vector<512x32xi32>
    %4 = arith.extui %3 : vector<512x32xi1> to vector<512x32xi32>
    %5 = arith.sitofp %4 : vector<512x32xi32> to vector<512x32xf32>
    %c0_1 = arith.constant 0 : index
    %c0_2 = arith.constant 0 : index
    %6 = vector.load %arg3[%c0_1, %c0_2] : memref<544x128xf32, #tpu.memory_space<vmem>>, vector<32x64xf32>
    %cst = arith.constant dense<0.000000e+00> : vector<512x64xf32>
    %7 = tpu.matmul %5, %6, %cst {dimension_numbers = #tpu.dot_dimension_numbers<[1], [0], [0], [1], [0, 0, 1, 1], [], []>} : vector<512x32xf32>, vector<32x64xf32>, vector<512x64xf32> -> vector<512x64xf32>
    %c32 = arith.constant 32 : index
    %c0_3 = arith.constant 0 : index
    %8 = vector.load %arg3[%c32, %c0_3] : memref<544x128xf32, #tpu.memory_space<vmem>>, vector<1x64xf32>
    %9 = vector.broadcast %8 : vector<1x64xf32> to vector<512x64xf32>
    %10 = arith.addf %7, %9 : vector<512x64xf32>
    %cst_4 = arith.constant 0.000000e+00 : f32
    %11 = vector.broadcast %cst_4 : f32 to vector<512x64xf32>
    %12 = arith.maximumf %10, %11 : vector<512x64xf32>
    %c48 = arith.constant 48 : index
    %c0_5 = arith.constant 0 : index
    %13 = vector.load %arg3[%c48, %c0_5] : memref<544x128xf32, #tpu.memory_space<vmem>>, vector<64x16xf32>
    %cst_6 = arith.constant dense<0.000000e+00> : vector<512x16xf32>
    %14 = tpu.matmul %12, %13, %cst_6 {dimension_numbers = #tpu.dot_dimension_numbers<[1], [0], [0], [1], [0, 0, 1, 1], [], []>} : vector<512x64xf32>, vector<64x16xf32>, vector<512x16xf32> -> vector<512x16xf32>
    %c112 = arith.constant 112 : index
    %c0_7 = arith.constant 0 : index
    %15 = vector.load %arg3[%c112, %c0_7] : memref<544x128xf32, #tpu.memory_space<vmem>>, vector<1x16xf32>
    %16 = vector.broadcast %15 : vector<1x16xf32> to vector<512x16xf32>
    %17 = arith.addf %14, %16 : vector<512x16xf32>
    %18 = arith.mulf %17, %17 : vector<512x16xf32>
    %cst_8 = arith.constant dense<0.000000e+00> : vector<512xf32>
    %19 = vector.multi_reduction <add>, %18, %cst_8 [1] : vector<512x16xf32> to vector<512xf32>
    %20 = vector.shape_cast %19 : vector<512xf32> to vector<512x1xf32>
    %cst_9 = arith.constant 2.82842708 : f32
    %21 = vector.broadcast %cst_9 : f32 to vector<512x16xf32>
    %22 = arith.mulf %21, %17 : vector<512x16xf32>
    %cst_10 = arith.constant 1.000000e-24 : f32
    %23 = vector.broadcast %cst_10 : f32 to vector<512x1xf32>
    %24 = arith.maximumf %20, %23 : vector<512x1xf32>
    %25 = math.rsqrt %24 : vector<512x1xf32>
    %26 = vector.broadcast %25 : vector<512x1xf32> to vector<512x16xf32>
    %27 = arith.mulf %22, %26 : vector<512x16xf32>
    %c128 = arith.constant 128 : index
    %c0_11 = arith.constant 0 : index
    %28 = vector.load %arg3[%c128, %c0_11] : memref<544x128xf32, #tpu.memory_space<vmem>>, vector<16x128xf32>
    %cst_12 = arith.constant dense<0.000000e+00> : vector<512x128xf32>
    %29 = tpu.matmul %27, %28, %cst_12 {dimension_numbers = #tpu.dot_dimension_numbers<[1], [0], [0], [1], [0, 0, 1, 1], [], []>} : vector<512x16xf32>, vector<16x128xf32>, vector<512x128xf32> -> vector<512x128xf32>
    %c144 = arith.constant 144 : index
    %c0_13 = arith.constant 0 : index
    %30 = vector.load %arg3[%c144, %c0_13] : memref<544x128xf32, #tpu.memory_space<vmem>>, vector<1x128xf32>
    %31 = vector.broadcast %30 : vector<1x128xf32> to vector<512x128xf32>
    %32 = arith.addf %29, %31 : vector<512x128xf32>
    %cst_14 = arith.constant 0.000000e+00 : f32
    %33 = vector.broadcast %cst_14 : f32 to vector<512x128xf32>
    %34 = arith.maximumf %32, %33 : vector<512x128xf32>
    %c160 = arith.constant 160 : index
    %c0_15 = arith.constant 0 : index
    %35 = vector.load %arg3[%c160, %c0_15] : memref<544x128xf32, #tpu.memory_space<vmem>>, vector<128x64xf32>
    %cst_16 = arith.constant dense<0.000000e+00> : vector<512x64xf32>
    %36 = tpu.matmul %34, %35, %cst_16 {dimension_numbers = #tpu.dot_dimension_numbers<[1], [0], [0], [1], [0, 0, 1, 1], [], []>} : vector<512x128xf32>, vector<128x64xf32>, vector<512x64xf32> -> vector<512x64xf32>
    %c288 = arith.constant 288 : index
    %c0_17 = arith.constant 0 : index
    %37 = vector.load %arg3[%c288, %c0_17] : memref<544x128xf32, #tpu.memory_space<vmem>>, vector<1x64xf32>
    %38 = vector.broadcast %37 : vector<1x64xf32> to vector<512x64xf32>
    %39 = arith.addf %36, %38 : vector<512x64xf32>
    %40 = tpu.iota {dimensions = array<i32: 1>} : vector<512x64xi32>
    %c32_i32 = arith.constant 32 : i32
    %41 = vector.broadcast %c32_i32 : i32 to vector<512x64xi32>
    %42 = arith.cmpi sge, %40, %41 : vector<512x64xi32>
    %cst_18 = arith.constant 0xFF800000 : f32
    %43 = vector.broadcast %cst_18 : f32 to vector<512x64xf32>
    %44 = arith.select %42, %39, %43 : vector<512x64xi1>, vector<512x64xf32>
    %cst_19 = arith.constant dense<0xFF800000> : vector<512xf32>
    %45 = vector.multi_reduction <maximumf>, %44, %cst_19 [1] : vector<512x64xf32> to vector<512xf32>
    %46 = vector.shape_cast %45 : vector<512xf32> to vector<512x1xf32>
    %47 = vector.broadcast %46 : vector<512x1xf32> to vector<512x64xf32>
    %48 = arith.cmpf oeq, %44, %47 : vector<512x64xf32>
    %c64_i32 = arith.constant 64 : i32
    %49 = vector.broadcast %c64_i32 : i32 to vector<512x64xi32>
    %50 = arith.select %48, %40, %49 : vector<512x64xi1>, vector<512x64xi32>
    %cst_20 = arith.constant dense<2147483647> : vector<512xi32>
    %51 = vector.multi_reduction <minsi>, %50, %cst_20 [1] : vector<512x64xi32> to vector<512xi32>
    %52 = vector.shape_cast %51 : vector<512xi32> to vector<512x1xi32>
    %c32_i32_21 = arith.constant 32 : i32
    %53 = vector.broadcast %c32_i32_21 : i32 to vector<512x1xi32>
    %54 = arith.subi %52, %53 : vector<512x1xi32>
    %55 = vector.broadcast %54 : vector<512x1xi32> to vector<512x32xi32>
    %56 = arith.cmpi eq, %55, %1 : vector<512x32xi32>
    %57 = arith.extui %56 : vector<512x32xi1> to vector<512x32xi32>
    %58 = arith.sitofp %57 : vector<512x32xi32> to vector<512x32xf32>
    %c304 = arith.constant 304 : index
    %c0_22 = arith.constant 0 : index
    %59 = vector.load %arg3[%c304, %c0_22] : memref<544x128xf32, #tpu.memory_space<vmem>>, vector<32x64xf32>
    %cst_23 = arith.constant dense<0.000000e+00> : vector<512x64xf32>
    %60 = tpu.matmul %58, %59, %cst_23 {dimension_numbers = #tpu.dot_dimension_numbers<[1], [0], [0], [1], [0, 0, 1, 1], [], []>} : vector<512x32xf32>, vector<32x64xf32>, vector<512x64xf32> -> vector<512x64xf32>
    %c336 = arith.constant 336 : index
    %c0_24 = arith.constant 0 : index
    %61 = vector.load %arg3[%c336, %c0_24] : memref<544x128xf32, #tpu.memory_space<vmem>>, vector<1x64xf32>
    %62 = vector.broadcast %61 : vector<1x64xf32> to vector<512x64xf32>
    %63 = arith.addf %60, %62 : vector<512x64xf32>
    %cst_25 = arith.constant 0.000000e+00 : f32
    %64 = vector.broadcast %cst_25 : f32 to vector<512x64xf32>
    %65 = arith.maximumf %63, %64 : vector<512x64xf32>
    %c352 = arith.constant 352 : index
    %c0_26 = arith.constant 0 : index
    %66 = vector.load %arg3[%c352, %c0_26] : memref<544x128xf32, #tpu.memory_space<vmem>>, vector<64x16xf32>
    %cst_27 = arith.constant dense<0.000000e+00> : vector<512x16xf32>
    %67 = tpu.matmul %65, %66, %cst_27 {dimension_numbers = #tpu.dot_dimension_numbers<[1], [0], [0], [1], [0, 0, 1, 1], [], []>} : vector<512x64xf32>, vector<64x16xf32>, vector<512x16xf32> -> vector<512x16xf32>
    %c416 = arith.constant 416 : index
    %c0_28 = arith.constant 0 : index
    %68 = vector.load %arg3[%c416, %c0_28] : memref<544x128xf32, #tpu.memory_space<vmem>>, vector<1x16xf32>
    %69 = vector.broadcast %68 : vector<1x16xf32> to vector<512x16xf32>
    %70 = arith.addf %67, %69 : vector<512x16xf32>
    %71 = arith.mulf %70, %70 : vector<512x16xf32>
    %cst_29 = arith.constant dense<0.000000e+00> : vector<512xf32>
    %72 = vector.multi_reduction <add>, %71, %cst_29 [1] : vector<512x16xf32> to vector<512xf32>
    %73 = vector.shape_cast %72 : vector<512xf32> to vector<512x1xf32>
    %cst_30 = arith.constant 2.82842708 : f32
    %74 = vector.broadcast %cst_30 : f32 to vector<512x16xf32>
    %75 = arith.mulf %74, %70 : vector<512x16xf32>
    %cst_31 = arith.constant 1.000000e-24 : f32
    %76 = vector.broadcast %cst_31 : f32 to vector<512x1xf32>
    %77 = arith.maximumf %73, %76 : vector<512x1xf32>
    %78 = math.rsqrt %77 : vector<512x1xf32>
    %79 = vector.broadcast %78 : vector<512x1xf32> to vector<512x16xf32>
    %80 = arith.mulf %75, %79 : vector<512x16xf32>
    %c432 = arith.constant 432 : index
    %c0_32 = arith.constant 0 : index
    %81 = vector.load %arg3[%c432, %c0_32] : memref<544x128xf32, #tpu.memory_space<vmem>>, vector<16x64xf32>
    %cst_33 = arith.constant dense<0.000000e+00> : vector<512x64xf32>
    %82 = tpu.matmul %80, %81, %cst_33 {dimension_numbers = #tpu.dot_dimension_numbers<[1], [0], [0], [1], [0, 0, 1, 1], [], []>} : vector<512x16xf32>, vector<16x64xf32>, vector<512x64xf32> -> vector<512x64xf32>
    %c448 = arith.constant 448 : index
    %c0_34 = arith.constant 0 : index
    %83 = vector.load %arg3[%c448, %c0_34] : memref<544x128xf32, #tpu.memory_space<vmem>>, vector<1x64xf32>
    %84 = vector.broadcast %83 : vector<1x64xf32> to vector<512x64xf32>
    %85 = arith.addf %82, %84 : vector<512x64xf32>
    %cst_35 = arith.constant 0.000000e+00 : f32
    %86 = vector.broadcast %cst_35 : f32 to vector<512x64xf32>
    %87 = arith.maximumf %85, %86 : vector<512x64xf32>
    %88 = vector.extract_strided_slice %39 {offsets = [0, 0], sizes = [512, 32], strides = [1, 1]} : vector<512x64xf32> to vector<512x32xf32>
    %c464 = arith.constant 464 : index
    %c0_36 = arith.constant 0 : index
    %89 = vector.load %arg3[%c464, %c0_36] : memref<544x128xf32, #tpu.memory_space<vmem>>, vector<64x32xf32>
    %cst_37 = arith.constant dense<0.000000e+00> : vector<512x32xf32>
    %90 = tpu.matmul %87, %89, %cst_37 {dimension_numbers = #tpu.dot_dimension_numbers<[1], [0], [0], [1], [0, 0, 1, 1], [], []>} : vector<512x64xf32>, vector<64x32xf32>, vector<512x32xf32> -> vector<512x32xf32>
    %91 = arith.addf %88, %90 : vector<512x32xf32>
    %c528 = arith.constant 528 : index
    %c0_38 = arith.constant 0 : index
    %92 = vector.load %arg3[%c528, %c0_38] : memref<544x128xf32, #tpu.memory_space<vmem>>, vector<1x32xf32>
    %93 = vector.broadcast %92 : vector<1x32xf32> to vector<512x32xf32>
    %94 = arith.addf %91, %93 : vector<512x32xf32>
    %c0_39 = arith.constant 0 : index
    %c0_40 = arith.constant 0 : index
    %95 = vector.load %arg4[%c0_39, %c0_40] : memref<512x32xf32, #tpu.memory_space<vmem>>, vector<512x32xf32>
    tpu.vector_store %arg4[%c0_39, %c0_40], %94 {strides = array<i32>} : memref<512x32xf32, #tpu.memory_space<vmem>>, vector<512x32xf32>,
    %cst_41 = arith.constant dense<0xFF800000> : vector<512xf32>
    %96 = vector.multi_reduction <maximumf>, %94, %cst_41 [1] : vector<512x32xf32> to vector<512xf32>
    %97 = vector.shape_cast %96 : vector<512xf32> to vector<512x1xf32>
    %98 = vector.broadcast %97 : vector<512x1xf32> to vector<512x32xf32>
    %99 = arith.subf %94, %98 : vector<512x32xf32>
    %100 = math.exp %99 : vector<512x32xf32>
    %cst_42 = arith.constant dense<0.000000e+00> : vector<512xf32>
    %101 = vector.multi_reduction <add>, %100, %cst_42 [1] : vector<512x32xf32> to vector<512xf32>
    %102 = vector.shape_cast %101 : vector<512xf32> to vector<512x1xf32>
    %103 = math.log %102 : vector<512x1xf32>
    %104 = arith.addf %97, %103 : vector<512x1xf32>
    %105 = vector.broadcast %0 : vector<512x1xi32> to vector<512x32xi32>
    %106 = arith.cmpi eq, %105, %1 : vector<512x32xi32>
    %cst_43 = arith.constant 0.000000e+00 : f32
    %107 = vector.broadcast %cst_43 : f32 to vector<512x32xf32>
    %108 = arith.select %106, %94, %107 : vector<512x32xi1>, vector<512x32xf32>
    %cst_44 = arith.constant dense<0.000000e+00> : vector<512xf32>
    %109 = vector.multi_reduction <add>, %108, %cst_44 [1] : vector<512x32xf32> to vector<512xf32>
    %110 = vector.shape_cast %109 : vector<512xf32> to vector<512x1xf32>
    %111 = arith.subf %104, %110 : vector<512x1xf32>
    %c0_45 = arith.constant 0 : index
    %c0_46 = arith.constant 0 : index
    %112 = vector.load %arg2[%c0_45, %c0_46] : memref<512x1xf32, #tpu.memory_space<vmem>>, vector<512x1xf32>
    %113 = arith.mulf %111, %112 : vector<512x1xf32>
    %114 = vector.shape_cast %113 : vector<512x1xf32> to vector<1x512x1xf32>
    %cst_47 = arith.constant dense<0.000000e+00> : vector<1xf32>
    %115 = vector.multi_reduction <add>, %114, %cst_47 [1, 2] : vector<1x512x1xf32> to vector<1xf32>
    %116 = vector.shape_cast %115 : vector<1xf32> to vector<1x1x1xf32>
    %117 = vector.extract %116[0, 0, 0] : f32 from vector<1x1x1xf32>
    %118 = vector.broadcast %117 : f32 to vector<1x1xf32>
    %c0_48 = arith.constant 0 : index
    %c0_49 = arith.constant 0 : index
    %119 = vector.load %arg5[%c0_48, %c0_49] : memref<1x1xf32, #tpu.memory_space<vmem>>, vector<1x1xf32>
    tpu.vector_store %arg5[%c0_48, %c0_49], %118 {strides = array<i32>} : memref<1x1xf32, #tpu.memory_space<vmem>>, vector<1x1xf32>,
    return
  }
  func.func @transform_0(%arg0: i32) -> (i32, i32) {
    %c0_i32 = arith.constant 0 : i32
    %c0_i32_0 = arith.constant 0 : i32
    return %arg0, %c0_i32 : i32, i32
  }
  func.func @transform_1(%arg0: i32) -> (i32, i32) {
    %c0_i32 = arith.constant 0 : i32
    %c0_i32_0 = arith.constant 0 : i32
    return %arg0, %c0_i32 : i32, i32
  }
  func.func @transform_2(%arg0: i32) -> (i32, i32) {
    %c0_i32 = arith.constant 0 : i32
    %c0_i32_0 = arith.constant 0 : i32
    %c0_i32_1 = arith.constant 0 : i32
    return %c0_i32, %c0_i32_0 : i32, i32
  }
  func.func @transform_3(%arg0: i32) -> (i32, i32) {
    %c0_i32 = arith.constant 0 : i32
    %c0_i32_0 = arith.constant 0 : i32
    return %arg0, %c0_i32 : i32, i32
  }
  func.func @transform_4(%arg0: i32) -> (i32, i32) {
    %c0_i32 = arith.constant 0 : i32
    %c0_i32_0 = arith.constant 0 : i32
    return %arg0, %c0_i32 : i32, i32
  }
}

</mosaic_0001>

<bundles_post_ra>
// kernel: _lambda_.1
= control target key start
LH: loop header
LB: loop body
LE: loop exit
PB: predicated region body
PF: predicated region fallthrough
CT: control target
= control target key end

     0   :  { %v12172_v2 = vmov 0   ;;  %s18381_s0 = inlined_call_operand.vmem [shape: s32[512,1], index: 0, kind: input, shape index: {}]   ;;  %s18382_s1 = inlined_call_operand.vmem [shape: f32[512,1], index: 1, kind: input, shape index: {}]   ;;  %s18383_s2 = inlined_call_operand.vmem [shape: f32[544,128], index: 2, kind: input, shape index: {}]   ;;  %s18384_s3 = inlined_call_operand.vmem [shape: f32[512,32], index: 3, kind: output, shape index: {0}]   ;;  %s18385_s4 = inlined_call_operand.hbm [shape: f32[1,1], index: 4, kind: output, shape index: {1}]  }
   0x1   :  { %v19_v0 = vld [vmem:[%s18381_s0 + $0x10] sm:$0xff]  ;;  %v17_v1 = vld [vmem:[%s18381_s0] sm:$0xff]  ;;  %11635 = vset.pattern.permute.xlu1 %v12172_v2  ;;  %11634 = vset.pattern.permute.xlu0 %v12172_v2  ;;  %v20_v3 = vld [vmem:[%s18381_s0 + $0x18] sm:$0xff] }
   0x2   :  { %90 = vperm.xlu1 %11635, %v19_v0   ;;  %84 = vperm.xlu0 %11634, %v17_v1   ;;  %v18_v4 = vld [vmem:[%s18381_s0 + $0x8] sm:$0xff]  ;;  %v21_v6 = vld [vmem:[%s18381_s0 + $0x20] sm:$0xff]  ;;  %v24_v7 = vld [vmem:[%s18381_s0 + $0x38] sm:$0xff] }
   0x3   :  { %v22_v5 = vld [vmem:[%s18381_s0 + $0x28] sm:$0xff]  ;;  %v23_v8 = vld [vmem:[%s18381_s0 + $0x30] sm:$0xff]  ;;  %v25_v10 = vld [vmem:[%s18381_s0 + $0x40] sm:$0xff] }
   0x4   :  { %v26_v9 = vld [vmem:[%s18381_s0 + $0x48] sm:$0xff]  ;;  %v28_v11 = vld [vmem:[%s18381_s0 + $0x58] sm:$0xff]  ;;  %v27_v12 = vld [vmem:[%s18381_s0 + $0x50] sm:$0xff] }
   0x5   :  { %v467_v13 = vld [vmem:[%s18383_s2] sm:$0xff]  ;;  %v468_v14 = vld [vmem:[%s18383_s2 + $0x8] sm:$0xff]  ;;  %v469_v16 = vld [vmem:[%s18383_s2 + $0x10] sm:$0xff] }
   0x6   :  { %93 = vperm.xlu1 %11635, %v20_v3   ;;  %87 = vperm.xlu0 %11634, %v18_v4   ;;  %v11517_v15 = vpack.c.bf16 %v468_v14, %v467_v13  ;;  %v470_v17 = vld [vmem:[%s18383_s2 + $0x18] sm:$0xff] }
   0xa   :  { %99 = vperm.xlu1 %11635, %v22_v5   ;;  %96 = vperm.xlu0 %11634, %v21_v6  }
   0xe   :  { %105 = vperm.xlu1 %11635, %v24_v7   ;;  %102 = vperm.xlu0 %11634, %v23_v8  }
  0x12   :  { %111 = vperm.xlu1 %11635, %v26_v9   ;;  %108 = vperm.xlu0 %11634, %v25_v10  }
  0x16   :  { %117 = vperm.xlu1 %11635, %v28_v11   ;;  %114 = vperm.xlu0 %11634, %v27_v12  }
  0x17   :  { %10 = vsyncpa [#allocation3], 0  ;;  %v30_v18 = vld [vmem:[%s18381_s0 + $0x68] sm:$0xff]  ;;  %v29_v19 = vld [vmem:[%s18381_s0 + $0x60] sm:$0xff]  ;;  %v11521_v20 = vpack.c.bf16 %v470_v17, %v469_v16  ;;  %11518 = vmatprep.subr.bf16.mxu0 %v11517_v15  ;;  %v81_v8 = vlaneseq  ;;  %vm476_vm0 = vcmask 261120   ;;  %v18448_v17 = vmov 0.0  }
  0x18   :  { %11520 = vmatpush3.bf16.msra.mxu0 %v11517_v15  ;;  %v32_v21 = vld [vmem:[%s18381_s0 + $0x78] sm:$0xff]  ;;  %v31_v22 = vld [vmem:[%s18381_s0 + $0x70] sm:$0xff]  ;;  %v34_v23 = vld [vmem:[%s18381_s0 + $0x88] sm:$0xff] }
  0x19   :  { %11522 = vmatprep.subr.bf16.mxu0 %v11521_v20  ;;  %v33_v24 = vld [vmem:[%s18381_s0 + $0x80] sm:$0xff]  ;;  %v36_v25 = vld [vmem:[%s18381_s0 + $0x98] sm:$0xff]  ;;  %v35_v26 = vld [vmem:[%s18381_s0 + $0x90] sm:$0xff]  ;;  %v12415_v11 = vand.u32 127, %v81_v8 }
  0x1a   :  { %123 = vperm.xlu1 %11635, %v30_v18   ;;  %120 = vperm.xlu0 %11634, %v29_v19   ;;  %v38_v27 = vld [vmem:[%s18381_s0 + $0xa8] sm:$0xff]  ;;  %v37_v28 = vld [vmem:[%s18381_s0 + $0xa0] sm:$0xff]  ;;  %v40_v29 = vld [vmem:[%s18381_s0 + $0xb8] sm:$0xff] }
  0x1b   :  { %v39_v30 = vld [vmem:[%s18381_s0 + $0xb0] sm:$0xff]  ;;  %v42_v31 = vld [vmem:[%s18381_s0 + $0xc8] sm:$0xff]  ;;  %v41_v32 = vld [vmem:[%s18381_s0 + $0xc0] sm:$0xff]  ;;  %18788 = vst [vmem:[#allocation5_spill] sm:$0xff] %v12415_v11 }
  0x1c   :  { %11524 = vmatpush3.bf16.msra.mxu0 %v11521_v20  ;;  %v44_v33 = vld [vmem:[%s18381_s0 + $0xd8] sm:$0xff]  ;;  %v43_v34 = vld [vmem:[%s18381_s0 + $0xd0] sm:$0xff]  ;;  %v46_v35 = vld [vmem:[%s18381_s0 + $0xe8] sm:$0xff] }
  0x1d   :  { %v45_v36 = vld [vmem:[%s18381_s0 + $0xe0] sm:$0xff]  ;;  %v48_v37 = vld [vmem:[%s18381_s0 + $0xf8] sm:$0xff]  ;;  %v47_v38 = vld [vmem:[%s18381_s0 + $0xf0] sm:$0xff] }
  0x1e   :  { %129 = vperm.xlu1 %11635, %v32_v21   ;;  %126 = vperm.xlu0 %11634, %v31_v22   ;;  %v50_v39 = vld [vmem:[%s18381_s0 + $0x108] sm:$0xff]  ;;  %v49_v40 = vld [vmem:[%s18381_s0 + $0x100] sm:$0xff]  ;;  %v52_v41 = vld [vmem:[%s18381_s0 + $0x118] sm:$0xff] }
  0x1f   :  { %v51_v42 = vld [vmem:[%s18381_s0 + $0x110] sm:$0xff]  ;;  %v54_v43 = vld [vmem:[%s18381_s0 + $0x128] sm:$0xff]  ;;  %v53_v44 = vld [vmem:[%s18381_s0 + $0x120] sm:$0xff] }
  0x20   :  { %v56_v45 = vld [vmem:[%s18381_s0 + $0x138] sm:$0xff]  ;;  %v55_v46 = vld [vmem:[%s18381_s0 + $0x130] sm:$0xff]  ;;  %v58_v47 = vld [vmem:[%s18381_s0 + $0x148] sm:$0xff] }
  0x21   :  { %v57_v48 = vld [vmem:[%s18381_s0 + $0x140] sm:$0xff]  ;;  %v60_v49 = vld [vmem:[%s18381_s0 + $0x158] sm:$0xff]  ;;  %v59_v50 = vld [vmem:[%s18381_s0 + $0x150] sm:$0xff] }
  0x22   :  { %135 = vperm.xlu1 %11635, %v34_v23   ;;  %132 = vperm.xlu0 %11634, %v33_v24   ;;  %v62_v51 = vld [vmem:[%s18381_s0 + $0x168] sm:$0xff]  ;;  %v61_v52 = vld [vmem:[%s18381_s0 + $0x160] sm:$0xff]  ;;  %v64_v53 = vld [vmem:[%s18381_s0 + $0x178] sm:$0xff] }
  0x23   :  { %v63_v54 = vld [vmem:[%s18381_s0 + $0x170] sm:$0xff]  ;;  %v66_v55 = vld [vmem:[%s18381_s0 + $0x188] sm:$0xff]  ;;  %v65_v56 = vld [vmem:[%s18381_s0 + $0x180] sm:$0xff] }
  0x24   :  { %v1118_v57 = vld [vmem:[%s18383_s2 + $0x30] sm:$0xff]  ;;  %v1119_v58 = vld [vmem:[%s18383_s2 + $0x38] sm:$0xff]  ;;  %v70_v62 = vld [vmem:[%s18381_s0 + $0x1a8] sm:$0xff] }
  0x25   :  { %v12368_v59 = vpack.c.bf16 %v1119_v58, %v1118_v57  ;;  %v68_v60 = vld [vmem:[%s18381_s0 + $0x198] sm:$0xff]  ;;  %v67_v61 = vld [vmem:[%s18381_s0 + $0x190] sm:$0xff]  ;;  %v69_v63 = vld [vmem:[%s18381_s0 + $0x1a0] sm:$0xff] }
  0x26   :  { %141 = vperm.xlu1 %11635, %v36_v25   ;;  %138 = vperm.xlu0 %11634, %v35_v26   ;;  %v72_v0 = vld [vmem:[%s18381_s0 + $0x1b8] sm:$0xff]  ;;  %v71_v1 = vld [vmem:[%s18381_s0 + $0x1b0] sm:$0xff]  ;;  %v74_v2 = vld [vmem:[%s18381_s0 + $0x1c8] sm:$0xff] }
  0x27   :  { %11526 = vmatprep.subr.bf16.mxu0 %v12368_v59  ;;  %11621 = vmatprep.subr.bf16.mxu1 %v12368_v59  ;;  %v73_v3 = vld [vmem:[%s18381_s0 + $0x1c0] sm:$0xff]  ;;  %v76_v4 = vld [vmem:[%s18381_s0 + $0x1d8] sm:$0xff]  ;;  %v75_v5 = vld [vmem:[%s18381_s0 + $0x1d0] sm:$0xff] }
  0x28   :  { %11625 = vmatpush3.bf16.msra.mxu1 %v12368_v59  ;;  %v78_v6 = vld [vmem:[%s18381_s0 + $0x1e8] sm:$0xff]  ;;  %v77_v7 = vld [vmem:[%s18381_s0 + $0x1e0] sm:$0xff]  ;;  %v80_v9 = vld [vmem:[%s18381_s0 + $0x1f8] sm:$0xff] }
  0x29   :  { %v79_v10 = vld [vmem:[%s18381_s0 + $0x1f0] sm:$0xff]  ;;  %v1120_v14 = vld [vmem:[%s18383_s2 + $0x40] sm:$0xff]  ;;  %v1121_v15 = vld [vmem:[%s18383_s2 + $0x48] sm:$0xff] }
  0x2a   :  { %147 = vperm.xlu1 %11635, %v38_v27   ;;  %144 = vperm.xlu0 %11634, %v37_v28   ;;  %v11529_v16 = vpack.c.bf16 %v1121_v15, %v1120_v14  ;;  %v1122_v19 = vld [vmem:[%s18383_s2 + $0x50] sm:$0xff]  ;;  %v1123_v20 = vld [vmem:[%s18383_s2 + $0x58] sm:$0xff]  ;;  %v1124_v25 = vld [vmem:[%s18383_s2 + $0x60] sm:$0xff] }
  0x2b   :  { %v11533_v23 = vpack.c.bf16 %v1123_v20, %v1122_v19  ;;  %v1125_v26 = vld [vmem:[%s18383_s2 + $0x68] sm:$0xff] }
  0x2c   :  { %11622 = vmatprep.subr.bf16.mxu1 %v11529_v16 }
  0x2d   :  { %11626 = vmatpush3.bf16.msra.mxu1 %v11529_v16 }
  0x2e   :  { %153 = vperm.xlu1 %11635, %v40_v29   ;;  %150 = vperm.xlu0 %11634, %v39_v30   ;;  %v11537_v30 = vpack.c.bf16 %v1125_v26, %v1124_v25 }
  0x2f   :  { %11623 = vmatprep.subr.bf16.mxu1 %v11533_v23 }
  0x31   :  { %11627 = vmatpush3.bf16.msra.mxu1 %v11533_v23 }
  0x32   :  { %159 = vperm.xlu1 %11635, %v42_v31   ;;  %156 = vperm.xlu0 %11634, %v41_v32  }
  0x33   :  { %11624 = vmatprep.subr.bf16.mxu1 %v11537_v30 }
  0x35   :  { %11628 = vmatpush3.bf16.msra.mxu1 %v11537_v30 }
  0x36   :  { %165 = vperm.xlu1 %11635, %v44_v33   ;;  %162 = vperm.xlu0 %11634, %v43_v34  }
  0x3a   :  { %171 = vperm.xlu1 %11635, %v46_v35   ;;  %168 = vperm.xlu0 %11634, %v45_v36  }
  0x3e   :  { %177 = vperm.xlu1 %11635, %v48_v37   ;;  %174 = vperm.xlu0 %11634, %v47_v38  }
  0x42   :  { %183 = vperm.xlu1 %11635, %v50_v39   ;;  %180 = vperm.xlu0 %11634, %v49_v40  }
  0x46   :  { %189 = vperm.xlu1 %11635, %v52_v41   ;;  %186 = vperm.xlu0 %11634, %v51_v42  }
  0x4a   :  { %195 = vperm.xlu1 %11635, %v54_v43   ;;  %192 = vperm.xlu0 %11634, %v53_v44  }
  0x4e   :  { %201 = vperm.xlu1 %11635, %v56_v45   ;;  %198 = vperm.xlu0 %11634, %v55_v46  }
  0x52   :  { %207 = vperm.xlu1 %11635, %v58_v47   ;;  %204 = vperm.xlu0 %11634, %v57_v48  }
  0x56   :  { %213 = vperm.xlu1 %11635, %v60_v49   ;;  %210 = vperm.xlu0 %11634, %v59_v50  }
  0x5a   :  { %219 = vperm.xlu1 %11635, %v62_v51   ;;  %216 = vperm.xlu0 %11634, %v61_v52  }
  0x5e   :  { %225 = vperm.xlu1 %11635, %v64_v53   ;;  %222 = vperm.xlu0 %11634, %v63_v54  }
  0x62   :  { %231 = vperm.xlu1 %11635, %v66_v55   ;;  %228 = vperm.xlu0 %11634, %v65_v56  }
  0x66   :  { %237 = vperm.xlu1 %11635, %v68_v60   ;;  %234 = vperm.xlu0 %11634, %v67_v61  }
  0x6a   :  { %243 = vperm.xlu1 %11635, %v70_v62   ;;  %240 = vperm.xlu0 %11634, %v69_v63  }
  0x6e   :  { %249 = vperm.xlu1 %11635, %v72_v0   ;;  %246 = vperm.xlu0 %11634, %v71_v1  }
  0x72   :  { %255 = vperm.xlu1 %11635, %v74_v2   ;;  %252 = vperm.xlu0 %11634, %v73_v3  }
  0x76   :  { %261 = vperm.xlu1 %11635, %v76_v4   ;;  %258 = vperm.xlu0 %11634, %v75_v5  }
  0x7a   :  { %267 = vperm.xlu1 %11635, %v78_v6   ;;  %264 = vperm.xlu0 %11634, %v77_v7  }
  0x7e   :  { %273 = vperm.xlu1 %11635, %v80_v9   ;;  %270 = vperm.xlu0 %11634, %v79_v10  }
  0x81   :  { %v12417_v12 = vpop.permute.xlu1 %90  ;;  %v12419_v13 = vpop.permute.xlu0 %84 }
  0x82   :  { %18789 = vst [vmem:[#allocation6_spill] sm:$0xff] %v12417_v12  ;;  %18790 = vst [vmem:[#allocation7_spill] sm:$0xff] %v12419_v13  ;;  %vm275_vm1 = vcmp.eq.s32.totalorder %v12419_v13, %v12415_v11  ;;  %vm277_vm2 = vcmp.eq.s32.totalorder %v12417_v12, %v12415_v11 }
  0x83   :  { %v9433_v18 = vsel %vm275_vm1, 1.0, %v18448_v17  ;;  %v9435_v24 = vsel %vm277_vm2, 1.0, %v18448_v17 }
  0x84   :  { %10653 = vmatprep.mubr.msk.f32.mxu0 %vm476_vm0, %v9433_v18 }
  0x85   :  { %v12442_v21 = vpop.permute.xlu1 %93  ;;  %v12444_v22 = vpop.permute.xlu0 %87 }
  0x86   :  { %18791 = vst [vmem:[#allocation8_spill] sm:$0xff] %v12442_v21  ;;  %18792 = vst [vmem:[#allocation9_spill] sm:$0xff] %v12444_v22  ;;  %vm276_vm3 = vcmp.eq.s32.totalorder %v12444_v22, %v12415_v11  ;;  %vm278_vm4 = vcmp.eq.s32.totalorder %v12442_v21, %v12415_v11 }
  0x87   :  { %v9434_v27 = vsel %vm276_vm3, 1.0, %v18448_v17  ;;  %v9436_v31 = vsel %vm278_vm4, 1.0, %v18448_v17 }
  0x88   :  { %10654 = vmatmul.mubr.msk.f32.vlgmr.msra.gmra.mrb[0].mxu0 %vm476_vm0, %v9434_v27 }
  0x89   :  { %v12465_v28 = vpop.permute.xlu1 %99  ;;  %10656 = vmatprep.mubr.msk.f32.mxu0 %vm476_vm0, %v9435_v24  ;;  %v12468_v29 = vpop.permute.xlu0 %96  ;;  %11528 = vmatpush3.bf16.msra.mxu0 %v12368_v59 }
  0x8a   :  { %18793 = vst [vmem:[#allocation10_spill] sm:$0xff] %v12465_v28  ;;  %18794 = vst [vmem:[#allocation11_spill] sm:$0xff] %v12468_v29  ;;  %vm279_vm5 = vcmp.eq.s32.totalorder %v12468_v29, %v12415_v11  ;;  %11530 = vmatprep.subr.bf16.mxu0 %v11529_v16  ;;  %vm280_vm6 = vcmp.eq.s32.totalorder %v12465_v28, %v12415_v11 }
  0x8b   :  { %v9437_v32 = vsel %vm279_vm5, 1.0, %v18448_v17  ;;  %v9438_v35 = vsel %vm280_vm6, 1.0, %v18448_v17 }
  0x8c   :  { %10657 = vmatmul.mubr.msk.f32.gmra.mrb[2].mxu0 %vm476_vm0, %v9436_v31 }
  0x8d   :  { %v12484_v33 = vpop.permute.xlu1 %105  ;;  %10659 = vmatprep.mubr.msk.f32.mxu0 %vm476_vm0, %v9437_v32  ;;  %v12487_v34 = vpop.permute.xlu0 %102  ;;  %11532 = vmatpush3.bf16.msra.mxu0 %v11529_v16 }
  0x8e   :  { %18795 = vst [vmem:[#allocation12_spill] sm:$0xff] %v12484_v33  ;;  %18796 = vst [vmem:[#allocation13_spill] sm:$0xff] %v12487_v34  ;;  %vm281_vm7 = vcmp.eq.s32.totalorder %v12487_v34, %v12415_v11  ;;  %11534 = vmatprep.subr.bf16.mxu0 %v11533_v23  ;;  %vm282_vm8 = vcmp.eq.s32.totalorder %v12484_v33, %v12415_v11 }
  0x8f   :  { %v9439_v36 = vsel %vm281_vm7, 1.0, %v18448_v17  ;;  %v9440_v39 = vsel %vm282_vm8, 1.0, %v18448_v17 }
  0x90   :  { %10660 = vmatmul.mubr.msk.f32.gmra.mrb[4].mxu0 %vm476_vm0, %v9438_v35 }
  0x91   :  { %v12502_v37 = vpop.permute.xlu1 %111  ;;  %10662 = vmatprep.mubr.msk.f32.mxu0 %vm476_vm0, %v9439_v36  ;;  %v12505_v38 = vpop.permute.xlu0 %108  ;;  %11536 = vmatpush3.bf16.msra.mxu0 %v11533_v23 }
  0x92   :  { %18797 = vst [vmem:[#allocation14_spill] sm:$0xff] %v12502_v37  ;;  %18798 = vst [vmem:[#allocation15_spill] sm:$0xff] %v12505_v38  ;;  %vm18596_vm9 = vcmp.eq.s32.totalorder %v12505_v38, %v12415_v11  ;;  %11538 = vmatprep.subr.bf16.mxu0 %v11537_v30  ;;  %vm284_vm10 = vcmp.eq.s32.totalorder %v12502_v37, %v12415_v11 }
  0x93   :  { %v9441_v40 = vsel %vm18596_vm9, 1.0, %v18448_v17  ;;  %v9442_v43 = vsel %vm284_vm10, 1.0, %v18448_v17 }
  0x94   :  { %10663 = vmatmul.mubr.msk.f32.gmra.mrb[6].mxu0 %vm476_vm0, %v9440_v39 }
  0x95   :  { %v12520_v41 = vpop.permute.xlu1 %117  ;;  %10665 = vmatprep.mubr.msk.f32.mxu0 %vm476_vm0, %v9441_v40  ;;  %v12523_v42 = vpop.permute.xlu0 %114  ;;  %11540 = vmatpush3.bf16.msra.mxu0 %v11537_v30 }
  0x96   :  { %18799 = vst [vmem:[#allocation16_spill] sm:$0xff] %v12520_v41  ;;  %18800 = vst [vmem:[#allocation17_spill] sm:$0xff] %v12523_v42  ;;  %vm18387_vm11 = vcmp.eq.s32.totalorder %v12523_v42, %v12415_v11  ;;  %vm18587_vm12 = vcmp.eq.s32.totalorder %v12520_v41, %v12415_v11 }
  0x97   :  { %v9443_v44 = vsel %vm18387_vm11, 1.0, %v18448_v17  ;;  %v9444_v47 = vsel %vm18587_vm12, 1.0, %v18448_v17 }
  0x98   :  { %10666 = vmatmul.mubr.msk.f32.gmra.mrb[8].mxu0 %vm476_vm0, %v9442_v43 }
  0x99   :  { %v12538_v45 = vpop.permute.xlu1 %123  ;;  %10668 = vmatprep.mubr.msk.f32.mxu0 %vm476_vm0, %v9443_v44  ;;  %v12541_v46 = vpop.permute.xlu0 %120 }
  0x9a   :  { %18801 = vst [vmem:[#allocation18_spill] sm:$0xff] %v12538_v45  ;;  %18802 = vst [vmem:[#allocation19_spill] sm:$0xff] %v12541_v46  ;;  %vm18386_vm13 = vcmp.eq.s32.totalorder %v12541_v46, %v12415_v11  ;;  %vm18389_vm14 = vcmp.eq.s32.totalorder %v12538_v45, %v12415_v11 }
  0x9b   :  { %v9445_v48 = vsel %vm18386_vm13, 1.0, %v18448_v17  ;;  %v9446_v51 = vsel %vm18389_vm14, 1.0, %v18448_v17 }
  0x9c   :  { %10669 = vmatmul.mubr.msk.f32.gmra.mrb[10].mxu0 %vm476_vm0, %v9444_v47 }
  0x9d   :  { %v12556_v49 = vpop.permute.xlu1 %129  ;;  %10671 = vmatprep.mubr.msk.f32.mxu0 %vm476_vm0, %v9445_v48  ;;  %v12559_v50 = vpop.permute.xlu0 %126 }
  0x9e   :  { %18803 = vst [vmem:[#allocation20_spill] sm:$0xff] %v12556_v49  ;;  %18804 = vst [vmem:[#allocation21_spill] sm:$0xff] %v12559_v50  ;;  %vm18388_vm15 = vcmp.eq.s32.totalorder %v12559_v50, %v12415_v11  ;;  %vm18391_vm13 = vcmp.eq.s32.totalorder %v12556_v49, %v12415_v11 }
  0x9f   :  { %v9447_v52 = vsel %vm18388_vm15, 1.0, %v18448_v17  ;;  %v9448_v55 = vsel %vm18391_vm13, 1.0, %v18448_v17 }
  0xa0   :  { %10672 = vmatmul.mubr.msk.f32.gmra.mrb[12].mxu0 %vm476_vm0, %v9446_v51 }
  0xa1   :  { %v12574_v53 = vpop.permute.xlu1 %135  ;;  %10674 = vmatprep.mubr.msk.f32.mxu0 %vm476_vm0, %v9447_v52  ;;  %v12577_v54 = vpop.permute.xlu0 %132 }
  0xa2   :  { %18805 = vst [vmem:[#allocation22_spill] sm:$0xff] %v12574_v53  ;;  %18806 = vst [vmem:[#allocation23_spill] sm:$0xff] %v12577_v54  ;;  %vm18390_vm11 = vcmp.eq.s32.totalorder %v12577_v54, %v12415_v11  ;;  %vm18393_vm15 = vcmp.eq.s32.totalorder %v12574_v53, %v12415_v11 }
  0xa3   :  { %v9449_v56 = vsel %vm18390_vm11, 1.0, %v18448_v17  ;;  %v9450_v59 = vsel %vm18393_vm15, 1.0, %v18448_v17 }
  0xa4   :  { %10675 = vmatmul.mubr.msk.f32.gmra.mrb[14].mxu0 %vm476_vm0, %v9448_v55 }
  0xa5   :  { %v12592_v57 = vpop.permute.xlu1 %141  ;;  %10677 = vmatprep.mubr.msk.f32.mxu0 %vm476_vm0, %v9449_v56  ;;  %v12595_v58 = vpop.permute.xlu0 %138 }
  0xa6   :  { %18807 = vst [vmem:[#allocation24_spill] sm:$0xff] %v12592_v57  ;;  %18808 = vst [vmem:[#allocation25_spill] sm:$0xff] %v12595_v58  ;;  %vm18392_vm14 = vcmp.eq.s32.totalorder %v12595_v58, %v12415_v11  ;;  %vm18395_vm11 = vcmp.eq.s32.totalorder %v12592_v57, %v12415_v11 }
  0xa7   :  { %v9451_v60 = vsel %vm18392_vm14, 1.0, %v18448_v17  ;;  %v9452_v63 = vsel %vm18395_vm11, 1.0, %v18448_v17 }
  0xa8   :  { %10678 = vmatmul.mubr.msk.f32.gmra.mrb[16].mxu0 %vm476_vm0, %v9450_v59 }
  0xa9   :  { %v12610_v61 = vpop.permute.xlu1 %147  ;;  %10680 = vmatprep.mubr.msk.f32.mxu0 %vm476_vm0, %v9451_v60  ;;  %v12613_v62 = vpop.permute.xlu0 %144 }
  0xaa   :  { %18809 = vst [vmem:[#allocation26_spill] sm:$0xff] %v12610_v61  ;;  %18810 = vst [vmem:[#allocation27_spill] sm:$0xff] %v12613_v62  ;;  %vm18394_vm13 = vcmp.eq.s32.totalorder %v12613_v62, %v12415_v11  ;;  %vm18397_vm14 = vcmp.eq.s32.totalorder %v12610_v61, %v12415_v11 }
  0xab   :  { %v9453_v0 = vsel %vm18394_vm13, 1.0, %v18448_v17  ;;  %v9454_v3 = vsel %vm18397_vm14, 1.0, %v18448_v17 }
  0xac   :  { %10681 = vmatmul.mubr.msk.f32.gmra.mrb[18].mxu0 %vm476_vm0, %v9452_v63 }
  0xad   :  { %v12628_v1 = vpop.permute.xlu1 %153  ;;  %10683 = vmatprep.mubr.msk.f32.mxu0 %vm476_vm0, %v9453_v0  ;;  %v12631_v2 = vpop.permute.xlu0 %150 }
  0xae   :  { %18811 = vst [vmem:[#allocation28_spill] sm:$0xff] %v12628_v1  ;;  %18812 = vst [vmem:[#allocation29_spill] sm:$0xff] %v12631_v2  ;;  %vm18396_vm15 = vcmp.eq.s32.totalorder %v12631_v2, %v12415_v11  ;;  %vm18399_vm13 = vcmp.eq.s32.totalorder %v12628_v1, %v12415_v11 }
  0xaf   :  { %v9455_v4 = vsel %vm18396_vm15, 1.0, %v18448_v17  ;;  %v9456_v7 = vsel %vm18399_vm13, 1.0, %v18448_v17 }
  0xb0   :  { %10684 = vmatmul.mubr.msk.f32.gmra.mrb[20].mxu0 %vm476_vm0, %v9454_v3 }
  0xb1   :  { %v12646_v5 = vpop.permute.xlu1 %159  ;;  %10686 = vmatprep.mubr.msk.f32.mxu0 %vm476_vm0, %v9455_v4  ;;  %v12649_v6 = vpop.permute.xlu0 %156 }
  0xb2   :  { %18813 = vst [vmem:[#allocation30_spill] sm:$0xff] %v12646_v5  ;;  %18814 = vst [vmem:[#allocation31_spill] sm:$0xff] %v12649_v6  ;;  %vm18398_vm11 = vcmp.eq.s32.totalorder %v12649_v6, %v12415_v11  ;;  %vm18401_vm15 = vcmp.eq.s32.totalorder %v12646_v5, %v12415_v11 }
  0xb3   :  { %v9457_v8 = vsel %vm18398_vm11, 1.0, %v18448_v17  ;;  %v9458_v14 = vsel %vm18401_vm15, 1.0, %v18448_v17 }
  0xb4   :  { %10687 = vmatmul.mubr.msk.f32.gmra.mrb[22].mxu0 %vm476_vm0, %v9456_v7 }
  0xb5   :  { %v12664_v9 = vpop.permute.xlu1 %165  ;;  %10689 = vmatprep.mubr.msk.f32.mxu0 %vm476_vm0, %v9457_v8  ;;  %v12667_v10 = vpop.permute.xlu0 %162 }
  0xb6   :  { %18815 = vst [vmem:[#allocation32_spill] sm:$0xff] %v12664_v9  ;;  %18816 = vst [vmem:[#allocation33_spill] sm:$0xff] %v12667_v10  ;;  %vm18400_vm14 = vcmp.eq.s32.totalorder %v12667_v10, %v12415_v11  ;;  %vm18403_vm11 = vcmp.eq.s32.totalorder %v12664_v9, %v12415_v11 }
  0xb7   :  { %v9459_v15 = vsel %vm18400_vm14, 1.0, %v18448_v17  ;;  %v9460_v19 = vsel %vm18403_vm11, 1.0, %v18448_v17 }
  0xb8   :  { %10690 = vmatmul.mubr.msk.f32.gmra.mrb[24].mxu0 %vm476_vm0, %v9458_v14 }
  0xb9   :  { %v12682_v16 = vpop.permute.xlu1 %171  ;;  %10692 = vmatprep.mubr.msk.f32.mxu0 %vm476_vm0, %v9459_v15  ;;  %v12685_v18 = vpop.permute.xlu0 %168 }
  0xba   :  { %18817 = vst [vmem:[#allocation34_spill] sm:$0xff] %v12682_v16  ;;  %18818 = vst [vmem:[#allocation35_spill] sm:$0xff] %v12685_v18  ;;  %vm18402_vm13 = vcmp.eq.s32.totalorder %v12685_v18, %v12415_v11  ;;  %vm18405_vm14 = vcmp.eq.s32.totalorder %v12682_v16, %v12415_v11 }
  0xbb   :  { %v9461_v20 = vsel %vm18402_vm13, 1.0, %v18448_v17  ;;  %v9462_v25 = vsel %vm18405_vm14, 1.0, %v18448_v17 }
  0xbc   :  { %10693 = vmatmul.mubr.msk.f32.gmra.mrb[26].mxu0 %vm476_vm0, %v9460_v19 }
  0xbd   :  { %v12700_v23 = vpop.permute.xlu1 %177  ;;  %10695 = vmatprep.mubr.msk.f32.mxu0 %vm476_vm0, %v9461_v20  ;;  %v12703_v24 = vpop.permute.xlu0 %174 }
  0xbe   :  { %18819 = vst [vmem:[#allocation36_spill] sm:$0xff] %v12700_v23  ;;  %18820 = vst [vmem:[#allocation37_spill] sm:$0xff] %v12703_v24  ;;  %vm18404_vm15 = vcmp.eq.s32.totalorder %v12703_v24, %v12415_v11  ;;  %vm18407_vm13 = vcmp.eq.s32.totalorder %v12700_v23, %v12415_v11 }
  0xbf   :  { %v9463_v26 = vsel %vm18404_vm15, 1.0, %v18448_v17  ;;  %v9464_v31 = vsel %vm18407_vm13, 1.0, %v18448_v17 }
  0xc0   :  { %10696 = vmatmul.mubr.msk.f32.gmra.mrb[28].mxu0 %vm476_vm0, %v9462_v25 }
  0xc1   :  { %v12718_v27 = vpop.permute.xlu1 %183  ;;  %10698 = vmatprep.mubr.msk.f32.mxu0 %vm476_vm0, %v9463_v26  ;;  %v12721_v30 = vpop.permute.xlu0 %180 }
  0xc2   :  { %18821 = vst [vmem:[#allocation38_spill] sm:$0xff] %v12718_v27  ;;  %18822 = vst [vmem:[#allocation39_spill] sm:$0xff] %v12721_v30  ;;  %vm18406_vm11 = vcmp.eq.s32.totalorder %v12721_v30, %v12415_v11  ;;  %vm18409_vm15 = vcmp.eq.s32.totalorder %v12718_v27, %v12415_v11 }
  0xc3   :  { %v9465_v32 = vsel %vm18406_vm11, 1.0, %v18448_v17  ;;  %v9466_v39 = vsel %vm18409_vm15, 1.0, %v18448_v17 }
  0xc4   :  { %10699 = vmatmul.mubr.msk.f32.gmra.mrb[30].mxu0 %vm476_vm0, %v9464_v31 }
  0xc5   :  { %v12736_v35 = vpop.permute.xlu1 %189  ;;  %10701 = vmatprep.mubr.msk.f32.mxu0 %vm476_vm0, %v9465_v32  ;;  %v12739_v36 = vpop.permute.xlu0 %186 }
  0xc6   :  { %18823 = vst [vmem:[#allocation40_spill] sm:$0xff] %v12736_v35  ;;  %18824 = vst [vmem:[#allocation41_spill] sm:$0xff] %v12739_v36  ;;  %vm18408_vm14 = vcmp.eq.s32.totalorder %v12739_v36, %v12415_v11  ;;  %vm18411_vm11 = vcmp.eq.s32.totalorder %v12736_v35, %v12415_v11 }
  0xc7   :  { %v9467_v40 = vsel %vm18408_vm14, 1.0, %v18448_v17  ;;  %v9468_v47 = vsel %vm18411_vm11, 1.0, %v18448_v17 }
  0xc8   :  { %10702 = vmatmul.mubr.msk.f32.gmra.mrb[32].mxu0 %vm476_vm0, %v9466_v39 }
  0xc9   :  { %v12754_v43 = vpop.permute.xlu1 %195  ;;  %10704 = vmatprep.mubr.msk.f32.mxu0 %vm476_vm0, %v9467_v40  ;;  %v12757_v44 = vpop.permute.xlu0 %192 }
  0xca   :  { %18825 = vst [vmem:[#allocation42_spill] sm:$0xff] %v12754_v43  ;;  %18826 = vst [vmem:[#allocation43_spill] sm:$0xff] %v12757_v44  ;;  %vm18410_vm13 = vcmp.eq.s32.totalorder %v12757_v44, %v12415_v11  ;;  %vm18413_vm14 = vcmp.eq.s32.totalorder %v12754_v43, %v12415_v11 }
  0xcb   :  { %v9469_v48 = vsel %vm18410_vm13, 1.0, %v18448_v17  ;;  %v9470_v55 = vsel %vm18413_vm14, 1.0, %v18448_v17 }
  0xcc   :  { %10705 = vmatmul.mubr.msk.f32.gmra.mrb[34].mxu0 %vm476_vm0, %v9468_v47 }
  0xcd   :  { %v12772_v51 = vpop.permute.xlu1 %201  ;;  %10707 = vmatprep.mubr.msk.f32.mxu0 %vm476_vm0, %v9469_v48  ;;  %v12775_v52 = vpop.permute.xlu0 %198 }
  0xce   :  { %18827 = vst [vmem:[#allocation44_spill] sm:$0xff] %v12772_v51  ;;  %18828 = vst [vmem:[#allocation45_spill] sm:$0xff] %v12775_v52  ;;  %vm18412_vm15 = vcmp.eq.s32.totalorder %v12775_v52, %v12415_v11  ;;  %vm18415_vm13 = vcmp.eq.s32.totalorder %v12772_v51, %v12415_v11 }
  0xcf   :  { %v9471_v56 = vsel %vm18412_vm15, 1.0, %v18448_v17  ;;  %v9472_v63 = vsel %vm18415_vm13, 1.0, %v18448_v17 }
  0xd0   :  { %10708 = vmatmul.mubr.msk.f32.gmra.mrb[36].mxu0 %vm476_vm0, %v9470_v55 }
  0xd1   :  { %v12790_v59 = vpop.permute.xlu1 %207  ;;  %10710 = vmatprep.mubr.msk.f32.mxu0 %vm476_vm0, %v9471_v56  ;;  %v12793_v60 = vpop.permute.xlu0 %204 }
  0xd2   :  { %18829 = vst [vmem:[#allocation46_spill] sm:$0xff] %v12790_v59  ;;  %18830 = vst [vmem:[#allocation47_spill] sm:$0xff] %v12793_v60  ;;  %vm18414_vm11 = vcmp.eq.s32.totalorder %v12793_v60, %v12415_v11  ;;  %vm18417_vm15 = vcmp.eq.s32.totalorder %v12790_v59, %v12415_v11 }
  0xd3   :  { %v9473_v0 = vsel %vm18414_vm11, 1.0, %v18448_v17  ;;  %v9474_v7 = vsel %vm18417_vm15, 1.0, %v18448_v17 }
  0xd4   :  { %10711 = vmatmul.mubr.msk.f32.gmra.mrb[38].mxu0 %vm476_vm0, %v9472_v63 }
  0xd5   :  { %v12808_v3 = vpop.permute.xlu1 %213  ;;  %10713 = vmatprep.mubr.msk.f32.mxu0 %vm476_vm0, %v9473_v0  ;;  %v12811_v4 = vpop.permute.xlu0 %210 }
  0xd6   :  { %18831 = vst [vmem:[#allocation48_spill] sm:$0xff] %v12808_v3  ;;  %18832 = vst [vmem:[#allocation49_spill] sm:$0xff] %v12811_v4  ;;  %vm18416_vm14 = vcmp.eq.s32.totalorder %v12811_v4, %v12415_v11  ;;  %vm18419_vm11 = vcmp.eq.s32.totalorder %v12808_v3, %v12415_v11 }
  0xd7   :  { %v9475_v8 = vsel %vm18416_vm14, 1.0, %v18448_v17  ;;  %v9476_v19 = vsel %vm18419_vm11, 1.0, %v18448_v17 }
  0xd8   :  { %10714 = vmatmul.mubr.msk.f32.gmra.mrb[40].mxu0 %vm476_vm0, %v9474_v7 }
  0xd9   :  { %v12826_v14 = vpop.permute.xlu1 %219  ;;  %10716 = vmatprep.mubr.msk.f32.mxu0 %vm476_vm0, %v9475_v8  ;;  %v12829_v15 = vpop.permute.xlu0 %216 }
  0xda   :  { %18833 = vst [vmem:[#allocation50_spill] sm:$0xff] %v12826_v14  ;;  %18834 = vst [vmem:[#allocation51_spill] sm:$0xff] %v12829_v15  ;;  %vm18418_vm13 = vcmp.eq.s32.totalorder %v12829_v15, %v12415_v11  ;;  %vm18421_vm14 = vcmp.eq.s32.totalorder %v12826_v14, %v12415_v11 }
  0xdb   :  { %v9477_v20 = vsel %vm18418_vm13, 1.0, %v18448_v17  ;;  %v9478_v31 = vsel %vm18421_vm14, 1.0, %v18448_v17 }
  0xdc   :  { %10717 = vmatmul.mubr.msk.f32.gmra.mrb[42].mxu0 %vm476_vm0, %v9476_v19 }
  0xdd   :  { %v12844_v25 = vpop.permute.xlu1 %225  ;;  %10719 = vmatprep.mubr.msk.f32.mxu0 %vm476_vm0, %v9477_v20  ;;  %v12847_v26 = vpop.permute.xlu0 %222 }
  0xde   :  { %18835 = vst [vmem:[#allocation52_spill] sm:$0xff] %v12844_v25  ;;  %18836 = vst [vmem:[#allocation53_spill] sm:$0xff] %v12847_v26  ;;  %vm18420_vm15 = vcmp.eq.s32.totalorder %v12847_v26, %v12415_v11  ;;  %vm18423_vm13 = vcmp.eq.s32.totalorder %v12844_v25, %v12415_v11 }
  0xdf   :  { %v9479_v32 = vsel %vm18420_vm15, 1.0, %v18448_v17  ;;  %v9480_v47 = vsel %vm18423_vm13, 1.0, %v18448_v17 }
  0xe0   :  { %10720 = vmatmul.mubr.msk.f32.gmra.mrb[44].mxu0 %vm476_vm0, %v9478_v31 }
  0xe1   :  { %v12862_v39 = vpop.permute.xlu1 %231  ;;  %10722 = vmatprep.mubr.msk.f32.mxu0 %vm476_vm0, %v9479_v32  ;;  %v12865_v40 = vpop.permute.xlu0 %228 }
  0xe2   :  { %18837 = vst [vmem:[#allocation54_spill] sm:$0xff] %v12862_v39  ;;  %18838 = vst [vmem:[#allocation55_spill] sm:$0xff] %v12865_v40  ;;  %vm18422_vm11 = vcmp.eq.s32.totalorder %v12865_v40, %v12415_v11  ;;  %vm18425_vm15 = vcmp.eq.s32.totalorder %v12862_v39, %v12415_v11 }
  0xe3   :  { %v9481_v48 = vsel %vm18422_vm11, 1.0, %v18448_v17  ;;  %v9482_v63 = vsel %vm18425_vm15, 1.0, %v18448_v17 }
  0xe4   :  { %10723 = vmatmul.mubr.msk.f32.gmra.mrb[46].mxu0 %vm476_vm0, %v9480_v47 }
  0xe5   :  { %v12880_v55 = vpop.permute.xlu1 %237  ;;  %10725 = vmatprep.mubr.msk.f32.mxu0 %vm476_vm0, %v9481_v48  ;;  %v12883_v56 = vpop.permute.xlu0 %234 }
  0xe6   :  { %18839 = vst [vmem:[#allocation56_spill] sm:$0xff] %v12880_v55  ;;  %18840 = vst [vmem:[#allocation57_spill] sm:$0xff] %v12883_v56  ;;  %vm18424_vm14 = vcmp.eq.s32.totalorder %v12883_v56, %v12415_v11  ;;  %vm18427_vm11 = vcmp.eq.s32.totalorder %v12880_v55, %v12415_v11 }
  0xe7   :  { %v9483_v0 = vsel %vm18424_vm14, 1.0, %v18448_v17  ;;  %v9484_v19 = vsel %vm18427_vm11, 1.0, %v18448_v17 }
  0xe8   :  { %10726 = vmatmul.mubr.msk.f32.gmra.mrb[48].mxu0 %vm476_vm0, %v9482_v63 }
  0xe9   :  { %v12898_v7 = vpop.permute.xlu1 %243  ;;  %10728 = vmatprep.mubr.msk.f32.mxu0 %vm476_vm0, %v9483_v0  ;;  %v12901_v8 = vpop.permute.xlu0 %240 }
  0xea   :  { %18841 = vst [vmem:[#allocation58_spill] sm:$0xff] %v12898_v7  ;;  %18842 = vst [vmem:[#allocation59_spill] sm:$0xff] %v12901_v8  ;;  %vm18426_vm13 = vcmp.eq.s32.totalorder %v12901_v8, %v12415_v11  ;;  %vm18429_vm14 = vcmp.eq.s32.totalorder %v12898_v7, %v12415_v11 }
  0xeb   :  { %v9485_v20 = vsel %vm18426_vm13, 1.0, %v18448_v17  ;;  %v9486_v47 = vsel %vm18429_vm14, 1.0, %v18448_v17 }
  0xec   :  { %10729 = vmatmul.mubr.msk.f32.gmra.mrb[50].mxu0 %vm476_vm0, %v9484_v19 }
  0xed   :  { %v12916_v31 = vpop.permute.xlu1 %249  ;;  %10731 = vmatprep.mubr.msk.f32.mxu0 %vm476_vm0, %v9485_v20  ;;  %v12919_v32 = vpop.permute.xlu0 %246 }
  0xee   :  { %18843 = vst [vmem:[#allocation60_spill] sm:$0xff] %v12916_v31  ;;  %18844 = vst [vmem:[#allocation61_spill] sm:$0xff] %v12919_v32  ;;  %vm18428_vm15 = vcmp.eq.s32.totalorder %v12919_v32, %v12415_v11  ;;  %vm18433_vm13 = vcmp.eq.s32.totalorder %v12916_v31, %v12415_v11 }
  0xef   :  { %v9487_v48 = vsel %vm18428_vm15, 1.0, %v18448_v17  ;;  %v9488_v19 = vsel %vm18433_vm13, 1.0, %v18448_v17 }
  0xf0   :  { %10732 = vmatmul.mubr.msk.f32.gmra.mrb[52].mxu0 %vm476_vm0, %v9486_v47 }
  0xf1   :  { %v12934_v63 = vpop.permute.xlu1 %255  ;;  %10734 = vmatprep.mubr.msk.f32.mxu0 %vm476_vm0, %v9487_v48  ;;  %v12937_v0 = vpop.permute.xlu0 %252 }
  0xf2   :  { %18845 = vst [vmem:[#allocation62_spill] sm:$0xff] %v12934_v63  ;;  %18846 = vst [vmem:[#allocation63_spill] sm:$0xff] %v12937_v0  ;;  %vm18432_vm11 = vcmp.eq.s32.totalorder %v12937_v0, %v12415_v11  ;;  %vm18436_vm15 = vcmp.eq.s32.totalorder %v12934_v63, %v12415_v11 }
  0xf3   :  { %v9489_v20 = vsel %vm18432_vm11, 1.0, %v18448_v17  ;;  %v9490_v0 = vsel %vm18436_vm15, 1.0, %v18448_v17 }
  0xf4   :  { %10735 = vmatmul.mubr.msk.f32.gmra.mrb[54].mxu0 %vm476_vm0, %v9488_v19 }
  0xf5   :  { %v12952_v47 = vpop.permute.xlu1 %261  ;;  %10737 = vmatprep.mubr.msk.f32.mxu0 %vm476_vm0, %v9489_v20  ;;  %v12955_v48 = vpop.permute.xlu0 %258 }
  0xf6   :  { %18847 = vst [vmem:[#allocation64_spill] sm:$0xff] %v12952_v47  ;;  %18848 = vst [vmem:[#allocation65_spill] sm:$0xff] %v12955_v48  ;;  %vm18437_vm14 = vcmp.eq.s32.totalorder %v12955_v48, %v12415_v11  ;;  %vm18440_vm11 = vcmp.eq.s32.totalorder %v12952_v47, %v12415_v11 }
  0xf7   :  { %v9491_v31 = vsel %vm18437_vm14, 1.0, %v18448_v17  ;;  %v9492_v63 = vsel %vm18440_vm11, 1.0, %v18448_v17 }
  0xf8   :  { %10738 = vmatmul.mubr.msk.f32.gmra.mrb[56].mxu0 %vm476_vm0, %v9490_v0 }
  0xf9   :  { %v12970_v19 = vpop.permute.xlu1 %267  ;;  %10740 = vmatprep.mubr.msk.f32.mxu0 %vm476_vm0, %v9491_v31  ;;  %v12973_v20 = vpop.permute.xlu0 %264 }
  0xfa   :  { %18849 = vst [vmem:[#allocation66_spill] sm:$0xff] %v12970_v19  ;;  %18850 = vst [vmem:[#allocation67_spill] sm:$0xff] %v12973_v20  ;;  %vm18586_vm13 = vcmp.eq.s32.totalorder %v12973_v20, %v12415_v11  ;;  %vm18444_vm15 = vcmp.eq.s32.totalorder %v12970_v19, %v12415_v11 }
  0xfb   :  { %v9493_v48 = vsel %vm18586_vm13, 1.0, %v18448_v17  ;;  %v9494_v47 = vsel %vm18444_vm15, 1.0, %v18448_v17  ;;  %vm1131_vm15 = vcmask 523264  }
  0xfc   :  { %10741 = vmatmul.mubr.msk.f32.gmra.mrb[58].mxu0 %vm476_vm0, %v9492_v63 }
  0xfd   :  { %v12988_v31 = vpop.permute.xlu1 %273  ;;  %10743 = vmatprep.mubr.msk.f32.mxu0 %vm476_vm0, %v9493_v48  ;;  %v12991_v0 = vpop.permute.xlu0 %270  ;;  %v13015_v48 = vld [vmem:[%s18383_s2 + $0x20] ss:$0 sm:$0xff] }
  0xfe   :  { %18851 = vst [vmem:[#allocation68_spill] sm:$0xff] %v12988_v31  ;;  %18852 = vst [vmem:[#allocation69_spill] sm:$0xff] %v12991_v0  ;;  %vm18521_vm14 = vcmp.eq.s32.totalorder %v12991_v0, %v12415_v11  ;;  %vm18454_vm11 = vcmp.eq.s32.totalorder %v12988_v31, %v12415_v11 }
  0xff   :  { %v9495_v20 = vsel %vm18521_vm14, 1.0, %v18448_v17  ;;  %v9496_v63 = vsel %vm18454_vm11, 1.0, %v18448_v17  ;;  %vm1773_vm11 = vcmask 130048  }
 0x100   :  { %10744 = vmatmul.mubr.msk.f32.gmra.mrb[60].mxu0 %vm476_vm0, %v9494_v47 }
 0x101   :  { %10746 = vmatprep.mubr.msk.f32.mxu0 %vm476_vm0, %v9495_v20 }
 0x104   :  { %10747 = vmatmul.mubr.msk.f32.gmra.mrb[62].mxu0 %vm476_vm0, %v9496_v63 }
 0x15b   :  { %v10655_v19 = vpop.f32.mrb[0].mxu0 }
 0x15c   :  { %v741_v0 = vadd.f32 %v10655_v19, %v13015_v48  ;;  %v735_v32 = vpop.f32.mrb[1].mxu0 }
 0x15d   :  { %v736_v47 = vadd.f32 %v13015_v48, %v735_v32 }
 0x15e   :  { %v1055_v8 = vmax.f32 %v741_v0, 0.0 }
 0x15f   :  { %v1054_v20 = vmax.f32 %v736_v47, 0.0  ;;  %v10658_v7 = vpop.f32.mrb[2].mxu0 }
 0x160   :  { %v751_v31 = vadd.f32 %v10658_v7, %v13015_v48  ;;  %v745_v17 = vpop.f32.mrb[3].mxu0 }
 0x161   :  { %v746_v63 = vadd.f32 %v13015_v48, %v745_v17  ;;  %10765 = vmatprep.mubr.msk.f32.mxu0 %vm1131_vm15, %v1054_v20 }
 0x162   :  { %10766 = vmatmul.mubr.msk.f32.vlgmr.msra.gmra.mrb[64].mxu0 %vm1131_vm15, %v1055_v8  ;;  %v1057_v39 = vmax.f32 %v751_v31, 0.0 }
 0x163   :  { %v1056_v55 = vmax.f32 %v746_v63, 0.0  ;;  %v10661_v56 = vpop.f32.mrb[4].mxu0 }
 0x164   :  { %v761_v19 = vadd.f32 %v10661_v56, %v13015_v48  ;;  %v755_v40 = vpop.f32.mrb[5].mxu0 }
 0x165   :  { %v756_v32 = vadd.f32 %v13015_v48, %v755_v40  ;;  %10768 = vmatprep.mubr.msk.f32.mxu1 %vm1131_vm15, %v1056_v55 }
 0x166   :  { %10769 = vmatmul.mubr.msk.f32.vlgmr.msra.gmra.mrb[0].mxu1 %vm1131_vm15, %v1057_v39  ;;  %v1059_v47 = vmax.f32 %v761_v19, 0.0 }
 0x167   :  { %v1058_v7 = vmax.f32 %v756_v32, 0.0  ;;  %v10664_v0 = vpop.f32.mrb[6].mxu0 }
 0x168   :  { %v771_v17 = vadd.f32 %v10664_v0, %v13015_v48  ;;  %v765_v20 = vpop.f32.mrb[7].mxu0 }
 0x169   :  { %v766_v8 = vadd.f32 %v13015_v48, %v765_v20  ;;  %10771 = vmatprep.mubr.msk.f32.mxu1 %vm1131_vm15, %v1058_v7 }
 0x16a   :  { %10772 = vmatmul.mubr.msk.f32.gmra.mrb[2].mxu1 %vm1131_vm15, %v1059_v47  ;;  %v1061_v63 = vmax.f32 %v771_v17, 0.0 }
 0x16b   :  { %v1060_v56 = vmax.f32 %v766_v8, 0.0  ;;  %v10667_v31 = vpop.f32.mrb[8].mxu0 }
 0x16c   :  { %v781_v40 = vadd.f32 %v10667_v31, %v13015_v48  ;;  %v775_v55 = vpop.f32.mrb[9].mxu0 }
 0x16d   :  { %v776_v39 = vadd.f32 %v13015_v48, %v775_v55  ;;  %10774 = vmatprep.mubr.msk.f32.mxu1 %vm1131_vm15, %v1060_v56 }
 0x16e   :  { %10775 = vmatmul.mubr.msk.f32.gmra.mrb[4].mxu1 %vm1131_vm15, %v1061_v63  ;;  %v1063_v0 = vmax.f32 %v781_v40, 0.0 }
 0x16f   :  { %v1062_v19 = vmax.f32 %v776_v39, 0.0  ;;  %v10670_v32 = vpop.f32.mrb[10].mxu0 }
 0x170   :  { %v791_v20 = vadd.f32 %v10670_v32, %v13015_v48  ;;  %v785_v7 = vpop.f32.mrb[11].mxu0 }
 0x171   :  { %v786_v47 = vadd.f32 %v13015_v48, %v785_v7  ;;  %10777 = vmatprep.mubr.msk.f32.mxu1 %vm1131_vm15, %v1062_v19 }
 0x172   :  { %10778 = vmatmul.mubr.msk.f32.gmra.mrb[6].mxu1 %vm1131_vm15, %v1063_v0  ;;  %v1065_v31 = vmax.f32 %v791_v20, 0.0 }
 0x173   :  { %v1064_v17 = vmax.f32 %v786_v47, 0.0  ;;  %v10673_v8 = vpop.f32.mrb[12].mxu0 }
 0x174   :  { %v801_v55 = vadd.f32 %v10673_v8, %v13015_v48  ;;  %v795_v56 = vpop.f32.mrb[13].mxu0 }
 0x175   :  { %v796_v63 = vadd.f32 %v13015_v48, %v795_v56  ;;  %10780 = vmatprep.mubr.msk.f32.mxu1 %vm1131_vm15, %v1064_v17 }
 0x176   :  { %10781 = vmatmul.mubr.msk.f32.gmra.mrb[8].mxu1 %vm1131_vm15, %v1065_v31  ;;  %v1067_v32 = vmax.f32 %v801_v55, 0.0 }
 0x177   :  { %v1066_v40 = vmax.f32 %v796_v63, 0.0  ;;  %v10676_v39 = vpop.f32.mrb[14].mxu0 }
 0x178   :  { %v811_v7 = vadd.f32 %v10676_v39, %v13015_v48  ;;  %v805_v19 = vpop.f32.mrb[15].mxu0 }
 0x179   :  { %v806_v0 = vadd.f32 %v13015_v48, %v805_v19  ;;  %10783 = vmatprep.mubr.msk.f32.mxu1 %vm1131_vm15, %v1066_v40 }
 0x17a   :  { %10784 = vmatmul.mubr.msk.f32.gmra.mrb[10].mxu1 %vm1131_vm15, %v1067_v32  ;;  %v1069_v8 = vmax.f32 %v811_v7, 0.0 }
 0x17b   :  { %v1068_v20 = vmax.f32 %v806_v0, 0.0  ;;  %v10679_v47 = vpop.f32.mrb[16].mxu0 }
 0x17c   :  { %v821_v56 = vadd.f32 %v10679_v47, %v13015_v48  ;;  %v815_v17 = vpop.f32.mrb[17].mxu0 }
 0x17d   :  { %v816_v31 = vadd.f32 %v13015_v48, %v815_v17  ;;  %10786 = vmatprep.mubr.msk.f32.mxu1 %vm1131_vm15, %v1068_v20 }
 0x17e   :  { %10787 = vmatmul.mubr.msk.f32.gmra.mrb[12].mxu1 %vm1131_vm15, %v1069_v8  ;;  %v1071_v39 = vmax.f32 %v821_v56, 0.0 }
 0x17f   :  { %v1070_v55 = vmax.f32 %v816_v31, 0.0  ;;  %v10682_v63 = vpop.f32.mrb[18].mxu0 }
 0x180   :  { %v831_v19 = vadd.f32 %v10682_v63, %v13015_v48  ;;  %v825_v40 = vpop.f32.mrb[19].mxu0 }
 0x181   :  { %v826_v32 = vadd.f32 %v13015_v48, %v825_v40  ;;  %10789 = vmatprep.mubr.msk.f32.mxu1 %vm1131_vm15, %v1070_v55 }
 0x182   :  { %10790 = vmatmul.mubr.msk.f32.gmra.mrb[14].mxu1 %vm1131_vm15, %v1071_v39  ;;  %v1073_v47 = vmax.f32 %v831_v19, 0.0 }
 0x183   :  { %v1072_v7 = vmax.f32 %v826_v32, 0.0  ;;  %v10685_v0 = vpop.f32.mrb[20].mxu0 }
 0x184   :  { %v841_v17 = vadd.f32 %v10685_v0, %v13015_v48  ;;  %v835_v20 = vpop.f32.mrb[21].mxu0 }
 0x185   :  { %v836_v8 = vadd.f32 %v13015_v48, %v835_v20  ;;  %10792 = vmatprep.mubr.msk.f32.mxu1 %vm1131_vm15, %v1072_v7 }
 0x186   :  { %10793 = vmatmul.mubr.msk.f32.gmra.mrb[16].mxu1 %vm1131_vm15, %v1073_v47  ;;  %v1075_v63 = vmax.f32 %v841_v17, 0.0 }
 0x187   :  { %v1074_v56 = vmax.f32 %v836_v8, 0.0  ;;  %v10688_v31 = vpop.f32.mrb[22].mxu0 }
 0x188   :  { %v851_v40 = vadd.f32 %v10688_v31, %v13015_v48  ;;  %v845_v55 = vpop.f32.mrb[23].mxu0 }
 0x189   :  { %v846_v39 = vadd.f32 %v13015_v48, %v845_v55  ;;  %10795 = vmatprep.mubr.msk.f32.mxu1 %vm1131_vm15, %v1074_v56 }
 0x18a   :  { %10796 = vmatmul.mubr.msk.f32.gmra.mrb[18].mxu1 %vm1131_vm15, %v1075_v63  ;;  %v1077_v0 = vmax.f32 %v851_v40, 0.0 }
 0x18b   :  { %v1076_v19 = vmax.f32 %v846_v39, 0.0  ;;  %v10691_v32 = vpop.f32.mrb[24].mxu0 }
 0x18c   :  { %v861_v20 = vadd.f32 %v10691_v32, %v13015_v48  ;;  %v855_v7 = vpop.f32.mrb[25].mxu0 }
 0x18d   :  { %v856_v47 = vadd.f32 %v13015_v48, %v855_v7  ;;  %10798 = vmatprep.mubr.msk.f32.mxu1 %vm1131_vm15, %v1076_v19 }
 0x18e   :  { %10799 = vmatmul.mubr.msk.f32.gmra.mrb[20].mxu1 %vm1131_vm15, %v1077_v0  ;;  %v1079_v31 = vmax.f32 %v861_v20, 0.0 }
 0x18f   :  { %v1078_v17 = vmax.f32 %v856_v47, 0.0  ;;  %v10694_v8 = vpop.f32.mrb[26].mxu0 }
 0x190   :  { %v871_v55 = vadd.f32 %v10694_v8, %v13015_v48  ;;  %v865_v56 = vpop.f32.mrb[27].mxu0 }
 0x191   :  { %v866_v63 = vadd.f32 %v13015_v48, %v865_v56  ;;  %10801 = vmatprep.mubr.msk.f32.mxu1 %vm1131_vm15, %v1078_v17 }
 0x192   :  { %10802 = vmatmul.mubr.msk.f32.gmra.mrb[22].mxu1 %vm1131_vm15, %v1079_v31  ;;  %v1081_v32 = vmax.f32 %v871_v55, 0.0 }
 0x193   :  { %v1080_v40 = vmax.f32 %v866_v63, 0.0  ;;  %v10697_v39 = vpop.f32.mrb[28].mxu0 }
 0x194   :  { %v881_v7 = vadd.f32 %v10697_v39, %v13015_v48  ;;  %v875_v19 = vpop.f32.mrb[29].mxu0 }
 0x195   :  { %v876_v0 = vadd.f32 %v13015_v48, %v875_v19  ;;  %10804 = vmatprep.mubr.msk.f32.mxu1 %vm1131_vm15, %v1080_v40 }
 0x196   :  { %10805 = vmatmul.mubr.msk.f32.gmra.mrb[24].mxu1 %vm1131_vm15, %v1081_v32  ;;  %v1083_v8 = vmax.f32 %v881_v7, 0.0 }
 0x197   :  { %v1082_v20 = vmax.f32 %v876_v0, 0.0  ;;  %v10700_v47 = vpop.f32.mrb[30].mxu0 }
 0x198   :  { %v891_v56 = vadd.f32 %v10700_v47, %v13015_v48  ;;  %v885_v17 = vpop.f32.mrb[31].mxu0 }
 0x199   :  { %v886_v31 = vadd.f32 %v13015_v48, %v885_v17  ;;  %10807 = vmatprep.mubr.msk.f32.mxu1 %vm1131_vm15, %v1082_v20 }
 0x19a   :  { %10808 = vmatmul.mubr.msk.f32.gmra.mrb[26].mxu1 %vm1131_vm15, %v1083_v8  ;;  %v1085_v39 = vmax.f32 %v891_v56, 0.0 }
 0x19b   :  { %v1084_v55 = vmax.f32 %v886_v31, 0.0  ;;  %v10703_v63 = vpop.f32.mrb[32].mxu0 }
 0x19c   :  { %v901_v19 = vadd.f32 %v10703_v63, %v13015_v48  ;;  %v895_v40 = vpop.f32.mrb[33].mxu0 }
 0x19d   :  { %v896_v32 = vadd.f32 %v13015_v48, %v895_v40  ;;  %10810 = vmatprep.mubr.msk.f32.mxu1 %vm1131_vm15, %v1084_v55 }
 0x19e   :  { %10811 = vmatmul.mubr.msk.f32.gmra.mrb[28].mxu1 %vm1131_vm15, %v1085_v39  ;;  %v1087_v47 = vmax.f32 %v901_v19, 0.0 }
 0x19f   :  { %v1086_v7 = vmax.f32 %v896_v32, 0.0  ;;  %v10706_v0 = vpop.f32.mrb[34].mxu0 }
 0x1a0   :  { %v911_v17 = vadd.f32 %v10706_v0, %v13015_v48  ;;  %v905_v20 = vpop.f32.mrb[35].mxu0 }
 0x1a1   :  { %v906_v8 = vadd.f32 %v13015_v48, %v905_v20  ;;  %10813 = vmatprep.mubr.msk.f32.mxu1 %vm1131_vm15, %v1086_v7 }
 0x1a2   :  { %10814 = vmatmul.mubr.msk.f32.gmra.mrb[30].mxu1 %vm1131_vm15, %v1087_v47  ;;  %v1089_v63 = vmax.f32 %v911_v17, 0.0 }
 0x1a3   :  { %v1088_v56 = vmax.f32 %v906_v8, 0.0  ;;  %v10709_v31 = vpop.f32.mrb[36].mxu0 }
 0x1a4   :  { %v921_v40 = vadd.f32 %v10709_v31, %v13015_v48  ;;  %v915_v55 = vpop.f32.mrb[37].mxu0 }
 0x1a5   :  { %v916_v39 = vadd.f32 %v13015_v48, %v915_v55  ;;  %10816 = vmatprep.mubr.msk.f32.mxu1 %vm1131_vm15, %v1088_v56 }
 0x1a6   :  { %10817 = vmatmul.mubr.msk.f32.gmra.mrb[32].mxu1 %vm1131_vm15, %v1089_v63  ;;  %v1091_v0 = vmax.f32 %v921_v40, 0.0 }
 0x1a7   :  { %v1090_v19 = vmax.f32 %v916_v39, 0.0  ;;  %v10712_v32 = vpop.f32.mrb[38].mxu0 }
 0x1a8   :  { %v931_v20 = vadd.f32 %v10712_v32, %v13015_v48  ;;  %v925_v7 = vpop.f32.mrb[39].mxu0 }
 0x1a9   :  { %v926_v47 = vadd.f32 %v13015_v48, %v925_v7  ;;  %10819 = vmatprep.mubr.msk.f32.mxu1 %vm1131_vm15, %v1090_v19 }
 0x1aa   :  { %10820 = vmatmul.mubr.msk.f32.gmra.mrb[34].mxu1 %vm1131_vm15, %v1091_v0  ;;  %v1093_v31 = vmax.f32 %v931_v20, 0.0 }
 0x1ab   :  { %v1092_v17 = vmax.f32 %v926_v47, 0.0  ;;  %v10715_v8 = vpop.f32.mrb[40].mxu0 }
 0x1ac   :  { %v941_v55 = vadd.f32 %v10715_v8, %v13015_v48  ;;  %v935_v56 = vpop.f32.mrb[41].mxu0 }
 0x1ad   :  { %v936_v63 = vadd.f32 %v13015_v48, %v935_v56  ;;  %10822 = vmatprep.mubr.msk.f32.mxu1 %vm1131_vm15, %v1092_v17 }
 0x1ae   :  { %10823 = vmatmul.mubr.msk.f32.gmra.mrb[36].mxu1 %vm1131_vm15, %v1093_v31  ;;  %v1095_v32 = vmax.f32 %v941_v55, 0.0 }
 0x1af   :  { %v1094_v40 = vmax.f32 %v936_v63, 0.0  ;;  %v10718_v39 = vpop.f32.mrb[42].mxu0 }
 0x1b0   :  { %v951_v7 = vadd.f32 %v10718_v39, %v13015_v48  ;;  %v945_v19 = vpop.f32.mrb[43].mxu0 }
 0x1b1   :  { %v946_v0 = vadd.f32 %v13015_v48, %v945_v19  ;;  %10825 = vmatprep.mubr.msk.f32.mxu1 %vm1131_vm15, %v1094_v40 }
 0x1b2   :  { %10826 = vmatmul.mubr.msk.f32.gmra.mrb[38].mxu1 %vm1131_vm15, %v1095_v32  ;;  %v1097_v8 = vmax.f32 %v951_v7, 0.0 }
 0x1b3   :  { %v1096_v20 = vmax.f32 %v946_v0, 0.0  ;;  %v10721_v47 = vpop.f32.mrb[44].mxu0 }
 0x1b4   :  { %v961_v56 = vadd.f32 %v10721_v47, %v13015_v48  ;;  %v955_v17 = vpop.f32.mrb[45].mxu0 }
 0x1b5   :  { %v956_v31 = vadd.f32 %v13015_v48, %v955_v17  ;;  %10828 = vmatprep.mubr.msk.f32.mxu1 %vm1131_vm15, %v1096_v20 }
 0x1b6   :  { %10829 = vmatmul.mubr.msk.f32.gmra.mrb[40].mxu1 %vm1131_vm15, %v1097_v8  ;;  %v1099_v39 = vmax.f32 %v961_v56, 0.0 }
 0x1b7   :  { %v1098_v55 = vmax.f32 %v956_v31, 0.0  ;;  %v10724_v63 = vpop.f32.mrb[46].mxu0 }
 0x1b8   :  { %v971_v19 = vadd.f32 %v10724_v63, %v13015_v48  ;;  %v965_v40 = vpop.f32.mrb[47].mxu0 }
 0x1b9   :  { %v966_v32 = vadd.f32 %v13015_v48, %v965_v40  ;;  %10831 = vmatprep.mubr.msk.f32.mxu1 %vm1131_vm15, %v1098_v55 }
 0x1ba   :  { %10832 = vmatmul.mubr.msk.f32.gmra.mrb[42].mxu1 %vm1131_vm15, %v1099_v39  ;;  %v1101_v47 = vmax.f32 %v971_v19, 0.0 }
 0x1bb   :  { %v1100_v7 = vmax.f32 %v966_v32, 0.0  ;;  %v10727_v0 = vpop.f32.mrb[48].mxu0 }
 0x1bc   :  { %v981_v17 = vadd.f32 %v10727_v0, %v13015_v48  ;;  %v975_v20 = vpop.f32.mrb[49].mxu0 }
 0x1bd   :  { %v976_v8 = vadd.f32 %v13015_v48, %v975_v20  ;;  %10834 = vmatprep.mubr.msk.f32.mxu1 %vm1131_vm15, %v1100_v7 }
 0x1be   :  { %10835 = vmatmul.mubr.msk.f32.gmra.mrb[44].mxu1 %vm1131_vm15, %v1101_v47  ;;  %v1103_v63 = vmax.f32 %v981_v17, 0.0 }
 0x1bf   :  { %v1102_v56 = vmax.f32 %v976_v8, 0.0  ;;  %v10730_v31 = vpop.f32.mrb[50].mxu0 }
 0x1c0   :  { %v991_v40 = vadd.f32 %v10730_v31, %v13015_v48  ;;  %v985_v55 = vpop.f32.mrb[51].mxu0 }
 0x1c1   :  { %v986_v39 = vadd.f32 %v13015_v48, %v985_v55  ;;  %10837 = vmatprep.mubr.msk.f32.mxu1 %vm1131_vm15, %v1102_v56 }
 0x1c2   :  { %10838 = vmatmul.mubr.msk.f32.gmra.mrb[46].mxu1 %vm1131_vm15, %v1103_v63  ;;  %v1105_v0 = vmax.f32 %v991_v40, 0.0 }
 0x1c3   :  { %v1104_v19 = vmax.f32 %v986_v39, 0.0  ;;  %v10733_v32 = vpop.f32.mrb[52].mxu0 }
 0x1c4   :  { %v1001_v20 = vadd.f32 %v10733_v32, %v13015_v48  ;;  %v995_v7 = vpop.f32.mrb[53].mxu0 }
 0x1c5   :  { %v996_v47 = vadd.f32 %v13015_v48, %v995_v7  ;;  %10840 = vmatprep.mubr.msk.f32.mxu1 %vm1131_vm15, %v1104_v19 }
 0x1c6   :  { %10841 = vmatmul.mubr.msk.f32.gmra.mrb[48].mxu1 %vm1131_vm15, %v1105_v0  ;;  %v1107_v31 = vmax.f32 %v1001_v20, 0.0 }
 0x1c7   :  { %v1106_v17 = vmax.f32 %v996_v47, 0.0  ;;  %v10736_v8 = vpop.f32.mrb[54].mxu0 }
 0x1c8   :  { %v1011_v55 = vadd.f32 %v10736_v8, %v13015_v48  ;;  %v1005_v56 = vpop.f32.mrb[55].mxu0 }
 0x1c9   :  { %v1006_v63 = vadd.f32 %v13015_v48, %v1005_v56  ;;  %10843 = vmatprep.mubr.msk.f32.mxu1 %vm1131_vm15, %v1106_v17 }
 0x1ca   :  { %10844 = vmatmul.mubr.msk.f32.gmra.mrb[50].mxu1 %vm1131_vm15, %v1107_v31  ;;  %v1109_v32 = vmax.f32 %v1011_v55, 0.0 }
 0x1cb   :  { %v1108_v40 = vmax.f32 %v1006_v63, 0.0  ;;  %v10739_v39 = vpop.f32.mrb[56].mxu0 }
 0x1cc   :  { %v1021_v7 = vadd.f32 %v10739_v39, %v13015_v48  ;;  %v1015_v19 = vpop.f32.mrb[57].mxu0 }
 0x1cd   :  { %v1016_v0 = vadd.f32 %v13015_v48, %v1015_v19  ;;  %10846 = vmatprep.mubr.msk.f32.mxu1 %vm1131_vm15, %v1108_v40 }
 0x1ce   :  { %10847 = vmatmul.mubr.msk.f32.gmra.mrb[52].mxu1 %vm1131_vm15, %v1109_v32  ;;  %v1111_v8 = vmax.f32 %v1021_v7, 0.0 }
 0x1cf   :  { %v1110_v20 = vmax.f32 %v1016_v0, 0.0  ;;  %v10742_v47 = vpop.f32.mrb[58].mxu0 }
 0x1d0   :  { %v1031_v56 = vadd.f32 %v10742_v47, %v13015_v48  ;;  %v1025_v17 = vpop.f32.mrb[59].mxu0 }
 0x1d1   :  { %v1026_v31 = vadd.f32 %v13015_v48, %v1025_v17  ;;  %10849 = vmatprep.mubr.msk.f32.mxu1 %vm1131_vm15, %v1110_v20 }
 0x1d2   :  { %10850 = vmatmul.mubr.msk.f32.gmra.mrb[54].mxu1 %vm1131_vm15, %v1111_v8  ;;  %v1113_v39 = vmax.f32 %v1031_v56, 0.0 }
 0x1d3   :  { %v1112_v55 = vmax.f32 %v1026_v31, 0.0  ;;  %v10745_v63 = vpop.f32.mrb[60].mxu0 }
 0x1d4   :  { %v1041_v19 = vadd.f32 %v10745_v63, %v13015_v48  ;;  %v1035_v40 = vpop.f32.mrb[61].mxu0 }
 0x1d5   :  { %v1036_v32 = vadd.f32 %v13015_v48, %v1035_v40  ;;  %10852 = vmatprep.mubr.msk.f32.mxu1 %vm1131_vm15, %v1112_v55  ;;  %v13148_v55 = vld [vmem:[%s18383_s2 + $0x70] ss:$0 sm:$0xff] }
 0x1d6   :  { %10853 = vmatmul.mubr.msk.f32.gmra.mrb[56].mxu1 %vm1131_vm15, %v1113_v39  ;;  %v1115_v47 = vmax.f32 %v1041_v19, 0.0 }
 0x1d7   :  { %v1114_v7 = vmax.f32 %v1036_v32, 0.0  ;;  %v10748_v0 = vpop.f32.mrb[62].mxu0 }
 0x1d8   :  { %v1051_v17 = vadd.f32 %v10748_v0, %v13015_v48  ;;  %v1045_v20 = vpop.f32.mrb[63].mxu0 }
 0x1d9   :  { %v1046_v8 = vadd.f32 %v13015_v48, %v1045_v20  ;;  %10855 = vmatprep.mubr.msk.f32.mxu1 %vm1131_vm15, %v1114_v7 }
 0x1da   :  { %10856 = vmatmul.mubr.msk.f32.gmra.mrb[58].mxu1 %vm1131_vm15, %v1115_v47  ;;  %v1117_v31 = vmax.f32 %v1051_v17, 0.0 }
 0x1db   :  { %v1116_v56 = vmax.f32 %v1046_v8, 0.0 }
 0x1dd   :  { %10858 = vmatprep.mubr.msk.f32.mxu1 %vm1131_vm15, %v1116_v56 }
 0x1de   :  { %10859 = vmatmul.mubr.msk.f32.gmra.mrb[60].mxu1 %vm1131_vm15, %v1117_v31 }
 0x235   :  { %v10767_v63 = vpop.f32.mrb[64].mxu0 }
 0x236   :  { %v13151_v39 = vadd.f32 %v10767_v63, %v13148_v55  ;;  %v1390_v48 = vpop.f32.mrb[65].mxu0 }
 0x237   :  { %v13154_v19 = vadd.f32 %v13148_v55, %v1390_v48 }
 0x238   :  { %v1710_v40 = vmul.f32 %v13151_v39, %v13151_v39 }
 0x239   :  { %v10770_v32 = vpop.f32.mrb[0].mxu1  ;;  %v1709_v7 = vmul.f32 %v13154_v19, %v13154_v19 }
 0x23a   :  { %v1400_v0 = vpop.f32.mrb[1].mxu1  ;;  %v1777_v47 = vsel %vm1773_vm11, %v1710_v40, 0.0  ;;  %v13162_v17 = vadd.f32 %v10770_v32, %v13148_v55 }
 0x23b   :  { %v13165_v20 = vadd.f32 %v13148_v55, %v1400_v0  ;;  %1778 = vadd.xlane.f32.xlu1 %v1777_v47  ;;  %v1774_v8 = vsel %vm1773_vm11, %v1709_v7, 0.0 }
 0x23c   :  { %1775 = vadd.xlane.f32.xlu0 %v1774_v8  ;;  %v1712_v0 = vmul.f32 %v13162_v17, %v13162_v17 }
 0x23d   :  { %v10773_v56 = vpop.f32.mrb[2].mxu1  ;;  %v1711_v31 = vmul.f32 %v13165_v20, %v13165_v20 }
 0x23e   :  { %v13171_v63 = vadd.f32 %v10773_v56, %v13148_v55  ;;  %v1410_v48 = vpop.f32.mrb[3].mxu1  ;;  %v1783_v26 = vsel %vm1773_vm11, %v1712_v0, 0.0 }
 0x23f   :  { %v13174_v40 = vadd.f32 %v13148_v55, %v1410_v48  ;;  %v1780_v32 = vsel %vm1773_vm11, %v1711_v31, 0.0 }
 0x240   :  { %1781 = vadd.xlane.f32.xlu0 %v1780_v32  ;;  %v1714_v25 = vmul.f32 %v13171_v63, %v13171_v63 }
 0x241   :  { %v10776_v47 = vpop.f32.mrb[4].mxu1  ;;  %v1713_v7 = vmul.f32 %v13174_v40, %v13174_v40 }
 0x242   :  { %v1420_v8 = vpop.f32.mrb[5].mxu1  ;;  %v13184_v56 = vadd.f32 %v10776_v47, %v13148_v55  ;;  %v1789_v3 = vsel %vm1773_vm11, %v1714_v25, 0.0 }
 0x243   :  { %v13187_v48 = vadd.f32 %v13148_v55, %v1420_v8  ;;  %v1786_v31 = vsel %vm1773_vm11, %v1713_v7, 0.0 }
 0x244   :  { %1787 = vadd.xlane.f32.xlu1 %v1786_v31  ;;  %1784 = vadd.xlane.f32.xlu0 %v1783_v26  ;;  %v1716_v0 = vmul.f32 %v13184_v56, %v13184_v56 }
 0x245   :  { %v10779_v32 = vpop.f32.mrb[6].mxu1  ;;  %v1715_v14 = vmul.f32 %v13187_v48, %v13187_v48 }
 0x246   :  { %v1430_v15 = vpop.f32.mrb[7].mxu1  ;;  %v13195_v4 = vadd.f32 %v10779_v32, %v13148_v55 }
 0x247   :  { %v13198_v47 = vadd.f32 %v13148_v55, %v1430_v15  ;;  %v1792_v8 = vsel %vm1773_vm11, %v1715_v14, 0.0  ;;  %v1795_v14 = vsel %vm1773_vm11, %v1716_v0, 0.0 }
 0x248   :  { %1793 = vadd.xlane.f32.xlu1 %v1792_v8  ;;  %1790 = vadd.xlane.f32.xlu0 %v1789_v3  ;;  %v1718_v59 = vmul.f32 %v13195_v4, %v13195_v4 }
 0x249   :  { %v10782_v26 = vpop.f32.mrb[8].mxu1  ;;  %v1717_v7 = vmul.f32 %v13198_v47, %v13198_v47 }
 0x24a   :  { %v13206_v31 = vadd.f32 %v10782_v26, %v13148_v55  ;;  %v1440_v25 = vpop.f32.mrb[9].mxu1  ;;  %v1801_v51 = vsel %vm1773_vm11, %v1718_v59, 0.0 }
 0x24b   :  { %v13209_v32 = vadd.f32 %v13148_v55, %v1440_v25  ;;  %v1798_v15 = vsel %vm1773_vm11, %v1717_v7, 0.0 }
 0x24c   :  { %1799 = vadd.xlane.f32.xlu1 %v1798_v15  ;;  %1796 = vadd.xlane.f32.xlu0 %v1795_v14  ;;  %v1720_v26 = vmul.f32 %v13206_v31, %v13206_v31 }
 0x24d   :  { %v10785_v3 = vpop.f32.mrb[10].mxu1  ;;  %v1719_v8 = vmul.f32 %v13209_v32, %v13209_v32 }
 0x24e   :  { %v1450_v60 = vpop.f32.mrb[11].mxu1  ;;  %v13220_v25 = vadd.f32 %v10785_v3, %v13148_v55  ;;  %v1807_v43 = vsel %vm1773_vm11, %v1720_v26, 0.0 }
 0x24f   :  { %v13223_v7 = vadd.f32 %v13148_v55, %v1450_v60  ;;  %v1804_v0 = vsel %vm1773_vm11, %v1719_v8, 0.0  ;;  %v2223_v8 = vld [vmem:[%s18383_s2 + $0x88] sm:$0xff] }
 0x250   :  { %1805 = vadd.xlane.f32.xlu1 %v1804_v0  ;;  %1802 = vadd.xlane.f32.xlu0 %v1801_v51  ;;  %v1722_v59 = vmul.f32 %v13220_v25, %v13220_v25  ;;  %v2222_v51 = vld [vmem:[%s18383_s2 + $0x80] sm:$0xff] }
 0x251   :  { %v10788_v15 = vpop.f32.mrb[12].mxu1  ;;  %v1721_v14 = vmul.f32 %v13223_v7, %v13223_v7  ;;  %v11541_v0 = vpack.c.bf16 %v2223_v8, %v2222_v51 }
 0x252   :  { %v1460_v52 = vpop.f32.mrb[13].mxu1  ;;  %v13231_v44 = vadd.f32 %v10788_v15, %v13148_v55  ;;  %v1813_v35 = vsel %vm1773_vm11, %v1722_v59, 0.0 }
 0x253   :  { %v13234_v3 = vadd.f32 %v13148_v55, %v1460_v52  ;;  %v1810_v60 = vsel %vm1773_vm11, %v1721_v14, 0.0  ;;  %11542 = vmatprep.subr.bf16.mxu0 %v11541_v0 }
 0x254   :  { %1811 = vadd.xlane.f32.xlu1 %v1810_v60  ;;  %1808 = vadd.xlane.f32.xlu0 %v1807_v43  ;;  %v1724_v36 = vmul.f32 %v13231_v44, %v13231_v44 }
 0x255   :  { %v10791_v26 = vpop.f32.mrb[14].mxu1  ;;  %v1723_v52 = vmul.f32 %v13234_v3, %v13234_v3  ;;  %11544 = vmatpush3.bf16.msra.mxu0 %v11541_v0 }
 0x256   :  { %v13248_v15 = vadd.f32 %v10791_v26, %v13148_v55  ;;  %v1470_v14 = vpop.f32.mrb[15].mxu1 }
 0x257   :  { %v13251_v60 = vadd.f32 %v13148_v55, %v1470_v14  ;;  %v1816_v43 = vsel %vm1773_vm11, %v1723_v52, 0.0 }
 0x258   :  { %1817 = vadd.xlane.f32.xlu1 %v1816_v43  ;;  %1814 = vadd.xlane.f32.xlu0 %v1813_v35  ;;  %v1726_v26 = vmul.f32 %v13248_v15, %v13248_v15  ;;  %v1819_v43 = vsel %vm1773_vm11, %v1724_v36, 0.0 }
 0x259   :  { %v10794_v27 = vpop.f32.mrb[16].mxu1  ;;  %v1725_v51 = vmul.f32 %v13251_v60, %v13251_v60 }
 0x25a   :  { %v1480_v8 = vpop.f32.mrb[17].mxu1  ;;  %v13262_v14 = vadd.f32 %v10794_v27, %v13148_v55  ;;  %v1825_v23 = vsel %vm1773_vm11, %v1726_v26, 0.0 }
 0x25b   :  { %v13265_v59 = vadd.f32 %v13148_v55, %v1480_v8  ;;  %v1822_v52 = vsel %vm1773_vm11, %v1725_v51, 0.0 }
 0x25c   :  { %1823 = vadd.xlane.f32.xlu1 %v1822_v52  ;;  %1820 = vadd.xlane.f32.xlu0 %v1819_v43  ;;  %v1728_v36 = vmul.f32 %v13262_v14, %v13262_v14 }
 0x25d   :  { %v10797_v35 = vpop.f32.mrb[18].mxu1  ;;  %v1727_v0 = vmul.f32 %v13265_v59, %v13265_v59 }
 0x25e   :  { %v1490_v30 = vpop.f32.mrb[19].mxu1  ;;  %v13273_v24 = vadd.f32 %v10797_v35, %v13148_v55 }
 0x25f   :  { %v13276_v27 = vadd.f32 %v13148_v55, %v1490_v30  ;;  %v1828_v8 = vsel %vm1773_vm11, %v1727_v0, 0.0  ;;  %v1831_v0 = vsel %vm1773_vm11, %v1728_v36, 0.0 }
 0x260   :  { %1829 = vadd.xlane.f32.xlu1 %v1828_v8  ;;  %1826 = vadd.xlane.f32.xlu0 %v1825_v23  ;;  %v1730_v18 = vmul.f32 %v13273_v24, %v13273_v24 }
 0x261   :  { %v10800_v51 = vpop.f32.mrb[20].mxu1  ;;  %v1729_v52 = vmul.f32 %v13276_v27, %v13276_v27 }
 0x262   :  { %v13284_v43 = vadd.f32 %v10800_v51, %v13148_v55  ;;  %v1500_v26 = vpop.f32.mrb[21].mxu1  ;;  %v1837_v10 = vsel %vm1773_vm11, %v1730_v18, 0.0 }
 0x263   :  { %v13287_v35 = vadd.f32 %v13148_v55, %v1500_v26  ;;  %v1834_v30 = vsel %vm1773_vm11, %v1729_v52, 0.0 }
 0x264   :  { %1835 = vadd.xlane.f32.xlu1 %v1834_v30  ;;  %1832 = vadd.xlane.f32.xlu0 %v1831_v0  ;;  %v1732_v51 = vmul.f32 %v13284_v43, %v13284_v43 }
 0x265   :  { %v10803_v23 = vpop.f32.mrb[22].mxu1  ;;  %v1731_v8 = vmul.f32 %v13287_v35, %v13287_v35 }
 0x266   :  { %v1510_v16 = vpop.f32.mrb[23].mxu1  ;;  %v13298_v26 = vadd.f32 %v10803_v23, %v13148_v55  ;;  %v1843_v6 = vsel %vm1773_vm11, %v1732_v51, 0.0 }
 0x267   :  { %v13301_v52 = vadd.f32 %v13148_v55, %v1510_v16  ;;  %v1840_v36 = vsel %vm1773_vm11, %v1731_v8, 0.0 }
 0x268   :  { %1841 = vadd.xlane.f32.xlu1 %v1840_v36  ;;  %1838 = vadd.xlane.f32.xlu0 %v1837_v10  ;;  %v1734_v18 = vmul.f32 %v13298_v26, %v13298_v26 }
 0x269   :  { %v10806_v30 = vpop.f32.mrb[24].mxu1  ;;  %v1733_v0 = vmul.f32 %v13301_v52, %v13301_v52 }
 0x26a   :  { %v1520_v9 = vpop.f32.mrb[25].mxu1  ;;  %v13309_v5 = vadd.f32 %v10806_v30, %v13148_v55 }
 0x26b   :  { %v13312_v23 = vadd.f32 %v13148_v55, %v1520_v9  ;;  %v1846_v16 = vsel %vm1773_vm11, %v1733_v0, 0.0  ;;  %v1849_v0 = vsel %vm1773_vm11, %v1734_v18, 0.0 }
 0x26c   :  { %1847 = vadd.xlane.f32.xlu1 %v1846_v16  ;;  %1844 = vadd.xlane.f32.xlu0 %v1843_v6  ;;  %v1736_v2 = vmul.f32 %v13309_v5, %v13309_v5 }
 0x26d   :  { %v10809_v10 = vpop.f32.mrb[26].mxu1  ;;  %v1735_v8 = vmul.f32 %v13312_v23, %v13312_v23 }
 0x26e   :  { %v13320_v36 = vadd.f32 %v10809_v10, %v13148_v55  ;;  %v1530_v51 = vpop.f32.mrb[27].mxu1  ;;  %v1855_v62 = vsel %vm1773_vm11, %v1736_v2, 0.0 }
 0x26f   :  { %v13323_v30 = vadd.f32 %v13148_v55, %v1530_v51  ;;  %v1852_v9 = vsel %vm1773_vm11, %v1735_v8, 0.0 }
 0x270   :  { %1853 = vadd.xlane.f32.xlu1 %v1852_v9  ;;  %1850 = vadd.xlane.f32.xlu0 %v1849_v0  ;;  %v1738_v10 = vmul.f32 %v13320_v36, %v13320_v36 }
 0x271   :  { %v10812_v6 = vpop.f32.mrb[28].mxu1  ;;  %v1737_v16 = vmul.f32 %v13323_v30, %v13323_v30 }
 0x272   :  { %v1540_v1 = vpop.f32.mrb[29].mxu1  ;;  %v13334_v51 = vadd.f32 %v10812_v6, %v13148_v55  ;;  %v1861_v58 = vsel %vm1773_vm11, %v1738_v10, 0.0 }
 0x273   :  { %v13337_v8 = vadd.f32 %v13148_v55, %v1540_v1  ;;  %v1858_v18 = vsel %vm1773_vm11, %v1737_v16, 0.0 }
 0x274   :  { %1859 = vadd.xlane.f32.xlu1 %v1858_v18  ;;  %1856 = vadd.xlane.f32.xlu0 %v1855_v62  ;;  %v1740_v2 = vmul.f32 %v13334_v51, %v13334_v51 }
 0x275   :  { %v10815_v9 = vpop.f32.mrb[30].mxu1  ;;  %v1739_v0 = vmul.f32 %v13337_v8, %v13337_v8 }
 0x276   :  { %v1550_v61 = vpop.f32.mrb[31].mxu1  ;;  %v13345_v57 = vadd.f32 %v10815_v9, %v13148_v55  ;;  %v1867_v54 = vsel %vm1773_vm11, %v1740_v2, 0.0 }
 0x277   :  { %v13348_v6 = vadd.f32 %v13148_v55, %v1550_v61  ;;  %v1864_v1 = vsel %vm1773_vm11, %v1739_v0, 0.0 }
 0x278   :  { %1865 = vadd.xlane.f32.xlu1 %v1864_v1  ;;  %1862 = vadd.xlane.f32.xlu0 %v1861_v58  ;;  %v1742_v9 = vmul.f32 %v13345_v57, %v13345_v57 }
 0x279   :  { %v10818_v62 = vpop.f32.mrb[32].mxu1  ;;  %v1741_v16 = vmul.f32 %v13348_v6, %v13348_v6 }
 0x27a   :  { %v13356_v18 = vadd.f32 %v10818_v62, %v13148_v55  ;;  %v1560_v10 = vpop.f32.mrb[33].mxu1  ;;  %v1873_v2 = vsel %vm1773_vm11, %v1742_v9, 0.0 }
 0x27b   :  { %v13361_v61 = vadd.f32 %v13148_v55, %v1560_v10  ;;  %v1870_v0 = vsel %vm1773_vm11, %v1741_v16, 0.0 }
 0x27c   :  { %1871 = vadd.xlane.f32.xlu1 %v1870_v0  ;;  %1868 = vadd.xlane.f32.xlu0 %v1867_v54  ;;  %v1744_v62 = vmul.f32 %v13356_v18, %v13356_v18 }
 0x27d   :  { %v10821_v58 = vpop.f32.mrb[34].mxu1  ;;  %v1743_v1 = vmul.f32 %v13361_v61, %v13361_v61 }
 0x27e   :  { %v1570_v53 = vpop.f32.mrb[35].mxu1  ;;  %v13370_v50 = vadd.f32 %v10821_v58, %v13148_v55  ;;  %v1879_v46 = vsel %vm1773_vm11, %v1744_v62, 0.0 }
 0x27f   :  { %v13373_v10 = vadd.f32 %v13148_v55, %v1570_v53  ;;  %v1876_v16 = vsel %vm1773_vm11, %v1743_v1, 0.0 }
 0x280   :  { %1877 = vadd.xlane.f32.xlu1 %v1876_v16  ;;  %1874 = vadd.xlane.f32.xlu0 %v1873_v2  ;;  %v1746_v58 = vmul.f32 %v13370_v50, %v13370_v50 }
 0x281   :  { %v1745_v54 = vmul.f32 %v13373_v10, %v13373_v10  ;;  %v10824_v0 = vpop.f32.mrb[36].mxu1 }
 0x282   :  { %v1580_v49 = vpop.f32.mrb[37].mxu1  ;;  %v13383_v45 = vadd.f32 %v10824_v0, %v13148_v55 }
 0x283   :  { %v13386_v53 = vadd.f32 %v13148_v55, %v1580_v49  ;;  %v1882_v9 = vsel %vm1773_vm11, %v1745_v54, 0.0  ;;  %v1885_v54 = vsel %vm1773_vm11, %v1746_v58, 0.0 }
 0x284   :  { %1883 = vadd.xlane.f32.xlu1 %v1882_v9  ;;  %1880 = vadd.xlane.f32.xlu0 %v1879_v46  ;;  %v1748_v42 = vmul.f32 %v13383_v45, %v13383_v45 }
 0x285   :  { %v1747_v1 = vmul.f32 %v13386_v53, %v13386_v53  ;;  %v10827_v16 = vpop.f32.mrb[38].mxu1 }
 0x286   :  { %v13392_v2 = vadd.f32 %v10827_v16, %v13148_v55  ;;  %v1590_v62 = vpop.f32.mrb[39].mxu1  ;;  %v1891_v58 = vsel %vm1773_vm11, %v1748_v42, 0.0 }
 0x287   :  { %v13397_v0 = vadd.f32 %v13148_v55, %v1590_v62  ;;  %v1888_v49 = vsel %vm1773_vm11, %v1747_v1, 0.0 }
 0x288   :  { %1889 = vadd.xlane.f32.xlu1 %v1888_v49  ;;  %1886 = vadd.xlane.f32.xlu0 %v1885_v54  ;;  %v1750_v16 = vmul.f32 %v13392_v2, %v13392_v2 }
 0x289   :  { %v1749_v46 = vmul.f32 %v13397_v0, %v13397_v0  ;;  %v10830_v9 = vpop.f32.mrb[40].mxu1 }
 0x28a   :  { %v1600_v41 = vpop.f32.mrb[41].mxu1  ;;  %v13406_v38 = vadd.f32 %v10830_v9, %v13148_v55  ;;  %v1897_v34 = vsel %vm1773_vm11, %v1750_v16, 0.0 }
 0x28b   :  { %v13409_v62 = vadd.f32 %v13148_v55, %v1600_v41  ;;  %v1894_v1 = vsel %vm1773_vm11, %v1749_v46, 0.0 }
 0x28c   :  { %1895 = vadd.xlane.f32.xlu1 %v1894_v1  ;;  %1892 = vadd.xlane.f32.xlu0 %v1891_v58  ;;  %v1752_v9 = vmul.f32 %v13406_v38, %v13406_v38 }
 0x28d   :  { %v1751_v49 = vmul.f32 %v13409_v62, %v13409_v62  ;;  %v10833_v54 = vpop.f32.mrb[42].mxu1 }
 0x28e   :  { %v1610_v37 = vpop.f32.mrb[43].mxu1  ;;  %v13419_v33 = vadd.f32 %v10833_v54, %v13148_v55 }
 0x28f   :  { %v13422_v41 = vadd.f32 %v13148_v55, %v1610_v37  ;;  %v1900_v42 = vsel %vm1773_vm11, %v1751_v49, 0.0  ;;  %v1903_v49 = vsel %vm1773_vm11, %v1752_v9, 0.0 }
 0x290   :  { %1901 = vadd.xlane.f32.xlu1 %v1900_v42  ;;  %1898 = vadd.xlane.f32.xlu0 %v1897_v34  ;;  %v1754_v29 = vmul.f32 %v13419_v33, %v13419_v33 }
 0x291   :  { %v1753_v46 = vmul.f32 %v13422_v41, %v13422_v41  ;;  %v10836_v1 = vpop.f32.mrb[44].mxu1 }
 0x292   :  { %v13428_v58 = vadd.f32 %v10836_v1, %v13148_v55  ;;  %v1620_v16 = vpop.f32.mrb[45].mxu1  ;;  %v1909_v9 = vsel %vm1773_vm11, %v1754_v29, 0.0 }
 0x293   :  { %v13433_v54 = vadd.f32 %v13148_v55, %v1620_v16  ;;  %v1906_v37 = vsel %vm1773_vm11, %v1753_v46, 0.0 }
 0x294   :  { %18853 = vst [vmem:[#allocation70_spill] sm:$0xff] %v13428_v58  ;;  %1907 = vadd.xlane.f32.xlu1 %v1906_v37  ;;  %1904 = vadd.xlane.f32.xlu0 %v1903_v49  ;;  %v1756_v1 = vmul.f32 %v13428_v58, %v13428_v58 }
 0x295   :  { %v1755_v34 = vmul.f32 %v13433_v54, %v13433_v54  ;;  %v10839_v42 = vpop.f32.mrb[46].mxu1 }
 0x296   :  { %v1630_v28 = vpop.f32.mrb[47].mxu1  ;;  %v13442_v12 = vadd.f32 %v10839_v42, %v13148_v55  ;;  %v1915_v13 = vsel %vm1773_vm11, %v1756_v1, 0.0 }
 0x297   :  { %v13445_v16 = vadd.f32 %v13148_v55, %v1630_v28  ;;  %v1912_v46 = vsel %vm1773_vm11, %v1755_v34, 0.0 }
 0x298   :  { %18854 = vst [vmem:[#allocation71_spill] sm:$0xff] %v13442_v12  ;;  %1913 = vadd.xlane.f32.xlu1 %v1912_v46  ;;  %1910 = vadd.xlane.f32.xlu0 %v1909_v9  ;;  %v1758_v42 = vmul.f32 %v13442_v12, %v13442_v12 }
 0x299   :  { %v1757_v37 = vmul.f32 %v13445_v16, %v13445_v16  ;;  %v10842_v49 = vpop.f32.mrb[48].mxu1 }
 0x29a   :  { %v1640_v21 = vpop.f32.mrb[49].mxu1  ;;  %v13455_v22 = vadd.f32 %v10842_v49, %v13148_v55 }
 0x29b   :  { %v13458_v28 = vadd.f32 %v13148_v55, %v1640_v21  ;;  %v1918_v29 = vsel %vm1773_vm11, %v1757_v37, 0.0  ;;  %v1921_v37 = vsel %vm1773_vm11, %v1758_v42, 0.0 }
 0x29c   :  { %18855 = vst [vmem:[#allocation72_spill] sm:$0xff] %v13455_v22  ;;  %1919 = vadd.xlane.f32.xlu1 %v1918_v29  ;;  %1916 = vadd.xlane.f32.xlu0 %v1915_v13  ;;  %v1760_v11 = vmul.f32 %v13455_v22, %v13455_v22 }
 0x29d   :  { %18856 = vst [vmem:[#allocation73_spill] sm:$0xff] %v13458_v28  ;;  %v1759_v34 = vmul.f32 %v13458_v28, %v13458_v28  ;;  %v10845_v46 = vpop.f32.mrb[50].mxu1 }
 0x29e   :  { %v13464_v9 = vadd.f32 %v10845_v46, %v13148_v55  ;;  %v1650_v1 = vpop.f32.mrb[51].mxu1  ;;  %v1927_v42 = vsel %vm1773_vm11, %v1760_v11, 0.0 }
 0x29f   :  { %v13469_v49 = vadd.f32 %v13148_v55, %v1650_v1  ;;  %v1924_v21 = vsel %vm1773_vm11, %v1759_v34, 0.0 }
 0x2a0   :  { %18857 = vst [vmem:[#allocation74_spill] sm:$0xff] %v13464_v9  ;;  %1925 = vadd.xlane.f32.xlu1 %v1924_v21  ;;  %1922 = vadd.xlane.f32.xlu0 %v1921_v37  ;;  %v1762_v46 = vmul.f32 %v13464_v9, %v13464_v9 }
 0x2a1   :  { %18858 = vst [vmem:[#allocation75_spill] sm:$0xff] %v13469_v49  ;;  %v1761_v13 = vmul.f32 %v13469_v49, %v13469_v49  ;;  %v10848_v29 = vpop.f32.mrb[52].mxu1 }
 0x2a2   :  { %v1660_v12 = vpop.f32.mrb[53].mxu1  ;;  %v13478_v28 = vadd.f32 %v10848_v29, %v13148_v55  ;;  %v1933_v9 = vsel %vm1773_vm11, %v1762_v46, 0.0 }
 0x2a3   :  { %v13481_v1 = vadd.f32 %v13148_v55, %v1660_v12  ;;  %v1930_v34 = vsel %vm1773_vm11, %v1761_v13, 0.0 }
 0x2a4   :  { %18859 = vst [vmem:[#allocation76_spill] sm:$0xff] %v13478_v28  ;;  %1931 = vadd.xlane.f32.xlu1 %v1930_v34  ;;  %1928 = vadd.xlane.f32.xlu0 %v1927_v42  ;;  %v1764_v29 = vmul.f32 %v13478_v28, %v13478_v28 }
 0x2a5   :  { %18860 = vst [vmem:[#allocation77_spill] sm:$0xff] %v13481_v1  ;;  %v1763_v21 = vmul.f32 %v13481_v1, %v13481_v1  ;;  %v10851_v37 = vpop.f32.mrb[54].mxu1 }
 0x2a6   :  { %v1670_v22 = vpop.f32.mrb[55].mxu1  ;;  %v13491_v49 = vadd.f32 %v10851_v37, %v13148_v55 }
 0x2a7   :  { %v13494_v12 = vadd.f32 %v13148_v55, %v1670_v22  ;;  %v1936_v11 = vsel %vm1773_vm11, %v1763_v21, 0.0  ;;  %v1939_v21 = vsel %vm1773_vm11, %v1764_v29, 0.0 }
 0x2a8   :  { %18861 = vst [vmem:[#allocation78_spill] sm:$0xff] %v13491_v49  ;;  %1937 = vadd.xlane.f32.xlu1 %v1936_v11  ;;  %1934 = vadd.xlane.f32.xlu0 %v1933_v9  ;;  %v1766_v28 = vmul.f32 %v13491_v49, %v13491_v49 }
 0x2a9   :  { %18862 = vst [vmem:[#allocation79_spill] sm:$0xff] %v13494_v12  ;;  %v1765_v13 = vmul.f32 %v13494_v12, %v13494_v12  ;;  %v10854_v34 = vpop.f32.mrb[56].mxu1 }
 0x2aa   :  { %v13500_v42 = vadd.f32 %v10854_v34, %v13148_v55  ;;  %v1680_v46 = vpop.f32.mrb[57].mxu1  ;;  %v1945_v29 = vsel %vm1773_vm11, %v1766_v28, 0.0 }
 0x2ab   :  { %v13505_v37 = vadd.f32 %v13148_v55, %v1680_v46  ;;  %v1942_v22 = vsel %vm1773_vm11, %v1765_v13, 0.0 }
 0x2ac   :  { %18863 = vst [vmem:[#allocation80_spill] sm:$0xff] %v13500_v42  ;;  %1943 = vadd.xlane.f32.xlu1 %v1942_v22  ;;  %1940 = vadd.xlane.f32.xlu0 %v1939_v21  ;;  %v1768_v34 = vmul.f32 %v13500_v42, %v13500_v42 }
 0x2ad   :  { %18864 = vst [vmem:[#allocation81_spill] sm:$0xff] %v13505_v37  ;;  %v1767_v9 = vmul.f32 %v13505_v37, %v13505_v37  ;;  %v10857_v11 = vpop.f32.mrb[58].mxu1 }
 0x2ae   :  { %v1690_v12 = vpop.f32.mrb[59].mxu1  ;;  %v13514_v1 = vadd.f32 %v10857_v11, %v13148_v55  ;;  %v1951_v42 = vsel %vm1773_vm11, %v1768_v34, 0.0 }
 0x2af   :  { %v13517_v46 = vadd.f32 %v13148_v55, %v1690_v12  ;;  %v1948_v13 = vsel %vm1773_vm11, %v1767_v9, 0.0 }
 0x2b0   :  { %18865 = vst [vmem:[#allocation82_spill] sm:$0xff] %v13514_v1  ;;  %1949 = vadd.xlane.f32.xlu1 %v1948_v13  ;;  %1946 = vadd.xlane.f32.xlu0 %v1945_v29  ;;  %v1770_v11 = vmul.f32 %v13514_v1, %v13514_v1 }
 0x2b1   :  { %18866 = vst [vmem:[#allocation83_spill] sm:$0xff] %v13517_v46  ;;  %v1769_v22 = vmul.f32 %v13517_v46, %v13517_v46  ;;  %v10860_v21 = vpop.f32.mrb[60].mxu1  ;;  %v1967_v46 = vmul.f32 2.828427, %v13151_v39  ;;  %v2874_v39 = vld [vmem:[%s18383_s2 + $0xc0] sm:$0xff] }
 0x2b2   :  { %v1700_v49 = vpop.f32.mrb[61].mxu1  ;;  %v13527_v37 = vadd.f32 %v10860_v21, %v13148_v55  ;;  %v1957_v34 = vsel %vm1773_vm11, %v1770_v11, 0.0 }
 0x2b3   :  { %v13530_v12 = vadd.f32 %v13148_v55, %v1700_v49  ;;  %v1954_v28 = vsel %vm1773_vm11, %v1769_v22, 0.0  ;;  %v2870_v55 = vld [vmem:[%s18383_s2 + $0xa0] sm:$0xff]  ;;  %v2871_v49 = vld [vmem:[%s18383_s2 + $0xa8] sm:$0xff] }
 0x2b4   :  { %18867 = vst [vmem:[#allocation84_spill] sm:$0xff] %v13527_v37  ;;  %1955 = vadd.xlane.f32.xlu1 %v1954_v28  ;;  %1952 = vadd.xlane.f32.xlu0 %v1951_v42  ;;  %v1772_v13 = vmul.f32 %v13527_v37, %v13527_v37  ;;  %v11545_v42 = vpack.c.bf16 %v2871_v49, %v2870_v55 }
 0x2b5   :  { %18868 = vst [vmem:[#allocation85_spill] sm:$0xff] %v13530_v12  ;;  %v1771_v9 = vmul.f32 %v13530_v12, %v13530_v12 }
 0x2b6   :  { %v1963_v21 = vsel %vm1773_vm11, %v1772_v13, 0.0  ;;  %11546 = vmatprep.subr.bf16.mxu1 %v11545_v42  ;;  %v2872_v13 = vld [vmem:[%s18383_s2 + $0xb0] sm:$0xff] }
 0x2b7   :  { %v1960_v29 = vsel %vm1773_vm11, %v1771_v9, 0.0  ;;  %11548 = vmatpush3.bf16.msra.mxu1 %v11545_v42 }
 0x2b8   :  { %1958 = vadd.xlane.f32.xlu0 %v1957_v34  ;;  %1961 = vadd.xlane.f32.xlu1 %v1960_v29  ;;  %v2873_v34 = vld [vmem:[%s18383_s2 + $0xb8] sm:$0xff] }
 0x2bc   :  { %1964 = vadd.xlane.f32.xlu0 %v1963_v21  ;;  %v11549_v21 = vpack.c.bf16 %v2873_v34, %v2872_v13 }
 0x2be   :  { %11550 = vmatprep.subr.bf16.mxu1 %v11549_v21 }
 0x2bf   :  { %11552 = vmatpush3.bf16.msra.mxu1 %v11549_v21 }
 0x2c8   :  { %v1779_v22 = vpop.xlane.xlu1 %1778 }
 0x2c9   :  { %v2031_v11 = vmax.f32 %v1779_v22, 1e-24  ;;  %v1776_v28 = vpop.xlane.xlu0 %1775 }
 0x2ca   :  { %v2030_v9 = vmax.f32 %v1776_v28, 1e-24  ;;  %v1966_v28 = vmul.f32 2.828427, %v13154_v19 }
 0x2cb   :  { %11636 = vrsqrt.f32 %v2031_v11 }
 0x2cc   :  { %11638 = vrsqrt.f32 %v2030_v9 }
 0x2cd   :  { %v1782_v29 = vpop.xlane.xlu0 %1781 }
 0x2ce   :  { %v2032_v37 = vmax.f32 %v1782_v29, 1e-24  ;;  %v1968_v29 = vmul.f32 2.828427, %v13165_v20 }
 0x2d0   :  { %11640 = vrsqrt.f32 %v2032_v37 }
 0x2d1   :  { %v1788_v55 = vpop.xlane.xlu1 %1787  ;;  %v1785_v49 = vpop.xlane.xlu0 %1784 }
 0x2d2   :  { %v2034_v42 = vmax.f32 %v1788_v55, 1e-24  ;;  %v2033_v22 = vmax.f32 %v1785_v49, 1e-24 }
 0x2d4   :  { %11642 = vrsqrt.f32 %v2034_v42 }
 0x2d5   :  { %v11637_v11 = vpop.eup %11636  ;;  %11644 = vrsqrt.f32 %v2033_v22  ;;  %v1794_v9 = vpop.xlane.xlu1 %1793 }
 0x2d6   :  { %v1791_v12 = vpop.xlane.xlu0 %1790  ;;  %v11639_v1 = vpop.eup %11638  ;;  %v2036_v58 = vmax.f32 %v1794_v9, 1e-24  ;;  %v2159_v37 = vmul.f32 %v11637_v11, %v1967_v46  ;;  %v2876_v46 = vld [vmem:[%s18383_s2 + $0xd0] sm:$0xff]  ;;  %v2878_v11 = vld [vmem:[%s18383_s2 + $0xe0] sm:$0xff]  ;;  %v1970_v9 = vmul.f32 2.828427, %v13174_v40 }
 0x2d7   :  { %v2035_v13 = vmax.f32 %v1791_v12, 1e-24  ;;  %v2158_v34 = vmul.f32 %v11639_v1, %v1966_v28  ;;  %v2877_v12 = vld [vmem:[%s18383_s2 + $0xd8] sm:$0xff]  ;;  %v2879_v28 = vld [vmem:[%s18383_s2 + $0xe8] sm:$0xff]  ;;  %v2880_v40 = vld [vmem:[%s18383_s2 + $0xf0] sm:$0xff] }
 0x2d8   :  { %11646 = vrsqrt.f32 %v2036_v58  ;;  %v2875_v58 = vld [vmem:[%s18383_s2 + $0xc8] sm:$0xff]  ;;  %v11557_v22 = vpack.c.bf16 %v2877_v12, %v2876_v46  ;;  %v1971_v12 = vmul.f32 2.828427, %v13171_v63 }
 0x2d9   :  { %11648 = vrsqrt.f32 %v2035_v13  ;;  %v1800_v21 = vpop.xlane.xlu1 %1799  ;;  %10865 = vmatprep.mubr.msk.f32.mxu0 %vm1773_vm11, %v2158_v34  ;;  %v11553_v20 = vpack.c.bf16 %v2875_v58, %v2874_v39  ;;  %v11561_v39 = vpack.c.bf16 %v2879_v28, %v2878_v11  ;;  %v2883_v63 = vld [vmem:[%s18383_s2 + $0x108] sm:$0xff] }
 0x2da   :  { %v1797_v55 = vpop.xlane.xlu0 %1796  ;;  %v11641_v49 = vpop.eup %11640  ;;  %v2038_v19 = vmax.f32 %v1800_v21, 1e-24  ;;  %10866 = vmatmul.mubr.msk.f32.vlgmr.msra.gmra.mrb[66].mxu0 %vm1773_vm11, %v2159_v37 }
 0x2db   :  { %v2037_v42 = vmax.f32 %v1797_v55, 1e-24  ;;  %v2160_v1 = vmul.f32 %v11641_v49, %v1968_v29  ;;  %11554 = vmatprep.subr.bf16.mxu1 %v11553_v20  ;;  %v1969_v29 = vmul.f32 2.828427, %v13162_v17 }
 0x2dc   :  { %11650 = vrsqrt.f32 %v2038_v19  ;;  %11556 = vmatpush3.bf16.msra.mxu1 %v11553_v20 }
 0x2dd   :  { %11652 = vrsqrt.f32 %v2037_v42  ;;  %v1806_v13 = vpop.xlane.xlu1 %1805  ;;  %10868 = vmatprep.mubr.msk.f32.mxu0 %vm1773_vm11, %v2160_v1  ;;  %11558 = vmatprep.subr.bf16.mxu1 %v11557_v22  ;;  %v2881_v42 = vld [vmem:[%s18383_s2 + $0xf8] sm:$0xff]  ;;  %v1972_v1 = vmul.f32 2.828427, %v13187_v48  ;;  %v2882_v48 = vld [vmem:[%s18383_s2 + $0x100] sm:$0xff] }
 0x2de   :  { %v1803_v34 = vpop.xlane.xlu0 %1802  ;;  %v11643_v37 = vpop.eup %11642  ;;  %v2040_v21 = vmax.f32 %v1806_v13, 1e-24 }
 0x2df   :  { %v2039_v55 = vmax.f32 %v1803_v34, 1e-24  ;;  %v11645_v49 = vpop.eup %11644  ;;  %v2162_v19 = vmul.f32 %v11643_v37, %v1970_v9  ;;  %v11565_v34 = vpack.c.bf16 %v2881_v42, %v2880_v40 }
 0x2e0   :  { %11654 = vrsqrt.f32 %v2040_v21  ;;  %v2161_v58 = vmul.f32 %v11645_v49, %v1969_v29  ;;  %11560 = vmatpush3.bf16.msra.mxu1 %v11557_v22  ;;  %v1974_v29 = vmul.f32 2.828427, %v13198_v47  ;;  %v1973_v49 = vmul.f32 2.828427, %v13184_v56  ;;  %v2884_v47 = vld [vmem:[%s18383_s2 + $0x110] sm:$0xff]  ;;  %v2885_v56 = vld [vmem:[%s18383_s2 + $0x118] sm:$0xff] }
 0x2e1   :  { %11656 = vrsqrt.f32 %v2039_v55  ;;  %v1812_v17 = vpop.xlane.xlu1 %1811  ;;  %11562 = vmatprep.subr.bf16.mxu1 %v11561_v39 }
 0x2e2   :  { %v1809_v46 = vpop.xlane.xlu0 %1808  ;;  %v11647_v20 = vpop.eup %11646  ;;  %v2042_v9 = vmax.f32 %v1812_v17, 1e-24  ;;  %10869 = vmatmul.mubr.msk.f32.gmra.mrb[68].mxu0 %vm1773_vm11, %v2161_v58 }
 0x2e3   :  { %v2041_v11 = vmax.f32 %v1809_v46, 1e-24  ;;  %v11649_v28 = vpop.eup %11648  ;;  %10871 = vmatprep.mubr.msk.f32.mxu0 %vm1773_vm11, %v2162_v19  ;;  %v2164_v13 = vmul.f32 %v11647_v20, %v1972_v1  ;;  %v11569_v1 = vpack.c.bf16 %v2883_v63, %v2882_v48  ;;  %v1976_v46 = vmul.f32 2.828427, %v13209_v32 }
 0x2e4   :  { %11658 = vrsqrt.f32 %v2042_v9  ;;  %v2163_v37 = vmul.f32 %v11649_v28, %v1971_v12  ;;  %11564 = vmatpush3.bf16.msra.mxu1 %v11561_v39  ;;  %v1975_v9 = vmul.f32 2.828427, %v13195_v4  ;;  %v11573_v48 = vpack.c.bf16 %v2885_v56, %v2884_v47 }
 0x2e5   :  { %11660 = vrsqrt.f32 %v2041_v11  ;;  %v1818_v22 = vpop.xlane.xlu1 %1817  ;;  %11566 = vmatprep.subr.bf16.mxu1 %v11565_v34  ;;  %v1978_v32 = vmul.f32 2.828427, %v13223_v7  ;;  %v1977_v4 = vmul.f32 2.828427, %v13206_v31  ;;  %v1980_v7 = vmul.f32 2.828427, %v13234_v3 }
 0x2e6   :  { %v1815_v21 = vpop.xlane.xlu0 %1814  ;;  %v11651_v55 = vpop.eup %11650  ;;  %v2044_v19 = vmax.f32 %v1818_v22, 1e-24  ;;  %10872 = vmatmul.mubr.msk.f32.gmra.mrb[70].mxu0 %vm1773_vm11, %v2163_v37  ;;  %v1979_v31 = vmul.f32 2.828427, %v13220_v25 }
 0x2e7   :  { %v2043_v58 = vmax.f32 %v1815_v21, 1e-24  ;;  %v11653_v40 = vpop.eup %11652  ;;  %10874 = vmatprep.mubr.msk.f32.mxu0 %vm1773_vm11, %v2164_v13  ;;  %v2166_v42 = vmul.f32 %v11651_v55, %v1974_v29 }
 0x2e8   :  { %11662 = vrsqrt.f32 %v2044_v19  ;;  %v2165_v17 = vmul.f32 %v11653_v40, %v1973_v49  ;;  %11568 = vmatpush3.bf16.msra.mxu1 %v11565_v34 }
 0x2e9   :  { %11664 = vrsqrt.f32 %v2043_v58  ;;  %v1824_v39 = vpop.xlane.xlu1 %1823  ;;  %11570 = vmatprep.subr.bf16.mxu1 %v11569_v1 }
 0x2ea   :  { %v1821_v20 = vpop.xlane.xlu0 %1820  ;;  %v11655_v12 = vpop.eup %11654  ;;  %v2046_v11 = vmax.f32 %v1824_v39, 1e-24  ;;  %10875 = vmatmul.mubr.msk.f32.gmra.mrb[72].mxu0 %vm1773_vm11, %v2165_v17 }
 0x2eb   :  { %v2045_v28 = vmax.f32 %v1821_v20, 1e-24  ;;  %v11657_v13 = vpop.eup %11656  ;;  %10877 = vmatprep.mubr.msk.f32.mxu0 %vm1773_vm11, %v2166_v42  ;;  %v2168_v37 = vmul.f32 %v11655_v12, %v1976_v46  ;;  %v1982_v20 = vmul.f32 2.828427, %v13251_v60 }
 0x2ec   :  { %11666 = vrsqrt.f32 %v2046_v11  ;;  %v2167_v63 = vmul.f32 %v11657_v13, %v1975_v9  ;;  %11572 = vmatpush3.bf16.msra.mxu1 %v11569_v1  ;;  %v1981_v11 = vmul.f32 2.828427, %v13231_v44 }
 0x2ed   :  { %11668 = vrsqrt.f32 %v2045_v28  ;;  %v1830_v29 = vpop.xlane.xlu1 %1829  ;;  %11574 = vmatprep.subr.bf16.mxu1 %v11573_v48 }
 0x2ee   :  { %v1827_v22 = vpop.xlane.xlu0 %1826  ;;  %v11659_v21 = vpop.eup %11658  ;;  %v2048_v55 = vmax.f32 %v1830_v29, 1e-24  ;;  %10878 = vmatmul.mubr.msk.f32.gmra.mrb[74].mxu0 %vm1773_vm11, %v2167_v63  ;;  %v1984_v63 = vmul.f32 2.828427, %v13265_v59 }
 0x2ef   :  { %v2047_v34 = vmax.f32 %v1827_v22, 1e-24  ;;  %v11661_v49 = vpop.eup %11660  ;;  %10880 = vmatprep.mubr.msk.f32.mxu0 %vm1773_vm11, %v2168_v37  ;;  %v2170_v19 = vmul.f32 %v11659_v21, %v1978_v32  ;;  %v1983_v22 = vmul.f32 2.828427, %v13248_v15 }
 0x2f0   :  { %11670 = vrsqrt.f32 %v2048_v55  ;;  %v2169_v58 = vmul.f32 %v11661_v49, %v1977_v4  ;;  %11576 = vmatpush3.bf16.msra.mxu1 %v11573_v48  ;;  %v1986_v49 = vmul.f32 2.828427, %v13276_v27 }
 0x2f1   :  { %11672 = vrsqrt.f32 %v2047_v34  ;;  %v1836_v40 = vpop.xlane.xlu1 %1835 }
 0x2f2   :  { %v1833_v42 = vpop.xlane.xlu0 %1832  ;;  %v11663_v17 = vpop.eup %11662  ;;  %v2050_v47 = vmax.f32 %v1836_v40, 1e-24  ;;  %10881 = vmatmul.mubr.msk.f32.gmra.mrb[76].mxu0 %vm1773_vm11, %v2169_v58 }
 0x2f3   :  { %v2049_v56 = vmax.f32 %v1833_v42, 1e-24  ;;  %v11665_v1 = vpop.eup %11664  ;;  %10883 = vmatprep.mubr.msk.f32.mxu0 %vm1773_vm11, %v2170_v19  ;;  %v2172_v46 = vmul.f32 %v11663_v17, %v1980_v7  ;;  %v1985_v7 = vmul.f32 2.828427, %v13262_v14 }
 0x2f4   :  { %11674 = vrsqrt.f32 %v2050_v47  ;;  %v2171_v39 = vmul.f32 %v11665_v1, %v1979_v31  ;;  %v1988_v47 = vmul.f32 2.828427, %v13287_v35 }
 0x2f5   :  { %11676 = vrsqrt.f32 %v2049_v56  ;;  %v1842_v3 = vpop.xlane.xlu1 %1841 }
 0x2f6   :  { %v1839_v12 = vpop.xlane.xlu0 %1838  ;;  %v11667_v9 = vpop.eup %11666  ;;  %v2052_v25 = vmax.f32 %v1842_v3, 1e-24  ;;  %10884 = vmatmul.mubr.msk.f32.gmra.mrb[78].mxu0 %vm1773_vm11, %v2171_v39 }
 0x2f7   :  { %v2051_v28 = vmax.f32 %v1839_v12, 1e-24  ;;  %v11669_v13 = vpop.eup %11668  ;;  %10886 = vmatprep.mubr.msk.f32.mxu0 %vm1773_vm11, %v2172_v46  ;;  %v2174_v37 = vmul.f32 %v11667_v9, %v1982_v20  ;;  %v1987_v46 = vmul.f32 2.828427, %v13273_v24  ;;  %v1990_v9 = vmul.f32 2.828427, %v13301_v52 }
 0x2f8   :  { %11678 = vrsqrt.f32 %v2052_v25  ;;  %v2173_v48 = vmul.f32 %v11669_v13, %v1981_v11 }
 0x2f9   :  { %11680 = vrsqrt.f32 %v2051_v28  ;;  %v1848_v60 = vpop.xlane.xlu1 %1847  ;;  %v1989_v28 = vmul.f32 2.828427, %v13284_v43 }
 0x2fa   :  { %v1845_v32 = vpop.xlane.xlu0 %1844  ;;  %v11671_v29 = vpop.eup %11670  ;;  %v2054_v21 = vmax.f32 %v1848_v60, 1e-24  ;;  %10887 = vmatmul.mubr.msk.f32.gmra.mrb[80].mxu0 %vm1773_vm11, %v2173_v48  ;;  %v1992_v60 = vmul.f32 2.828427, %v13312_v23 }
 0x2fb   :  { %v2053_v44 = vmax.f32 %v1845_v32, 1e-24  ;;  %v11673_v4 = vpop.eup %11672  ;;  %10889 = vmatprep.mubr.msk.f32.mxu0 %vm1773_vm11, %v2174_v37  ;;  %v2176_v55 = vmul.f32 %v11671_v29, %v1984_v63 }
 0x2fc   :  { %11682 = vrsqrt.f32 %v2054_v21  ;;  %v2175_v34 = vmul.f32 %v11673_v4, %v1983_v22  ;;  %v1991_v22 = vmul.f32 2.828427, %v13298_v26 }
 0x2fd   :  { %11684 = vrsqrt.f32 %v2053_v44  ;;  %v1854_v59 = vpop.xlane.xlu1 %1853 }
 0x2fe   :  { %v1851_v19 = vpop.xlane.xlu0 %1850  ;;  %v11675_v58 = vpop.eup %11674  ;;  %v2056_v40 = vmax.f32 %v1854_v59, 1e-24  ;;  %10890 = vmatmul.mubr.msk.f32.gmra.mrb[82].mxu0 %vm1773_vm11, %v2175_v34  ;;  %v1994_v34 = vmul.f32 2.828427, %v13323_v30 }
 0x2ff   :  { %v2055_v15 = vmax.f32 %v1851_v19, 1e-24  ;;  %v11677_v42 = vpop.eup %11676  ;;  %10892 = vmatprep.mubr.msk.f32.mxu0 %vm1773_vm11, %v2176_v55  ;;  %v2178_v17 = vmul.f32 %v11675_v58, %v1986_v49  ;;  %v1993_v19 = vmul.f32 2.828427, %v13309_v5 }
 0x300   :  { %11686 = vrsqrt.f32 %v2056_v40  ;;  %v2177_v31 = vmul.f32 %v11677_v42, %v1985_v7  ;;  %v1996_v42 = vmul.f32 2.828427, %v13337_v8 }
 0x301   :  { %11688 = vrsqrt.f32 %v2055_v15  ;;  %v1860_v27 = vpop.xlane.xlu1 %1859 }
 0x302   :  { %v1857_v56 = vpop.xlane.xlu0 %1856  ;;  %v11679_v1 = vpop.eup %11678  ;;  %v2058_v39 = vmax.f32 %v1860_v27, 1e-24  ;;  %10893 = vmatmul.mubr.msk.f32.gmra.mrb[84].mxu0 %vm1773_vm11, %v2177_v31 }
 0x303   :  { %v2057_v14 = vmax.f32 %v1857_v56, 1e-24  ;;  %v11681_v20 = vpop.eup %11680  ;;  %10895 = vmatprep.mubr.msk.f32.mxu0 %vm1773_vm11, %v2178_v17  ;;  %v2180_v3 = vmul.f32 %v11679_v1, %v1988_v47  ;;  %v1995_v47 = vmul.f32 2.828427, %v13320_v36 }
 0x304   :  { %11690 = vrsqrt.f32 %v2058_v39  ;;  %v2179_v12 = vmul.f32 %v11681_v20, %v1987_v46  ;;  %v1998_v39 = vmul.f32 2.828427, %v13348_v6 }
 0x305   :  { %11692 = vrsqrt.f32 %v2057_v14  ;;  %v1866_v35 = vpop.xlane.xlu1 %1865 }
 0x306   :  { %v1863_v11 = vpop.xlane.xlu0 %1862  ;;  %v11683_v25 = vpop.eup %11682  ;;  %v2060_v13 = vmax.f32 %v1866_v35, 1e-24  ;;  %10896 = vmatmul.mubr.msk.f32.gmra.mrb[86].mxu0 %vm1773_vm11, %v2179_v12 }
 0x307   :  { %v2059_v24 = vmax.f32 %v1863_v11, 1e-24  ;;  %v11685_v37 = vpop.eup %11684  ;;  %10898 = vmatprep.mubr.msk.f32.mxu0 %vm1773_vm11, %v2180_v3  ;;  %v2182_v48 = vmul.f32 %v11683_v25, %v1990_v9  ;;  %v1997_v3 = vmul.f32 2.828427, %v13334_v51  ;;  %v2000_v25 = vmul.f32 2.828427, %v13361_v61 }
 0x308   :  { %11694 = vrsqrt.f32 %v2060_v13  ;;  %v2181_v63 = vmul.f32 %v11685_v37, %v1989_v28 }
 0x309   :  { %11696 = vrsqrt.f32 %v2059_v24  ;;  %v1872_v52 = vpop.xlane.xlu1 %1871  ;;  %v1999_v24 = vmul.f32 2.828427, %v13345_v57 }
 0x30a   :  { %v1869_v32 = vpop.xlane.xlu0 %1868  ;;  %v11687_v29 = vpop.eup %11686  ;;  %v2062_v21 = vmax.f32 %v1872_v52, 1e-24  ;;  %10899 = vmatmul.mubr.msk.f32.gmra.mrb[88].mxu0 %vm1773_vm11, %v2181_v63  ;;  %v2002_v52 = vmul.f32 2.828427, %v13373_v10 }
 0x30b   :  { %v2061_v43 = vmax.f32 %v1869_v32, 1e-24  ;;  %v11689_v44 = vpop.eup %11688  ;;  %10901 = vmatprep.mubr.msk.f32.mxu0 %vm1773_vm11, %v2182_v48  ;;  %v2184_v4 = vmul.f32 %v11687_v29, %v1992_v60 }
 0x30c   :  { %11698 = vrsqrt.f32 %v2062_v21  ;;  %v2183_v55 = vmul.f32 %v11689_v44, %v1991_v22  ;;  %v2001_v22 = vmul.f32 2.828427, %v13356_v18 }
 0x30d   :  { %11700 = vrsqrt.f32 %v2061_v43  ;;  %v1878_v23 = vpop.xlane.xlu1 %1877 }
 0x30e   :  { %v1875_v49 = vpop.xlane.xlu0 %1874  ;;  %v11691_v59 = vpop.eup %11690  ;;  %v2064_v58 = vmax.f32 %v1878_v23, 1e-24  ;;  %10902 = vmatmul.mubr.msk.f32.gmra.mrb[90].mxu0 %vm1773_vm11, %v2183_v55  ;;  %v2004_v55 = vmul.f32 2.828427, %v13386_v53 }
 0x30f   :  { %v2063_v26 = vmax.f32 %v1875_v49, 1e-24  ;;  %v11693_v7 = vpop.eup %11692  ;;  %10904 = vmatprep.mubr.msk.f32.mxu0 %vm1773_vm11, %v2184_v4  ;;  %v2186_v40 = vmul.f32 %v11691_v59, %v1994_v34  ;;  %v2003_v49 = vmul.f32 2.828427, %v13370_v50 }
 0x310   :  { %11702 = vrsqrt.f32 %v2064_v58  ;;  %v2185_v15 = vmul.f32 %v11693_v7, %v1993_v19  ;;  %v2006_v7 = vmul.f32 2.828427, %v13397_v0 }
 0x311   :  { %11704 = vrsqrt.f32 %v2063_v26  ;;  %v1884_v30 = vpop.xlane.xlu1 %1883 }
 0x312   :  { %v1881_v17 = vpop.xlane.xlu0 %1880  ;;  %v11695_v31 = vpop.eup %11694  ;;  %v2066_v27 = vmax.f32 %v1884_v30, 1e-24  ;;  %10905 = vmatmul.mubr.msk.f32.gmra.mrb[92].mxu0 %vm1773_vm11, %v2185_v15 }
 0x313   :  { %v2065_v5 = vmax.f32 %v1881_v17, 1e-24  ;;  %v11697_v56 = vpop.eup %11696  ;;  %10907 = vmatprep.mubr.msk.f32.mxu0 %vm1773_vm11, %v2186_v40  ;;  %v2188_v1 = vmul.f32 %v11695_v31, %v1996_v42  ;;  %v2005_v42 = vmul.f32 2.828427, %v13383_v45 }
 0x314   :  { %11706 = vrsqrt.f32 %v2066_v27  ;;  %v2187_v46 = vmul.f32 %v11697_v56, %v1995_v47  ;;  %v2008_v27 = vmul.f32 2.828427, %v13409_v62 }
 0x315   :  { %11708 = vrsqrt.f32 %v2065_v5  ;;  %v1890_v8 = vpop.xlane.xlu1 %1889 }
 0x316   :  { %v1887_v14 = vpop.xlane.xlu0 %1886  ;;  %v11699_v20 = vpop.eup %11698  ;;  %v2068_v12 = vmax.f32 %v1890_v8, 1e-24  ;;  %10908 = vmatmul.mubr.msk.f32.gmra.mrb[94].mxu0 %vm1773_vm11, %v2187_v46 }
 0x317   :  { %v2067_v36 = vmax.f32 %v1887_v14, 1e-24  ;;  %v11701_v9 = vpop.eup %11700  ;;  %10910 = vmatprep.mubr.msk.f32.mxu0 %vm1773_vm11, %v2188_v1  ;;  %v2190_v35 = vmul.f32 %v11699_v20, %v1998_v39  ;;  %v2007_v1 = vmul.f32 2.828427, %v13392_v2  ;;  %v2010_v20 = vmul.f32 2.828427, %v13422_v41 }
 0x318   :  { %11710 = vrsqrt.f32 %v2068_v12  ;;  %v2189_v11 = vmul.f32 %v11701_v9, %v1997_v3 }
 0x319   :  { %11712 = vrsqrt.f32 %v2067_v36  ;;  %v1896_v6 = vpop.xlane.xlu1 %1895  ;;  %v2009_v36 = vmul.f32 2.828427, %v13406_v38 }
 0x31a   :  { %v1893_v28 = vpop.xlane.xlu0 %1892  ;;  %v11703_v13 = vpop.eup %11702  ;;  %v2070_v37 = vmax.f32 %v1896_v6, 1e-24  ;;  %10911 = vmatmul.mubr.msk.f32.gmra.mrb[96].mxu0 %vm1773_vm11, %v2189_v11  ;;  %v2012_v6 = vmul.f32 2.828427, %v13433_v54 }
 0x31b   :  { %v2069_v51 = vmax.f32 %v1893_v28, 1e-24  ;;  %v11705_v48 = vpop.eup %11704  ;;  %10913 = vmatprep.mubr.msk.f32.mxu0 %vm1773_vm11, %v2190_v35  ;;  %v2192_v63 = vmul.f32 %v11703_v13, %v2000_v25 }
 0x31c   :  { %11714 = vrsqrt.f32 %v2070_v37  ;;  %v2191_v60 = vmul.f32 %v11705_v48, %v1999_v24  ;;  %v2011_v24 = vmul.f32 2.828427, %v13419_v33 }
 0x31d   :  { %11716 = vrsqrt.f32 %v2069_v51  ;;  %v1902_v61 = vpop.xlane.xlu1 %1901 }
 0x31e   :  { %v1899_v32 = vpop.xlane.xlu0 %1898  ;;  %v11707_v29 = vpop.eup %11706  ;;  %v2072_v21 = vmax.f32 %v1902_v61, 1e-24  ;;  %10914 = vmatmul.mubr.msk.f32.gmra.mrb[98].mxu0 %vm1773_vm11, %v2191_v60  ;;  %v2014_v60 = vmul.f32 2.828427, %v13445_v16 }
 0x31f   :  { %v2071_v57 = vmax.f32 %v1899_v32, 1e-24  ;;  %v11709_v43 = vpop.eup %11708  ;;  %10916 = vmatprep.mubr.msk.f32.mxu0 %vm1773_vm11, %v2192_v63  ;;  %v2194_v44 = vmul.f32 %v11707_v29, %v2002_v52  ;;  %v18869_v32 = vld [vmem:[#allocation70_spill] sm:$0xff] }
 0x320   :  { %11718 = vrsqrt.f32 %v2072_v21  ;;  %v2193_v4 = vmul.f32 %v11709_v43, %v2001_v22  ;;  %v2013_v29 = vmul.f32 2.828427, %v18869_v32 }
 0x321   :  { %11720 = vrsqrt.f32 %v2071_v57  ;;  %v1908_v10 = vpop.xlane.xlu1 %1907 }
 0x322   :  { %v1905_v34 = vpop.xlane.xlu0 %1904  ;;  %v11711_v23 = vpop.eup %11710  ;;  %v2074_v59 = vmax.f32 %v1908_v10, 1e-24  ;;  %10917 = vmatmul.mubr.msk.f32.gmra.mrb[100].mxu0 %vm1773_vm11, %v2193_v4 }
 0x323   :  { %v2073_v18 = vmax.f32 %v1905_v34, 1e-24  ;;  %v11713_v19 = vpop.eup %11712  ;;  %10919 = vmatprep.mubr.msk.f32.mxu0 %vm1773_vm11, %v2194_v44  ;;  %v2196_v58 = vmul.f32 %v11711_v23, %v2004_v55  ;;  %v18870_v44 = vld [vmem:[#allocation73_spill] sm:$0xff]  ;;  %v18871_v34 = vld [vmem:[#allocation71_spill] sm:$0xff] }
 0x324   :  { %11722 = vrsqrt.f32 %v2074_v59  ;;  %v2195_v26 = vmul.f32 %v11713_v19, %v2003_v49  ;;  %v2016_v4 = vmul.f32 2.828427, %v18870_v44  ;;  %v2015_v23 = vmul.f32 2.828427, %v18871_v34  ;;  %v18883_v34 = vld [vmem:[#allocation85_spill] sm:$0xff] }
 0x325   :  { %11724 = vrsqrt.f32 %v2073_v18  ;;  %v1914_v53 = vpop.xlane.xlu1 %1913 }
 0x326   :  { %v1911_v40 = vpop.xlane.xlu0 %1910  ;;  %v11715_v15 = vpop.eup %11714  ;;  %v2076_v30 = vmax.f32 %v1914_v53, 1e-24  ;;  %10920 = vmatmul.mubr.msk.f32.gmra.mrb[102].mxu0 %vm1773_vm11, %v2195_v26  ;;  %v18872_v26 = vld [vmem:[#allocation75_spill] sm:$0xff] }
 0x327   :  { %v2075_v50 = vmax.f32 %v1911_v40, 1e-24  ;;  %v11717_v17 = vpop.eup %11716  ;;  %10922 = vmatprep.mubr.msk.f32.mxu0 %vm1773_vm11, %v2196_v58  ;;  %v2198_v31 = vmul.f32 %v11715_v15, %v2006_v7  ;;  %v2018_v7 = vmul.f32 2.828427, %v18872_v26 }
 0x328   :  { %11726 = vrsqrt.f32 %v2076_v30  ;;  %v2197_v47 = vmul.f32 %v11717_v17, %v2005_v42  ;;  %v18873_v42 = vld [vmem:[#allocation72_spill] sm:$0xff] }
 0x329   :  { %11728 = vrsqrt.f32 %v2075_v50  ;;  %v1920_v0 = vpop.xlane.xlu1 %1919  ;;  %v2017_v30 = vmul.f32 2.828427, %v18873_v42 }
 0x32a   :  { %v1917_v5 = vpop.xlane.xlu0 %1916  ;;  %v11719_v56 = vpop.eup %11718  ;;  %v2078_v46 = vmax.f32 %v1920_v0, 1e-24  ;;  %10923 = vmatmul.mubr.msk.f32.gmra.mrb[104].mxu0 %vm1773_vm11, %v2197_v47  ;;  %v18874_v0 = vld [vmem:[#allocation77_spill] sm:$0xff] }
 0x32b   :  { %v2077_v45 = vmax.f32 %v1917_v5, 1e-24  ;;  %v11721_v39 = vpop.eup %11720  ;;  %10925 = vmatprep.mubr.msk.f32.mxu0 %vm1773_vm11, %v2198_v31  ;;  %v2200_v8 = vmul.f32 %v11719_v56, %v2008_v27  ;;  %v2020_v5 = vmul.f32 2.828427, %v18874_v0 }
 0x32c   :  { %11730 = vrsqrt.f32 %v2078_v46  ;;  %v2199_v14 = vmul.f32 %v11721_v39, %v2007_v1 }
 0x32d   :  { %11732 = vrsqrt.f32 %v2077_v45  ;;  %v1926_v62 = vpop.xlane.xlu1 %1925  ;;  %v18875_v45 = vld [vmem:[#allocation74_spill] sm:$0xff] }
 0x32e   :  { %v1923_v3 = vpop.xlane.xlu0 %1922  ;;  %v11723_v12 = vpop.eup %11722  ;;  %v2080_v9 = vmax.f32 %v1926_v62, 1e-24  ;;  %10926 = vmatmul.mubr.msk.f32.gmra.mrb[106].mxu0 %vm1773_vm11, %v2199_v14  ;;  %v2019_v39 = vmul.f32 2.828427, %v18875_v45 }
 0x32f   :  { %v2079_v2 = vmax.f32 %v1923_v3, 1e-24  ;;  %v11725_v35 = vpop.eup %11724  ;;  %10928 = vmatprep.mubr.msk.f32.mxu0 %vm1773_vm11, %v2200_v8  ;;  %v2202_v11 = vmul.f32 %v11723_v12, %v2010_v20  ;;  %v18876_v12 = vld [vmem:[#allocation79_spill] sm:$0xff] }
 0x330   :  { %11734 = vrsqrt.f32 %v2080_v9  ;;  %v2201_v25 = vmul.f32 %v11725_v35, %v2009_v36  ;;  %v2022_v36 = vmul.f32 2.828427, %v18876_v12 }
 0x331   :  { %11736 = vrsqrt.f32 %v2079_v2  ;;  %v1932_v41 = vpop.xlane.xlu1 %1931 }
 0x332   :  { %v1929_v28 = vpop.xlane.xlu0 %1928  ;;  %v11727_v13 = vpop.eup %11726  ;;  %v2082_v37 = vmax.f32 %v1932_v41, 1e-24  ;;  %10929 = vmatmul.mubr.msk.f32.gmra.mrb[108].mxu0 %vm1773_vm11, %v2201_v25 }
 0x333   :  { %v2081_v38 = vmax.f32 %v1929_v28, 1e-24  ;;  %v11729_v51 = vpop.eup %11728  ;;  %10931 = vmatprep.mubr.msk.f32.mxu0 %vm1773_vm11, %v2202_v11  ;;  %v2204_v48 = vmul.f32 %v11727_v13, %v2012_v6  ;;  %v18877_v11 = vld [vmem:[#allocation76_spill] sm:$0xff] }
 0x334   :  { %11738 = vrsqrt.f32 %v2082_v37  ;;  %v2203_v63 = vmul.f32 %v11729_v51, %v2011_v24  ;;  %v2021_v25 = vmul.f32 2.828427, %v18877_v11  ;;  %v18878_v37 = vld [vmem:[#allocation81_spill] sm:$0xff] }
 0x335   :  { %11740 = vrsqrt.f32 %v2081_v38  ;;  %v1938_v54 = vpop.xlane.xlu1 %1937  ;;  %v2024_v38 = vmul.f32 2.828427, %v18878_v37 }
 0x336   :  { %v1935_v52 = vpop.xlane.xlu0 %1934  ;;  %v11731_v61 = vpop.eup %11730  ;;  %v2084_v22 = vmax.f32 %v1938_v54, 1e-24  ;;  %10932 = vmatmul.mubr.msk.f32.gmra.mrb[110].mxu0 %vm1773_vm11, %v2203_v63  ;;  %v18879_v63 = vld [vmem:[#allocation78_spill] sm:$0xff] }
 0x337   :  { %v2083_v33 = vmax.f32 %v1935_v52, 1e-24  ;;  %v11733_v21 = vpop.eup %11732  ;;  %10934 = vmatprep.mubr.msk.f32.mxu0 %vm1773_vm11, %v2204_v48  ;;  %v2206_v57 = vmul.f32 %v11731_v61, %v2014_v60  ;;  %v2023_v60 = vmul.f32 2.828427, %v18879_v63 }
 0x338   :  { %11742 = vrsqrt.f32 %v2084_v22  ;;  %v2205_v43 = vmul.f32 %v11733_v21, %v2013_v29  ;;  %v18880_v29 = vld [vmem:[#allocation83_spill] sm:$0xff]  ;;  %v18881_v21 = vld [vmem:[#allocation80_spill] sm:$0xff] }
 0x339   :  { %11744 = vrsqrt.f32 %v2083_v33  ;;  %v1944_v16 = vpop.xlane.xlu1 %1943  ;;  %v2026_v22 = vmul.f32 2.828427, %v18880_v29 }
 0x33a   :  { %v1941_v55 = vpop.xlane.xlu0 %1940  ;;  %v11735_v10 = vpop.eup %11734  ;;  %v2086_v49 = vmax.f32 %v1944_v16, 1e-24  ;;  %10935 = vmatmul.mubr.msk.f32.gmra.mrb[112].mxu0 %vm1773_vm11, %v2205_v43  ;;  %v18882_v16 = vld [vmem:[#allocation82_spill] sm:$0xff] }
 0x33b   :  { %v2085_v59 = vmax.f32 %v1941_v55, 1e-24  ;;  %v11737_v18 = vpop.eup %11736  ;;  %10937 = vmatprep.mubr.msk.f32.mxu0 %vm1773_vm11, %v2206_v57  ;;  %v2208_v19 = vmul.f32 %v11735_v10, %v2016_v4  ;;  %v2025_v57 = vmul.f32 2.828427, %v18881_v21  ;;  %v2027_v55 = vmul.f32 2.828427, %v18882_v16 }
 0x33c   :  { %11746 = vrsqrt.f32 %v2086_v49  ;;  %v2207_v58 = vmul.f32 %v11737_v18, %v2015_v23  ;;  %v2028_v23 = vmul.f32 2.828427, %v18883_v34 }
 0x33d   :  { %11748 = vrsqrt.f32 %v2085_v59  ;;  %v1950_v53 = vpop.xlane.xlu1 %1949 }
 0x33e   :  { %v1947_v40 = vpop.xlane.xlu0 %1946  ;;  %v11739_v15 = vpop.eup %11738  ;;  %v2088_v50 = vmax.f32 %v1950_v53, 1e-24  ;;  %10938 = vmatmul.mubr.msk.f32.gmra.mrb[114].mxu0 %vm1773_vm11, %v2207_v58  ;;  %v13719_v53 = vld [vmem:[%s18383_s2 + $0x90] ss:$0 sm:$0xff] }
 0x33f   :  { %v2087_v17 = vmax.f32 %v1947_v40, 1e-24  ;;  %v11741_v31 = vpop.eup %11740  ;;  %10940 = vmatprep.mubr.msk.f32.mxu0 %vm1773_vm11, %v2208_v19  ;;  %v2210_v47 = vmul.f32 %v11739_v15, %v2018_v7  ;;  %v18884_v19 = vld [vmem:[#allocation84_spill] sm:$0xff] }
 0x340   :  { %11750 = vrsqrt.f32 %v2088_v50  ;;  %v2209_v27 = vmul.f32 %v11741_v31, %v2017_v30  ;;  %v2029_v58 = vmul.f32 2.828427, %v18884_v19 }
 0x341   :  { %11752 = vrsqrt.f32 %v2087_v17  ;;  %v1956_v56 = vpop.xlane.xlu1 %1955 }
 0x342   :  { %v1953_v1 = vpop.xlane.xlu0 %1952  ;;  %v11743_v46 = vpop.eup %11742  ;;  %v2090_v8 = vmax.f32 %v1956_v56, 1e-24  ;;  %10941 = vmatmul.mubr.msk.f32.gmra.mrb[116].mxu0 %vm1773_vm11, %v2209_v27 }
 0x343   :  { %v2089_v14 = vmax.f32 %v1953_v1, 1e-24  ;;  %v11745_v20 = vpop.eup %11744  ;;  %10943 = vmatprep.mubr.msk.f32.mxu0 %vm1773_vm11, %v2210_v47  ;;  %v2212_v62 = vmul.f32 %v11743_v46, %v2020_v5 }
 0x344   :  { %11754 = vrsqrt.f32 %v2090_v8  ;;  %v2211_v3 = vmul.f32 %v11745_v20, %v2019_v39 }
 0x345   :  { %11756 = vrsqrt.f32 %v2089_v14  ;;  %v1962_v2 = vpop.xlane.xlu1 %1961 }
 0x346   :  { %v1959_v9 = vpop.xlane.xlu0 %1958  ;;  %v11747_v35 = vpop.eup %11746  ;;  %10944 = vmatmul.mubr.msk.f32.gmra.mrb[118].mxu0 %vm1773_vm11, %v2211_v3  ;;  %v2092_v41 = vmax.f32 %v1962_v2, 1e-24 }
 0x347   :  { %v2091_v6 = vmax.f32 %v1959_v9, 1e-24  ;;  %v11749_v28 = vpop.eup %11748  ;;  %10946 = vmatprep.mubr.msk.f32.mxu0 %vm1773_vm11, %v2212_v62  ;;  %v2214_v13 = vmul.f32 %v11747_v35, %v2022_v36 }
 0x348   :  { %v2213_v24 = vmul.f32 %v11749_v28, %v2021_v25 }
 0x349   :  { %11758 = vrsqrt.f32 %v2091_v6 }
 0x34a   :  { %11760 = vrsqrt.f32 %v2092_v41  ;;  %v1965_v51 = vpop.xlane.xlu0 %1964  ;;  %v11751_v48 = vpop.eup %11750  ;;  %10947 = vmatmul.mubr.msk.f32.gmra.mrb[120].mxu0 %vm1773_vm11, %v2213_v24 }
 0x34b   :  { %v2093_v54 = vmax.f32 %v1965_v51, 1e-24  ;;  %v11753_v52 = vpop.eup %11752  ;;  %10949 = vmatprep.mubr.msk.f32.mxu0 %vm1773_vm11, %v2214_v13  ;;  %v2216_v61 = vmul.f32 %v11751_v48, %v2024_v38 }
 0x34c   :  { %v2215_v32 = vmul.f32 %v11753_v52, %v2023_v60 }
 0x34d   :  { %11762 = vrsqrt.f32 %v2093_v54 }
 0x34e   :  { %v11755_v33 = vpop.eup %11754  ;;  %10950 = vmatmul.mubr.msk.f32.gmra.mrb[122].mxu0 %vm1773_vm11, %v2215_v32 }
 0x34f   :  { %v11757_v43 = vpop.eup %11756  ;;  %10952 = vmatprep.mubr.msk.f32.mxu0 %vm1773_vm11, %v2216_v61  ;;  %v2218_v44 = vmul.f32 %v11755_v33, %v2026_v22 }
 0x350   :  { %v2217_v4 = vmul.f32 %v11757_v43, %v2025_v57 }
 0x352   :  { %10953 = vmatmul.mubr.msk.f32.gmra.mrb[124].mxu0 %vm1773_vm11, %v2217_v4 }
 0x353   :  { %v11759_v10 = vpop.eup %11758  ;;  %10955 = vmatprep.mubr.msk.f32.mxu0 %vm1773_vm11, %v2218_v44 }
 0x354   :  { %v11761_v49 = vpop.eup %11760  ;;  %v2219_v59 = vmul.f32 %v11759_v10, %v2027_v55 }
 0x355   :  { %v2220_v18 = vmul.f32 %v11761_v49, %v2028_v23 }
 0x356   :  { %10956 = vmatmul.mubr.msk.f32.gmra.mrb[126].mxu0 %vm1773_vm11, %v2219_v59 }
 0x357   :  { %v11763_v26 = vpop.eup %11762  ;;  %10958 = vmatprep.mubr.msk.f32.mxu0 %vm1773_vm11, %v2220_v18 }
 0x358   :  { %v2221_v7 = vmul.f32 %v11763_v26, %v2029_v58 }
 0x35a   :  { %10959 = vmatmul.mubr.msk.f32.gmra.mrb[128].mxu0 %vm1773_vm11, %v2221_v7 }
 0x3ad   :  { %v10867_v40 = vpop.f32.mrb[66].mxu0 }
 0x3ae   :  { %v2493_v15 = vadd.f32 %v10867_v40, %v13719_v53  ;;  %v2487_v42 = vpop.f32.mrb[67].mxu0 }
 0x3af   :  { %v2488_v30 = vadd.f32 %v13719_v53, %v2487_v42 }
 0x3b0   :  { %v2807_v17 = vmax.f32 %v2493_v15, 0.0 }
 0x3b1   :  { %v2806_v50 = vmax.f32 %v2488_v30, 0.0 }
 0x3b3   :  { %10993 = vmatprep.mubr.f32.mxu1 %v2806_v50 }
 0x3b4   :  { %10994 = vmatmul.mubr.f32.vlgmr.msra.gmra.mrb[62].mxu1 %v2807_v17 }
 0x3b5   :  { %v10870_v31 = vpop.f32.mrb[68].mxu0 }
 0x3b6   :  { %v2503_v47 = vadd.f32 %v10870_v31, %v13719_v53  ;;  %v2497_v27 = vpop.f32.mrb[69].mxu0 }
 0x3b7   :  { %v2498_v0 = vadd.f32 %v13719_v53, %v2497_v27 }
 0x3b8   :  { %v2809_v1 = vmax.f32 %v2503_v47, 0.0 }
 0x3b9   :  { %v2808_v5 = vmax.f32 %v2498_v0, 0.0  ;;  %v10873_v56 = vpop.f32.mrb[70].mxu0 }
 0x3ba   :  { %v2513_v46 = vadd.f32 %v10873_v56, %v13719_v53  ;;  %v2507_v45 = vpop.f32.mrb[71].mxu0 }
 0x3bb   :  { %v2508_v39 = vadd.f32 %v13719_v53, %v2507_v45  ;;  %10996 = vmatprep.mubr.f32.mxu1 %v2808_v5 }
 0x3bc   :  { %10997 = vmatmul.mubr.f32.gmra.mrb[64].mxu1 %v2809_v1  ;;  %v2811_v20 = vmax.f32 %v2513_v46, 0.0 }
 0x3bd   :  { %v2810_v8 = vmax.f32 %v2508_v39, 0.0  ;;  %v10876_v14 = vpop.f32.mrb[72].mxu0 }
 0x3be   :  { %v2523_v62 = vadd.f32 %v10876_v14, %v13719_v53  ;;  %v2517_v3 = vpop.f32.mrb[73].mxu0 }
 0x3bf   :  { %v2518_v12 = vadd.f32 %v13719_v53, %v2517_v3  ;;  %10999 = vmatprep.mubr.f32.mxu1 %v2810_v8 }
 0x3c0   :  { %11000 = vmatmul.mubr.f32.gmra.mrb[66].mxu1 %v2811_v20  ;;  %v2813_v2 = vmax.f32 %v2523_v62, 0.0 }
 0x3c1   :  { %v2812_v36 = vmax.f32 %v2518_v12, 0.0  ;;  %v10879_v9 = vpop.f32.mrb[74].mxu0 }
 0x3c2   :  { %v2533_v35 = vadd.f32 %v10879_v9, %v13719_v53  ;;  %v2527_v11 = vpop.f32.mrb[75].mxu0 }
 0x3c3   :  { %v2528_v25 = vadd.f32 %v13719_v53, %v2527_v11  ;;  %11002 = vmatprep.mubr.f32.mxu1 %v2812_v36 }
 0x3c4   :  { %11003 = vmatmul.mubr.f32.gmra.mrb[68].mxu1 %v2813_v2  ;;  %v2815_v28 = vmax.f32 %v2533_v35, 0.0 }
 0x3c5   :  { %v2814_v6 = vmax.f32 %v2528_v25, 0.0  ;;  %v10882_v41 = vpop.f32.mrb[76].mxu0 }
 0x3c6   :  { %v2543_v13 = vadd.f32 %v10882_v41, %v13719_v53  ;;  %v2537_v24 = vpop.f32.mrb[77].mxu0 }
 0x3c7   :  { %v2538_v37 = vadd.f32 %v13719_v53, %v2537_v24  ;;  %11005 = vmatprep.mubr.f32.mxu1 %v2814_v6 }
 0x3c8   :  { %11006 = vmatmul.mubr.f32.gmra.mrb[70].mxu1 %v2815_v28  ;;  %v2817_v48 = vmax.f32 %v2543_v13, 0.0 }
 0x3c9   :  { %v2816_v38 = vmax.f32 %v2538_v37, 0.0  ;;  %v10885_v51 = vpop.f32.mrb[78].mxu0 }
 0x3ca   :  { %v2553_v63 = vadd.f32 %v10885_v51, %v13719_v53  ;;  %v2547_v60 = vpop.f32.mrb[79].mxu0 }
 0x3cb   :  { %v2548_v54 = vadd.f32 %v13719_v53, %v2547_v60  ;;  %11008 = vmatprep.mubr.f32.mxu1 %v2816_v38 }
 0x3cc   :  { %11009 = vmatmul.mubr.f32.gmra.mrb[72].mxu1 %v2817_v48  ;;  %v2819_v32 = vmax.f32 %v2553_v63, 0.0 }
 0x3cd   :  { %v2818_v52 = vmax.f32 %v2548_v54, 0.0  ;;  %v10888_v61 = vpop.f32.mrb[80].mxu0 }
 0x3ce   :  { %v2563_v29 = vadd.f32 %v10888_v61, %v13719_v53  ;;  %v2557_v22 = vpop.f32.mrb[81].mxu0 }
 0x3cf   :  { %v2558_v33 = vadd.f32 %v13719_v53, %v2557_v22  ;;  %11011 = vmatprep.mubr.f32.mxu1 %v2818_v52 }
 0x3d0   :  { %11012 = vmatmul.mubr.f32.gmra.mrb[74].mxu1 %v2819_v32  ;;  %v2821_v43 = vmax.f32 %v2563_v29, 0.0 }
 0x3d1   :  { %v2820_v21 = vmax.f32 %v2558_v33, 0.0  ;;  %v10891_v57 = vpop.f32.mrb[82].mxu0 }
 0x3d2   :  { %v2573_v44 = vadd.f32 %v10891_v57, %v13719_v53  ;;  %v2567_v4 = vpop.f32.mrb[83].mxu0 }
 0x3d3   :  { %v2568_v16 = vadd.f32 %v13719_v53, %v2567_v4  ;;  %11014 = vmatprep.mubr.f32.mxu1 %v2820_v21 }
 0x3d4   :  { %11015 = vmatmul.mubr.f32.gmra.mrb[76].mxu1 %v2821_v43  ;;  %v2823_v34 = vmax.f32 %v2573_v44, 0.0 }
 0x3d5   :  { %v2822_v55 = vmax.f32 %v2568_v16, 0.0  ;;  %v10894_v10 = vpop.f32.mrb[84].mxu0 }
 0x3d6   :  { %v2583_v23 = vadd.f32 %v10894_v10, %v13719_v53  ;;  %v2577_v49 = vpop.f32.mrb[85].mxu0 }
 0x3d7   :  { %v2578_v59 = vadd.f32 %v13719_v53, %v2577_v49  ;;  %11017 = vmatprep.mubr.f32.mxu1 %v2822_v55 }
 0x3d8   :  { %11018 = vmatmul.mubr.f32.gmra.mrb[78].mxu1 %v2823_v34  ;;  %v2825_v58 = vmax.f32 %v2583_v23, 0.0 }
 0x3d9   :  { %v2824_v18 = vmax.f32 %v2578_v59, 0.0  ;;  %v10897_v19 = vpop.f32.mrb[86].mxu0 }
 0x3da   :  { %v2593_v26 = vadd.f32 %v10897_v19, %v13719_v53  ;;  %v2587_v7 = vpop.f32.mrb[87].mxu0 }
 0x3db   :  { %v2588_v40 = vadd.f32 %v13719_v53, %v2587_v7  ;;  %11020 = vmatprep.mubr.f32.mxu1 %v2824_v18 }
 0x3dc   :  { %11021 = vmatmul.mubr.f32.gmra.mrb[80].mxu1 %v2825_v58  ;;  %v2827_v30 = vmax.f32 %v2593_v26, 0.0 }
 0x3dd   :  { %v2826_v15 = vmax.f32 %v2588_v40, 0.0  ;;  %v10900_v42 = vpop.f32.mrb[88].mxu0 }
 0x3de   :  { %v2603_v50 = vadd.f32 %v10900_v42, %v13719_v53  ;;  %v2597_v17 = vpop.f32.mrb[89].mxu0 }
 0x3df   :  { %v2598_v31 = vadd.f32 %v13719_v53, %v2597_v17  ;;  %11023 = vmatprep.mubr.f32.mxu1 %v2826_v15 }
 0x3e0   :  { %11024 = vmatmul.mubr.f32.gmra.mrb[82].mxu1 %v2827_v30  ;;  %v2829_v0 = vmax.f32 %v2603_v50, 0.0 }
 0x3e1   :  { %v2828_v47 = vmax.f32 %v2598_v31, 0.0  ;;  %v10903_v27 = vpop.f32.mrb[90].mxu0 }
 0x3e2   :  { %v2613_v5 = vadd.f32 %v10903_v27, %v13719_v53  ;;  %v2607_v56 = vpop.f32.mrb[91].mxu0 }
 0x3e3   :  { %v2608_v1 = vadd.f32 %v13719_v53, %v2607_v56  ;;  %11026 = vmatprep.mubr.f32.mxu1 %v2828_v47 }
 0x3e4   :  { %11027 = vmatmul.mubr.f32.gmra.mrb[84].mxu1 %v2829_v0  ;;  %v2831_v39 = vmax.f32 %v2613_v5, 0.0 }
 0x3e5   :  { %v2830_v46 = vmax.f32 %v2608_v1, 0.0  ;;  %v10906_v45 = vpop.f32.mrb[92].mxu0 }
 0x3e6   :  { %v2623_v8 = vadd.f32 %v10906_v45, %v13719_v53  ;;  %v2617_v14 = vpop.f32.mrb[93].mxu0 }
 0x3e7   :  { %v2618_v20 = vadd.f32 %v13719_v53, %v2617_v14  ;;  %11029 = vmatprep.mubr.f32.mxu1 %v2830_v46 }
 0x3e8   :  { %11030 = vmatmul.mubr.f32.gmra.mrb[86].mxu1 %v2831_v39  ;;  %v2833_v12 = vmax.f32 %v2623_v8, 0.0 }
 0x3e9   :  { %v2832_v62 = vmax.f32 %v2618_v20, 0.0  ;;  %v10909_v3 = vpop.f32.mrb[94].mxu0 }
 0x3ea   :  { %v2633_v36 = vadd.f32 %v10909_v3, %v13719_v53  ;;  %v2627_v9 = vpop.f32.mrb[95].mxu0 }
 0x3eb   :  { %v2628_v2 = vadd.f32 %v13719_v53, %v2627_v9  ;;  %11032 = vmatprep.mubr.f32.mxu1 %v2832_v62 }
 0x3ec   :  { %11033 = vmatmul.mubr.f32.gmra.mrb[88].mxu1 %v2833_v12  ;;  %v2835_v25 = vmax.f32 %v2633_v36, 0.0 }
 0x3ed   :  { %v2834_v35 = vmax.f32 %v2628_v2, 0.0  ;;  %v10912_v11 = vpop.f32.mrb[96].mxu0 }
 0x3ee   :  { %v2643_v6 = vadd.f32 %v10912_v11, %v13719_v53  ;;  %v2637_v41 = vpop.f32.mrb[97].mxu0 }
 0x3ef   :  { %v2638_v28 = vadd.f32 %v13719_v53, %v2637_v41  ;;  %11035 = vmatprep.mubr.f32.mxu1 %v2834_v35 }
 0x3f0   :  { %11036 = vmatmul.mubr.f32.gmra.mrb[90].mxu1 %v2835_v25  ;;  %v2837_v37 = vmax.f32 %v2643_v6, 0.0 }
 0x3f1   :  { %v2836_v13 = vmax.f32 %v2638_v28, 0.0  ;;  %v10915_v24 = vpop.f32.mrb[98].mxu0 }
 0x3f2   :  { %v2653_v38 = vadd.f32 %v10915_v24, %v13719_v53  ;;  %v2647_v51 = vpop.f32.mrb[99].mxu0 }
 0x3f3   :  { %v2648_v48 = vadd.f32 %v13719_v53, %v2647_v51  ;;  %11038 = vmatprep.mubr.f32.mxu1 %v2836_v13 }
 0x3f4   :  { %11039 = vmatmul.mubr.f32.gmra.mrb[92].mxu1 %v2837_v37  ;;  %v2839_v54 = vmax.f32 %v2653_v38, 0.0 }
 0x3f5   :  { %v2838_v63 = vmax.f32 %v2648_v48, 0.0  ;;  %v10918_v60 = vpop.f32.mrb[100].mxu0 }
 0x3f6   :  { %v2663_v52 = vadd.f32 %v10918_v60, %v13719_v53  ;;  %v2657_v61 = vpop.f32.mrb[101].mxu0 }
 0x3f7   :  { %v2658_v32 = vadd.f32 %v13719_v53, %v2657_v61  ;;  %11041 = vmatprep.mubr.f32.mxu1 %v2838_v63 }
 0x3f8   :  { %11042 = vmatmul.mubr.f32.gmra.mrb[94].mxu1 %v2839_v54  ;;  %v2841_v33 = vmax.f32 %v2663_v52, 0.0 }
 0x3f9   :  { %v2840_v29 = vmax.f32 %v2658_v32, 0.0  ;;  %v10921_v22 = vpop.f32.mrb[102].mxu0 }
 0x3fa   :  { %v2673_v21 = vadd.f32 %v10921_v22, %v13719_v53  ;;  %v2667_v57 = vpop.f32.mrb[103].mxu0 }
 0x3fb   :  { %v2668_v43 = vadd.f32 %v13719_v53, %v2667_v57  ;;  %11044 = vmatprep.mubr.f32.mxu1 %v2840_v29 }
 0x3fc   :  { %11045 = vmatmul.mubr.f32.gmra.mrb[96].mxu1 %v2841_v33  ;;  %v2843_v16 = vmax.f32 %v2673_v21, 0.0 }
 0x3fd   :  { %v2842_v44 = vmax.f32 %v2668_v43, 0.0  ;;  %v10924_v4 = vpop.f32.mrb[104].mxu0 }
 0x3fe   :  { %v2683_v55 = vadd.f32 %v10924_v4, %v13719_v53  ;;  %v2677_v10 = vpop.f32.mrb[105].mxu0 }
 0x3ff   :  { %v2678_v34 = vadd.f32 %v13719_v53, %v2677_v10  ;;  %11047 = vmatprep.mubr.f32.mxu1 %v2842_v44 }
 0x400   :  { %11048 = vmatmul.mubr.f32.gmra.mrb[98].mxu1 %v2843_v16  ;;  %v2845_v59 = vmax.f32 %v2683_v55, 0.0 }
 0x401   :  { %v2844_v23 = vmax.f32 %v2678_v34, 0.0  ;;  %v10927_v49 = vpop.f32.mrb[106].mxu0 }
 0x402   :  { %v2693_v18 = vadd.f32 %v10927_v49, %v13719_v53  ;;  %v2687_v19 = vpop.f32.mrb[107].mxu0 }
 0x403   :  { %v2688_v58 = vadd.f32 %v13719_v53, %v2687_v19  ;;  %11050 = vmatprep.mubr.f32.mxu1 %v2844_v23 }
 0x404   :  { %11051 = vmatmul.mubr.f32.gmra.mrb[100].mxu1 %v2845_v59  ;;  %v2847_v40 = vmax.f32 %v2693_v18, 0.0 }
 0x405   :  { %v2846_v26 = vmax.f32 %v2688_v58, 0.0  ;;  %v10930_v7 = vpop.f32.mrb[108].mxu0 }
 0x406   :  { %v2703_v15 = vadd.f32 %v10930_v7, %v13719_v53  ;;  %v2697_v42 = vpop.f32.mrb[109].mxu0 }
 0x407   :  { %v2698_v30 = vadd.f32 %v13719_v53, %v2697_v42  ;;  %11053 = vmatprep.mubr.f32.mxu1 %v2846_v26 }
 0x408   :  { %11054 = vmatmul.mubr.f32.gmra.mrb[102].mxu1 %v2847_v40  ;;  %v2849_v31 = vmax.f32 %v2703_v15, 0.0 }
 0x409   :  { %v2848_v50 = vmax.f32 %v2698_v30, 0.0  ;;  %v10933_v17 = vpop.f32.mrb[110].mxu0  ;;  %v13788_v30 = vld [vmem:[%s18383_s2 + $0x120] ss:$0 sm:$0xff] }
 0x40a   :  { %v2713_v47 = vadd.f32 %v10933_v17, %v13719_v53  ;;  %v2707_v27 = vpop.f32.mrb[111].mxu0  ;;  %v18885_v17 = vld [vmem:[#allocation5_spill] sm:$0xff] }
 0x40b   :  { %v2708_v0 = vadd.f32 %v13719_v53, %v2707_v27  ;;  %11056 = vmatprep.mubr.f32.mxu1 %v2848_v50  ;;  %vm3276_vm14 = vcmp.ge.s32.totalorder %v18885_v17, 32 }
 0x40c   :  { %11057 = vmatmul.mubr.f32.gmra.mrb[104].mxu1 %v2849_v31  ;;  %v2851_v1 = vmax.f32 %v2713_v47, 0.0 }
 0x40d   :  { %v2850_v5 = vmax.f32 %v2708_v0, 0.0  ;;  %v10936_v56 = vpop.f32.mrb[112].mxu0 }
 0x40e   :  { %v2723_v46 = vadd.f32 %v10936_v56, %v13719_v53  ;;  %v2717_v45 = vpop.f32.mrb[113].mxu0 }
 0x40f   :  { %v2718_v39 = vadd.f32 %v13719_v53, %v2717_v45  ;;  %11059 = vmatprep.mubr.f32.mxu1 %v2850_v5 }
 0x410   :  { %11060 = vmatmul.mubr.f32.gmra.mrb[106].mxu1 %v2851_v1  ;;  %v2853_v20 = vmax.f32 %v2723_v46, 0.0 }
 0x411   :  { %v2852_v8 = vmax.f32 %v2718_v39, 0.0  ;;  %v10939_v14 = vpop.f32.mrb[114].mxu0 }
 0x412   :  { %v2733_v62 = vadd.f32 %v10939_v14, %v13719_v53  ;;  %v2727_v3 = vpop.f32.mrb[115].mxu0 }
 0x413   :  { %v2728_v12 = vadd.f32 %v13719_v53, %v2727_v3  ;;  %11062 = vmatprep.mubr.f32.mxu1 %v2852_v8 }
 0x414   :  { %11063 = vmatmul.mubr.f32.gmra.mrb[108].mxu1 %v2853_v20  ;;  %v2855_v2 = vmax.f32 %v2733_v62, 0.0 }
 0x415   :  { %v2854_v36 = vmax.f32 %v2728_v12, 0.0  ;;  %v10942_v9 = vpop.f32.mrb[116].mxu0 }
 0x416   :  { %v2743_v35 = vadd.f32 %v10942_v9, %v13719_v53  ;;  %v2737_v11 = vpop.f32.mrb[117].mxu0 }
 0x417   :  { %v2738_v25 = vadd.f32 %v13719_v53, %v2737_v11  ;;  %11065 = vmatprep.mubr.f32.mxu1 %v2854_v36 }
 0x418   :  { %11066 = vmatmul.mubr.f32.gmra.mrb[110].mxu1 %v2855_v2  ;;  %v2857_v28 = vmax.f32 %v2743_v35, 0.0 }
 0x419   :  { %v2856_v6 = vmax.f32 %v2738_v25, 0.0  ;;  %v10945_v41 = vpop.f32.mrb[118].mxu0 }
 0x41a   :  { %v2753_v13 = vadd.f32 %v10945_v41, %v13719_v53  ;;  %v2747_v24 = vpop.f32.mrb[119].mxu0 }
 0x41b   :  { %v2748_v37 = vadd.f32 %v13719_v53, %v2747_v24  ;;  %11068 = vmatprep.mubr.f32.mxu1 %v2856_v6 }
 0x41c   :  { %11069 = vmatmul.mubr.f32.gmra.mrb[112].mxu1 %v2857_v28  ;;  %v2859_v48 = vmax.f32 %v2753_v13, 0.0 }
 0x41d   :  { %v2858_v38 = vmax.f32 %v2748_v37, 0.0  ;;  %v10948_v51 = vpop.f32.mrb[120].mxu0 }
 0x41e   :  { %v2763_v63 = vadd.f32 %v10948_v51, %v13719_v53  ;;  %v2757_v60 = vpop.f32.mrb[121].mxu0 }
 0x41f   :  { %v2758_v54 = vadd.f32 %v13719_v53, %v2757_v60  ;;  %11071 = vmatprep.mubr.f32.mxu1 %v2858_v38 }
 0x420   :  { %11072 = vmatmul.mubr.f32.gmra.mrb[114].mxu1 %v2859_v48  ;;  %v2861_v32 = vmax.f32 %v2763_v63, 0.0 }
 0x421   :  { %v2860_v52 = vmax.f32 %v2758_v54, 0.0  ;;  %v10951_v61 = vpop.f32.mrb[122].mxu0 }
 0x422   :  { %v2773_v29 = vadd.f32 %v10951_v61, %v13719_v53  ;;  %v2767_v22 = vpop.f32.mrb[123].mxu0 }
 0x423   :  { %v2768_v33 = vadd.f32 %v13719_v53, %v2767_v22  ;;  %11074 = vmatprep.mubr.f32.mxu1 %v2860_v52 }
 0x424   :  { %11075 = vmatmul.mubr.f32.gmra.mrb[116].mxu1 %v2861_v32  ;;  %v2863_v43 = vmax.f32 %v2773_v29, 0.0 }
 0x425   :  { %v2862_v21 = vmax.f32 %v2768_v33, 0.0  ;;  %v10954_v57 = vpop.f32.mrb[124].mxu0 }
 0x426   :  { %v2783_v44 = vadd.f32 %v10954_v57, %v13719_v53  ;;  %v2777_v4 = vpop.f32.mrb[125].mxu0 }
 0x427   :  { %v2778_v16 = vadd.f32 %v13719_v53, %v2777_v4  ;;  %11077 = vmatprep.mubr.f32.mxu1 %v2862_v21 }
 0x428   :  { %11078 = vmatmul.mubr.f32.gmra.mrb[118].mxu1 %v2863_v43  ;;  %v2865_v34 = vmax.f32 %v2783_v44, 0.0 }
 0x429   :  { %v2864_v55 = vmax.f32 %v2778_v16, 0.0  ;;  %v10957_v10 = vpop.f32.mrb[126].mxu0 }
 0x42a   :  { %v2793_v23 = vadd.f32 %v10957_v10, %v13719_v53  ;;  %v2787_v49 = vpop.f32.mrb[127].mxu0 }
 0x42b   :  { %v2788_v59 = vadd.f32 %v13719_v53, %v2787_v49  ;;  %11080 = vmatprep.mubr.f32.mxu1 %v2864_v55 }
 0x42c   :  { %11081 = vmatmul.mubr.f32.gmra.mrb[120].mxu1 %v2865_v34  ;;  %v2867_v58 = vmax.f32 %v2793_v23, 0.0 }
 0x42d   :  { %v2866_v18 = vmax.f32 %v2788_v59, 0.0  ;;  %v10960_v19 = vpop.f32.mrb[128].mxu0 }
 0x42e   :  { %v2803_v26 = vadd.f32 %v10960_v19, %v13719_v53  ;;  %v2797_v7 = vpop.f32.mrb[129].mxu0 }
 0x42f   :  { %v2798_v40 = vadd.f32 %v13719_v53, %v2797_v7  ;;  %11083 = vmatprep.mubr.f32.mxu1 %v2866_v18 }
 0x430   :  { %11084 = vmatmul.mubr.f32.gmra.mrb[122].mxu1 %v2867_v58  ;;  %v2869_v42 = vmax.f32 %v2803_v26, 0.0 }
 0x431   :  { %v2868_v15 = vmax.f32 %v2798_v40, 0.0 }
 0x433   :  { %11086 = vmatprep.mubr.f32.mxu1 %v2868_v15 }
 0x434   :  { %11087 = vmatmul.mubr.f32.gmra.mrb[124].mxu1 %v2869_v42 }
 0x487   :  { %v10995_v50 = vpop.f32.mrb[62].mxu1 }
 0x488   :  { %v13792_v31 = vadd.f32 %v10995_v50, %v13788_v30  ;;  %v2957_v47 = vpop.f32.mrb[63].mxu1 }
 0x489   :  { %v13795_v53 = vadd.f32 %v13788_v30, %v2957_v47 }
 0x48a   :  { %18886 = vst [vmem:[#allocation70_spill] sm:$0xff] %v13792_v31  ;;  %v13800_v27 = vsel %vm3276_vm14, %v13792_v31, -inf }
 0x48b   :  { %18887 = vst [vmem:[#allocation73_spill] sm:$0xff] %v13795_v53  ;;  %v13805_v0 = vsel %vm3276_vm14, %v13795_v53, -inf  ;;  %v3344_v5 = vsel %vm1131_vm15, %v13800_v27, -inf }
 0x48c   :  { %3345 = vmax.xlane.f32.xlu0 %v3344_v5  ;;  %v3341_v56 = vsel %vm1131_vm15, %v13805_v0, -inf }
 0x48d   :  { %3342 = vmax.xlane.f32.xlu1 %v3341_v56 }
 0x48f   :  { %v10998_v1 = vpop.f32.mrb[64].mxu1 }
 0x490   :  { %v13812_v46 = vadd.f32 %v10998_v1, %v13788_v30  ;;  %v2967_v45 = vpop.f32.mrb[65].mxu1 }
 0x491   :  { %v13815_v39 = vadd.f32 %v13788_v30, %v2967_v45 }
 0x492   :  { %18888 = vst [vmem:[#allocation71_spill] sm:$0xff] %v13812_v46  ;;  %v13820_v8 = vsel %vm3276_vm14, %v13812_v46, -inf }
 0x493   :  { %18889 = vst [vmem:[#allocation75_spill] sm:$0xff] %v13815_v39  ;;  %v13825_v14 = vsel %vm3276_vm14, %v13815_v39, -inf  ;;  %v11001_v20 = vpop.f32.mrb[66].mxu1  ;;  %v3350_v62 = vsel %vm1131_vm15, %v13820_v8, -inf }
 0x494   :  { %v13830_v3 = vadd.f32 %v11001_v20, %v13788_v30  ;;  %3351 = vmax.xlane.f32.xlu0 %v3350_v62  ;;  %v2977_v12 = vpop.f32.mrb[67].mxu1  ;;  %v3347_v36 = vsel %vm1131_vm15, %v13825_v14, -inf }
 0x495   :  { %v13835_v9 = vadd.f32 %v13788_v30, %v2977_v12  ;;  %3348 = vmax.xlane.f32.xlu1 %v3347_v36 }
 0x496   :  { %18890 = vst [vmem:[#allocation72_spill] sm:$0xff] %v13830_v3  ;;  %v13840_v2 = vsel %vm3276_vm14, %v13830_v3, -inf }
 0x497   :  { %18891 = vst [vmem:[#allocation77_spill] sm:$0xff] %v13835_v9  ;;  %v13845_v35 = vsel %vm3276_vm14, %v13835_v9, -inf  ;;  %v11004_v11 = vpop.f32.mrb[68].mxu1  ;;  %v3356_v25 = vsel %vm1131_vm15, %v13840_v2, -inf }
 0x498   :  { %v13850_v6 = vadd.f32 %v11004_v11, %v13788_v30  ;;  %3357 = vmax.xlane.f32.xlu0 %v3356_v25  ;;  %v2987_v41 = vpop.f32.mrb[69].mxu1  ;;  %v3353_v28 = vsel %vm1131_vm15, %v13845_v35, -inf }
 0x499   :  { %v13855_v13 = vadd.f32 %v13788_v30, %v2987_v41  ;;  %3354 = vmax.xlane.f32.xlu1 %v3353_v28 }
 0x49a   :  { %18892 = vst [vmem:[#allocation74_spill] sm:$0xff] %v13850_v6  ;;  %v13860_v24 = vsel %vm3276_vm14, %v13850_v6, -inf }
 0x49b   :  { %18893 = vst [vmem:[#allocation79_spill] sm:$0xff] %v13855_v13  ;;  %v13865_v37 = vsel %vm3276_vm14, %v13855_v13, -inf  ;;  %v11007_v38 = vpop.f32.mrb[70].mxu1  ;;  %v3362_v51 = vsel %vm1131_vm15, %v13860_v24, -inf }
 0x49c   :  { %v13870_v48 = vadd.f32 %v11007_v38, %v13788_v30  ;;  %3363 = vmax.xlane.f32.xlu0 %v3362_v51  ;;  %v2997_v63 = vpop.f32.mrb[71].mxu1  ;;  %v3359_v60 = vsel %vm1131_vm15, %v13865_v37, -inf }
 0x49d   :  { %v13875_v54 = vadd.f32 %v13788_v30, %v2997_v63  ;;  %3360 = vmax.xlane.f32.xlu1 %v3359_v60 }
 0x49e   :  { %18894 = vst [vmem:[#allocation76_spill] sm:$0xff] %v13870_v48  ;;  %v13880_v52 = vsel %vm3276_vm14, %v13870_v48, -inf }
 0x49f   :  { %18895 = vst [vmem:[#allocation81_spill] sm:$0xff] %v13875_v54  ;;  %v13885_v61 = vsel %vm3276_vm14, %v13875_v54, -inf  ;;  %v11010_v32 = vpop.f32.mrb[72].mxu1  ;;  %v3368_v29 = vsel %vm1131_vm15, %v13880_v52, -inf }
 0x4a0   :  { %v13890_v22 = vadd.f32 %v11010_v32, %v13788_v30  ;;  %3369 = vmax.xlane.f32.xlu0 %v3368_v29  ;;  %v3007_v33 = vpop.f32.mrb[73].mxu1  ;;  %v3365_v21 = vsel %vm1131_vm15, %v13885_v61, -inf }
 0x4a1   :  { %v13895_v57 = vadd.f32 %v13788_v30, %v3007_v33  ;;  %3366 = vmax.xlane.f32.xlu1 %v3365_v21 }
 0x4a2   :  { %18896 = vst [vmem:[#allocation78_spill] sm:$0xff] %v13890_v22  ;;  %v13900_v43 = vsel %vm3276_vm14, %v13890_v22, -inf }
 0x4a3   :  { %18897 = vst [vmem:[#allocation83_spill] sm:$0xff] %v13895_v57  ;;  %v13905_v44 = vsel %vm3276_vm14, %v13895_v57, -inf  ;;  %v11013_v4 = vpop.f32.mrb[74].mxu1  ;;  %v3374_v16 = vsel %vm1131_vm15, %v13900_v43, -inf }
 0x4a4   :  { %v13910_v55 = vadd.f32 %v11013_v4, %v13788_v30  ;;  %3375 = vmax.xlane.f32.xlu0 %v3374_v16  ;;  %v3017_v10 = vpop.f32.mrb[75].mxu1  ;;  %v3371_v34 = vsel %vm1131_vm15, %v13905_v44, -inf }
 0x4a5   :  { %v13915_v23 = vadd.f32 %v13788_v30, %v3017_v10  ;;  %3372 = vmax.xlane.f32.xlu1 %v3371_v34 }
 0x4a6   :  { %18898 = vst [vmem:[#allocation80_spill] sm:$0xff] %v13910_v55  ;;  %v13920_v49 = vsel %vm3276_vm14, %v13910_v55, -inf }
 0x4a7   :  { %18899 = vst [vmem:[#allocation82_spill] sm:$0xff] %v13915_v23  ;;  %v13925_v59 = vsel %vm3276_vm14, %v13915_v23, -inf  ;;  %v11016_v18 = vpop.f32.mrb[76].mxu1  ;;  %v3380_v19 = vsel %vm1131_vm15, %v13920_v49, -inf }
 0x4a8   :  { %v13930_v58 = vadd.f32 %v11016_v18, %v13788_v30  ;;  %3381 = vmax.xlane.f32.xlu0 %v3380_v19  ;;  %v3027_v26 = vpop.f32.mrb[77].mxu1  ;;  %v3377_v7 = vsel %vm1131_vm15, %v13925_v59, -inf }
 0x4a9   :  { %v13935_v40 = vadd.f32 %v13788_v30, %v3027_v26  ;;  %3378 = vmax.xlane.f32.xlu1 %v3377_v7 }
 0x4aa   :  { %18900 = vst [vmem:[#allocation85_spill] sm:$0xff] %v13930_v58  ;;  %v13940_v15 = vsel %vm3276_vm14, %v13930_v58, -inf }
 0x4ab   :  { %18901 = vst [vmem:[#allocation84_spill] sm:$0xff] %v13935_v40  ;;  %v13945_v42 = vsel %vm3276_vm14, %v13935_v40, -inf  ;;  %v11019_v50 = vpop.f32.mrb[78].mxu1  ;;  %v3386_v47 = vsel %vm1131_vm15, %v13940_v15, -inf }
 0x4ac   :  { %v13950_v5 = vadd.f32 %v11019_v50, %v13788_v30  ;;  %3387 = vmax.xlane.f32.xlu0 %v3386_v47  ;;  %v3037_v56 = vpop.f32.mrb[79].mxu1  ;;  %v3383_v1 = vsel %vm1131_vm15, %v13945_v42, -inf }
 0x4ad   :  { %v13955_v45 = vadd.f32 %v13788_v30, %v3037_v56  ;;  %3384 = vmax.xlane.f32.xlu1 %v3383_v1 }
 0x4ae   :  { %18902 = vst [vmem:[#allocation86_spill] sm:$0xff] %v13950_v5  ;;  %v13960_v20 = vsel %vm3276_vm14, %v13950_v5, -inf }
 0x4af   :  { %18903 = vst [vmem:[#allocation87_spill] sm:$0xff] %v13955_v45  ;;  %v13965_v62 = vsel %vm3276_vm14, %v13955_v45, -inf  ;;  %v11022_v12 = vpop.f32.mrb[80].mxu1  ;;  %v3392_v36 = vsel %vm1131_vm15, %v13960_v20, -inf }
 0x4b0   :  { %v13970_v11 = vadd.f32 %v11022_v12, %v13788_v30  ;;  %3393 = vmax.xlane.f32.xlu0 %v3392_v36  ;;  %v3047_v25 = vpop.f32.mrb[81].mxu1  ;;  %v3389_v41 = vsel %vm1131_vm15, %v13965_v62, -inf }
 0x4b1   :  { %v13975_v28 = vadd.f32 %v13788_v30, %v3047_v25  ;;  %3390 = vmax.xlane.f32.xlu1 %v3389_v41 }
 0x4b2   :  { %18904 = vst [vmem:[#allocation88_spill] sm:$0xff] %v13970_v11  ;;  %v13980_v38 = vsel %vm3276_vm14, %v13970_v11, -inf }
 0x4b3   :  { %18905 = vst [vmem:[#allocation89_spill] sm:$0xff] %v13975_v28  ;;  %v13985_v51 = vsel %vm3276_vm14, %v13975_v28, -inf  ;;  %v11025_v63 = vpop.f32.mrb[82].mxu1  ;;  %v3398_v60 = vsel %vm1131_vm15, %v13980_v38, -inf }
 0x4b4   :  { %v13990_v32 = vadd.f32 %v11025_v63, %v13788_v30  ;;  %3399 = vmax.xlane.f32.xlu0 %v3398_v60  ;;  %v3057_v29 = vpop.f32.mrb[83].mxu1  ;;  %v3395_v33 = vsel %vm1131_vm15, %v13985_v51, -inf }
 0x4b5   :  { %v13995_v21 = vadd.f32 %v13788_v30, %v3057_v29  ;;  %3396 = vmax.xlane.f32.xlu1 %v3395_v33 }
 0x4b6   :  { %18906 = vst [vmem:[#allocation90_spill] sm:$0xff] %v13990_v32  ;;  %v14000_v4 = vsel %vm3276_vm14, %v13990_v32, -inf }
 0x4b7   :  { %18907 = vst [vmem:[#allocation91_spill] sm:$0xff] %v13995_v21  ;;  %v14005_v16 = vsel %vm3276_vm14, %v13995_v21, -inf  ;;  %v11028_v10 = vpop.f32.mrb[84].mxu1  ;;  %v3404_v34 = vsel %vm1131_vm15, %v14000_v4, -inf }
 0x4b8   :  { %v14010_v18 = vadd.f32 %v11028_v10, %v13788_v30  ;;  %3405 = vmax.xlane.f32.xlu0 %v3404_v34  ;;  %v3067_v19 = vpop.f32.mrb[85].mxu1  ;;  %v3401_v26 = vsel %vm1131_vm15, %v14005_v16, -inf }
 0x4b9   :  { %v14015_v7 = vadd.f32 %v13788_v30, %v3067_v19  ;;  %3402 = vmax.xlane.f32.xlu1 %v3401_v26 }
 0x4ba   :  { %18908 = vst [vmem:[#allocation92_spill] sm:$0xff] %v14010_v18  ;;  %v14020_v50 = vsel %vm3276_vm14, %v14010_v18, -inf }
 0x4bb   :  { %18909 = vst [vmem:[#allocation93_spill] sm:$0xff] %v14015_v7  ;;  %v14025_v47 = vsel %vm3276_vm14, %v14015_v7, -inf  ;;  %v11031_v56 = vpop.f32.mrb[86].mxu1  ;;  %v3410_v1 = vsel %vm1131_vm15, %v14020_v50, -inf }
 0x4bc   :  { %v14030_v12 = vadd.f32 %v11031_v56, %v13788_v30  ;;  %3411 = vmax.xlane.f32.xlu0 %v3410_v1  ;;  %v3077_v36 = vpop.f32.mrb[87].mxu1  ;;  %v3407_v25 = vsel %vm1131_vm15, %v14025_v47, -inf }
 0x4bd   :  { %v14035_v41 = vadd.f32 %v13788_v30, %v3077_v36  ;;  %3408 = vmax.xlane.f32.xlu1 %v3407_v25 }
 0x4be   :  { %18910 = vst [vmem:[#allocation94_spill] sm:$0xff] %v14030_v12  ;;  %v14040_v63 = vsel %vm3276_vm14, %v14030_v12, -inf }
 0x4bf   :  { %18911 = vst [vmem:[#allocation95_spill] sm:$0xff] %v14035_v41  ;;  %v14045_v60 = vsel %vm3276_vm14, %v14035_v41, -inf  ;;  %v11034_v29 = vpop.f32.mrb[88].mxu1  ;;  %v3416_v33 = vsel %vm1131_vm15, %v14040_v63, -inf }
 0x4c0   :  { %v14050_v10 = vadd.f32 %v11034_v29, %v13788_v30  ;;  %3417 = vmax.xlane.f32.xlu0 %v3416_v33  ;;  %v3087_v34 = vpop.f32.mrb[89].mxu1  ;;  %v3413_v19 = vsel %vm1131_vm15, %v14045_v60, -inf }
 0x4c1   :  { %v14055_v26 = vadd.f32 %v13788_v30, %v3087_v34  ;;  %3414 = vmax.xlane.f32.xlu1 %v3413_v19 }
 0x4c2   :  { %18912 = vst [vmem:[#allocation96_spill] sm:$0xff] %v14050_v10  ;;  %v14060_v56 = vsel %vm3276_vm14, %v14050_v10, -inf }
 0x4c3   :  { %18913 = vst [vmem:[#allocation97_spill] sm:$0xff] %v14055_v26  ;;  %v14065_v1 = vsel %vm3276_vm14, %v14055_v26, -inf  ;;  %v11037_v36 = vpop.f32.mrb[90].mxu1  ;;  %v3422_v25 = vsel %vm1131_vm15, %v14060_v56, -inf }
 0x4c4   :  { %v14070_v29 = vadd.f32 %v11037_v36, %v13788_v30  ;;  %3423 = vmax.xlane.f32.xlu0 %v3422_v25  ;;  %v3097_v33 = vpop.f32.mrb[91].mxu1  ;;  %v3419_v34 = vsel %vm1131_vm15, %v14065_v1, -inf }
 0x4c5   :  { %v14075_v19 = vadd.f32 %v13788_v30, %v3097_v33  ;;  %3420 = vmax.xlane.f32.xlu1 %v3419_v34 }
 0x4c6   :  { %18914 = vst [vmem:[#allocation98_spill] sm:$0xff] %v14070_v29  ;;  %v14080_v26 = vsel %vm3276_vm14, %v14070_v29, -inf }
 0x4c7   :  { %18915 = vst [vmem:[#allocation99_spill] sm:$0xff] %v14075_v19  ;;  %v14085_v10 = vsel %vm3276_vm14, %v14075_v19, -inf  ;;  %v11040_v36 = vpop.f32.mrb[92].mxu1  ;;  %v3428_v25 = vsel %vm1131_vm15, %v14080_v26, -inf }
 0x4c8   :  { %v14090_v41 = vadd.f32 %v11040_v36, %v13788_v30  ;;  %3429 = vmax.xlane.f32.xlu0 %v3428_v25  ;;  %v3107_v33 = vpop.f32.mrb[93].mxu1  ;;  %v3425_v34 = vsel %vm1131_vm15, %v14085_v10, -inf }
 0x4c9   :  { %v14095_v29 = vadd.f32 %v13788_v30, %v3107_v33  ;;  %3426 = vmax.xlane.f32.xlu1 %v3425_v34 }
 0x4ca   :  { %18916 = vst [vmem:[#allocation100_spill] sm:$0xff] %v14090_v41  ;;  %v14100_v19 = vsel %vm3276_vm14, %v14090_v41, -inf }
 0x4cb   :  { %18917 = vst [vmem:[#allocation101_spill] sm:$0xff] %v14095_v29  ;;  %v14105_v12 = vsel %vm3276_vm14, %v14095_v29, -inf  ;;  %v11043_v36 = vpop.f32.mrb[94].mxu1  ;;  %v3434_v25 = vsel %vm1131_vm15, %v14100_v19, -inf }
 0x4cc   :  { %v14110_v7 = vadd.f32 %v11043_v36, %v13788_v30  ;;  %3435 = vmax.xlane.f32.xlu0 %v3434_v25  ;;  %v3117_v33 = vpop.f32.mrb[95].mxu1  ;;  %v3431_v34 = vsel %vm1131_vm15, %v14105_v12, -inf }
 0x4cd   :  { %v14115_v41 = vadd.f32 %v13788_v30, %v3117_v33  ;;  %3432 = vmax.xlane.f32.xlu1 %v3431_v34 }
 0x4ce   :  { %18918 = vst [vmem:[#allocation102_spill] sm:$0xff] %v14110_v7  ;;  %v14120_v29 = vsel %vm3276_vm14, %v14110_v7, -inf }
 0x4cf   :  { %18919 = vst [vmem:[#allocation103_spill] sm:$0xff] %v14115_v41  ;;  %v14125_v18 = vsel %vm3276_vm14, %v14115_v41, -inf  ;;  %v11046_v36 = vpop.f32.mrb[96].mxu1  ;;  %v3440_v25 = vsel %vm1131_vm15, %v14120_v29, -inf }
 0x4d0   :  { %v14130_v21 = vadd.f32 %v11046_v36, %v13788_v30  ;;  %3441 = vmax.xlane.f32.xlu0 %v3440_v25  ;;  %v3127_v33 = vpop.f32.mrb[97].mxu1  ;;  %v3437_v34 = vsel %vm1131_vm15, %v14125_v18, -inf }
 0x4d1   :  { %v14135_v7 = vadd.f32 %v13788_v30, %v3127_v33  ;;  %3438 = vmax.xlane.f32.xlu1 %v3437_v34 }
 0x4d2   :  { %18920 = vst [vmem:[#allocation104_spill] sm:$0xff] %v14130_v21  ;;  %v14140_v41 = vsel %vm3276_vm14, %v14130_v21, -inf }
 0x4d3   :  { %18921 = vst [vmem:[#allocation105_spill] sm:$0xff] %v14135_v7  ;;  %v14145_v32 = vsel %vm3276_vm14, %v14135_v7, -inf  ;;  %v11049_v36 = vpop.f32.mrb[98].mxu1  ;;  %v3446_v25 = vsel %vm1131_vm15, %v14140_v41, -inf }
 0x4d4   :  { %v14150_v28 = vadd.f32 %v11049_v36, %v13788_v30  ;;  %3447 = vmax.xlane.f32.xlu0 %v3446_v25  ;;  %v3137_v33 = vpop.f32.mrb[99].mxu1  ;;  %v3443_v34 = vsel %vm1131_vm15, %v14145_v32, -inf }
 0x4d5   :  { %v14155_v21 = vadd.f32 %v13788_v30, %v3137_v33  ;;  %3444 = vmax.xlane.f32.xlu1 %v3443_v34 }
 0x4d6   :  { %18922 = vst [vmem:[#allocation106_spill] sm:$0xff] %v14150_v28  ;;  %v14160_v7 = vsel %vm3276_vm14, %v14150_v28, -inf }
 0x4d7   :  { %18923 = vst [vmem:[#allocation107_spill] sm:$0xff] %v14155_v21  ;;  %v14165_v11 = vsel %vm3276_vm14, %v14155_v21, -inf  ;;  %v11052_v36 = vpop.f32.mrb[100].mxu1  ;;  %v3452_v25 = vsel %vm1131_vm15, %v14160_v7, -inf }
 0x4d8   :  { %v14170_v45 = vadd.f32 %v11052_v36, %v13788_v30  ;;  %3453 = vmax.xlane.f32.xlu0 %v3452_v25  ;;  %v3147_v33 = vpop.f32.mrb[101].mxu1  ;;  %v3449_v34 = vsel %vm1131_vm15, %v14165_v11, -inf }
 0x4d9   :  { %v14175_v28 = vadd.f32 %v13788_v30, %v3147_v33  ;;  %3450 = vmax.xlane.f32.xlu1 %v3449_v34 }
 0x4da   :  { %18924 = vst [vmem:[#allocation108_spill] sm:$0xff] %v14170_v45  ;;  %v14180_v21 = vsel %vm3276_vm14, %v14170_v45, -inf }
 0x4db   :  { %18925 = vst [vmem:[#allocation109_spill] sm:$0xff] %v14175_v28  ;;  %v14185_v5 = vsel %vm3276_vm14, %v14175_v28, -inf  ;;  %v11055_v36 = vpop.f32.mrb[102].mxu1  ;;  %v3458_v25 = vsel %vm1131_vm15, %v14180_v21, -inf }
 0x4dc   :  { %18926 = vst [vmem:[#allocation110_spill] sm:$0xff] %v14185_v5  ;;  %v14190_v40 = vadd.f32 %v11055_v36, %v13788_v30  ;;  %3459 = vmax.xlane.f32.xlu0 %v3458_v25  ;;  %v3157_v33 = vpop.f32.mrb[103].mxu1  ;;  %v3455_v34 = vsel %vm1131_vm15, %v14185_v5, -inf }
 0x4dd   :  { %v14195_v45 = vadd.f32 %v13788_v30, %v3157_v33  ;;  %3456 = vmax.xlane.f32.xlu1 %v3455_v34 }
 0x4de   :  { %18927 = vst [vmem:[#allocation111_spill] sm:$0xff] %v14190_v40  ;;  %v14200_v28 = vsel %vm3276_vm14, %v14190_v40, -inf }
 0x4df   :  { %18928 = vst [vmem:[#allocation112_spill] sm:$0xff] %v14195_v45  ;;  %v11058_v58 = vpop.f32.mrb[104].mxu1  ;;  %v3464_v23 = vsel %vm1131_vm15, %v14200_v28, -inf  ;;  %v14207_v36 = vsel %vm3276_vm14, %v14195_v45, -inf }
 0x4e0   :  { %18929 = vst [vmem:[#allocation113_spill] sm:$0xff] %v14207_v36  ;;  %v14210_v25 = vadd.f32 %v11058_v58, %v13788_v30  ;;  %3465 = vmax.xlane.f32.xlu0 %v3464_v23  ;;  %v3167_v33 = vpop.f32.mrb[105].mxu1  ;;  %v3461_v55 = vsel %vm1131_vm15, %v14207_v36, -inf }
 0x4e1   :  { %v14220_v57 = vadd.f32 %v13788_v30, %v3167_v33 }
 0x4e2   :  { %18930 = vst [vmem:[#allocation114_spill] sm:$0xff] %v14210_v25  ;;  %v14217_v40 = vsel %vm3276_vm14, %v14210_v25, -inf }
 0x4e3   :  { %v11061_v34 = vpop.f32.mrb[106].mxu1  ;;  %18931 = vst [vmem:[#allocation115_spill] sm:$0xff] %v14220_v57  ;;  %v3470_v58 = vsel %vm1131_vm15, %v14217_v40, -inf  ;;  %v14227_v23 = vsel %vm3276_vm14, %v14220_v57, -inf }
 0x4e4   :  { %v3177_v22 = vpop.f32.mrb[107].mxu1  ;;  %3462 = vmax.xlane.f32.xlu0 %v3461_v55  ;;  %18932 = vst [vmem:[#allocation116_spill] sm:$0xff] %v14227_v23  ;;  %v14230_v54 = vadd.f32 %v11061_v34, %v13788_v30  ;;  %v3467_v33 = vsel %vm1131_vm15, %v14227_v23, -inf }
 0x4e5   :  { %v14240_v13 = vadd.f32 %v13788_v30, %v3177_v22 }
 0x4e6   :  { %18933 = vst [vmem:[#allocation117_spill] sm:$0xff] %v14230_v54  ;;  %v14237_v55 = vsel %vm3276_vm14, %v14230_v54, -inf }
 0x4e7   :  { %v11064_v45 = vpop.f32.mrb[108].mxu1  ;;  %18934 = vst [vmem:[#allocation118_spill] sm:$0xff] %v14240_v13  ;;  %v3476_v34 = vsel %vm1131_vm15, %v14237_v55, -inf }
 0x4e8   :  { %v3187_v48 = vpop.f32.mrb[109].mxu1  ;;  %3471 = vmax.xlane.f32.xlu0 %v3470_v58  ;;  %v14247_v58 = vsel %vm3276_vm14, %v14240_v13, -inf  ;;  %v14250_v9 = vadd.f32 %v11064_v45, %v13788_v30 }
 0x4e9   :  { %18935 = vst [vmem:[#allocation119_spill] sm:$0xff] %v14247_v58  ;;  %v3473_v22 = vsel %vm1131_vm15, %v14247_v58, -inf  ;;  %v14260_v39 = vadd.f32 %v13788_v30, %v3187_v48 }
 0x4ea   :  { %18936 = vst [vmem:[#allocation120_spill] sm:$0xff] %v14250_v9 }
 0x4eb   :  { %v11067_v25 = vpop.f32.mrb[110].mxu1  ;;  %18937 = vst [vmem:[#allocation121_spill] sm:$0xff] %v14260_v39 }
 0x4ec   :  { %v3197_v6 = vpop.f32.mrb[111].mxu1  ;;  %3468 = vmax.xlane.f32.xlu0 %v3467_v33  ;;  %v14257_v33 = vsel %vm3276_vm14, %v14250_v9, -inf  ;;  %v14270_v53 = vadd.f32 %v11067_v25, %v13788_v30 }
 0x4ed   :  { %v3482_v45 = vsel %vm1131_vm15, %v14257_v33, -inf  ;;  %v14280_v58 = vadd.f32 %v13788_v30, %v3197_v6 }
 0x4ee   :  { %18939 = vst [vmem:[#allocation123_spill] sm:$0xff] %v14270_v53 }
 0x4ef   :  { %v11070_v57 = vpop.f32.mrb[112].mxu1  ;;  %18941 = vst [vmem:[#allocation125_spill] sm:$0xff] %v14280_v58 }
 0x4f0   :  { %v3207_v3 = vpop.f32.mrb[113].mxu1  ;;  %3477 = vmax.xlane.f32.xlu0 %v3476_v34  ;;  %v14267_v34 = vsel %vm3276_vm14, %v14260_v39, -inf }
 0x4f1   :  { %18938 = vst [vmem:[#allocation122_spill] sm:$0xff] %v14267_v34  ;;  %v3479_v48 = vsel %vm1131_vm15, %v14267_v34, -inf  ;;  %v14290_v34 = vadd.f32 %v11070_v57, %v13788_v30 }
 0x4f3   :  { %v11073_v54 = vpop.f32.mrb[114].mxu1  ;;  %18943 = vst [vmem:[#allocation127_spill] sm:$0xff] %v14290_v34 }
 0x4f4   :  { %v3217_v46 = vpop.f32.mrb[115].mxu1  ;;  %3474 = vmax.xlane.f32.xlu0 %v3473_v22  ;;  %v14277_v22 = vsel %vm3276_vm14, %v14270_v53, -inf  ;;  %v14316_v5 = vadd.f32 %v11073_v54, %v13788_v30 }
 0x4f5   :  { %18940 = vst [vmem:[#allocation124_spill] sm:$0xff] %v14277_v22  ;;  %v3488_v25 = vsel %vm1131_vm15, %v14277_v22, -inf  ;;  %v14302_v22 = vadd.f32 %v13788_v30, %v3207_v3 }
 0x4f6   :  { %18946 = vst [vmem:[#allocation130_spill] sm:$0xff] %v14316_v5 }
 0x4f7   :  { %v11076_v13 = vpop.f32.mrb[116].mxu1  ;;  %18945 = vst [vmem:[#allocation129_spill] sm:$0xff] %v14302_v22 }
 0x4f8   :  { %v3227_v31 = vpop.f32.mrb[117].mxu1  ;;  %3483 = vmax.xlane.f32.xlu0 %v3482_v45  ;;  %v14287_v45 = vsel %vm3276_vm14, %v14280_v58, -inf }
 0x4f9   :  { %18942 = vst [vmem:[#allocation126_spill] sm:$0xff] %v14287_v45  ;;  %v3485_v6 = vsel %vm1131_vm15, %v14287_v45, -inf  ;;  %v14313_v45 = vsel %vm3276_vm14, %v14302_v22, -inf }
 0x4fa   :  { %v3491_v3 = vsel %vm1131_vm15, %v14313_v45, -inf }
 0x4fb   :  { %v11079_v9 = vpop.f32.mrb[118].mxu1 }
 0x4fc   :  { %v3237_v23 = vpop.f32.mrb[119].mxu1  ;;  %3480 = vmax.xlane.f32.xlu0 %v3479_v48  ;;  %v14299_v48 = vsel %vm3276_vm14, %v14290_v34, -inf }
 0x4fd   :  { %18944 = vst [vmem:[#allocation128_spill] sm:$0xff] %v14299_v48 }
 0x4ff   :  { %v11082_v39 = vpop.f32.mrb[120].mxu1 }
 0x500   :  { %v3247_v36 = vpop.f32.mrb[121].mxu1  ;;  %3489 = vmax.xlane.f32.xlu0 %v3488_v25  ;;  %v3494_v25 = vsel %vm1131_vm15, %v14299_v48, -inf  ;;  %v14328_v48 = vadd.f32 %v13788_v30, %v3217_v46 }
 0x502   :  { %18947 = vst [vmem:[#allocation131_spill] sm:$0xff] %v14328_v48  ;;  %v14335_v54 = vsel %vm3276_vm14, %v14328_v48, -inf }
 0x503   :  { %v14292_v53 = vpop.f32.mrb[122].mxu1  ;;  %18948 = vst [vmem:[#allocation132_spill] sm:$0xff] %v14335_v54 }
 0x504   :  { %v14304_v58 = vpop.f32.mrb[123].mxu1  ;;  %3486 = vmax.xlane.f32.xlu0 %v3485_v6  ;;  %v14325_v6 = vsel %vm3276_vm14, %v14316_v5, -inf  ;;  %v3497_v5 = vsel %vm1131_vm15, %v14335_v54, -inf }
 0x505   :  { %v3500_v22 = vsel %vm1131_vm15, %v14325_v6, -inf }
 0x507   :  { %v14306_v57 = vpop.f32.mrb[124].mxu1 }
 0x508   :  { %3495 = vmax.xlane.f32.xlu0 %v3494_v25  ;;  %v14318_v34 = vpop.f32.mrb[125].mxu1  ;;  %v14338_v25 = vadd.f32 %v11076_v13, %v13788_v30 }
 0x50a   :  { %18949 = vst [vmem:[#allocation133_spill] sm:$0xff] %v14338_v25  ;;  %v14345_v46 = vsel %vm3276_vm14, %v14338_v25, -inf  ;;  %v14361_v25 = vadd.f32 %v13788_v30, %v3237_v23 }
 0x50b   :  { %18950 = vst [vmem:[#allocation134_spill] sm:$0xff] %v14345_v46  ;;  %v3506_v48 = vsel %vm1131_vm15, %v14345_v46, -inf }
 0x50c   :  { %3492 = vmax.xlane.f32.xlu0 %v3491_v3  ;;  %v14348_v3 = vadd.f32 %v13788_v30, %v3227_v31  ;;  %18953 = vst [vmem:[#allocation137_spill] sm:$0xff] %v14361_v25 }
 0x50e   :  { %18951 = vst [vmem:[#allocation135_spill] sm:$0xff] %v14348_v3  ;;  %v14355_v13 = vsel %vm3276_vm14, %v14348_v3, -inf }
 0x50f   :  { %v3503_v46 = vsel %vm1131_vm15, %v14355_v13, -inf }
 0x510   :  { %3501 = vmax.xlane.f32.xlu0 %v3500_v22  ;;  %v14358_v22 = vadd.f32 %v11079_v9, %v13788_v30 }
 0x512   :  { %18952 = vst [vmem:[#allocation136_spill] sm:$0xff] %v14358_v22  ;;  %v14371_v9 = vsel %vm3276_vm14, %v14358_v22, -inf }
 0x514   :  { %3498 = vmax.xlane.f32.xlu0 %v3497_v5 }
 0x518   :  { %3507 = vmax.xlane.f32.xlu0 %v3506_v48 }
 0x519   :  { %v3346_v54 = vpop.xlane.xlu0 %3345 }
 0x51a   :  { %vm3534_vm13 = vcmp.eq.f32.partialorder %v13800_v27, %v3346_v54  ;;  %v3343_v31 = vpop.xlane.xlu1 %3342 }
 0x51b   :  { %v3598_v5 = vsel %vm3534_vm13, %v18885_v17, 64  ;;  %vm3533_vm12 = vcmp.eq.f32.partialorder %v13805_v0, %v3343_v31  ;;  %v14384_v0 = vsel %vm3276_vm14, %v14361_v25, -inf  ;;  %v14387_v31 = vadd.f32 %v11082_v39, %v13788_v30 }
 0x51c   :  { %v14374_v48 = vsel %vm1131_vm15, %v3598_v5, 2147483647  ;;  %v3597_v23 = vsel %vm3533_vm12, %v18885_v17, 64  ;;  %3504 = vmax.xlane.f32.xlu0 %v3503_v46  ;;  %v3512_v5 = vsel %vm1131_vm15, %v14371_v9, -inf  ;;  %v3509_v25 = vsel %vm1131_vm15, %v14384_v0, -inf }
 0x51d   :  { %18954 = vst [vmem:[#allocation138_spill] sm:$0xff] %v14374_v48  ;;  %v14378_v27 = vsel %vm1131_vm15, %v3597_v23, 2147483647  ;;  %v3678_v54 = vshra.s32 %v14374_v48, 16  ;;  %18956 = vst [vmem:[#allocation140_spill] sm:$0xff] %v14387_v31  ;;  %v14401_v39 = vsel %vm3276_vm14, %v14387_v31, -inf }
 0x51e   :  { %18955 = vst [vmem:[#allocation139_spill] sm:$0xff] %v14378_v27  ;;  %v3663_v46 = vshra.s32 %v14378_v27, 16 }
 0x51f   :  { %v14391_v22 = vcvt.s32.f32 %v3678_v54 }
 0x520   :  { %3513 = vmax.xlane.f32.xlu0 %v3512_v5  ;;  %v14405_v27 = vcvt.s32.f32 %v3663_v46  ;;  %v14408_v5 = vadd.f32 %v13788_v30, %v3247_v36  ;;  %v3518_v36 = vsel %vm1131_vm15, %v14401_v39, -inf }
 0x521   :  { %18957 = vst [vmem:[#allocation141_spill] sm:$0xff] %v14391_v22  ;;  %v3352_v23 = vpop.xlane.xlu0 %3351  ;;  %3681 = vmin.xlane.f32.xlu1 %v14391_v22 }
 0x522   :  { %vm3536_vm12 = vcmp.eq.f32.partialorder %v13820_v8, %v3352_v23  ;;  %v3349_v3 = vpop.xlane.xlu1 %3348  ;;  %18958 = vst [vmem:[#allocation142_spill] sm:$0xff] %v14408_v5 }
 0x523   :  { %v3600_v54 = vsel %vm3536_vm12, %v18885_v17, 64  ;;  %vm3535_vm13 = vcmp.eq.f32.partialorder %v13825_v14, %v3349_v3 }
 0x524   :  { %v14411_v8 = vsel %vm1131_vm15, %v3600_v54, 2147483647  ;;  %v3599_v23 = vsel %vm3535_vm13, %v18885_v17, 64  ;;  %3510 = vmax.xlane.f32.xlu0 %v3509_v25  ;;  %v14430_v54 = vsel %vm3276_vm14, %v14408_v5, -inf }
 0x525   :  { %v14415_v22 = vsel %vm1131_vm15, %v3599_v23, 2147483647  ;;  %v3358_v31 = vpop.xlane.xlu0 %3357  ;;  %3666 = vmin.xlane.f32.xlu1 %v14405_v27  ;;  %v3708_v48 = vshra.s32 %v14411_v8, 16 }
 0x526   :  { %18959 = vst [vmem:[#allocation143_spill] sm:$0xff] %v14415_v22  ;;  %vm3538_vm12 = vcmp.eq.f32.partialorder %v13840_v2, %v3358_v31  ;;  %v3355_v14 = vpop.xlane.xlu1 %3354  ;;  %v3693_v25 = vshra.s32 %v14415_v22, 16  ;;  %v14434_v2 = vadd.f32 %v14292_v53, %v13788_v30 }
 0x527   :  { %v3602_v3 = vsel %vm3538_vm12, %v18885_v17, 64  ;;  %vm3537_vm9 = vcmp.eq.f32.partialorder %v13845_v35, %v3355_v14  ;;  %v14424_v46 = vcvt.s32.f32 %v3708_v48  ;;  %v3515_v14 = vsel %vm1131_vm15, %v14430_v54, -inf }
 0x528   :  { %18960 = vst [vmem:[#allocation144_spill] sm:$0xff] %v14434_v2  ;;  %v14437_v31 = vsel %vm1131_vm15, %v3602_v3, 2147483647  ;;  %3519 = vmax.xlane.f32.xlu0 %v3518_v36  ;;  %v3601_v23 = vsel %vm3537_vm9, %v18885_v17, 64  ;;  %v14444_v5 = vcvt.s32.f32 %v3693_v25  ;;  %v14450_v3 = vsel %vm3276_vm14, %v14434_v2, -inf }
 0x529   :  { %18961 = vst [vmem:[#allocation145_spill] sm:$0xff] %v14437_v31  ;;  %v3364_v35 = vpop.xlane.xlu0 %3363  ;;  %3711 = vmin.xlane.f32.xlu1 %v14424_v46  ;;  %v3738_v53 = vshra.s32 %v14437_v31, 16  ;;  %v14454_v36 = vadd.f32 %v13788_v30, %v14304_v58  ;;  %v14457_v22 = vsel %vm1131_vm15, %v3601_v23, 2147483647  ;;  %v3524_v25 = vsel %vm1131_vm15, %v14450_v3, -inf }
 0x52a   :  { %vm3540_vm13 = vcmp.eq.f32.partialorder %v13860_v24, %v3364_v35  ;;  %v3361_v48 = vpop.xlane.xlu1 %3360  ;;  %18963 = vst [vmem:[#allocation147_spill] sm:$0xff] %v14457_v22  ;;  %v3723_v31 = vshra.s32 %v14457_v22, 16  ;;  %v14474_v23 = vadd.f32 %v14306_v57, %v13788_v30 }
 0x52b   :  { %18962 = vst [vmem:[#allocation146_spill] sm:$0xff] %v14454_v36  ;;  %v3604_v24 = vsel %vm3540_vm13, %v18885_v17, 64  ;;  %vm3539_vm9 = vcmp.eq.f32.partialorder %v13865_v37, %v3361_v48  ;;  %v14464_v2 = vcvt.s32.f32 %v3738_v53  ;;  %v14470_v58 = vsel %vm3276_vm14, %v14454_v36, -inf }
 0x52c   :  { %3516 = vmax.xlane.f32.xlu0 %v3515_v14  ;;  %18965 = vst [vmem:[#allocation149_spill] sm:$0xff] %v14474_v23  ;;  %v14477_v14 = vsel %vm1131_vm15, %v3604_v24, 2147483647  ;;  %v3603_v37 = vsel %vm3539_vm9, %v18885_v17, 64  ;;  %v3521_v36 = vsel %vm1131_vm15, %v14470_v58, -inf  ;;  %v14484_v22 = vcvt.s32.f32 %v3723_v31 }
 0x52d   :  { %v3370_v35 = vpop.xlane.xlu0 %3369  ;;  %3696 = vmin.xlane.f32.xlu1 %v14444_v5  ;;  %18964 = vst [vmem:[#allocation148_spill] sm:$0xff] %v14464_v2  ;;  %18966 = vst [vmem:[#allocation150_spill] sm:$0xff] %v14477_v14  ;;  %v3768_v57 = vshra.s32 %v14477_v14, 16  ;;  %v14490_v24 = vsel %vm3276_vm14, %v14474_v23, -inf }
 0x52e   :  { %v3367_v48 = vpop.xlane.xlu1 %3366  ;;  %vm3542_vm12 = vcmp.eq.f32.partialorder %v13880_v52, %v3370_v35  ;;  %18967 = vst [vmem:[#allocation151_spill] sm:$0xff] %v14484_v22  ;;  %v3530_v23 = vsel %vm1131_vm15, %v14490_v24, -inf }
 0x52f   :  { %v3606_v52 = vsel %vm3542_vm12, %v18885_v17, 64  ;;  %vm3541_vm13 = vcmp.eq.f32.partialorder %v13885_v61, %v3367_v48  ;;  %v14504_v14 = vcvt.s32.f32 %v3768_v57 }
 0x530   :  { %3525 = vmax.xlane.f32.xlu0 %v3524_v25  ;;  %v14494_v25 = vadd.f32 %v13788_v30, %v14318_v34 }
 0x531   :  { %v3376_v53 = vpop.xlane.xlu0 %3375  ;;  %3741 = vmin.xlane.f32.xlu1 %v14464_v2  ;;  %v14497_v2 = vsel %vm1131_vm15, %v3603_v37, 2147483647  ;;  %18970 = vst [vmem:[#allocation154_spill] sm:$0xff] %v14504_v14  ;;  %v3605_v37 = vsel %vm3541_vm13, %v18885_v17, 64 }
 0x532   :  { %18968 = vst [vmem:[#allocation152_spill] sm:$0xff] %v14494_v25  ;;  %18969 = vst [vmem:[#allocation153_spill] sm:$0xff] %v14497_v2  ;;  %v3373_v31 = vpop.xlane.xlu1 %3372  ;;  %v3753_v30 = vshra.s32 %v14497_v2, 16  ;;  %v14510_v34 = vsel %vm3276_vm14, %v14494_v25, -inf  ;;  %vm3544_vm9 = vcmp.eq.f32.partialorder %v13900_v43, %v3376_v53  ;;  %v14524_v25 = vsel %vm1131_vm15, %v3605_v37, 2147483647 }
 0x533   :  { %v3527_v48 = vsel %vm1131_vm15, %v14510_v34, -inf  ;;  %18972 = vst [vmem:[#allocation156_spill] sm:$0xff] %v14524_v25  ;;  %vm3543_vm14 = vcmp.eq.f32.partialorder %v13905_v44, %v3373_v31  ;;  %v3783_v53 = vshra.s32 %v14524_v25, 16 }
 0x534   :  { %3522 = vmax.xlane.f32.xlu0 %v3521_v36  ;;  %v14513_v36 = vsel %vm1131_vm15, %v3606_v52, 2147483647  ;;  %v14520_v57 = vcvt.s32.f32 %v3753_v30 }
 0x535   :  { %v3382_v35 = vpop.xlane.xlu0 %3381  ;;  %3726 = vmin.xlane.f32.xlu1 %v14484_v22  ;;  %18971 = vst [vmem:[#allocation155_spill] sm:$0xff] %v14513_v36  ;;  %v3798_v2 = vshra.s32 %v14513_v36, 16  ;;  %v3607_v36 = vsel %vm3543_vm14, %v18885_v17, 64 }
 0x536   :  { %v3379_v52 = vpop.xlane.xlu1 %3378  ;;  %vm3546_vm12 = vcmp.eq.f32.partialorder %v13920_v49, %v3382_v35 }
 0x537   :  { %v14529_v43 = vcvt.s32.f32 %v3798_v2  ;;  %v14544_v2 = vsel %vm1131_vm15, %v3607_v36, 2147483647  ;;  %v3610_v31 = vsel %vm3546_vm12, %v18885_v17, 64  ;;  %vm3545_vm13 = vcmp.eq.f32.partialorder %v13925_v59, %v3379_v52 }
 0x538   :  { %3531 = vmax.xlane.f32.xlu0 %v3530_v23  ;;  %v3608_v23 = vsel %vm3544_vm9, %v18885_v17, 64  ;;  %18975 = vst [vmem:[#allocation159_spill] sm:$0xff] %v14544_v2  ;;  %v3813_v49 = vshra.s32 %v14544_v2, 16  ;;  %v14555_v35 = vsel %vm1131_vm15, %v3610_v31, 2147483647 }
 0x539   :  { %v3388_v61 = vpop.xlane.xlu0 %3387  ;;  %3771 = vmin.xlane.f32.xlu1 %v14504_v14  ;;  %18973 = vst [vmem:[#allocation157_spill] sm:$0xff] %v14529_v43  ;;  %v14533_v30 = vsel %vm1131_vm15, %v3608_v23, 2147483647  ;;  %v14540_v14 = vcvt.s32.f32 %v3783_v53  ;;  %18977 = vst [vmem:[#allocation161_spill] sm:$0xff] %v14555_v35  ;;  %v3609_v53 = vsel %vm3545_vm13, %v18885_v17, 64  ;;  %v3858_v59 = vshra.s32 %v14555_v35, 16 }
 0x53a   :  { %18974 = vst [vmem:[#allocation158_spill] sm:$0xff] %v14533_v30  ;;  %v3828_v44 = vshra.s32 %v14533_v30, 16  ;;  %vm3548_vm9 = vcmp.eq.f32.partialorder %v13940_v15, %v3388_v61  ;;  %v14566_v52 = vsel %vm1131_vm15, %v3609_v53, 2147483647 }
 0x53b   :  { %18979 = vst [vmem:[#allocation163_spill] sm:$0xff] %v14566_v52  ;;  %v14573_v15 = vcvt.s32.f32 %v3858_v59  ;;  %v3843_v61 = vshra.s32 %v14566_v52, 16 }
 0x53c   :  { %3528 = vmax.xlane.f32.xlu0 %v3527_v48  ;;  %v3385_v48 = vpop.xlane.xlu1 %3384  ;;  %v14551_v25 = vcvt.s32.f32 %v3828_v44  ;;  %v3612_v44 = vsel %vm3548_vm9, %v18885_v17, 64 }
 0x53d   :  { %v3394_v22 = vpop.xlane.xlu0 %3393  ;;  %3756 = vmin.xlane.f32.xlu1 %v14520_v57  ;;  %vm3547_vm14 = vcmp.eq.f32.partialorder %v13945_v42, %v3385_v48  ;;  %v14590_v59 = vcvt.s32.f32 %v3843_v61 }
 0x53e   :  { %18976 = vst [vmem:[#allocation160_spill] sm:$0xff] %v14551_v25  ;;  %v3611_v35 = vsel %vm3547_vm14, %v18885_v17, 64  ;;  %vm3550_vm13 = vcmp.eq.f32.partialorder %v13960_v20, %v3394_v22 }
 0x540   :  { %v3391_v30 = vpop.xlane.xlu1 %3390 }
 0x541   :  { %v14536_v37 = vpop.xlane.xlu0 %3399  ;;  %3801 = vmin.xlane.f32.xlu1 %v14529_v43  ;;  %v14562_v43 = vcvt.s32.f32 %v3813_v49  ;;  %v14577_v49 = vsel %vm1131_vm15, %v3612_v44, 2147483647  ;;  %v14594_v44 = vsel %vm1131_vm15, %v3611_v35, 2147483647  ;;  %vm3549_vm14 = vcmp.eq.f32.partialorder %v13965_v62, %v3391_v30 }
 0x542   :  { %v3873_v61 = vshra.s32 %v14594_v44, 16 }
 0x543   :  { %18978 = vst [vmem:[#allocation162_spill] sm:$0xff] %v14562_v43 }
 0x544   :  { %v3397_v2 = vpop.xlane.xlu1 %3396 }
 0x545   :  { %v14547_v23 = vpop.xlane.xlu0 %3405  ;;  %3786 = vmin.xlane.f32.xlu1 %v14540_v14 }
 0x548   :  { %v14600_v52 = vpop.xlane.xlu1 %3402 }
 0x549   :  { %v14558_v36 = vpop.xlane.xlu0 %3411  ;;  %3831 = vmin.xlane.f32.xlu1 %v14551_v25 }
 0x54d   :  { %v3418_v31 = vpop.xlane.xlu0 %3417  ;;  %3816 = vmin.xlane.f32.xlu1 %v14562_v43 }
 0x54e   :  { %vm3558_vm12 = vcmp.eq.f32.partialorder %v14040_v63, %v3418_v31 }
 0x54f   :  { %v3622_v25 = vsel %vm3558_vm12, %v18885_v17, 64 }
 0x550   :  { %v14580_v53 = vsel %vm1131_vm15, %v3622_v25, 2147483647  ;;  %v3888_v25 = vshra.s32 %v14577_v49, 16 }
 0x551   :  { %18980 = vst [vmem:[#allocation164_spill] sm:$0xff] %v14580_v53  ;;  %v3424_v43 = vpop.xlane.xlu0 %3423  ;;  %3861 = vmin.xlane.f32.xlu1 %v14573_v15  ;;  %v4038_v42 = vshra.s32 %v14580_v53, 16  ;;  %v3614_v53 = vsel %vm3550_vm13, %v18885_v17, 64  ;;  %vm3552_vm13 = vcmp.eq.f32.partialorder %v13980_v38, %v14536_v37 }
 0x552   :  { %vm3560_vm9 = vcmp.eq.f32.partialorder %v14060_v56, %v3424_v43  ;;  %v14610_v35 = vcvt.s32.f32 %v3888_v25  ;;  %v14631_v25 = vcvt.s32.f32 %v3873_v61  ;;  %v3616_v38 = vsel %vm3552_vm13, %v18885_v17, 64 }
 0x553   :  { %v3624_v63 = vsel %vm3560_vm9, %v18885_v17, 64  ;;  %v14588_v48 = vcvt.s32.f32 %v4038_v42  ;;  %v14614_v42 = vsel %vm1131_vm15, %v3614_v53, 2147483647  ;;  %vm3554_vm13 = vcmp.eq.f32.partialorder %v14000_v4, %v14547_v23 }
 0x554   :  { %v14597_v31 = vsel %vm1131_vm15, %v3624_v63, 2147483647 }
 0x555   :  { %18981 = vst [vmem:[#allocation165_spill] sm:$0xff] %v14588_v48  ;;  %18982 = vst [vmem:[#allocation166_spill] sm:$0xff] %v14597_v31  ;;  %v3430_v20 = vpop.xlane.xlu0 %3429  ;;  %4041 = vmin.xlane.f32.xlu0 %v14588_v48  ;;  %3846 = vmin.xlane.f32.xlu1 %v14590_v59  ;;  %v4068_v56 = vshra.s32 %v14597_v31, 16  ;;  %v3613_v31 = vsel %vm3549_vm14, %v18885_v17, 64  ;;  %vm3551_vm14 = vcmp.eq.f32.partialorder %v13985_v51, %v3397_v2 }
 0x556   :  { %vm3562_vm12 = vcmp.eq.f32.partialorder %v14080_v26, %v3430_v20  ;;  %v14626_v26 = vpop.xlane.xlu1 %3408  ;;  %v3918_v20 = vshra.s32 %v14614_v42, 16 }
 0x557   :  { %v3626_v22 = vsel %vm3562_vm12, %v18885_v17, 64  ;;  %v14608_v43 = vcvt.s32.f32 %v4068_v56  ;;  %v14635_v56 = vsel %vm1131_vm15, %v3613_v31, 2147483647 }
 0x558   :  { %v14617_v63 = vsel %vm1131_vm15, %v3626_v22, 2147483647  ;;  %v14649_v61 = vcvt.s32.f32 %v3918_v20 }
 0x559   :  { %18983 = vst [vmem:[#allocation167_spill] sm:$0xff] %v14617_v63  ;;  %v3436_v48 = vpop.xlane.xlu0 %3435  ;;  %4071 = vmin.xlane.f32.xlu0 %v14608_v43  ;;  %3891 = vmin.xlane.f32.xlu1 %v14610_v35  ;;  %v4098_v62 = vshra.s32 %v14617_v63, 16 }
 0x55a   :  { %vm3564_vm9 = vcmp.eq.f32.partialorder %v14100_v19, %v3436_v48  ;;  %v14659_v63 = vpop.xlane.xlu1 %3414 }
 0x55b   :  { %v3628_v30 = vsel %vm3564_vm9, %v18885_v17, 64  ;;  %v14629_v53 = vcvt.s32.f32 %v4098_v62  ;;  %v3903_v62 = vshra.s32 %v14635_v56, 16 }
 0x55c   :  { %v14638_v22 = vsel %vm1131_vm15, %v3628_v30, 2147483647  ;;  %v14653_v30 = vsel %vm1131_vm15, %v3616_v38, 2147483647 }
 0x55d   :  { %18984 = vst [vmem:[#allocation168_spill] sm:$0xff] %v14629_v53  ;;  %18985 = vst [vmem:[#allocation169_spill] sm:$0xff] %v14638_v22  ;;  %v3442_v37 = vpop.xlane.xlu0 %3441  ;;  %4101 = vmin.xlane.f32.xlu0 %v14629_v53  ;;  %3876 = vmin.xlane.f32.xlu1 %v14631_v25  ;;  %v4128_v19 = vshra.s32 %v14638_v22, 16  ;;  %v3615_v22 = vsel %vm3551_vm14, %v18885_v17, 64  ;;  %v14670_v38 = vcvt.s32.f32 %v3903_v62  ;;  %vm3553_vm14 = vcmp.eq.f32.partialorder %v14005_v16, %v14600_v52 }
 0x55e   :  { %vm3566_vm12 = vcmp.eq.f32.partialorder %v14120_v29, %v3442_v37  ;;  %v3948_v37 = vshra.s32 %v14653_v30, 16 }
 0x55f   :  { %v3630_v48 = vsel %vm3566_vm12, %v18885_v17, 64  ;;  %v14647_v31 = vcvt.s32.f32 %v4128_v19  ;;  %v14674_v19 = vsel %vm1131_vm15, %v3615_v22, 2147483647 }
 0x560   :  { %v14656_v53 = vsel %vm1131_vm15, %v3630_v48, 2147483647  ;;  %v14689_v62 = vcvt.s32.f32 %v3948_v37 }
 0x561   :  { %18986 = vst [vmem:[#allocation170_spill] sm:$0xff] %v14647_v31  ;;  %18987 = vst [vmem:[#allocation171_spill] sm:$0xff] %v14656_v53  ;;  %v3448_v51 = vpop.xlane.xlu0 %3447  ;;  %4131 = vmin.xlane.f32.xlu0 %v14647_v31  ;;  %3921 = vmin.xlane.f32.xlu1 %v14649_v61  ;;  %v4158_v29 = vshra.s32 %v14656_v53, 16  ;;  %v3618_v53 = vsel %vm3554_vm13, %v18885_v17, 64  ;;  %vm3556_vm13 = vcmp.eq.f32.partialorder %v14020_v50, %v14558_v36  ;;  %v4877_v36 = vld [vmem:[%s18383_s2 + $0x130] sm:$0xff] }
 0x562   :  { %vm3568_vm9 = vcmp.eq.f32.partialorder %v14140_v41, %v3448_v51  ;;  %v3421_v41 = vpop.xlane.xlu1 %3420  ;;  %v3933_v51 = vshra.s32 %v14674_v19, 16 }
 0x563   :  { %v3632_v2 = vsel %vm3568_vm9, %v18885_v17, 64  ;;  %v14668_v20 = vcvt.s32.f32 %v4158_v29  ;;  %v14693_v29 = vsel %vm1131_vm15, %v3618_v53, 2147483647 }
 0x564   :  { %v14677_v48 = vsel %vm1131_vm15, %v3632_v2, 2147483647  ;;  %v3978_v37 = vshra.s32 %v14693_v29, 16 }
 0x565   :  { %18988 = vst [vmem:[#allocation172_spill] sm:$0xff] %v14668_v20  ;;  %18989 = vst [vmem:[#allocation173_spill] sm:$0xff] %v14677_v48  ;;  %v3454_v31 = vpop.xlane.xlu0 %3453  ;;  %4161 = vmin.xlane.f32.xlu0 %v14668_v20  ;;  %3906 = vmin.xlane.f32.xlu1 %v14670_v38  ;;  %v4188_v4 = vshra.s32 %v14677_v48, 16  ;;  %v3617_v48 = vsel %vm3553_vm14, %v18885_v17, 64  ;;  %vm3555_vm14 = vcmp.eq.f32.partialorder %v14025_v47, %v14626_v26 }
 0x566   :  { %vm3570_vm12 = vcmp.eq.f32.partialorder %v14160_v7, %v3454_v31  ;;  %v14708_v31 = vcvt.s32.f32 %v3933_v51  ;;  %v3619_v47 = vsel %vm3555_vm14, %v18885_v17, 64 }
 0x567   :  { %v3634_v23 = vsel %vm3570_vm12, %v18885_v17, 64  ;;  %v14687_v22 = vcvt.s32.f32 %v4188_v4  ;;  %v14712_v4 = vsel %vm1131_vm15, %v3617_v48, 2147483647  ;;  %v4878_v48 = vld [vmem:[%s18383_s2 + $0x138] sm:$0xff] }
 0x568   :  { %v14696_v2 = vsel %vm1131_vm15, %v3634_v23, 2147483647  ;;  %v11577_v51 = vpack.c.bf16 %v4878_v48, %v4877_v36  ;;  %v14756_v36 = vsel %vm1131_vm15, %v3619_v47, 2147483647 }
 0x569   :  { %18990 = vst [vmem:[#allocation174_spill] sm:$0xff] %v14687_v22  ;;  %18991 = vst [vmem:[#allocation175_spill] sm:$0xff] %v14696_v2  ;;  %v3460_v16 = vpop.xlane.xlu0 %3459  ;;  %4191 = vmin.xlane.f32.xlu0 %v14687_v22  ;;  %3951 = vmin.xlane.f32.xlu1 %v14689_v62  ;;  %v4218_v7 = vshra.s32 %v14696_v2, 16  ;;  %v3620_v2 = vsel %vm3556_vm13, %v18885_v17, 64  ;;  %v3427_v22 = vpop.xlane.xlu1 %3426  ;;  %vm3557_vm13 = vcmp.eq.f32.partialorder %v14045_v60, %v14659_v63 }
 0x56a   :  { %vm3572_vm9 = vcmp.eq.f32.partialorder %v14180_v21, %v3460_v16  ;;  %11578 = vmatprep.subr.bf16.mxu0 %v11577_v51  ;;  %v3621_v48 = vsel %vm3557_vm13, %v18885_v17, 64 }
 0x56b   :  { %v3636_v52 = vsel %vm3572_vm9, %v18885_v17, 64  ;;  %v14706_v53 = vcvt.s32.f32 %v4218_v7  ;;  %11580 = vmatpush3.bf16.msra.mxu0 %v11577_v51  ;;  %vm3559_vm9 = vcmp.eq.f32.partialorder %v14065_v1, %v3421_v41  ;;  %v14768_v51 = vsel %vm1131_vm15, %v3621_v48, 2147483647 }
 0x56c   :  { %v14715_v23 = vsel %vm1131_vm15, %v3636_v52, 2147483647  ;;  %v14733_v52 = vcvt.s32.f32 %v3978_v37 }
 0x56d   :  { %18992 = vst [vmem:[#allocation176_spill] sm:$0xff] %v14706_v53  ;;  %18993 = vst [vmem:[#allocation177_spill] sm:$0xff] %v14715_v23  ;;  %v3466_v50 = vpop.xlane.xlu0 %3465  ;;  %4221 = vmin.xlane.f32.xlu0 %v14706_v53  ;;  %3936 = vmin.xlane.f32.xlu1 %v14708_v31  ;;  %v4248_v21 = vshra.s32 %v14715_v23, 16  ;;  %v3963_v23 = vshra.s32 %v14712_v4, 16  ;;  %v14737_v53 = vsel %vm1131_vm15, %v3620_v2, 2147483647  ;;  %v3433_v2 = vpop.xlane.xlu1 %3432 }
 0x56e   :  { %vm3574_vm12 = vcmp.eq.f32.partialorder %v14200_v28, %v3466_v50  ;;  %vm3563_vm13 = vcmp.eq.f32.partialorder %v14105_v12, %v3433_v2 }
 0x56f   :  { %v3638_v16 = vsel %vm3574_vm12, %v18885_v17, 64  ;;  %v14731_v7 = vcvt.s32.f32 %v4248_v21  ;;  %v14752_v50 = vcvt.s32.f32 %v3963_v23  ;;  %v4008_v21 = vshra.s32 %v14737_v53, 16 }
 0x570   :  { %v14740_v20 = vsel %vm1131_vm15, %v3638_v16, 2147483647  ;;  %v3993_v23 = vshra.s32 %v14756_v36, 16  ;;  %vm3561_vm12 = vcmp.eq.f32.partialorder %v14085_v10, %v3427_v22 }
 0x571   :  { %18994 = vst [vmem:[#allocation178_spill] sm:$0xff] %v14731_v7  ;;  %18995 = vst [vmem:[#allocation179_spill] sm:$0xff] %v14740_v20  ;;  %v14743_v26 = vpop.xlane.xlu0 %3462  ;;  %4251 = vmin.xlane.f32.xlu0 %v14731_v7  ;;  %3981 = vmin.xlane.f32.xlu1 %v14733_v52  ;;  %v4278_v28 = vshra.s32 %v14740_v20, 16  ;;  %v14764_v63 = vcvt.s32.f32 %v4008_v21  ;;  %v4023_v21 = vshra.s32 %v14768_v51, 16 }
 0x572   :  { %v14781_v41 = vcvt.s32.f32 %v3993_v23 }
 0x573   :  { %v14750_v37 = vcvt.s32.f32 %v4278_v28  ;;  %v3623_v28 = vsel %vm3559_vm9, %v18885_v17, 64  ;;  %v14793_v23 = vcvt.s32.f32 %v4023_v21 }
 0x574   :  { %v14785_v48 = vsel %vm1131_vm15, %v3623_v28, 2147483647 }
 0x575   :  { %18996 = vst [vmem:[#allocation180_spill] sm:$0xff] %v14750_v37  ;;  %v3472_v16 = vpop.xlane.xlu0 %3471  ;;  %4281 = vmin.xlane.f32.xlu0 %v14750_v37  ;;  %3966 = vmin.xlane.f32.xlu1 %v14752_v50  ;;  %v3439_v37 = vpop.xlane.xlu1 %3438  ;;  %18999 = vst [vmem:[#allocation183_spill] sm:$0xff] %v14785_v48 }
 0x576   :  { %vm3576_vm14 = vcmp.eq.f32.partialorder %v14217_v40, %v3472_v16  ;;  %v3625_v16 = vsel %vm3561_vm12, %v18885_v17, 64 }
 0x577   :  { %v3640_v60 = vsel %vm3576_vm14, %v18885_v17, 64  ;;  %v14797_v28 = vsel %vm1131_vm15, %v3625_v16, 2147483647  ;;  %vm3565_vm14 = vcmp.eq.f32.partialorder %v14125_v18, %v3439_v37 }
 0x578   :  { %v14771_v47 = vsel %vm1131_vm15, %v3640_v60, 2147483647  ;;  %v4083_v21 = vshra.s32 %v14797_v28, 16 }
 0x579   :  { %18997 = vst [vmem:[#allocation181_spill] sm:$0xff] %v14771_v47  ;;  %v14774_v20 = vpop.xlane.xlu0 %3468  ;;  %4011 = vmin.xlane.f32.xlu1 %v14764_v63  ;;  %v4308_v40 = vshra.s32 %v14771_v47, 16  ;;  %v3445_v10 = vpop.xlane.xlu1 %3444 }
 0x57a   :  { %vm3567_vm12 = vcmp.eq.f32.partialorder %v14145_v32, %v3445_v10  ;;  %v14822_v37 = vcvt.s32.f32 %v4083_v21 }
 0x57b   :  { %v14779_v1 = vcvt.s32.f32 %v4308_v40  ;;  %v4053_v40 = vshra.s32 %v14785_v48, 16 }
 0x57c   :  { %19003 = vst [vmem:[#allocation187_spill] sm:$0xff] %v14822_v37 }
 0x57d   :  { %18998 = vst [vmem:[#allocation182_spill] sm:$0xff] %v14779_v1  ;;  %v3478_v60 = vpop.xlane.xlu0 %3477  ;;  %4311 = vmin.xlane.f32.xlu0 %v14779_v1  ;;  %3996 = vmin.xlane.f32.xlu1 %v14781_v41  ;;  %v3627_v1 = vsel %vm3563_vm13, %v18885_v17, 64  ;;  %v14810_v2 = vcvt.s32.f32 %v4053_v40 }
 0x57e   :  { %vm3578_vm9 = vcmp.eq.f32.partialorder %v14237_v55, %v3478_v60  ;;  %v14814_v16 = vsel %vm1131_vm15, %v3627_v1, 2147483647  ;;  %v3629_v60 = vsel %vm3565_vm14, %v18885_v17, 64 }
 0x57f   :  { %v3642_v22 = vsel %vm3578_vm9, %v18885_v17, 64  ;;  %19002 = vst [vmem:[#allocation186_spill] sm:$0xff] %v14814_v16  ;;  %v4113_v40 = vshra.s32 %v14814_v16, 16  ;;  %v14826_v1 = vsel %vm1131_vm15, %v3629_v60, 2147483647 }
 0x580   :  { %v14800_v47 = vsel %vm1131_vm15, %v3642_v22, 2147483647  ;;  %v3451_v22 = vpop.xlane.xlu1 %3450  ;;  %19004 = vst [vmem:[#allocation188_spill] sm:$0xff] %v14826_v1  ;;  %v4143_v21 = vshra.s32 %v14826_v1, 16 }
 0x581   :  { %19000 = vst [vmem:[#allocation184_spill] sm:$0xff] %v14800_v47  ;;  %v14803_v7 = vpop.xlane.xlu0 %3474  ;;  %4026 = vmin.xlane.f32.xlu1 %v14793_v23  ;;  %v4338_v12 = vshra.s32 %v14800_v47, 16  ;;  %vm3569_vm9 = vcmp.eq.f32.partialorder %v14165_v11, %v3451_v22  ;;  %v14837_v10 = vcvt.s32.f32 %v4113_v40  ;;  %v19009_v11 = vld [vmem:[#allocation124_spill] sm:$0xff] }
 0x582   :  { %v14849_v40 = vcvt.s32.f32 %v4143_v21 }
 0x583   :  { %v14808_v55 = vcvt.s32.f32 %v4338_v12 }
 0x585   :  { %19001 = vst [vmem:[#allocation185_spill] sm:$0xff] %v14808_v55  ;;  %v3484_v48 = vpop.xlane.xlu0 %3483  ;;  %4341 = vmin.xlane.f32.xlu0 %v14808_v55  ;;  %4056 = vmin.xlane.f32.xlu1 %v14810_v2  ;;  %v3631_v55 = vsel %vm3567_vm12, %v18885_v17, 64 }
 0x586   :  { %vm3580_vm13 = vcmp.eq.f32.partialorder %v14257_v33, %v3484_v48  ;;  %v3457_v33 = vpop.xlane.xlu1 %3456  ;;  %v14841_v60 = vsel %vm1131_vm15, %v3631_v55, 2147483647 }
 0x587   :  { %v3644_v18 = vsel %vm3580_vm13, %v18885_v17, 64  ;;  %19007 = vst [vmem:[#allocation191_spill] sm:$0xff] %v14841_v60 }
 0x588   :  { %v14829_v12 = vsel %vm1131_vm15, %v3644_v18, 2147483647  ;;  %v3633_v18 = vsel %vm3569_vm9, %v18885_v17, 64 }
 0x589   :  { %19005 = vst [vmem:[#allocation189_spill] sm:$0xff] %v14829_v12  ;;  %v3481_v47 = vpop.xlane.xlu0 %3480  ;;  %4086 = vmin.xlane.f32.xlu1 %v14822_v37  ;;  %v4368_v32 = vshra.s32 %v14829_v12, 16  ;;  %v19008_v12 = vld [vmem:[#allocation110_spill] sm:$0xff]  ;;  %v14853_v55 = vsel %vm1131_vm15, %v3633_v18, 2147483647 }
 0x58a   :  { %vm3571_vm14 = vcmp.eq.f32.partialorder %v19008_v12, %v3457_v33  ;;  %19010 = vst [vmem:[#allocation110_spill] sm:$0xff] %v14853_v55  ;;  %v4203_v18 = vshra.s32 %v14853_v55, 16 }
 0x58b   :  { %v14835_v48 = vcvt.s32.f32 %v4368_v32  ;;  %v4173_v32 = vshra.s32 %v14841_v60, 16 }
 0x58d   :  { %19006 = vst [vmem:[#allocation190_spill] sm:$0xff] %v14835_v48  ;;  %v3490_v16 = vpop.xlane.xlu0 %3489  ;;  %4371 = vmin.xlane.f32.xlu0 %v14835_v48  ;;  %4116 = vmin.xlane.f32.xlu1 %v14837_v10  ;;  %v3635_v48 = vsel %vm3571_vm14, %v18885_v17, 64  ;;  %v14865_v21 = vcvt.s32.f32 %v4173_v32 }
 0x58e   :  { %vm3582_vm12 = vcmp.eq.f32.partialorder %v19009_v11, %v3490_v16  ;;  %v19012_v16 = vld [vmem:[#allocation113_spill] sm:$0xff]  ;;  %v14869_v11 = vsel %vm1131_vm15, %v3635_v48, 2147483647 }
 0x58f   :  { %v3646_v22 = vsel %vm3582_vm12, %v18885_v17, 64  ;;  %vm3573_vm13 = vcmp.eq.f32.partialorder %v19012_v16, %v14743_v26  ;;  %19014 = vst [vmem:[#allocation192_spill] sm:$0xff] %v14865_v21  ;;  %19015 = vst [vmem:[#allocation193_spill] sm:$0xff] %v14869_v11  ;;  %v19017_v26 = vld [vmem:[#allocation128_spill] sm:$0xff]  ;;  %v4233_v16 = vshra.s32 %v14869_v11, 16 }
 0x590   :  { %v14856_v1 = vsel %vm1131_vm15, %v3646_v22, 2147483647  ;;  %v3637_v22 = vsel %vm3573_vm13, %v18885_v17, 64 }
 0x591   :  { %19011 = vst [vmem:[#allocation124_spill] sm:$0xff] %v14856_v1  ;;  %v3487_v37 = vpop.xlane.xlu0 %3486  ;;  %4146 = vmin.xlane.f32.xlu1 %v14849_v40  ;;  %v4398_v12 = vshra.s32 %v14856_v1, 16  ;;  %v19016_v1 = vld [vmem:[#allocation116_spill] sm:$0xff]  ;;  %v14882_v48 = vsel %vm1131_vm15, %v3637_v22, 2147483647 }
 0x592   :  { %vm3575_vm9 = vcmp.eq.f32.partialorder %v19016_v1, %v14774_v20  ;;  %19018 = vst [vmem:[#allocation116_spill] sm:$0xff] %v14882_v48  ;;  %v19020_v1 = vld [vmem:[#allocation119_spill] sm:$0xff]  ;;  %v4263_v22 = vshra.s32 %v14882_v48, 16 }
 0x593   :  { %v14863_v33 = vcvt.s32.f32 %v4398_v12  ;;  %v14878_v12 = vcvt.s32.f32 %v4203_v18  ;;  %vm3577_vm12 = vcmp.eq.f32.partialorder %v19020_v1, %v14803_v7  ;;  %v14894_v18 = vcvt.s32.f32 %v4233_v16 }
 0x594   :  { %v14906_v16 = vcvt.s32.f32 %v4263_v22 }
 0x595   :  { %19013 = vst [vmem:[#allocation113_spill] sm:$0xff] %v14863_v33  ;;  %v3496_v60 = vpop.xlane.xlu0 %3495  ;;  %4401 = vmin.xlane.f32.xlu0 %v14863_v33  ;;  %4176 = vmin.xlane.f32.xlu1 %v14865_v21  ;;  %v3639_v33 = vsel %vm3575_vm9, %v18885_v17, 64 }
 0x596   :  { %vm3584_vm14 = vcmp.eq.f32.partialorder %v19017_v26, %v3496_v60  ;;  %v14898_v26 = vsel %vm1131_vm15, %v3639_v33, 2147483647 }
 0x597   :  { %v3648_v32 = vsel %vm3584_vm14, %v18885_v17, 64  ;;  %19022 = vst [vmem:[#allocation194_spill] sm:$0xff] %v14898_v26 }
 0x598   :  { %v14885_v55 = vsel %vm1131_vm15, %v3648_v32, 2147483647  ;;  %v3641_v32 = vsel %vm3577_vm12, %v18885_v17, 64 }
 0x599   :  { %19019 = vst [vmem:[#allocation128_spill] sm:$0xff] %v14885_v55  ;;  %v3493_v21 = vpop.xlane.xlu0 %3492  ;;  %4206 = vmin.xlane.f32.xlu1 %v14878_v12  ;;  %v4428_v20 = vshra.s32 %v14885_v55, 16  ;;  %v19023_v55 = vld [vmem:[#allocation122_spill] sm:$0xff]  ;;  %v14910_v33 = vsel %vm1131_vm15, %v3641_v32, 2147483647 }
 0x59a   :  { %vm3579_vm13 = vcmp.eq.f32.partialorder %v19023_v55, %v3481_v47  ;;  %19024 = vst [vmem:[#allocation122_spill] sm:$0xff] %v14910_v33  ;;  %v4323_v22 = vshra.s32 %v14910_v33, 16  ;;  %vm3583_vm12 = vcmp.eq.f32.partialorder %v14313_v45, %v3493_v21  ;;  %v19032_v21 = vld [vmem:[#allocation132_spill] sm:$0xff] }
 0x59b   :  { %v14892_v60 = vcvt.s32.f32 %v4428_v20  ;;  %v4293_v20 = vshra.s32 %v14898_v26, 16 }
 0x59d   :  { %19021 = vst [vmem:[#allocation119_spill] sm:$0xff] %v14892_v60  ;;  %v3502_v11 = vpop.xlane.xlu0 %3501  ;;  %4431 = vmin.xlane.f32.xlu0 %v14892_v60  ;;  %4236 = vmin.xlane.f32.xlu1 %v14894_v18  ;;  %v3643_v60 = vsel %vm3579_vm13, %v18885_v17, 64 }
 0x59e   :  { %vm3586_vm9 = vcmp.eq.f32.partialorder %v14325_v6, %v3502_v11  ;;  %v19026_v6 = vld [vmem:[#allocation126_spill] sm:$0xff]  ;;  %v14921_v11 = vcvt.s32.f32 %v4293_v20  ;;  %v14925_v32 = vsel %vm1131_vm15, %v3643_v60, 2147483647  ;;  %v14933_v20 = vcvt.s32.f32 %v4323_v22 }
 0x59f   :  { %v3650_v7 = vsel %vm3586_vm9, %v18885_v17, 64  ;;  %vm3581_vm14 = vcmp.eq.f32.partialorder %v19026_v6, %v3487_v37  ;;  %19028 = vst [vmem:[#allocation196_spill] sm:$0xff] %v14925_v32 }
 0x5a0   :  { %v14913_v1 = vsel %vm1131_vm15, %v3650_v7, 2147483647  ;;  %v3645_v7 = vsel %vm3581_vm14, %v18885_v17, 64 }
 0x5a1   :  { %19025 = vst [vmem:[#allocation195_spill] sm:$0xff] %v14913_v1  ;;  %v3499_v48 = vpop.xlane.xlu0 %3498  ;;  %4266 = vmin.xlane.f32.xlu1 %v14906_v16  ;;  %v4458_v47 = vshra.s32 %v14913_v1, 16  ;;  %v19029_v1 = vld [vmem:[#allocation134_spill] sm:$0xff]  ;;  %v14937_v60 = vsel %vm1131_vm15, %v3645_v7, 2147483647 }
 0x5a2   :  { %19030 = vst [vmem:[#allocation134_spill] sm:$0xff] %v14937_v60  ;;  %vm3585_vm9 = vcmp.eq.f32.partialorder %v19032_v21, %v3499_v48  ;;  %v4383_v22 = vshra.s32 %v14937_v60, 16  ;;  %v4879_v48 = vld [vmem:[%s18383_s2 + $0x140] sm:$0xff] }
 0x5a3   :  { %v14919_v55 = vcvt.s32.f32 %v4458_v47  ;;  %v4353_v47 = vshra.s32 %v14925_v32, 16 }
 0x5a5   :  { %19027 = vst [vmem:[#allocation126_spill] sm:$0xff] %v14919_v55  ;;  %v3508_v26 = vpop.xlane.xlu0 %3507  ;;  %4461 = vmin.xlane.f32.xlu0 %v14919_v55  ;;  %4296 = vmin.xlane.f32.xlu1 %v14921_v11  ;;  %v3647_v55 = vsel %vm3583_vm12, %v18885_v17, 64 }
 0x5a6   :  { %vm3588_vm13 = vcmp.eq.f32.partialorder %v19029_v1, %v3508_v26  ;;  %v14948_v1 = vcvt.s32.f32 %v4353_v47  ;;  %v14952_v7 = vsel %vm1131_vm15, %v3647_v55, 2147483647  ;;  %v4880_v47 = vld [vmem:[%s18383_s2 + $0x148] sm:$0xff] }
 0x5a7   :  { %v3652_v37 = vsel %vm3588_vm13, %v18885_v17, 64  ;;  %19035 = vst [vmem:[#allocation199_spill] sm:$0xff] %v14952_v7 }
 0x5a8   :  { %v14940_v6 = vsel %vm1131_vm15, %v3652_v37, 2147483647  ;;  %19034 = vst [vmem:[#allocation198_spill] sm:$0xff] %v14948_v1  ;;  %v3649_v37 = vsel %vm3585_vm9, %v18885_v17, 64 }
 0x5a9   :  { %19031 = vst [vmem:[#allocation197_spill] sm:$0xff] %v14940_v6  ;;  %v3505_v33 = vpop.xlane.xlu0 %3504  ;;  %4326 = vmin.xlane.f32.xlu1 %v14933_v20  ;;  %v4488_v45 = vshra.s32 %v14940_v6, 16  ;;  %v4413_v6 = vshra.s32 %v14952_v7, 16 }
 0x5aa   :  { %vm3587_vm14 = vcmp.eq.f32.partialorder %v14355_v13, %v3505_v33 }
 0x5ab   :  { %v14946_v26 = vcvt.s32.f32 %v4488_v45  ;;  %v11581_v45 = vpack.c.bf16 %v4880_v47, %v4879_v48  ;;  %v3651_v13 = vsel %vm3587_vm14, %v18885_v17, 64 }
 0x5ac   :  { %v14989_v47 = vsel %vm1131_vm15, %v3651_v13, 2147483647 }
 0x5ad   :  { %19033 = vst [vmem:[#allocation132_spill] sm:$0xff] %v14946_v26  ;;  %v3514_v32 = vpop.xlane.xlu0 %3513  ;;  %4491 = vmin.xlane.f32.xlu0 %v14946_v26  ;;  %4356 = vmin.xlane.f32.xlu1 %v14948_v1  ;;  %v14968_v26 = vcvt.s32.f32 %v4383_v22  ;;  %v14972_v1 = vsel %vm1131_vm15, %v3649_v37, 2147483647  ;;  %v14985_v37 = vcvt.s32.f32 %v4413_v6  ;;  %19040 = vst [vmem:[#allocation204_spill] sm:$0xff] %v14989_v47 }
 0x5ae   :  { %vm3590_vm12 = vcmp.eq.f32.partialorder %v14371_v9, %v3514_v32  ;;  %v14965_v55 = vpop.xlane.xlu1 %3681  ;;  %11582 = vmatprep.subr.bf16.mxu0 %v11581_v45  ;;  %v4443_v48 = vshra.s32 %v14972_v1, 16 }
 0x5af   :  { %19036 = vst [vmem:[#allocation200_spill] sm:$0xff] %v14965_v55  ;;  %v3654_v21 = vsel %vm3590_vm12, %v18885_v17, 64  ;;  %11584 = vmatpush3.bf16.msra.mxu0 %v11581_v45  ;;  %19039 = vst [vmem:[#allocation203_spill] sm:$0xff] %v14985_v37 }
 0x5b0   :  { %v14975_v60 = vsel %vm1131_vm15, %v3654_v21, 2147483647  ;;  %v14998_v6 = vcvt.s32.f32 %v4443_v48 }
 0x5b1   :  { %19037 = vst [vmem:[#allocation201_spill] sm:$0xff] %v14975_v60  ;;  %v3511_v33 = vpop.xlane.xlu0 %3510  ;;  %4386 = vmin.xlane.f32.xlu1 %v14968_v26  ;;  %v4518_v9 = vshra.s32 %v14975_v60, 16 }
 0x5b2   :  { %vm3589_vm13 = vcmp.eq.f32.partialorder %v14384_v0, %v3511_v33  ;;  %v14981_v32 = vpop.xlane.xlu1 %3666  ;;  %v4473_v33 = vshra.s32 %v14989_v47, 16 }
 0x5b3   :  { %v14983_v22 = vcvt.s32.f32 %v4518_v9  ;;  %v3653_v21 = vsel %vm3589_vm13, %v18885_v17, 64 }
 0x5b4   :  { %v15002_v13 = vsel %vm1131_vm15, %v3653_v21, 2147483647  ;;  %v15015_v47 = vcvt.s32.f32 %v4473_v33 }
 0x5b5   :  { %19038 = vst [vmem:[#allocation202_spill] sm:$0xff] %v14983_v22  ;;  %v3520_v7 = vpop.xlane.xlu0 %3519  ;;  %4521 = vmin.xlane.f32.xlu0 %v14983_v22  ;;  %4416 = vmin.xlane.f32.xlu1 %v14985_v37  ;;  %19042 = vst [vmem:[#allocation206_spill] sm:$0xff] %v15002_v13  ;;  %v4503_v21 = vshra.s32 %v15002_v13, 16 }
 0x5b6   :  { %vm3592_vm9 = vcmp.eq.f32.partialorder %v14401_v39, %v3520_v7  ;;  %v14995_v0 = vpop.xlane.xlu1 %3711  ;;  %19045 = vst [vmem:[#allocation209_spill] sm:$0xff] %v15015_v47 }
 0x5b7   :  { %19041 = vst [vmem:[#allocation205_spill] sm:$0xff] %v14995_v0  ;;  %v3656_v45 = vsel %vm3592_vm9, %v18885_v17, 64 }
 0x5b8   :  { %v15005_v9 = vsel %vm1131_vm15, %v3656_v45, 2147483647 }
 0x5b9   :  { %19043 = vst [vmem:[#allocation207_spill] sm:$0xff] %v15005_v9  ;;  %v3517_v60 = vpop.xlane.xlu0 %3516  ;;  %4446 = vmin.xlane.f32.xlu1 %v14998_v6  ;;  %v4548_v22 = vshra.s32 %v15005_v9, 16 }
 0x5ba   :  { %vm3591_vm14 = vcmp.eq.f32.partialorder %v14430_v54, %v3517_v60  ;;  %v15010_v39 = vpop.xlane.xlu1 %3696 }
 0x5bb   :  { %v3655_v7 = vsel %vm3591_vm14, %v18885_v17, 64  ;;  %v15013_v48 = vcvt.s32.f32 %v4548_v22  ;;  %v15027_v22 = vcvt.s32.f32 %v4503_v21 }
 0x5bc   :  { %v15019_v45 = vsel %vm1131_vm15, %v3655_v7, 2147483647 }
 0x5bd   :  { %19044 = vst [vmem:[#allocation208_spill] sm:$0xff] %v15013_v48  ;;  %19046 = vst [vmem:[#allocation210_spill] sm:$0xff] %v15019_v45  ;;  %v3526_v37 = vpop.xlane.xlu0 %3525  ;;  %4551 = vmin.xlane.f32.xlu0 %v15013_v48  ;;  %4476 = vmin.xlane.f32.xlu1 %v15015_v47  ;;  %v4533_v33 = vshra.s32 %v15019_v45, 16 }
 0x5be   :  { %vm3594_vm12 = vcmp.eq.f32.partialorder %v14450_v3, %v3526_v37  ;;  %v15024_v54 = vpop.xlane.xlu1 %3741  ;;  %19048 = vst [vmem:[#allocation212_spill] sm:$0xff] %v15027_v22 }
 0x5bf   :  { %19047 = vst [vmem:[#allocation211_spill] sm:$0xff] %v15024_v54  ;;  %v3658_v60 = vsel %vm3594_vm12, %v18885_v17, 64  ;;  %v15041_v21 = vcvt.s32.f32 %v4533_v33 }
 0x5c0   :  { %v15031_v13 = vsel %vm1131_vm15, %v3658_v60, 2147483647 }
 0x5c1   :  { %19049 = vst [vmem:[#allocation213_spill] sm:$0xff] %v15031_v13  ;;  %v3523_v7 = vpop.xlane.xlu0 %3522  ;;  %4506 = vmin.xlane.f32.xlu1 %v15027_v22  ;;  %v4578_v48 = vshra.s32 %v15031_v13, 16  ;;  %19051 = vst [vmem:[#allocation215_spill] sm:$0xff] %v15041_v21 }
 0x5c2   :  { %vm3593_vm13 = vcmp.eq.f32.partialorder %v14470_v58, %v3523_v7  ;;  %v15036_v47 = vpop.xlane.xlu1 %3726 }
 0x5c3   :  { %v3657_v3 = vsel %vm3593_vm13, %v18885_v17, 64  ;;  %v15039_v37 = vcvt.s32.f32 %v4578_v48  ;;  %vm3668_vm13 = vcmp.eq.f32.partialorder %v14405_v27, %v14981_v32  ;;  %v19063_v27 = vld [vmem:[#allocation148_spill] sm:$0xff] }
 0x5c4   :  { %v15044_v45 = vsel %vm1131_vm15, %v3657_v3, 2147483647 }
 0x5c5   :  { %19050 = vst [vmem:[#allocation214_spill] sm:$0xff] %v15039_v37  ;;  %19052 = vst [vmem:[#allocation216_spill] sm:$0xff] %v15044_v45  ;;  %v3532_v60 = vpop.xlane.xlu0 %3531  ;;  %4581 = vmin.xlane.f32.xlu0 %v15039_v37  ;;  %4536 = vmin.xlane.f32.xlu1 %v15041_v21  ;;  %v4563_v22 = vshra.s32 %v15044_v45, 16  ;;  %v19055_v45 = vld [vmem:[#allocation138_spill] sm:$0xff] }
 0x5c6   :  { %vm3596_vm9 = vcmp.eq.f32.partialorder %v14490_v24, %v3532_v60  ;;  %v15050_v58 = vpop.xlane.xlu1 %3771  ;;  %v3677_v24 = vand.u32 65535, %v19055_v45  ;;  %v3707_v45 = vand.u32 65535, %v14411_v8 }
 0x5c7   :  { %v3660_v7 = vsel %vm3596_vm9, %v18885_v17, 64  ;;  %v15053_v48 = vcvt.s32.f32 %v4563_v22  ;;  %vm3713_vm9 = vcmp.eq.f32.partialorder %v14424_v46, %v14995_v0 }
 0x5c8   :  { %v15056_v33 = vsel %vm1131_vm15, %v3660_v7, 2147483647 }
 0x5c9   :  { %19053 = vst [vmem:[#allocation217_spill] sm:$0xff] %v15053_v48  ;;  %19054 = vst [vmem:[#allocation218_spill] sm:$0xff] %v15056_v33  ;;  %v3529_v3 = vpop.xlane.xlu0 %3528  ;;  %4566 = vmin.xlane.f32.xlu1 %v15053_v48  ;;  %v4608_v37 = vshra.s32 %v15056_v33, 16  ;;  %v19058_v48 = vld [vmem:[#allocation141_spill] sm:$0xff] }
 0x5ca   :  { %vm3595_vm14 = vcmp.eq.f32.partialorder %v14510_v34, %v3529_v3  ;;  %v15061_v21 = vpop.xlane.xlu1 %3756  ;;  %vm3683_vm12 = vcmp.eq.f32.partialorder %v19058_v48, %v14965_v55  ;;  %v3679_v34 = vcvt.s32.f32 %v3677_v24  ;;  %v19059_v3 = vld [vmem:[#allocation139_spill] sm:$0xff]  ;;  %v3709_v24 = vcvt.s32.f32 %v3707_v45  ;;  %v19062_v55 = vld [vmem:[#allocation145_spill] sm:$0xff] }
 0x5cb   :  { %v3659_v60 = vsel %vm3595_vm14, %v18885_v17, 64  ;;  %v15065_v13 = vcvt.s32.f32 %v4608_v37  ;;  %v3662_v9 = vand.u32 65535, %v19059_v3  ;;  %v3737_v8 = vand.u32 65535, %v19062_v55 }
 0x5cc   :  { %v15068_v22 = vsel %vm1131_vm15, %v3659_v60, 2147483647  ;;  %v3684_v37 = vsel %vm3683_vm12, %v3679_v34, inf  ;;  %vm3698_vm14 = vcmp.eq.f32.partialorder %v14444_v5, %v15010_v39  ;;  %vm3743_vm12 = vcmp.eq.f32.partialorder %v19063_v27, %v15024_v54  ;;  %v19067_v5 = vld [vmem:[#allocation154_spill] sm:$0xff]  ;;  %v19069_v27 = vld [vmem:[#allocation155_spill] sm:$0xff] }
 0x5cd   :  { %19056 = vst [vmem:[#allocation138_spill] sm:$0xff] %v15065_v13  ;;  %19057 = vst [vmem:[#allocation219_spill] sm:$0xff] %v15068_v22  ;;  %4611 = vmin.xlane.f32.xlu0 %v15065_v13  ;;  %v4593_v7 = vshra.s32 %v15068_v22, 16  ;;  %v3664_v60 = vcvt.s32.f32 %v3662_v9  ;;  %v19061_v13 = vld [vmem:[#allocation143_spill] sm:$0xff]  ;;  %v3714_v22 = vsel %vm3713_vm9, %v3709_v24, inf  ;;  %vm3773_vm9 = vcmp.eq.f32.partialorder %v19067_v5, %v15050_v58 }
 0x5ce   :  { %v15074_v33 = vpop.xlane.xlu1 %3801  ;;  %v3692_v3 = vand.u32 65535, %v19061_v13  ;;  %v19064_v9 = vld [vmem:[#allocation147_spill] sm:$0xff] }
 0x5cf   :  { %v15078_v17 = vcvt.s32.f32 %v4593_v7  ;;  %v3669_v7 = vsel %vm3668_vm13, %v3664_v60, inf  ;;  %v3722_v45 = vand.u32 65535, %v19064_v9  ;;  %v3797_v9 = vand.u32 65535, %v19069_v27 }
 0x5d0   :  { %v3694_v46 = vcvt.s32.f32 %v3692_v3  ;;  %v19068_v3 = vld [vmem:[#allocation153_spill] sm:$0xff] }
 0x5d1   :  { %19060 = vst [vmem:[#allocation141_spill] sm:$0xff] %v15078_v17  ;;  %4596 = vmin.xlane.f32.xlu1 %v15078_v17  ;;  %3685 = vmin.xlane.f32.xlu0 %v3684_v37  ;;  %v3739_v37 = vcvt.s32.f32 %v3737_v8  ;;  %v19065_v17 = vld [vmem:[#allocation150_spill] sm:$0xff]  ;;  %v3724_v24 = vcvt.s32.f32 %v3722_v45  ;;  %v3752_v8 = vand.u32 65535, %v19068_v3  ;;  %v19071_v45 = vld [vmem:[#allocation156_spill] sm:$0xff] }
 0x5d2   :  { %v15085_v48 = vpop.xlane.xlu1 %3786  ;;  %v3767_v13 = vand.u32 65535, %v19065_v17  ;;  %v3699_v0 = vsel %vm3698_vm14, %v3694_v46, inf  ;;  %vm3758_vm14 = vcmp.eq.f32.partialorder %v14520_v57, %v15061_v21  ;;  %v19073_v57 = vld [vmem:[#allocation160_spill] sm:$0xff] }
 0x5d3   :  { %v3744_v55 = vsel %vm3743_vm12, %v3739_v37, inf  ;;  %v3754_v37 = vcvt.s32.f32 %v3752_v8  ;;  %v19074_v8 = vld [vmem:[#allocation159_spill] sm:$0xff] }
 0x5d5   :  { %3670 = vmin.xlane.f32.xlu1 %v3669_v7  ;;  %3715 = vmin.xlane.f32.xlu0 %v3714_v22  ;;  %v19066_v22 = vld [vmem:[#allocation151_spill] sm:$0xff]  ;;  %v3769_v7 = vcvt.s32.f32 %v3767_v13  ;;  %v3782_v13 = vand.u32 65535, %v19071_v45  ;;  %v3759_v3 = vsel %vm3758_vm14, %v3754_v37, inf  ;;  %v19076_v37 = vld [vmem:[#allocation162_spill] sm:$0xff] }
 0x5d6   :  { %v15093_v34 = vpop.xlane.xlu1 %3831  ;;  %vm3728_vm13 = vcmp.eq.f32.partialorder %v19066_v22, %v15036_v47  ;;  %v19072_v22 = vld [vmem:[#allocation158_spill] sm:$0xff] }
 0x5d7   :  { %v3729_v54 = vsel %vm3728_vm13, %v3724_v24, inf  ;;  %v3774_v17 = vsel %vm3773_vm9, %v3769_v7, inf  ;;  %v3827_v5 = vand.u32 65535, %v19072_v22  ;;  %vm3788_vm13 = vcmp.eq.f32.partialorder %v14540_v14, %v15085_v48 }
 0x5d8   :  { %vm3833_vm9 = vcmp.eq.f32.partialorder %v19073_v57, %v15093_v34  ;;  %v3784_v24 = vcvt.s32.f32 %v3782_v13  ;;  %v19077_v13 = vld [vmem:[#allocation163_spill] sm:$0xff] }
 0x5d9   :  { %3700 = vmin.xlane.f32.xlu1 %v3699_v0  ;;  %3745 = vmin.xlane.f32.xlu0 %v3744_v55  ;;  %v19070_v0 = vld [vmem:[#allocation157_spill] sm:$0xff]  ;;  %v3799_v55 = vcvt.s32.f32 %v3797_v9  ;;  %v3829_v7 = vcvt.s32.f32 %v3827_v5  ;;  %v3812_v9 = vand.u32 65535, %v19074_v8  ;;  %v3842_v5 = vand.u32 65535, %v19077_v13 }
 0x5da   :  { %v15101_v60 = vpop.xlane.xlu1 %3816  ;;  %vm3803_vm12 = vcmp.eq.f32.partialorder %v19070_v0, %v15074_v33  ;;  %v3789_v45 = vsel %vm3788_vm13, %v3784_v24, inf }
 0x5db   :  { %v3804_v27 = vsel %vm3803_vm12, %v3799_v55, inf  ;;  %v3834_v22 = vsel %vm3833_vm9, %v3829_v7, inf  ;;  %vm3818_vm14 = vcmp.eq.f32.partialorder %v19076_v37, %v15101_v60  ;;  %v3814_v55 = vcvt.s32.f32 %v3812_v9 }
 0x5dc   :  { %v3872_v9 = vand.u32 65535, %v14594_v44 }
 0x5dd   :  { %3730 = vmin.xlane.f32.xlu1 %v3729_v54  ;;  %3775 = vmin.xlane.f32.xlu0 %v3774_v17  ;;  %v19075_v17 = vld [vmem:[#allocation161_spill] sm:$0xff]  ;;  %v3819_v57 = vsel %vm3818_vm14, %v3814_v55, inf }
 0x5de   :  { %v15109_v46 = vpop.xlane.xlu1 %3861  ;;  %v3857_v0 = vand.u32 65535, %v19075_v17  ;;  %v3917_v17 = vand.u32 65535, %v14614_v42 }
 0x5df   :  { %vm3863_vm12 = vcmp.eq.f32.partialorder %v14573_v15, %v15109_v46  ;;  %v3844_v15 = vcvt.s32.f32 %v3842_v5 }
 0x5e1   :  { %3760 = vmin.xlane.f32.xlu1 %v3759_v3  ;;  %3805 = vmin.xlane.f32.xlu0 %v3804_v27  ;;  %v3859_v3 = vcvt.s32.f32 %v3857_v0  ;;  %v3887_v27 = vand.u32 65535, %v14577_v49 }
 0x5e2   :  { %v15117_v54 = vpop.xlane.xlu1 %3846  ;;  %v15149_v13 = vpop.xlane.xlu0 %4041 }
 0x5e3   :  { %v3864_v8 = vsel %vm3863_vm12, %v3859_v3, inf  ;;  %vm3848_vm13 = vcmp.eq.f32.partialorder %v14590_v59, %v15117_v54  ;;  %v3889_v7 = vcvt.s32.f32 %v3887_v27  ;;  %v3874_v59 = vcvt.s32.f32 %v3872_v9 }
 0x5e4   :  { %v3849_v0 = vsel %vm3848_vm13, %v3844_v15, inf  ;;  %v3947_v3 = vand.u32 65535, %v14653_v30  ;;  %v3962_v9 = vand.u32 65535, %v14712_v4 }
 0x5e5   :  { %3790 = vmin.xlane.f32.xlu1 %v3789_v45  ;;  %3835 = vmin.xlane.f32.xlu0 %v3834_v22  ;;  %v3919_v22 = vcvt.s32.f32 %v3917_v17 }
 0x5e6   :  { %v15125_v14 = vpop.xlane.xlu1 %3891  ;;  %v3949_v5 = vcvt.s32.f32 %v3947_v3 }
 0x5e7   :  { %vm3893_vm9 = vcmp.eq.f32.partialorder %v14610_v35, %v15125_v14  ;;  %v3902_v35 = vand.u32 65535, %v14635_v56 }
 0x5e8   :  { %v3894_v49 = vsel %vm3893_vm9, %v3889_v7, inf }
 0x5e9   :  { %3820 = vmin.xlane.f32.xlu1 %v3819_v57  ;;  %3865 = vmin.xlane.f32.xlu0 %v3864_v8  ;;  %v3904_v55 = vcvt.s32.f32 %v3902_v35  ;;  %v3977_v8 = vand.u32 65535, %v14693_v29 }
 0x5ea   :  { %v15133_v24 = vpop.xlane.xlu1 %3876 }
 0x5eb   :  { %vm3878_vm14 = vcmp.eq.f32.partialorder %v14631_v25, %v15133_v24 }
 0x5ec   :  { %v3879_v37 = vsel %vm3878_vm14, %v3874_v59, inf }
 0x5ed   :  { %3850 = vmin.xlane.f32.xlu1 %v3849_v0  ;;  %3895 = vmin.xlane.f32.xlu0 %v3894_v49  ;;  %v3964_v0 = vcvt.s32.f32 %v3962_v9 }
 0x5ee   :  { %v15139_v45 = vpop.xlane.xlu1 %3921 }
 0x5ef   :  { %vm3923_vm12 = vcmp.eq.f32.partialorder %v14649_v61, %v15139_v45  ;;  %v3932_v61 = vand.u32 65535, %v14674_v19  ;;  %v3979_v19 = vcvt.s32.f32 %v3977_v8 }
 0x5f0   :  { %v3924_v44 = vsel %vm3923_vm12, %v3919_v22, inf  ;;  %v19078_v22 = vld [vmem:[#allocation164_spill] sm:$0xff] }
 0x5f1   :  { %3880 = vmin.xlane.f32.xlu1 %v3879_v37  ;;  %3925 = vmin.xlane.f32.xlu0 %v3924_v44  ;;  %v3934_v30 = vcvt.s32.f32 %v3932_v61  ;;  %v4037_v35 = vand.u32 65535, %v19078_v22  ;;  %v4022_v61 = vand.u32 65535, %v14768_v51  ;;  %v19084_v22 = vld [vmem:[#allocation169_spill] sm:$0xff] }
 0x5f2   :  { %v15144_v42 = vpop.xlane.xlu1 %3906 }
 0x5f3   :  { %vm3908_vm13 = vcmp.eq.f32.partialorder %v14670_v38, %v15144_v42  ;;  %v15161_v38 = vpop.xlane.xlu0 %4071 }
 0x5f4   :  { %v3909_v25 = vsel %vm3908_vm13, %v3904_v55, inf  ;;  %v4039_v55 = vcvt.s32.f32 %v4037_v35  ;;  %v4127_v35 = vand.u32 65535, %v19084_v22 }
 0x5f5   :  { %3910 = vmin.xlane.f32.xlu1 %v3909_v25  ;;  %v19080_v25 = vld [vmem:[#allocation166_spill] sm:$0xff] }
 0x5f6   :  { %v15151_v56 = vpop.xlane.xlu1 %3951 }
 0x5f7   :  { %vm3953_vm9 = vcmp.eq.f32.partialorder %v14689_v62, %v15151_v56  ;;  %v15168_v17 = vpop.xlane.xlu0 %4101 }
 0x5f8   :  { %v3954_v27 = vsel %vm3953_vm9, %v3949_v5, inf  ;;  %v4067_v5 = vand.u32 65535, %v19080_v25  ;;  %v4129_v25 = vcvt.s32.f32 %v4127_v35 }
 0x5f9   :  { %3955 = vmin.xlane.f32.xlu0 %v3954_v27 }
 0x5fa   :  { %v15156_v57 = vpop.xlane.xlu1 %3936  ;;  %v4069_v8 = vcvt.s32.f32 %v4067_v5 }
 0x5fb   :  { %vm3938_vm14 = vcmp.eq.f32.partialorder %v14708_v31, %v15156_v57  ;;  %v4007_v31 = vand.u32 65535, %v14737_v53  ;;  %v15181_v37 = vpop.xlane.xlu0 %4131  ;;  %v19079_v53 = vld [vmem:[#allocation165_spill] sm:$0xff] }
 0x5fc   :  { %v3939_v15 = vsel %vm3938_vm14, %v3934_v30, inf  ;;  %vm4043_vm14 = vcmp.eq.f32.partialorder %v19079_v53, %v15149_v13 }
 0x5fd   :  { %3940 = vmin.xlane.f32.xlu1 %v3939_v15  ;;  %v4009_v4 = vcvt.s32.f32 %v4007_v31  ;;  %v4024_v15 = vcvt.s32.f32 %v4022_v61  ;;  %v19083_v31 = vld [vmem:[#allocation168_spill] sm:$0xff]  ;;  %v19086_v61 = vld [vmem:[#allocation171_spill] sm:$0xff] }
 0x5fe   :  { %v15163_v7 = vpop.xlane.xlu1 %3981 }
 0x5ff   :  { %vm3983_vm12 = vcmp.eq.f32.partialorder %v14733_v52, %v15163_v7  ;;  %v3992_v52 = vand.u32 65535, %v14756_v36  ;;  %v4044_v36 = vsel %vm4043_vm14, %v4039_v55, inf  ;;  %v15193_v27 = vpop.xlane.xlu0 %4161  ;;  %vm4103_vm14 = vcmp.eq.f32.partialorder %v19083_v31, %v15168_v17  ;;  %v19085_v55 = vld [vmem:[#allocation170_spill] sm:$0xff] }
 0x600   :  { %v3984_v62 = vsel %vm3983_vm12, %v3979_v19, inf  ;;  %v19081_v19 = vld [vmem:[#allocation167_spill] sm:$0xff] }
 0x601   :  { %3985 = vmin.xlane.f32.xlu0 %v3984_v62  ;;  %v3994_v3 = vcvt.s32.f32 %v3992_v52  ;;  %v4097_v9 = vand.u32 65535, %v19081_v19  ;;  %v19082_v62 = vld [vmem:[#allocation183_spill] sm:$0xff]  ;;  %v4082_v52 = vand.u32 65535, %v14797_v28  ;;  %v19089_v19 = vld [vmem:[#allocation172_spill] sm:$0xff] }
 0x602   :  { %v15170_v29 = vpop.xlane.xlu1 %3966  ;;  %v4052_v51 = vand.u32 65535, %v19082_v62 }
 0x603   :  { %vm3968_vm13 = vcmp.eq.f32.partialorder %v14752_v50, %v15170_v29  ;;  %v4084_v5 = vcvt.s32.f32 %v4082_v52  ;;  %v19092_v52 = vld [vmem:[#allocation174_spill] sm:$0xff] }
 0x604   :  { %v3969_v49 = vsel %vm3968_vm13, %v3964_v0, inf  ;;  %vm4073_vm13 = vcmp.eq.f32.partialorder %v14608_v43, %v15161_v38 }
 0x605   :  { %3970 = vmin.xlane.f32.xlu1 %v3969_v49  ;;  %v4099_v49 = vcvt.s32.f32 %v4097_v9 }
 0x606   :  { %v15175_v59 = vpop.xlane.xlu1 %4011 }
 0x607   :  { %vm4013_vm9 = vcmp.eq.f32.partialorder %v14764_v63, %v15175_v59 }
 0x608   :  { %v4014_v44 = vsel %vm4013_vm9, %v4009_v4, inf  ;;  %v4054_v4 = vcvt.s32.f32 %v4052_v51 }
 0x609   :  { %4015 = vmin.xlane.f32.xlu0 %v4014_v44  ;;  %v15209_v44 = vpop.xlane.xlu0 %4191 }
 0x60a   :  { %v15185_v50 = vpop.xlane.xlu1 %3996 }
 0x60b   :  { %vm3998_vm12 = vcmp.eq.f32.partialorder %v14781_v41, %v15185_v50  ;;  %v4074_v41 = vsel %vm4073_vm13, %v4069_v8, inf  ;;  %vm4133_vm13 = vcmp.eq.f32.partialorder %v19085_v55, %v15181_v37  ;;  %v19088_v8 = vld [vmem:[#allocation187_spill] sm:$0xff] }
 0x60c   :  { %v3999_v63 = vsel %vm3998_vm12, %v3994_v3, inf }
 0x60d   :  { %4045 = vmin.xlane.f32.xlu0 %v4044_v36  ;;  %4000 = vmin.xlane.f32.xlu1 %v3999_v63  ;;  %v4157_v36 = vand.u32 65535, %v19086_v61  ;;  %v19087_v63 = vld [vmem:[#allocation186_spill] sm:$0xff]  ;;  %v15221_v9 = vpop.xlane.xlu0 %4221  ;;  %v19094_v61 = vld [vmem:[#allocation191_spill] sm:$0xff] }
 0x60e   :  { %v15195_v30 = vpop.xlane.xlu1 %4026  ;;  %v4112_v28 = vand.u32 65535, %v19087_v63 }
 0x60f   :  { %vm4028_vm9 = vcmp.eq.f32.partialorder %v14793_v23, %v15195_v30  ;;  %v4104_v23 = vsel %vm4103_vm14, %v4099_v49, inf  ;;  %vm4163_vm14 = vcmp.eq.f32.partialorder %v19089_v19, %v15193_v27  ;;  %v4159_v51 = vcvt.s32.f32 %v4157_v36  ;;  %v19091_v49 = vld [vmem:[#allocation188_spill] sm:$0xff] }
 0x610   :  { %v4029_v0 = vsel %vm4028_vm9, %v4024_v15, inf  ;;  %v4172_v36 = vand.u32 65535, %v19094_v61  ;;  %v19101_v61 = vld [vmem:[#allocation193_spill] sm:$0xff] }
 0x611   :  { %4075 = vmin.xlane.f32.xlu0 %v4074_v41  ;;  %4030 = vmin.xlane.f32.xlu1 %v4029_v0  ;;  %v4114_v41 = vcvt.s32.f32 %v4112_v28  ;;  %v19090_v0 = vld [vmem:[#allocation173_spill] sm:$0xff]  ;;  %v4164_v22 = vsel %vm4163_vm14, %v4159_v51, inf  ;;  %v15237_v63 = vpop.xlane.xlu0 %4251 }
 0x612   :  { %v15203_v43 = vpop.xlane.xlu1 %4056  ;;  %v4187_v31 = vand.u32 65535, %v19090_v0  ;;  %v4174_v19 = vcvt.s32.f32 %v4172_v36  ;;  %v19096_v51 = vld [vmem:[#allocation177_spill] sm:$0xff]  ;;  %v19097_v0 = vld [vmem:[#allocation110_spill] sm:$0xff]  ;;  %v4232_v36 = vand.u32 65535, %v19101_v61  ;;  %v19106_v61 = vld [vmem:[#allocation184_spill] sm:$0xff] }
 0x613   :  { %vm4058_vm12 = vcmp.eq.f32.partialorder %v14810_v2, %v15203_v43  ;;  %v4134_v2 = vsel %vm4133_vm13, %v4129_v25, inf  ;;  %vm4193_vm13 = vcmp.eq.f32.partialorder %v19092_v52, %v15209_v44  ;;  %v19093_v25 = vld [vmem:[#allocation175_spill] sm:$0xff] }
 0x614   :  { %v4059_v53 = vsel %vm4058_vm12, %v4054_v4, inf  ;;  %v4142_v4 = vand.u32 65535, %v19091_v49  ;;  %v19098_v49 = vld [vmem:[#allocation192_spill] sm:$0xff] }
 0x615   :  { %4105 = vmin.xlane.f32.xlu0 %v4104_v23  ;;  %4060 = vmin.xlane.f32.xlu1 %v4059_v53  ;;  %v4189_v53 = vcvt.s32.f32 %v4187_v31  ;;  %v4202_v31 = vand.u32 65535, %v19097_v0  ;;  %v19103_v0 = vld [vmem:[#allocation181_spill] sm:$0xff] }
 0x616   :  { %v15213_v3 = vpop.xlane.xlu1 %4086  ;;  %v4144_v55 = vcvt.s32.f32 %v4142_v4 }
 0x617   :  { %vm4088_vm9 = vcmp.eq.f32.partialorder %v19088_v8, %v15213_v3  ;;  %v19095_v8 = vld [vmem:[#allocation176_spill] sm:$0xff] }
 0x618   :  { %v4089_v15 = vsel %vm4088_vm9, %v4084_v5, inf  ;;  %v4217_v5 = vand.u32 65535, %v19093_v25  ;;  %vm4223_vm14 = vcmp.eq.f32.partialorder %v19095_v8, %v15221_v9  ;;  %v19100_v25 = vld [vmem:[#allocation179_spill] sm:$0xff]  ;;  %v19102_v8 = vld [vmem:[#allocation180_spill] sm:$0xff] }
 0x619   :  { %4135 = vmin.xlane.f32.xlu0 %v4134_v2  ;;  %4090 = vmin.xlane.f32.xlu1 %v4089_v15 }
 0x61a   :  { %v15223_v62 = vpop.xlane.xlu1 %4116  ;;  %v4219_v15 = vcvt.s32.f32 %v4217_v5  ;;  %v4277_v5 = vand.u32 65535, %v19100_v25 }
 0x61b   :  { %vm4118_vm12 = vcmp.eq.f32.partialorder %v14837_v10, %v15223_v62  ;;  %v4194_v10 = vsel %vm4193_vm13, %v4189_v53, inf }
 0x61c   :  { %v4119_v35 = vsel %vm4118_vm12, %v4114_v41, inf  ;;  %v4247_v41 = vand.u32 65535, %v19096_v51  ;;  %v4279_v51 = vcvt.s32.f32 %v4277_v5 }
 0x61d   :  { %4165 = vmin.xlane.f32.xlu0 %v4164_v22  ;;  %4120 = vmin.xlane.f32.xlu1 %v4119_v35  ;;  %v19099_v22 = vld [vmem:[#allocation178_spill] sm:$0xff]  ;;  %v15249_v35 = vpop.xlane.xlu0 %4281 }
 0x61e   :  { %v15231_v23 = vpop.xlane.xlu1 %4146  ;;  %vm4253_vm13 = vcmp.eq.f32.partialorder %v19099_v22, %v15237_v63  ;;  %v4249_v53 = vcvt.s32.f32 %v4247_v41  ;;  %v4234_v41 = vcvt.s32.f32 %v4232_v36  ;;  %v19105_v22 = vld [vmem:[#allocation182_spill] sm:$0xff]  ;;  %v4337_v36 = vand.u32 65535, %v19106_v61 }
 0x61f   :  { %vm4148_vm9 = vcmp.eq.f32.partialorder %v14849_v40, %v15231_v23  ;;  %v4224_v40 = vsel %vm4223_vm14, %v4219_v15, inf  ;;  %vm4283_vm14 = vcmp.eq.f32.partialorder %v19102_v8, %v15249_v35 }
 0x620   :  { %v4149_v28 = vsel %vm4148_vm9, %v4144_v55, inf  ;;  %v4204_v55 = vcvt.s32.f32 %v4202_v31  ;;  %v4307_v31 = vand.u32 65535, %v19103_v0 }
 0x621   :  { %4195 = vmin.xlane.f32.xlu0 %v4194_v10  ;;  %4150 = vmin.xlane.f32.xlu1 %v4149_v28  ;;  %v4254_v10 = vsel %vm4253_vm13, %v4249_v53, inf  ;;  %v15259_v15 = vpop.xlane.xlu0 %4311 }
 0x622   :  { %v15241_v2 = vpop.xlane.xlu1 %4176  ;;  %vm4313_vm13 = vcmp.eq.f32.partialorder %v19105_v22, %v15259_v15  ;;  %v4309_v25 = vcvt.s32.f32 %v4307_v31  ;;  %v4339_v31 = vcvt.s32.f32 %v4337_v36 }
 0x623   :  { %vm4178_vm12 = vcmp.eq.f32.partialorder %v19098_v49, %v15241_v2  ;;  %v19104_v49 = vld [vmem:[#allocation116_spill] sm:$0xff] }
 0x624   :  { %v4179_v4 = vsel %vm4178_vm12, %v4174_v19, inf }
 0x625   :  { %4225 = vmin.xlane.f32.xlu0 %v4224_v40  ;;  %4180 = vmin.xlane.f32.xlu1 %v4179_v4  ;;  %v4262_v40 = vand.u32 65535, %v19104_v49  ;;  %v15269_v53 = vpop.xlane.xlu0 %4341 }
 0x626   :  { %v15251_v52 = vpop.xlane.xlu1 %4206 }
 0x627   :  { %vm4208_vm9 = vcmp.eq.f32.partialorder %v14878_v12, %v15251_v52  ;;  %v4284_v12 = vsel %vm4283_vm14, %v4279_v51, inf  ;;  %v4264_v5 = vcvt.s32.f32 %v4262_v40  ;;  %v19108_v51 = vld [vmem:[#allocation185_spill] sm:$0xff] }
 0x628   :  { %v4209_v28 = vsel %vm4208_vm9, %v4204_v55, inf  ;;  %vm4343_vm14 = vcmp.eq.f32.partialorder %v19108_v51, %v15269_v53  ;;  %v19110_v40 = vld [vmem:[#allocation189_spill] sm:$0xff]  ;;  %v19116_v51 = vld [vmem:[#allocation196_spill] sm:$0xff] }
 0x629   :  { %4255 = vmin.xlane.f32.xlu0 %v4254_v10  ;;  %4210 = vmin.xlane.f32.xlu1 %v4209_v28  ;;  %v19107_v10 = vld [vmem:[#allocation194_spill] sm:$0xff] }
 0x62a   :  { %v15261_v19 = vpop.xlane.xlu1 %4236  ;;  %v4292_v28 = vand.u32 65535, %v19107_v10 }
 0x62b   :  { %vm4238_vm12 = vcmp.eq.f32.partialorder %v14894_v18, %v15261_v19  ;;  %v4314_v18 = vsel %vm4313_vm13, %v4309_v25, inf }
 0x62c   :  { %v4239_v4 = vsel %vm4238_vm12, %v4234_v41, inf  ;;  %v15279_v41 = vpop.xlane.xlu0 %4371  ;;  %v4294_v49 = vcvt.s32.f32 %v4292_v28 }
 0x62d   :  { %4285 = vmin.xlane.f32.xlu0 %v4284_v12  ;;  %4240 = vmin.xlane.f32.xlu1 %v4239_v4  ;;  %19109 = vst [vmem:[#allocation139_spill] sm:$0xff] %v15279_v41  ;;  %v4367_v12 = vand.u32 65535, %v19110_v40  ;;  %v19111_v4 = vld [vmem:[#allocation122_spill] sm:$0xff]  ;;  %v4352_v40 = vand.u32 65535, %v19116_v51 }
 0x62e   :  { %v15271_v55 = vpop.xlane.xlu1 %4266  ;;  %v4322_v22 = vand.u32 65535, %v19111_v4 }
 0x62f   :  { %vm4268_vm9 = vcmp.eq.f32.partialorder %v14906_v16, %v15271_v55  ;;  %v4344_v16 = vsel %vm4343_vm14, %v4339_v31, inf  ;;  %v4369_v36 = vcvt.s32.f32 %v4367_v12 }
 0x630   :  { %v4269_v8 = vsel %vm4268_vm9, %v4264_v5, inf  ;;  %v19112_v5 = vld [vmem:[#allocation190_spill] sm:$0xff]  ;;  %v15289_v61 = vpop.xlane.xlu0 %4401  ;;  %v4324_v28 = vcvt.s32.f32 %v4322_v22  ;;  %v4354_v22 = vcvt.s32.f32 %v4352_v40 }
 0x631   :  { %4315 = vmin.xlane.f32.xlu0 %v4314_v18  ;;  %4270 = vmin.xlane.f32.xlu1 %v4269_v8  ;;  %vm4373_vm13 = vcmp.eq.f32.partialorder %v19112_v5, %v15279_v41  ;;  %19113 = vst [vmem:[#allocation143_spill] sm:$0xff] %v15289_v61  ;;  %v19115_v18 = vld [vmem:[#allocation124_spill] sm:$0xff]  ;;  %v19122_v41 = vld [vmem:[#allocation198_spill] sm:$0xff] }
 0x632   :  { %v15281_v0 = vpop.xlane.xlu1 %4296  ;;  %v4397_v8 = vand.u32 65535, %v19115_v18  ;;  %v19121_v18 = vld [vmem:[#allocation134_spill] sm:$0xff] }
 0x633   :  { %vm4298_vm12 = vcmp.eq.f32.partialorder %v14921_v11, %v15281_v0  ;;  %v4374_v11 = vsel %vm4373_vm13, %v4369_v36, inf  ;;  %v4382_v51 = vand.u32 65535, %v19121_v18 }
 0x634   :  { %v4299_v25 = vsel %vm4298_vm12, %v4294_v49, inf  ;;  %v19117_v49 = vld [vmem:[#allocation113_spill] sm:$0xff]  ;;  %v15299_v4 = vpop.xlane.xlu0 %4431  ;;  %v4399_v12 = vcvt.s32.f32 %v4397_v8 }
 0x635   :  { %4345 = vmin.xlane.f32.xlu0 %v4344_v16  ;;  %4300 = vmin.xlane.f32.xlu1 %v4299_v25  ;;  %vm4403_vm14 = vcmp.eq.f32.partialorder %v19117_v49, %v15289_v61  ;;  %19118 = vst [vmem:[#allocation148_spill] sm:$0xff] %v15299_v4  ;;  %v19120_v25 = vld [vmem:[#allocation128_spill] sm:$0xff]  ;;  %v4384_v40 = vcvt.s32.f32 %v4382_v51  ;;  %v19126_v49 = vld [vmem:[#allocation195_spill] sm:$0xff] }
 0x636   :  { %v15291_v10 = vpop.xlane.xlu1 %4326  ;;  %v4427_v5 = vand.u32 65535, %v19120_v25  ;;  %v4457_v25 = vand.u32 65535, %v19126_v49  ;;  %v19127_v61 = vld [vmem:[#allocation199_spill] sm:$0xff] }
 0x637   :  { %19114 = vst [vmem:[#allocation145_spill] sm:$0xff] %v15291_v10  ;;  %vm4328_vm9 = vcmp.eq.f32.partialorder %v14933_v20, %v15291_v10  ;;  %v4404_v20 = vsel %vm4403_vm14, %v4399_v12, inf  ;;  %v4412_v18 = vand.u32 65535, %v19127_v61  ;;  %v4442_v61 = vand.u32 65535, %v14972_v1 }
 0x638   :  { %v4329_v31 = vsel %vm4328_vm9, %v4324_v28, inf  ;;  %v19123_v28 = vld [vmem:[#allocation119_spill] sm:$0xff]  ;;  %v4429_v8 = vcvt.s32.f32 %v4427_v5  ;;  %v4459_v5 = vcvt.s32.f32 %v4457_v25 }
 0x639   :  { %4375 = vmin.xlane.f32.xlu0 %v4374_v11  ;;  %4330 = vmin.xlane.f32.xlu1 %v4329_v31  ;;  %vm4433_vm13 = vcmp.eq.f32.partialorder %v19123_v28, %v15299_v4  ;;  %v15309_v11 = vpop.xlane.xlu0 %4461  ;;  %v4414_v51 = vcvt.s32.f32 %v4412_v18  ;;  %v19131_v28 = vld [vmem:[#allocation197_spill] sm:$0xff]  ;;  %v19132_v4 = vld [vmem:[#allocation203_spill] sm:$0xff]  ;;  %v4444_v18 = vcvt.s32.f32 %v4442_v61 }
 0x63a   :  { %v15301_v16 = vpop.xlane.xlu1 %4356  ;;  %19124 = vst [vmem:[#allocation150_spill] sm:$0xff] %v15309_v11  ;;  %v4487_v49 = vand.u32 65535, %v19131_v28 }
 0x63b   :  { %19119 = vst [vmem:[#allocation147_spill] sm:$0xff] %v15301_v16  ;;  %vm4358_vm12 = vcmp.eq.f32.partialorder %v19122_v41, %v15301_v16  ;;  %v4434_v41 = vsel %vm4433_vm13, %v4429_v8, inf }
 0x63c   :  { %v4359_v36 = vsel %vm4358_vm12, %v4354_v22, inf  ;;  %v19128_v22 = vld [vmem:[#allocation126_spill] sm:$0xff]  ;;  %v4489_v25 = vcvt.s32.f32 %v4487_v49 }
 0x63d   :  { %4405 = vmin.xlane.f32.xlu0 %v4404_v20  ;;  %4360 = vmin.xlane.f32.xlu1 %v4359_v36  ;;  %vm4463_vm14 = vcmp.eq.f32.partialorder %v19128_v22, %v15309_v11  ;;  %v15319_v20 = vpop.xlane.xlu0 %4491  ;;  %v19136_v22 = vld [vmem:[#allocation201_spill] sm:$0xff]  ;;  %v19137_v11 = vld [vmem:[#allocation204_spill] sm:$0xff]  ;;  %v19138_v49 = vld [vmem:[#allocation202_spill] sm:$0xff] }
 0x63e   :  { %v15311_v31 = vpop.xlane.xlu1 %4386  ;;  %19129 = vst [vmem:[#allocation154_spill] sm:$0xff] %v15319_v20  ;;  %v4517_v28 = vand.u32 65535, %v19136_v22  ;;  %v4472_v1 = vand.u32 65535, %v19137_v11  ;;  %v19141_v22 = vld [vmem:[#allocation207_spill] sm:$0xff] }
 0x63f   :  { %19125 = vst [vmem:[#allocation151_spill] sm:$0xff] %v15311_v31  ;;  %vm4388_vm9 = vcmp.eq.f32.partialorder %v14968_v26, %v15311_v31  ;;  %v4464_v26 = vsel %vm4463_vm14, %v4459_v5, inf  ;;  %v5528_v5 = vld [vmem:[%s18383_s2 + $0x168] sm:$0xff] }
 0x640   :  { %v4389_v12 = vsel %vm4388_vm9, %v4384_v40, inf  ;;  %v19133_v40 = vld [vmem:[#allocation132_spill] sm:$0xff] }
 0x641   :  { %4435 = vmin.xlane.f32.xlu0 %v4434_v41  ;;  %4390 = vmin.xlane.f32.xlu1 %v4389_v12  ;;  %vm4493_vm13 = vcmp.eq.f32.partialorder %v19133_v40, %v15319_v20  ;;  %v4474_v40 = vcvt.s32.f32 %v4472_v1  ;;  %v19142_v20 = vld [vmem:[#allocation206_spill] sm:$0xff] }
 0x642   :  { %v15321_v36 = vpop.xlane.xlu1 %4416  ;;  %v15329_v41 = vpop.xlane.xlu0 %4521 }
 0x643   :  { %19130 = vst [vmem:[#allocation153_spill] sm:$0xff] %v15321_v36  ;;  %vm4418_vm12 = vcmp.eq.f32.partialorder %v19132_v4, %v15321_v36  ;;  %19134 = vst [vmem:[#allocation155_spill] sm:$0xff] %v15329_v41  ;;  %v5527_v4 = vld [vmem:[%s18383_s2 + $0x160] sm:$0xff]  ;;  %vm4523_vm14 = vcmp.eq.f32.partialorder %v19138_v49, %v15329_v41  ;;  %v4502_v36 = vand.u32 65535, %v19142_v20 }
 0x644   :  { %v4419_v8 = vsel %vm4418_vm12, %v4414_v51, inf  ;;  %v4494_v51 = vsel %vm4493_vm13, %v4489_v25, inf  ;;  %v19143_v25 = vld [vmem:[#allocation209_spill] sm:$0xff]  ;;  %v19148_v41 = vld [vmem:[#allocation212_spill] sm:$0xff] }
 0x645   :  { %4465 = vmin.xlane.f32.xlu0 %v4464_v26  ;;  %4420 = vmin.xlane.f32.xlu1 %v4419_v8  ;;  %v11585_v8 = vpack.c.bf16 %v5528_v5, %v5527_v4  ;;  %v19144_v5 = vld [vmem:[#allocation208_spill] sm:$0xff]  ;;  %v4504_v1 = vcvt.s32.f32 %v4502_v36  ;;  %v19152_v36 = vld [vmem:[#allocation214_spill] sm:$0xff] }
 0x646   :  { %v15331_v12 = vpop.xlane.xlu1 %4446 }
 0x647   :  { %19135 = vst [vmem:[#allocation157_spill] sm:$0xff] %v15331_v12  ;;  %vm4448_vm9 = vcmp.eq.f32.partialorder %v14998_v6, %v15331_v12  ;;  %v4519_v6 = vcvt.s32.f32 %v4517_v28  ;;  %v4547_v12 = vand.u32 65535, %v19141_v22  ;;  %11586 = vmatprep.subr.bf16.mxu1 %v11585_v8  ;;  %v19147_v22 = vld [vmem:[#allocation210_spill] sm:$0xff] }
 0x648   :  { %v4449_v26 = vsel %vm4448_vm9, %v4444_v18, inf  ;;  %11588 = vmatpush3.bf16.msra.mxu1 %v11585_v8  ;;  %v4532_v20 = vand.u32 65535, %v19147_v22 }
 0x649   :  { %4495 = vmin.xlane.f32.xlu0 %v4494_v51  ;;  %4450 = vmin.xlane.f32.xlu1 %v4449_v26  ;;  %v4524_v18 = vsel %vm4523_vm14, %v4519_v6, inf  ;;  %v4549_v28 = vcvt.s32.f32 %v4547_v12  ;;  %v19146_v26 = vld [vmem:[#allocation213_spill] sm:$0xff] }
 0x64a   :  { %v15345_v11 = vpop.xlane.xlu0 %4551  ;;  %v15347_v61 = vpop.xlane.xlu1 %4476  ;;  %v4577_v49 = vand.u32 65535, %v19146_v26  ;;  %v19153_v26 = vld [vmem:[#allocation215_spill] sm:$0xff] }
 0x64b   :  { %19139 = vst [vmem:[#allocation156_spill] sm:$0xff] %v15345_v11  ;;  %19140 = vst [vmem:[#allocation158_spill] sm:$0xff] %v15347_v61  ;;  %vm4478_vm12 = vcmp.eq.f32.partialorder %v19143_v25, %v15347_v61  ;;  %vm4553_vm13 = vcmp.eq.f32.partialorder %v19144_v5, %v15345_v11  ;;  %v19151_v5 = vld [vmem:[#allocation216_spill] sm:$0xff] }
 0x64c   :  { %v4479_v4 = vsel %vm4478_vm12, %v4474_v40, inf  ;;  %v4554_v25 = vsel %vm4553_vm13, %v4549_v28, inf  ;;  %v4562_v12 = vand.u32 65535, %v19151_v5 }
 0x64d   :  { %4525 = vmin.xlane.f32.xlu0 %v4524_v18  ;;  %4480 = vmin.xlane.f32.xlu1 %v4479_v4  ;;  %v4579_v18 = vcvt.s32.f32 %v4577_v49  ;;  %v4534_v4 = vcvt.s32.f32 %v4532_v20  ;;  %v19156_v49 = vld [vmem:[#allocation217_spill] sm:$0xff] }
 0x64e   :  { %v15355_v51 = vpop.xlane.xlu1 %4506 }
 0x64f   :  { %19145 = vst [vmem:[#allocation160_spill] sm:$0xff] %v15355_v51  ;;  %vm4508_vm9 = vcmp.eq.f32.partialorder %v19148_v41, %v15355_v51 }
 0x650   :  { %v4509_v8 = vsel %vm4508_vm9, %v4504_v1, inf  ;;  %v4564_v1 = vcvt.s32.f32 %v4562_v12  ;;  %v3673_v12 = vcvt.f32.s32 %v14981_v32 }
 0x651   :  { %4555 = vmin.xlane.f32.xlu0 %v4554_v25  ;;  %4510 = vmin.xlane.f32.xlu1 %v4509_v8  ;;  %v19155_v25 = vld [vmem:[#allocation218_spill] sm:$0xff] }
 0x652   :  { %v15361_v6 = vpop.xlane.xlu0 %4581  ;;  %v15363_v40 = vpop.xlane.xlu1 %4536  ;;  %v4607_v8 = vand.u32 65535, %v19155_v25  ;;  %v3674_v11 = vshll.u32 %v3673_v12, 16 }
 0x653   :  { %19149 = vst [vmem:[#allocation159_spill] sm:$0xff] %v15361_v6  ;;  %19150 = vst [vmem:[#allocation161_spill] sm:$0xff] %v15363_v40  ;;  %vm4583_vm14 = vcmp.eq.f32.partialorder %v19152_v36, %v15361_v6  ;;  %vm4538_vm12 = vcmp.eq.f32.partialorder %v19153_v26, %v15363_v40  ;;  %v19158_v6 = vld [vmem:[#allocation219_spill] sm:$0xff]  ;;  %v19159_v26 = vld [vmem:[#allocation200_spill] sm:$0xff] }
 0x654   :  { %v4584_v22 = vsel %vm4583_vm14, %v4579_v18, inf  ;;  %v4539_v41 = vsel %vm4538_vm12, %v4534_v4, inf  ;;  %v4609_v36 = vcvt.s32.f32 %v4607_v8  ;;  %v4592_v51 = vand.u32 65535, %v19158_v6  ;;  %v19160_v4 = vld [vmem:[#allocation138_spill] sm:$0xff]  ;;  %v19162_v8 = vld [vmem:[#allocation141_spill] sm:$0xff] }
 0x655   :  { %4585 = vmin.xlane.f32.xlu0 %v4584_v22  ;;  %4540 = vmin.xlane.f32.xlu1 %v4539_v41  ;;  %v3688_v18 = vcvt.f32.s32 %v19159_v26 }
 0x656   :  { %v15370_v28 = vpop.xlane.xlu1 %4566 }
 0x657   :  { %19154 = vst [vmem:[#allocation162_spill] sm:$0xff] %v15370_v28  ;;  %vm4568_vm13 = vcmp.eq.f32.partialorder %v19156_v49, %v15370_v28  ;;  %v4594_v49 = vcvt.s32.f32 %v4592_v51 }
 0x658   :  { %v4569_v20 = vsel %vm4568_vm13, %v4564_v1, inf  ;;  %v3689_v1 = vshll.u32 %v3688_v18, 16 }
 0x659   :  { %4570 = vmin.xlane.f32.xlu1 %v4569_v20  ;;  %v19161_v20 = vld [vmem:[#allocation205_spill] sm:$0xff] }
 0x65a   :  { %v15375_v5 = vpop.xlane.xlu0 %4611  ;;  %v3718_v28 = vcvt.f32.s32 %v19161_v20  ;;  %v3733_v20 = vcvt.f32.s32 %v15036_v47  ;;  %v19164_v47 = vld [vmem:[#allocation5_spill] sm:$0xff] }
 0x65b   :  { %19157 = vst [vmem:[#allocation163_spill] sm:$0xff] %v15375_v5  ;;  %vm4613_vm9 = vcmp.eq.f32.partialorder %v19160_v4, %v15375_v5  ;;  %v19163_v5 = vld [vmem:[#allocation211_spill] sm:$0xff] }
 0x65c   :  { %v4614_v22 = vsel %vm4613_vm9, %v4609_v36, inf  ;;  %v3703_v36 = vcvt.f32.s32 %v15010_v39  ;;  %v3719_v32 = vshll.u32 %v3718_v28, 16  ;;  %v3748_v61 = vcvt.f32.s32 %v19163_v5  ;;  %v5529_v28 = vld [vmem:[%s18383_s2 + $0x170] sm:$0xff]  ;;  %v5530_v5 = vld [vmem:[%s18383_s2 + $0x178] sm:$0xff] }
 0x65d   :  { %4615 = vmin.xlane.f32.xlu0 %v4614_v22 }
 0x65e   :  { %v3686_v41 = vpop.xlane.xlu0 %3685  ;;  %v15382_v25 = vpop.xlane.xlu1 %4596  ;;  %v3704_v10 = vshll.u32 %v3703_v36, 16  ;;  %v3749_v12 = vshll.u32 %v3748_v61, 16  ;;  %v3763_v61 = vcvt.f32.s32 %v15061_v21  ;;  %v3793_v21 = vcvt.f32.s32 %v15085_v48 }
 0x65f   :  { %v3687_v40 = vcvt.f32.s32 %v3686_v41  ;;  %vm4598_vm14 = vcmp.eq.f32.partialorder %v19162_v8, %v15382_v25 }
 0x660   :  { %v4599_v6 = vsel %vm4598_vm14, %v4594_v49, inf  ;;  %v3778_v49 = vcvt.f32.s32 %v15050_v58 }
 0x661   :  { %v3690_v26 = vadd.s32 %v3689_v1, %v3687_v40  ;;  %4600 = vmin.xlane.f32.xlu1 %v4599_v6 }
 0x662   :  { %v3716_v4 = vpop.xlane.xlu0 %3715  ;;  %v3671_v22 = vpop.xlane.xlu1 %3670 }
 0x663   :  { %v3717_v31 = vcvt.f32.s32 %v3716_v4  ;;  %v3672_v51 = vcvt.f32.s32 %v3671_v22  ;;  %v9694_v18 = vadd.s32 4294967264, %v3690_v26  ;;  %v3734_v26 = vshll.u32 %v3733_v20, 16 }
 0x664   :  { %v3808_v4 = vcvt.f32.s32 %v15074_v33 }
 0x665   :  { %v3720_v41 = vadd.s32 %v3719_v32, %v3717_v31  ;;  %v3675_v16 = vadd.s32 %v3674_v11, %v3672_v51  ;;  %vm4686_vm12 = vcmp.eq.s32.totalorder %v9694_v18, %v19164_v47  ;;  %v11589_v11 = vpack.c.bf16 %v5530_v5, %v5529_v28 }
 0x666   :  { %v3746_v40 = vpop.xlane.xlu0 %3745  ;;  %v3701_v1 = vpop.xlane.xlu1 %3700  ;;  %v19165_v51 = vmov 0.0  }
 0x667   :  { %v9693_v8 = vadd.s32 4294967264, %v3675_v16  ;;  %v3747_v39 = vcvt.f32.s32 %v3746_v40  ;;  %v3702_v6 = vcvt.f32.s32 %v3701_v1  ;;  %v9696_v31 = vadd.s32 4294967264, %v3720_v41  ;;  %11590 = vmatprep.subr.bf16.mxu1 %v11589_v11 }
 0x668   :  { %v3779_v16 = vshll.u32 %v3778_v49, 16  ;;  %v9758_v1 = vsel %vm4686_vm12, 1.0, %v19165_v51  ;;  %11592 = vmatpush3.bf16.msra.mxu1 %v11589_v11  ;;  %v3764_v49 = vshll.u32 %v3763_v61, 16 }
 0x669   :  { %v3750_v58 = vadd.s32 %v3749_v12, %v3747_v39  ;;  %v3705_v36 = vadd.s32 %v3704_v10, %v3702_v6  ;;  %vm4685_vm13 = vcmp.eq.s32.totalorder %v9693_v8, %v19164_v47  ;;  %vm4688_vm9 = vcmp.eq.s32.totalorder %v9696_v31, %v19164_v47 }
 0x66a   :  { %v3776_v22 = vpop.xlane.xlu0 %3775  ;;  %v3731_v32 = vpop.xlane.xlu1 %3730  ;;  %v9757_v40 = vsel %vm4685_vm13, 1.0, %v19165_v51  ;;  %v3809_v12 = vshll.u32 %v3808_v4, 16  ;;  %v3838_v8 = vcvt.f32.s32 %v15093_v34  ;;  %v9760_v31 = vsel %vm4688_vm9, 1.0, %v19165_v51 }
 0x66b   :  { %v9695_v18 = vadd.s32 4294967264, %v3705_v36  ;;  %v3777_v41 = vcvt.f32.s32 %v3776_v22  ;;  %v3732_v28 = vcvt.f32.s32 %v3731_v32  ;;  %11097 = vmatprep.mubr.msk.f32.mxu0 %vm476_vm0, %v9757_v40  ;;  %v9698_v10 = vadd.s32 4294967264, %v3750_v58 }
 0x66c   :  { %11098 = vmatmul.mubr.msk.f32.vlgmr.msra.gmra.mrb[130].mxu0 %vm476_vm0, %v9758_v1  ;;  %v3839_v34 = vshll.u32 %v3838_v8, 16  ;;  %v3823_v4 = vcvt.f32.s32 %v15101_v60  ;;  %v3868_v22 = vcvt.f32.s32 %v15109_v46 }
 0x66d   :  { %v3780_v33 = vadd.s32 %v3779_v16, %v3777_v41  ;;  %v3735_v20 = vadd.s32 %v3734_v26, %v3732_v28  ;;  %vm4687_vm14 = vcmp.eq.s32.totalorder %v9695_v18, %v19164_v47  ;;  %vm4690_vm12 = vcmp.eq.s32.totalorder %v9698_v10, %v19164_v47 }
 0x66e   :  { %v3806_v39 = vpop.xlane.xlu0 %3805  ;;  %v3761_v6 = vpop.xlane.xlu1 %3760  ;;  %v9759_v5 = vsel %vm4687_vm14, 1.0, %v19165_v51  ;;  %v3794_v26 = vshll.u32 %v3793_v21, 16  ;;  %v9762_v10 = vsel %vm4690_vm12, 1.0, %v19165_v51  ;;  %v3853_v21 = vcvt.f32.s32 %v15117_v54 }
 0x66f   :  { %v9697_v11 = vadd.s32 4294967264, %v3735_v20  ;;  %v3807_v58 = vcvt.f32.s32 %v3806_v39  ;;  %v3762_v36 = vcvt.f32.s32 %v3761_v6  ;;  %11100 = vmatprep.mubr.msk.f32.mxu0 %vm476_vm0, %v9759_v5  ;;  %v9700_v48 = vadd.s32 4294967264, %v3780_v33 }
 0x670   :  { %11101 = vmatmul.mubr.msk.f32.gmra.mrb[132].mxu0 %vm476_vm0, %v9760_v31  ;;  %v3898_v33 = vcvt.f32.s32 %v15125_v14 }
 0x671   :  { %v3810_v16 = vadd.s32 %v3809_v12, %v3807_v58  ;;  %v3765_v61 = vadd.s32 %v3764_v49, %v3762_v36  ;;  %vm4689_vm13 = vcmp.eq.s32.totalorder %v9697_v11, %v19164_v47  ;;  %vm4692_vm9 = vcmp.eq.s32.totalorder %v9700_v48, %v19164_v47  ;;  %v5531_v48 = vld [vmem:[%s18383_s2 + $0x180] sm:$0xff] }
 0x672   :  { %v3836_v32 = vpop.xlane.xlu0 %3835  ;;  %v3791_v40 = vpop.xlane.xlu1 %3790  ;;  %v9761_v1 = vsel %vm4689_vm13, 1.0, %v19165_v51  ;;  %v3824_v49 = vshll.u32 %v3823_v4, 16  ;;  %v3869_v12 = vshll.u32 %v3868_v22, 16  ;;  %v9764_v14 = vsel %vm4692_vm9, 1.0, %v19165_v51  ;;  %v5534_v22 = vld [vmem:[%s18383_s2 + $0x198] sm:$0xff] }
 0x673   :  { %v9699_v18 = vadd.s32 4294967264, %v3765_v61  ;;  %v3837_v41 = vcvt.f32.s32 %v3836_v32  ;;  %v3792_v28 = vcvt.f32.s32 %v3791_v40  ;;  %11103 = vmatprep.mubr.msk.f32.mxu0 %vm476_vm0, %v9761_v1  ;;  %v9702_v20 = vadd.s32 4294967264, %v3810_v16  ;;  %v5533_v16 = vld [vmem:[%s18383_s2 + $0x190] sm:$0xff] }
 0x674   :  { %11104 = vmatmul.mubr.msk.f32.gmra.mrb[134].mxu0 %vm476_vm0, %v9762_v10  ;;  %v3854_v58 = vshll.u32 %v3853_v21, 16  ;;  %v3899_v36 = vshll.u32 %v3898_v33, 16  ;;  %v3883_v61 = vcvt.f32.s32 %v15133_v24  ;;  %v3928_v32 = vcvt.f32.s32 %v15139_v45 }
 0x675   :  { %v3840_v60 = vadd.s32 %v3839_v34, %v3837_v41  ;;  %v3795_v46 = vadd.s32 %v3794_v26, %v3792_v28  ;;  %vm4691_vm14 = vcmp.eq.s32.totalorder %v9699_v18, %v19164_v47  ;;  %vm4694_vm12 = vcmp.eq.s32.totalorder %v9702_v20, %v19164_v47  ;;  %v5532_v26 = vld [vmem:[%s18383_s2 + $0x188] sm:$0xff] }
 0x676   :  { %v3866_v8 = vpop.xlane.xlu0 %3865  ;;  %v3821_v39 = vpop.xlane.xlu1 %3820  ;;  %v9763_v6 = vsel %vm4691_vm14, 1.0, %v19165_v51  ;;  %v11593_v41 = vpack.c.bf16 %v5532_v26, %v5531_v48  ;;  %v11597_v28 = vpack.c.bf16 %v5534_v22, %v5533_v16  ;;  %v9766_v24 = vsel %vm4694_vm12, 1.0, %v19165_v51 }
 0x677   :  { %v9701_v5 = vadd.s32 4294967264, %v3795_v46  ;;  %v3867_v11 = vcvt.f32.s32 %v3866_v8  ;;  %v3822_v54 = vcvt.f32.s32 %v3821_v39  ;;  %11106 = vmatprep.mubr.msk.f32.mxu0 %vm476_vm0, %v9763_v6  ;;  %v9704_v31 = vadd.s32 4294967264, %v3840_v60 }
 0x678   :  { %11107 = vmatmul.mubr.msk.f32.gmra.mrb[136].mxu0 %vm476_vm0, %v9764_v14  ;;  %11594 = vmatprep.subr.bf16.mxu1 %v11593_v41  ;;  %v3913_v8 = vcvt.f32.s32 %v15144_v42  ;;  %v3958_v48 = vcvt.f32.s32 %v15151_v56 }
 0x679   :  { %v3870_v34 = vadd.s32 %v3869_v12, %v3867_v11  ;;  %v3825_v4 = vadd.s32 %v3824_v49, %v3822_v54  ;;  %vm4693_vm13 = vcmp.eq.s32.totalorder %v9701_v5, %v19164_v47  ;;  %vm4696_vm9 = vcmp.eq.s32.totalorder %v9704_v31, %v19164_v47  ;;  %11596 = vmatpush3.bf16.msra.mxu1 %v11593_v41 }
 0x67a   :  { %v3896_v40 = vpop.xlane.xlu0 %3895  ;;  %v3851_v1 = vpop.xlane.xlu1 %3850  ;;  %v9765_v18 = vsel %vm4693_vm13, 1.0, %v19165_v51  ;;  %v3884_v49 = vshll.u32 %v3883_v61, 16  ;;  %v3929_v12 = vshll.u32 %v3928_v32, 16  ;;  %11598 = vmatprep.subr.bf16.mxu1 %v11597_v28  ;;  %v9768_v14 = vsel %vm4696_vm9, 1.0, %v19165_v51 }
 0x67b   :  { %v9703_v10 = vadd.s32 4294967264, %v3825_v4  ;;  %v3897_v21 = vcvt.f32.s32 %v3896_v40  ;;  %v3852_v33 = vcvt.f32.s32 %v3851_v1  ;;  %11109 = vmatprep.mubr.msk.f32.mxu0 %vm476_vm0, %v9765_v18  ;;  %v9706_v60 = vadd.s32 4294967264, %v3870_v34 }
 0x67c   :  { %11110 = vmatmul.mubr.msk.f32.gmra.mrb[138].mxu0 %vm476_vm0, %v9766_v24  ;;  %v3914_v61 = vshll.u32 %v3913_v8, 16  ;;  %v3959_v40 = vshll.u32 %v3958_v48, 16  ;;  %v3943_v18 = vcvt.f32.s32 %v15156_v57 }
 0x67d   :  { %v3900_v45 = vadd.s32 %v3899_v36, %v3897_v21  ;;  %v3855_v46 = vadd.s32 %v3854_v58, %v3852_v33  ;;  %vm4695_vm14 = vcmp.eq.s32.totalorder %v9703_v10, %v19164_v47  ;;  %vm4698_vm12 = vcmp.eq.s32.totalorder %v9706_v60, %v19164_v47  ;;  %11600 = vmatpush3.bf16.msra.mxu1 %v11597_v28 }
 0x67e   :  { %v3881_v39 = vpop.xlane.xlu1 %3880  ;;  %v3926_v6 = vpop.xlane.xlu0 %3925  ;;  %v9767_v20 = vsel %vm4695_vm14, 1.0, %v19165_v51  ;;  %v9770_v4 = vsel %vm4698_vm12, 1.0, %v19165_v51  ;;  %v3944_v60 = vshll.u32 %v3943_v18, 16 }
 0x67f   :  { %v9705_v5 = vadd.s32 4294967264, %v3855_v46  ;;  %v3882_v11 = vcvt.f32.s32 %v3881_v39  ;;  %v3927_v54 = vcvt.f32.s32 %v3926_v6  ;;  %11112 = vmatprep.mubr.msk.f32.mxu0 %vm476_vm0, %v9767_v20  ;;  %v9708_v58 = vadd.s32 4294967264, %v3900_v45 }
 0x680   :  { %11113 = vmatmul.mubr.msk.f32.gmra.mrb[140].mxu0 %vm476_vm0, %v9768_v14  ;;  %v3988_v45 = vcvt.f32.s32 %v15163_v7  ;;  %v3973_v6 = vcvt.f32.s32 %v15170_v29 }
 0x681   :  { %v3885_v42 = vadd.s32 %v3884_v49, %v3882_v11  ;;  %v3930_v36 = vadd.s32 %v3929_v12, %v3927_v54  ;;  %vm4697_vm13 = vcmp.eq.s32.totalorder %v9705_v5, %v19164_v47  ;;  %vm4700_vm9 = vcmp.eq.s32.totalorder %v9708_v58, %v19164_v47 }
 0x682   :  { %v9769_v26 = vsel %vm4697_vm13, 1.0, %v19165_v51  ;;  %v3911_v16 = vpop.xlane.xlu1 %3910  ;;  %v9772_v10 = vsel %vm4700_vm9, 1.0, %v19165_v51  ;;  %v3989_v39 = vshll.u32 %v3988_v45, 16  ;;  %v3974_v14 = vshll.u32 %v3973_v6, 16 }
 0x683   :  { %v9707_v34 = vadd.s32 4294967264, %v3885_v42  ;;  %11115 = vmatprep.mubr.msk.f32.mxu0 %vm476_vm0, %v9769_v26  ;;  %v3912_v31 = vcvt.f32.s32 %v3911_v16  ;;  %v9710_v22 = vadd.s32 4294967264, %v3930_v36  ;;  %v4018_v58 = vcvt.f32.s32 %v15175_v59 }
 0x684   :  { %11116 = vmatmul.mubr.msk.f32.gmra.mrb[142].mxu0 %vm476_vm0, %v9770_v4  ;;  %v4048_v26 = vcvt.f32.s32 %v15149_v13  ;;  %v4003_v16 = vcvt.f32.s32 %v15185_v50  ;;  %v4033_v13 = vcvt.f32.s32 %v15195_v30 }
 0x685   :  { %v3915_v32 = vadd.s32 %v3914_v61, %v3912_v31  ;;  %vm4699_vm14 = vcmp.eq.s32.totalorder %v9707_v34, %v19164_v47  ;;  %vm4702_vm12 = vcmp.eq.s32.totalorder %v9710_v22, %v19164_v47  ;;  %v4019_v34 = vshll.u32 %v4018_v58, 16 }
 0x686   :  { %v3956_v56 = vpop.xlane.xlu0 %3955  ;;  %v9771_v1 = vsel %vm4699_vm14, 1.0, %v19165_v51  ;;  %v9774_v46 = vsel %vm4702_vm12, 1.0, %v19165_v51  ;;  %v4049_v22 = vshll.u32 %v4048_v26, 16 }
 0x687   :  { %v9709_v41 = vadd.s32 4294967264, %v3915_v32  ;;  %v3957_v28 = vcvt.f32.s32 %v3956_v56  ;;  %11118 = vmatprep.mubr.msk.f32.mxu0 %vm476_vm0, %v9771_v1  ;;  %v4078_v32 = vcvt.f32.s32 %v15161_v38  ;;  %v4108_v38 = vcvt.f32.s32 %v15168_v17 }
 0x688   :  { %11119 = vmatmul.mubr.msk.f32.gmra.mrb[144].mxu0 %vm476_vm0, %v9772_v10  ;;  %v4093_v17 = vcvt.f32.s32 %v15213_v3  ;;  %v4168_v3 = vcvt.f32.s32 %v15193_v27  ;;  %v4198_v27 = vcvt.f32.s32 %v15209_v44 }
 0x689   :  { %v3960_v21 = vadd.s32 %v3959_v40, %v3957_v28  ;;  %vm4701_vm13 = vcmp.eq.s32.totalorder %v9709_v41, %v19164_v47  ;;  %v4004_v40 = vshll.u32 %v4003_v16, 16 }
 0x68a   :  { %v3941_v33 = vpop.xlane.xlu1 %3940  ;;  %v9773_v24 = vsel %vm4701_vm13, 1.0, %v19165_v51  ;;  %v4094_v16 = vshll.u32 %v4093_v17, 16 }
 0x68b   :  { %v3942_v57 = vcvt.f32.s32 %v3941_v33  ;;  %11121 = vmatprep.mubr.msk.f32.mxu0 %vm476_vm0, %v9773_v24  ;;  %v9712_v49 = vadd.s32 4294967264, %v3960_v21  ;;  %v4079_v24 = vshll.u32 %v4078_v32, 16 }
 0x68c   :  { %11122 = vmatmul.mubr.msk.f32.gmra.mrb[146].mxu0 %vm476_vm0, %v9774_v46  ;;  %v4034_v46 = vshll.u32 %v4033_v13, 16 }
 0x68d   :  { %v3945_v12 = vadd.s32 %v3944_v60, %v3942_v57  ;;  %vm4704_vm9 = vcmp.eq.s32.totalorder %v9712_v49, %v19164_v47  ;;  %v4063_v60 = vcvt.f32.s32 %v15203_v43 }
 0x68e   :  { %v3986_v8 = vpop.xlane.xlu0 %3985  ;;  %v9776_v36 = vsel %vm4704_vm9, 1.0, %v19165_v51 }
 0x68f   :  { %v9711_v20 = vadd.s32 4294967264, %v3945_v12  ;;  %v3987_v5 = vcvt.f32.s32 %v3986_v8 }
 0x691   :  { %v3990_v11 = vadd.s32 %v3989_v39, %v3987_v5  ;;  %vm4703_vm14 = vcmp.eq.s32.totalorder %v9711_v20, %v19164_v47  ;;  %v4138_v39 = vcvt.f32.s32 %v15181_v37  ;;  %v4109_v5 = vshll.u32 %v4108_v38, 16 }
 0x692   :  { %v3971_v7 = vpop.xlane.xlu1 %3970  ;;  %v9775_v54 = vsel %vm4703_vm14, 1.0, %v19165_v51 }
 0x693   :  { %v3972_v42 = vcvt.f32.s32 %v3971_v7  ;;  %11124 = vmatprep.mubr.msk.f32.mxu0 %vm476_vm0, %v9775_v54  ;;  %v9714_v48 = vadd.s32 4294967264, %v3990_v11  ;;  %v4064_v11 = vshll.u32 %v4063_v60, 16  ;;  %v4199_v60 = vshll.u32 %v4198_v27, 16 }
 0x694   :  { %11125 = vmatmul.mubr.msk.f32.gmra.mrb[148].mxu0 %vm476_vm0, %v9776_v36 }
 0x695   :  { %v3975_v29 = vadd.s32 %v3974_v14, %v3972_v42  ;;  %vm4706_vm12 = vcmp.eq.s32.totalorder %v9714_v48, %v19164_v47  ;;  %v4139_v48 = vshll.u32 %v4138_v39, 16 }
 0x696   :  { %v4016_v61 = vpop.xlane.xlu0 %4015  ;;  %v9778_v28 = vsel %vm4706_vm12, 1.0, %v19165_v51 }
 0x697   :  { %v9713_v31 = vadd.s32 4294967264, %v3975_v29  ;;  %v4017_v4 = vcvt.f32.s32 %v4016_v61  ;;  %v4123_v61 = vcvt.f32.s32 %v15223_v62 }
 0x699   :  { %v4020_v59 = vadd.s32 %v4019_v34, %v4017_v4  ;;  %vm4705_vm13 = vcmp.eq.s32.totalorder %v9713_v31, %v19164_v47  ;;  %v4124_v13 = vshll.u32 %v4123_v61, 16 }
 0x69a   :  { %v4046_v56 = vpop.xlane.xlu0 %4045  ;;  %v4001_v1 = vpop.xlane.xlu1 %4000  ;;  %v9777_v18 = vsel %vm4705_vm13, 1.0, %v19165_v51 }
 0x69b   :  { %v4047_v50 = vcvt.f32.s32 %v4046_v56  ;;  %v4002_v41 = vcvt.f32.s32 %v4001_v1  ;;  %11127 = vmatprep.mubr.msk.f32.mxu0 %vm476_vm0, %v9777_v18  ;;  %v9716_v10 = vadd.s32 4294967264, %v4020_v59  ;;  %v4169_v18 = vshll.u32 %v4168_v3, 16 }
 0x69c   :  { %11128 = vmatmul.mubr.msk.f32.gmra.mrb[150].mxu0 %vm476_vm0, %v9778_v28 }
 0x69d   :  { %v4050_v21 = vadd.s32 %v4049_v22, %v4047_v50  ;;  %v4005_v33 = vadd.s32 %v4004_v40, %v4002_v41  ;;  %vm4708_vm9 = vcmp.eq.s32.totalorder %v9716_v10, %v19164_v47  ;;  %v4153_v50 = vcvt.f32.s32 %v15231_v23 }
 0x69e   :  { %v4076_v45 = vpop.xlane.xlu0 %4075  ;;  %v4031_v57 = vpop.xlane.xlu1 %4030  ;;  %v9780_v36 = vsel %vm4708_vm9, 1.0, %v19165_v51  ;;  %v4228_v23 = vcvt.f32.s32 %v15221_v9  ;;  %v4258_v9 = vcvt.f32.s32 %v15237_v63 }
 0x69f   :  { %v9715_v30 = vadd.s32 4294967264, %v4005_v33  ;;  %v4077_v49 = vcvt.f32.s32 %v4076_v45  ;;  %v4032_v12 = vcvt.f32.s32 %v4031_v57  ;;  %v9718_v8 = vadd.s32 4294967264, %v4050_v21 }
 0x6a1   :  { %v4080_v6 = vadd.s32 %v4079_v24, %v4077_v49  ;;  %v4035_v20 = vadd.s32 %v4034_v46, %v4032_v12  ;;  %vm4707_vm14 = vcmp.eq.s32.totalorder %v9715_v30, %v19164_v47  ;;  %vm4710_vm12 = vcmp.eq.s32.totalorder %v9718_v8, %v19164_v47 }
 0x6a2   :  { %v4106_v43 = vpop.xlane.xlu0 %4105  ;;  %v4061_v7 = vpop.xlane.xlu1 %4060  ;;  %v9779_v54 = vsel %vm4707_vm14, 1.0, %v19165_v51  ;;  %v9782_v40 = vsel %vm4710_vm12, 1.0, %v19165_v51  ;;  %v4154_v46 = vshll.u32 %v4153_v50, 16  ;;  %v4183_v30 = vcvt.f32.s32 %v15241_v2 }
 0x6a3   :  { %v9717_v14 = vadd.s32 4294967264, %v4035_v20  ;;  %v4107_v58 = vcvt.f32.s32 %v4106_v43  ;;  %v4062_v42 = vcvt.f32.s32 %v4061_v7  ;;  %11130 = vmatprep.mubr.msk.f32.mxu0 %vm476_vm0, %v9779_v54  ;;  %v9720_v37 = vadd.s32 4294967264, %v4080_v6 }
 0x6a4   :  { %11131 = vmatmul.mubr.msk.f32.gmra.mrb[152].mxu0 %vm476_vm0, %v9780_v36  ;;  %v4229_v43 = vshll.u32 %v4228_v23, 16  ;;  %v4184_v7 = vshll.u32 %v4183_v30, 16  ;;  %v4213_v54 = vcvt.f32.s32 %v15251_v52  ;;  %v4288_v52 = vcvt.f32.s32 %v15249_v35 }
 0x6a5   :  { %v4110_v29 = vadd.s32 %v4109_v5, %v4107_v58  ;;  %v4065_v26 = vadd.s32 %v4064_v11, %v4062_v42  ;;  %vm4709_vm13 = vcmp.eq.s32.totalorder %v9717_v14, %v19164_v47  ;;  %vm4712_vm9 = vcmp.eq.s32.totalorder %v9720_v37, %v19164_v47 }
 0x6a6   :  { %v4136_v34 = vpop.xlane.xlu0 %4135  ;;  %v4091_v31 = vpop.xlane.xlu1 %4090  ;;  %v9781_v4 = vsel %vm4709_vm13, 1.0, %v19165_v51  ;;  %v9784_v38 = vsel %vm4712_vm9, 1.0, %v19165_v51  ;;  %v4214_v61 = vshll.u32 %v4213_v54, 16  ;;  %v4318_v35 = vcvt.f32.s32 %v15259_v15 }
 0x6a7   :  { %v9719_v59 = vadd.s32 4294967264, %v4065_v26  ;;  %v4137_v22 = vcvt.f32.s32 %v4136_v34  ;;  %v4092_v32 = vcvt.f32.s32 %v4091_v31  ;;  %11133 = vmatprep.mubr.msk.f32.mxu0 %vm476_vm0, %v9781_v4  ;;  %v9722_v56 = vadd.s32 4294967264, %v4110_v29 }
 0x6a8   :  { %11134 = vmatmul.mubr.msk.f32.gmra.mrb[154].mxu0 %vm476_vm0, %v9782_v40  ;;  %v4259_v26 = vshll.u32 %v4258_v9, 16  ;;  %v4243_v34 = vcvt.f32.s32 %v15261_v19 }
 0x6a9   :  { %v4140_v1 = vadd.s32 %v4139_v48, %v4137_v22  ;;  %v4095_v62 = vadd.s32 %v4094_v16, %v4092_v32  ;;  %vm4711_vm14 = vcmp.eq.s32.totalorder %v9719_v59, %v19164_v47  ;;  %vm4714_vm12 = vcmp.eq.s32.totalorder %v9722_v56, %v19164_v47 }
 0x6aa   :  { %v4166_v41 = vpop.xlane.xlu0 %4165  ;;  %v4121_v28 = vpop.xlane.xlu1 %4120  ;;  %v9783_v10 = vsel %vm4711_vm14, 1.0, %v19165_v51  ;;  %v9786_v5 = vsel %vm4714_vm12, 1.0, %v19165_v51 }
 0x6ab   :  { %v9721_v21 = vadd.s32 4294967264, %v4095_v62  ;;  %v4167_v33 = vcvt.f32.s32 %v4166_v41  ;;  %v4122_v24 = vcvt.f32.s32 %v4121_v28  ;;  %11136 = vmatprep.mubr.msk.f32.mxu0 %vm476_vm0, %v9783_v10  ;;  %v9724_v44 = vadd.s32 4294967264, %v4140_v1 }
 0x6ac   :  { %11137 = vmatmul.mubr.msk.f32.gmra.mrb[156].mxu0 %vm476_vm0, %v9784_v38  ;;  %v4289_v62 = vshll.u32 %v4288_v52, 16  ;;  %v4319_v38 = vshll.u32 %v4318_v35, 16  ;;  %v19169_v52 = vld [vmem:[#allocation147_spill] sm:$0xff] }
 0x6ad   :  { %v4170_v45 = vadd.s32 %v4169_v18, %v4167_v33  ;;  %v4125_v57 = vadd.s32 %v4124_v13, %v4122_v24  ;;  %vm4713_vm13 = vcmp.eq.s32.totalorder %v9721_v21, %v19164_v47  ;;  %vm4716_vm9 = vcmp.eq.s32.totalorder %v9724_v44, %v19164_v47 }
 0x6ae   :  { %v4196_v49 = vpop.xlane.xlu0 %4195  ;;  %v4151_v12 = vpop.xlane.xlu1 %4150  ;;  %v9785_v8 = vsel %vm4713_vm13, 1.0, %v19165_v51  ;;  %v9788_v29 = vsel %vm4716_vm9, 1.0, %v19165_v51  ;;  %v4244_v18 = vshll.u32 %v4243_v34, 16  ;;  %v4273_v13 = vcvt.f32.s32 %v15271_v55 }
 0x6af   :  { %v9723_v39 = vadd.s32 4294967264, %v4125_v57  ;;  %v4197_v6 = vcvt.f32.s32 %v4196_v49  ;;  %v4152_v20 = vcvt.f32.s32 %v4151_v12  ;;  %11139 = vmatprep.mubr.msk.f32.mxu0 %vm476_vm0, %v9785_v8  ;;  %v9726_v11 = vadd.s32 4294967264, %v4170_v45 }
 0x6b0   :  { %11140 = vmatmul.mubr.msk.f32.gmra.mrb[158].mxu0 %vm476_vm0, %v9786_v5  ;;  %v4348_v55 = vcvt.f32.s32 %v15269_v53  ;;  %v4274_v45 = vshll.u32 %v4273_v13, 16  ;;  %v4303_v57 = vcvt.f32.s32 %v15281_v0  ;;  %v19166_v53 = vld [vmem:[#allocation139_spill] sm:$0xff] }
 0x6b1   :  { %v4200_v17 = vadd.s32 %v4199_v60, %v4197_v6  ;;  %v4155_v2 = vadd.s32 %v4154_v46, %v4152_v20  ;;  %vm4715_vm14 = vcmp.eq.s32.totalorder %v9723_v39, %v19164_v47  ;;  %vm4718_vm12 = vcmp.eq.s32.totalorder %v9726_v11, %v19164_v47  ;;  %v19171_v13 = vld [vmem:[#allocation151_spill] sm:$0xff] }
 0x6b2   :  { %v4226_v14 = vpop.xlane.xlu0 %4225  ;;  %v4181_v58 = vpop.xlane.xlu1 %4180  ;;  %v9787_v42 = vsel %vm4715_vm14, 1.0, %v19165_v51  ;;  %v9790_v56 = vsel %vm4718_vm12, 1.0, %v19165_v51  ;;  %v4378_v20 = vcvt.f32.s32 %v19166_v53  ;;  %v4349_v11 = vshll.u32 %v4348_v55, 16 }
 0x6b3   :  { %v9725_v36 = vadd.s32 4294967264, %v4155_v2  ;;  %v4227_v37 = vcvt.f32.s32 %v4226_v14  ;;  %v4182_v48 = vcvt.f32.s32 %v4181_v58  ;;  %11142 = vmatprep.mubr.msk.f32.mxu0 %vm476_vm0, %v9787_v42  ;;  %v9728_v63 = vadd.s32 4294967264, %v4200_v17  ;;  %v19167_v17 = vld [vmem:[#allocation145_spill] sm:$0xff] }
 0x6b4   :  { %11143 = vmatmul.mubr.msk.f32.gmra.mrb[160].mxu0 %vm476_vm0, %v9788_v29  ;;  %v4304_v9 = vshll.u32 %v4303_v57, 16  ;;  %v4333_v2 = vcvt.f32.s32 %v19167_v17 }
 0x6b5   :  { %v4230_v3 = vadd.s32 %v4229_v43, %v4227_v37  ;;  %v4185_v16 = vadd.s32 %v4184_v7, %v4182_v48  ;;  %vm4717_vm13 = vcmp.eq.s32.totalorder %v9725_v36, %v19164_v47  ;;  %vm4720_vm9 = vcmp.eq.s32.totalorder %v9728_v63, %v19164_v47 }
 0x6b6   :  { %v4256_v31 = vpop.xlane.xlu0 %4255  ;;  %v4211_v4 = vpop.xlane.xlu1 %4210  ;;  %v9789_v59 = vsel %vm4717_vm13, 1.0, %v19165_v51  ;;  %v9792_v24 = vsel %vm4720_vm9, 1.0, %v19165_v51  ;;  %v4379_v48 = vshll.u32 %v4378_v20, 16 }
 0x6b7   :  { %v9727_v22 = vadd.s32 4294967264, %v4185_v16  ;;  %v4257_v32 = vcvt.f32.s32 %v4256_v31  ;;  %v4212_v40 = vcvt.f32.s32 %v4211_v4  ;;  %11145 = vmatprep.mubr.msk.f32.mxu0 %vm476_vm0, %v9789_v59  ;;  %v9730_v27 = vadd.s32 4294967264, %v4230_v3 }
 0x6b8   :  { %11146 = vmatmul.mubr.msk.f32.gmra.mrb[162].mxu0 %vm476_vm0, %v9790_v56  ;;  %v4334_v16 = vshll.u32 %v4333_v2, 16 }
 0x6b9   :  { %v4260_v1 = vadd.s32 %v4259_v26, %v4257_v32  ;;  %v4215_v19 = vadd.s32 %v4214_v61, %v4212_v40  ;;  %vm4719_vm14 = vcmp.eq.s32.totalorder %v9727_v22, %v19164_v47  ;;  %vm4722_vm12 = vcmp.eq.s32.totalorder %v9730_v27, %v19164_v47  ;;  %v19168_v26 = vld [vmem:[#allocation143_spill] sm:$0xff]  ;;  %v19170_v27 = vld [vmem:[#allocation148_spill] sm:$0xff] }
 0x6ba   :  { %v4286_v50 = vpop.xlane.xlu0 %4285  ;;  %v4241_v41 = vpop.xlane.xlu1 %4240  ;;  %v9791_v28 = vsel %vm4719_vm14, 1.0, %v19165_v51  ;;  %v9794_v39 = vsel %vm4722_vm12, 1.0, %v19165_v51  ;;  %v4408_v3 = vcvt.f32.s32 %v19168_v26  ;;  %v4363_v61 = vcvt.f32.s32 %v19169_v52  ;;  %v19176_v52 = vld [vmem:[#allocation155_spill] sm:$0xff] }
 0x6bb   :  { %v9729_v10 = vadd.s32 4294967264, %v4215_v19  ;;  %v4287_v21 = vcvt.f32.s32 %v4286_v50  ;;  %v4242_v33 = vcvt.f32.s32 %v4241_v41  ;;  %11148 = vmatprep.mubr.msk.f32.mxu0 %vm476_vm0, %v9791_v28  ;;  %v9732_v15 = vadd.s32 4294967264, %v4260_v1 }
 0x6bc   :  { %11149 = vmatmul.mubr.msk.f32.gmra.mrb[164].mxu0 %vm476_vm0, %v9792_v24  ;;  %v4438_v35 = vcvt.f32.s32 %v19170_v27  ;;  %v4393_v50 = vcvt.f32.s32 %v19171_v13 }
 0x6bd   :  { %v4290_v44 = vadd.s32 %v4289_v62, %v4287_v21  ;;  %v4245_v60 = vadd.s32 %v4244_v18, %v4242_v33  ;;  %vm4721_vm13 = vcmp.eq.s32.totalorder %v9729_v10, %v19164_v47  ;;  %vm4724_vm9 = vcmp.eq.s32.totalorder %v9732_v15, %v19164_v47 }
 0x6be   :  { %v4316_v23 = vpop.xlane.xlu0 %4315  ;;  %v4271_v46 = vpop.xlane.xlu1 %4270  ;;  %v9793_v30 = vsel %vm4721_vm13, 1.0, %v19165_v51  ;;  %v9796_v36 = vsel %vm4724_vm9, 1.0, %v19165_v51  ;;  %v4409_v62 = vshll.u32 %v4408_v3, 16  ;;  %v4364_v18 = vshll.u32 %v4363_v61, 16 }
 0x6bf   :  { %v9731_v49 = vadd.s32 4294967264, %v4245_v60  ;;  %v4317_v12 = vcvt.f32.s32 %v4316_v23  ;;  %v4272_v8 = vcvt.f32.s32 %v4271_v46  ;;  %11151 = vmatprep.mubr.msk.f32.mxu0 %vm476_vm0, %v9793_v30  ;;  %v9734_v6 = vadd.s32 4294967264, %v4290_v44  ;;  %v19173_v46 = vld [vmem:[#allocation153_spill] sm:$0xff] }
 0x6c0   :  { %11152 = vmatmul.mubr.msk.f32.gmra.mrb[166].mxu0 %vm476_vm0, %v9794_v39  ;;  %v4439_v44 = vshll.u32 %v4438_v35, 16  ;;  %v4394_v23 = vshll.u32 %v4393_v50, 16  ;;  %v4423_v30 = vcvt.f32.s32 %v19173_v46  ;;  %v4528_v61 = vcvt.f32.s32 %v19176_v52  ;;  %v19183_v52 = vld [vmem:[#allocation163_spill] sm:$0xff] }
 0x6c1   :  { %v4320_v5 = vadd.s32 %v4319_v38, %v4317_v12  ;;  %v4275_v0 = vadd.s32 %v4274_v45, %v4272_v8  ;;  %vm4723_vm14 = vcmp.eq.s32.totalorder %v9731_v49, %v19164_v47  ;;  %vm4726_vm12 = vcmp.eq.s32.totalorder %v9734_v6, %v19164_v47  ;;  %v19172_v45 = vld [vmem:[#allocation150_spill] sm:$0xff] }
 0x6c2   :  { %v4346_v43 = vpop.xlane.xlu0 %4345  ;;  %v4301_v7 = vpop.xlane.xlu1 %4300  ;;  %v9795_v54 = vsel %vm4723_vm14, 1.0, %v19165_v51  ;;  %v9798_v40 = vsel %vm4726_vm12, 1.0, %v19165_v51  ;;  %v4468_v57 = vcvt.f32.s32 %v19172_v45  ;;  %v4529_v50 = vshll.u32 %v4528_v61, 16 }
 0x6c3   :  { %v9733_v14 = vadd.s32 4294967264, %v4275_v0  ;;  %v4347_v58 = vcvt.f32.s32 %v4346_v43  ;;  %v4302_v42 = vcvt.f32.s32 %v4301_v7  ;;  %11154 = vmatprep.mubr.msk.f32.mxu0 %vm476_vm0, %v9795_v54  ;;  %v9736_v37 = vadd.s32 4294967264, %v4320_v5  ;;  %v19174_v0 = vld [vmem:[#allocation154_spill] sm:$0xff]  ;;  %v19175_v7 = vld [vmem:[#allocation157_spill] sm:$0xff] }
 0x6c4   :  { %11155 = vmatmul.mubr.msk.f32.gmra.mrb[168].mxu0 %vm476_vm0, %v9796_v36  ;;  %v4469_v2 = vshll.u32 %v4468_v57, 16  ;;  %v4424_v43 = vshll.u32 %v4423_v30, 16  ;;  %v4453_v54 = vcvt.f32.s32 %v19175_v7  ;;  %v19180_v30 = vld [vmem:[#allocation159_spill] sm:$0xff]  ;;  %v4618_v61 = vcvt.f32.s32 %v19183_v52 }
 0x6c5   :  { %v4350_v29 = vadd.s32 %v4349_v11, %v4347_v58  ;;  %v4305_v63 = vadd.s32 %v4304_v9, %v4302_v42  ;;  %vm4725_vm13 = vcmp.eq.s32.totalorder %v9733_v14, %v19164_v47  ;;  %vm4728_vm9 = vcmp.eq.s32.totalorder %v9736_v37, %v19164_v47 }
 0x6c6   :  { %v4376_v34 = vpop.xlane.xlu0 %4375  ;;  %v4331_v31 = vpop.xlane.xlu1 %4330  ;;  %v9797_v4 = vsel %vm4725_vm13, 1.0, %v19165_v51  ;;  %v9800_v15 = vsel %vm4728_vm9, 1.0, %v19165_v51  ;;  %v4498_v11 = vcvt.f32.s32 %v19174_v0 }
 0x6c7   :  { %v9735_v59 = vadd.s32 4294967264, %v4305_v63  ;;  %v4377_v22 = vcvt.f32.s32 %v4376_v34  ;;  %v4332_v32 = vcvt.f32.s32 %v4331_v31  ;;  %11157 = vmatprep.mubr.msk.f32.mxu0 %vm476_vm0, %v9797_v4  ;;  %v9738_v56 = vadd.s32 4294967264, %v4350_v29  ;;  %v19177_v31 = vld [vmem:[#allocation158_spill] sm:$0xff] }
 0x6c8   :  { %11158 = vmatmul.mubr.msk.f32.gmra.mrb[170].mxu0 %vm476_vm0, %v9798_v40  ;;  %v4499_v26 = vshll.u32 %v4498_v11, 16  ;;  %v4454_v34 = vshll.u32 %v4453_v54, 16  ;;  %v4483_v4 = vcvt.f32.s32 %v19177_v31  ;;  %v19182_v54 = vld [vmem:[#allocation162_spill] sm:$0xff] }
 0x6c9   :  { %v4380_v1 = vadd.s32 %v4379_v48, %v4377_v22  ;;  %v4335_v19 = vadd.s32 %v4334_v16, %v4332_v32  ;;  %vm4727_vm14 = vcmp.eq.s32.totalorder %v9735_v59, %v19164_v47  ;;  %vm4730_vm12 = vcmp.eq.s32.totalorder %v9738_v56, %v19164_v47 }
 0x6ca   :  { %v4406_v41 = vpop.xlane.xlu0 %4405  ;;  %v4361_v28 = vpop.xlane.xlu1 %4360  ;;  %v9799_v10 = vsel %vm4727_vm14, 1.0, %v19165_v51  ;;  %v9802_v20 = vsel %vm4730_vm12, 1.0, %v19165_v51 }
 0x6cb   :  { %v9737_v21 = vadd.s32 4294967264, %v4335_v19  ;;  %v4407_v33 = vcvt.f32.s32 %v4406_v41  ;;  %v4362_v24 = vcvt.f32.s32 %v4361_v28  ;;  %11160 = vmatprep.mubr.msk.f32.mxu0 %vm476_vm0, %v9799_v10  ;;  %v9740_v38 = vadd.s32 4294967264, %v4380_v1  ;;  %v19178_v19 = vld [vmem:[#allocation156_spill] sm:$0xff] }
 0x6cc   :  { %11161 = vmatmul.mubr.msk.f32.gmra.mrb[172].mxu0 %vm476_vm0, %v9800_v15  ;;  %v4484_v41 = vshll.u32 %v4483_v4, 16  ;;  %v19179_v28 = vld [vmem:[#allocation160_spill] sm:$0xff] }
 0x6cd   :  { %v4410_v60 = vadd.s32 %v4409_v62, %v4407_v33  ;;  %v4365_v55 = vadd.s32 %v4364_v18, %v4362_v24  ;;  %vm4729_vm13 = vcmp.eq.s32.totalorder %v9737_v21, %v19164_v47  ;;  %vm4732_vm9 = vcmp.eq.s32.totalorder %v9740_v38, %v19164_v47 }
 0x6ce   :  { %v4436_v49 = vpop.xlane.xlu0 %4435  ;;  %v4391_v12 = vpop.xlane.xlu1 %4390  ;;  %v9801_v8 = vsel %vm4729_vm13, 1.0, %v19165_v51  ;;  %v9804_v29 = vsel %vm4732_vm9, 1.0, %v19165_v51  ;;  %v4558_v62 = vcvt.f32.s32 %v19178_v19  ;;  %v4513_v10 = vcvt.f32.s32 %v19179_v28 }
 0x6cf   :  { %v9739_v39 = vadd.s32 4294967264, %v4365_v55  ;;  %v4437_v6 = vcvt.f32.s32 %v4436_v49  ;;  %v4392_v53 = vcvt.f32.s32 %v4391_v12  ;;  %11163 = vmatprep.mubr.msk.f32.mxu0 %vm476_vm0, %v9801_v8  ;;  %v9742_v5 = vadd.s32 4294967264, %v4410_v60  ;;  %v19181_v12 = vld [vmem:[#allocation161_spill] sm:$0xff] }
 0x6d0   :  { %11164 = vmatmul.mubr.msk.f32.gmra.mrb[174].mxu0 %vm476_vm0, %v9802_v20  ;;  %v4559_v45 = vshll.u32 %v4558_v62, 16  ;;  %v4514_v46 = vshll.u32 %v4513_v10, 16  ;;  %v4588_v49 = vcvt.f32.s32 %v19180_v30  ;;  %v4543_v8 = vcvt.f32.s32 %v19181_v12 }
 0x6d1   :  { %v4440_v9 = vadd.s32 %v4439_v44, %v4437_v6  ;;  %v4395_v17 = vadd.s32 %v4394_v23, %v4392_v53  ;;  %vm4731_vm14 = vcmp.eq.s32.totalorder %v9739_v39, %v19164_v47  ;;  %vm4734_vm12 = vcmp.eq.s32.totalorder %v9742_v5, %v19164_v47 }
 0x6d2   :  { %v4466_v14 = vpop.xlane.xlu0 %4465  ;;  %v4421_v58 = vpop.xlane.xlu1 %4420  ;;  %v9803_v42 = vsel %vm4731_vm14, 1.0, %v19165_v51  ;;  %v9806_v35 = vsel %vm4734_vm12, 1.0, %v19165_v51  ;;  %v4544_v7 = vshll.u32 %v4543_v8, 16  ;;  %v4603_v19 = vcvt.f32.s32 %v15382_v25 }
 0x6d3   :  { %v9741_v36 = vadd.s32 4294967264, %v4395_v17  ;;  %v4467_v37 = vcvt.f32.s32 %v4466_v14  ;;  %v4422_v48 = vcvt.f32.s32 %v4421_v58  ;;  %11166 = vmatprep.mubr.msk.f32.mxu0 %vm476_vm0, %v9803_v42  ;;  %v9744_v63 = vadd.s32 4294967264, %v4440_v9 }
 0x6d4   :  { %11167 = vmatmul.mubr.msk.f32.gmra.mrb[176].mxu0 %vm476_vm0, %v9804_v29  ;;  %v4573_v14 = vcvt.f32.s32 %v19182_v54  ;;  %v4604_v10 = vshll.u32 %v4603_v19, 16 }
 0x6d5   :  { %v4470_v3 = vadd.s32 %v4469_v2, %v4467_v37  ;;  %v4425_v16 = vadd.s32 %v4424_v43, %v4422_v48  ;;  %vm4733_vm13 = vcmp.eq.s32.totalorder %v9741_v36, %v19164_v47  ;;  %vm4736_vm9 = vcmp.eq.s32.totalorder %v9744_v63, %v19164_v47 }
 0x6d6   :  { %v4496_v59 = vpop.xlane.xlu0 %4495  ;;  %v4451_v22 = vpop.xlane.xlu1 %4450  ;;  %v9805_v32 = vsel %vm4733_vm13, 1.0, %v19165_v51  ;;  %v9808_v60 = vsel %vm4736_vm9, 1.0, %v19165_v51  ;;  %v4589_v43 = vshll.u32 %v4588_v49, 16  ;;  %v4574_v4 = vshll.u32 %v4573_v14, 16 }
 0x6d7   :  { %v9743_v40 = vadd.s32 4294967264, %v4425_v16  ;;  %v4497_v56 = vcvt.f32.s32 %v4496_v59  ;;  %v4452_v27 = vcvt.f32.s32 %v4451_v22  ;;  %11169 = vmatprep.mubr.msk.f32.mxu0 %vm476_vm0, %v9805_v32  ;;  %v9746_v1 = vadd.s32 4294967264, %v4470_v3 }
 0x6d8   :  { %11170 = vmatmul.mubr.msk.f32.gmra.mrb[178].mxu0 %vm476_vm0, %v9806_v35 }
 0x6d9   :  { %v4500_v18 = vadd.s32 %v4499_v26, %v4497_v56  ;;  %v4455_v13 = vadd.s32 %v4454_v34, %v4452_v27  ;;  %vm4735_vm14 = vcmp.eq.s32.totalorder %v9743_v40, %v19164_v47  ;;  %vm4738_vm12 = vcmp.eq.s32.totalorder %v9746_v1, %v19164_v47 }
 0x6da   :  { %v4526_v21 = vpop.xlane.xlu0 %4525  ;;  %v4481_v33 = vpop.xlane.xlu1 %4480  ;;  %v9807_v24 = vsel %vm4735_vm14, 1.0, %v19165_v51  ;;  %v9810_v11 = vsel %vm4738_vm12, 1.0, %v19165_v51  ;;  %v4619_v27 = vshll.u32 %v4618_v61, 16 }
 0x6db   :  { %v9745_v15 = vadd.s32 4294967264, %v4455_v13  ;;  %v4527_v38 = vcvt.f32.s32 %v4526_v21  ;;  %v4482_v44 = vcvt.f32.s32 %v4481_v33  ;;  %11172 = vmatprep.mubr.msk.f32.mxu0 %vm476_vm0, %v9807_v24  ;;  %v9748_v55 = vadd.s32 4294967264, %v4500_v18 }
 0x6dc   :  { %11173 = vmatmul.mubr.msk.f32.gmra.mrb[180].mxu0 %vm476_vm0, %v9808_v60  ;;  %v15665_v60 = vld [vmem:[%s18383_s2 + $0x150] ss:$0 sm:$0xff] }
 0x6dd   :  { %v4530_v57 = vadd.s32 %v4529_v50, %v4527_v38  ;;  %v4485_v23 = vadd.s32 %v4484_v41, %v4482_v44  ;;  %vm4737_vm13 = vcmp.eq.s32.totalorder %v9745_v15, %v19164_v47  ;;  %vm4740_vm9 = vcmp.eq.s32.totalorder %v9748_v55, %v19164_v47 }
 0x6de   :  { %v4556_v39 = vpop.xlane.xlu0 %4555  ;;  %v4511_v6 = vpop.xlane.xlu1 %4510  ;;  %v9809_v53 = vsel %vm4737_vm13, 1.0, %v19165_v51  ;;  %v9812_v63 = vsel %vm4740_vm9, 1.0, %v19165_v51 }
 0x6df   :  { %v9747_v20 = vadd.s32 4294967264, %v4485_v23  ;;  %v4557_v5 = vcvt.f32.s32 %v4556_v39  ;;  %v4512_v0 = vcvt.f32.s32 %v4511_v6  ;;  %11175 = vmatprep.mubr.msk.f32.mxu0 %vm476_vm0, %v9809_v53  ;;  %v9750_v9 = vadd.s32 4294967264, %v4530_v57 }
 0x6e0   :  { %11176 = vmatmul.mubr.msk.f32.gmra.mrb[182].mxu0 %vm476_vm0, %v9810_v11 }
 0x6e1   :  { %v4560_v17 = vadd.s32 %v4559_v45, %v4557_v5  ;;  %v4515_v2 = vadd.s32 %v4514_v46, %v4512_v0  ;;  %vm4739_vm14 = vcmp.eq.s32.totalorder %v9747_v20, %v19164_v47  ;;  %vm4742_vm12 = vcmp.eq.s32.totalorder %v9750_v9, %v19164_v47 }
 0x6e2   :  { %v4586_v58 = vpop.xlane.xlu0 %4585  ;;  %v4541_v42 = vpop.xlane.xlu1 %4540  ;;  %v9811_v36 = vsel %vm4739_vm14, 1.0, %v19165_v51  ;;  %v9814_v32 = vsel %vm4742_vm12, 1.0, %v19165_v51 }
 0x6e3   :  { %v9749_v37 = vadd.s32 4294967264, %v4515_v2  ;;  %v4587_v48 = vcvt.f32.s32 %v4586_v58  ;;  %v4542_v29 = vcvt.f32.s32 %v4541_v42  ;;  %11178 = vmatprep.mubr.msk.f32.mxu0 %vm476_vm0, %v9811_v36  ;;  %v9752_v26 = vadd.s32 4294967264, %v4560_v17 }
 0x6e4   :  { %11179 = vmatmul.mubr.msk.f32.gmra.mrb[184].mxu0 %vm476_vm0, %v9812_v63 }
 0x6e5   :  { %v4590_v3 = vadd.s32 %v4589_v43, %v4587_v48  ;;  %v4545_v16 = vadd.s32 %v4544_v7, %v4542_v29  ;;  %vm4741_vm13 = vcmp.eq.s32.totalorder %v9749_v37, %v19164_v47  ;;  %vm4744_vm9 = vcmp.eq.s32.totalorder %v9752_v26, %v19164_v47 }
 0x6e6   :  { %v4571_v34 = vpop.xlane.xlu1 %4570  ;;  %v9813_v31 = vsel %vm4741_vm13, 1.0, %v19165_v51  ;;  %v9816_v13 = vsel %vm4744_vm9, 1.0, %v19165_v51 }
 0x6e7   :  { %v9751_v59 = vadd.s32 4294967264, %v4545_v16  ;;  %v4572_v22 = vcvt.f32.s32 %v4571_v34  ;;  %11181 = vmatprep.mubr.msk.f32.mxu0 %vm476_vm0, %v9813_v31  ;;  %v9754_v40 = vadd.s32 4294967264, %v4590_v3 }
 0x6e8   :  { %11182 = vmatmul.mubr.msk.f32.gmra.mrb[186].mxu0 %vm476_vm0, %v9814_v32 }
 0x6e9   :  { %v4575_v56 = vadd.s32 %v4574_v4, %v4572_v22  ;;  %vm4743_vm14 = vcmp.eq.s32.totalorder %v9751_v59, %v19164_v47  ;;  %vm4746_vm12 = vcmp.eq.s32.totalorder %v9754_v40, %v19164_v47 }
 0x6ea   :  { %v4616_v35 = vpop.xlane.xlu0 %4615  ;;  %v9815_v1 = vsel %vm4743_vm14, 1.0, %v19165_v51  ;;  %v9818_v25 = vsel %vm4746_vm12, 1.0, %v19165_v51 }
 0x6eb   :  { %v9753_v62 = vadd.s32 4294967264, %v4575_v56  ;;  %v4617_v18 = vcvt.f32.s32 %v4616_v35  ;;  %11184 = vmatprep.mubr.msk.f32.mxu0 %vm476_vm0, %v9815_v1 }
 0x6ec   :  { %11185 = vmatmul.mubr.msk.f32.gmra.mrb[188].mxu0 %vm476_vm0, %v9816_v13 }
 0x6ed   :  { %v4620_v50 = vadd.s32 %v4619_v27, %v4617_v18  ;;  %vm4745_vm13 = vcmp.eq.s32.totalorder %v9753_v62, %v19164_v47 }
 0x6ee   :  { %v4601_v41 = vpop.xlane.xlu1 %4600  ;;  %v9817_v28 = vsel %vm4745_vm13, 1.0, %v19165_v51 }
 0x6ef   :  { %v4602_v21 = vcvt.f32.s32 %v4601_v41  ;;  %11187 = vmatprep.mubr.msk.f32.mxu0 %vm476_vm0, %v9817_v28  ;;  %v9756_v33 = vadd.s32 4294967264, %v4620_v50 }
 0x6f0   :  { %11188 = vmatmul.mubr.msk.f32.gmra.mrb[190].mxu0 %vm476_vm0, %v9818_v25 }
 0x6f1   :  { %v4605_v24 = vadd.s32 %v4604_v10, %v4602_v21  ;;  %vm4748_vm9 = vcmp.eq.s32.totalorder %v9756_v33, %v19164_v47 }
 0x6f2   :  { %v9820_v44 = vsel %vm4748_vm9, 1.0, %v19165_v51 }
 0x6f3   :  { %v9755_v15 = vadd.s32 4294967264, %v4605_v24 }
 0x6f5   :  { %vm4747_vm14 = vcmp.eq.s32.totalorder %v9755_v15, %v19164_v47 }
 0x6f6   :  { %v9819_v38 = vsel %vm4747_vm14, 1.0, %v19165_v51 }
 0x6f7   :  { %11190 = vmatprep.mubr.msk.f32.mxu0 %vm476_vm0, %v9819_v38 }
 0x6f8   :  { %11191 = vmatmul.mubr.msk.f32.gmra.mrb[192].mxu0 %vm476_vm0, %v9820_v44 }
 0x73f   :  { %v11099_v55 = vpop.f32.mrb[130].mxu0 }
 0x740   :  { %v5150_v45 = vadd.f32 %v11099_v55, %v15665_v60  ;;  %v5144_v57 = vpop.f32.mrb[131].mxu0 }
 0x741   :  { %v5145_v23 = vadd.f32 %v15665_v60, %v5144_v57 }
 0x742   :  { %v5464_v49 = vmax.f32 %v5150_v45, 0.0 }
 0x743   :  { %v5463_v46 = vmax.f32 %v5145_v23, 0.0  ;;  %v11102_v30 = vpop.f32.mrb[132].mxu0 }
 0x744   :  { %v5160_v12 = vadd.f32 %v11102_v30, %v15665_v60  ;;  %v5154_v8 = vpop.f32.mrb[133].mxu0 }
 0x745   :  { %v5155_v51 = vadd.f32 %v15665_v60, %v5154_v8  ;;  %11209 = vmatprep.mubr.msk.f32.mxu1 %vm1131_vm15, %v5463_v46 }
 0x746   :  { %11210 = vmatmul.mubr.msk.f32.vlgmr.msra.gmra.mrb[126].mxu1 %vm1131_vm15, %v5464_v49  ;;  %v5466_v53 = vmax.f32 %v5160_v12, 0.0 }
 0x747   :  { %v5465_v39 = vmax.f32 %v5155_v51, 0.0  ;;  %v11105_v6 = vpop.f32.mrb[134].mxu0 }
 0x748   :  { %v5170_v20 = vadd.f32 %v11105_v6, %v15665_v60  ;;  %v5164_v5 = vpop.f32.mrb[135].mxu0 }
 0x749   :  { %v5165_v0 = vadd.f32 %v15665_v60, %v5164_v5  ;;  %11212 = vmatprep.mubr.msk.f32.mxu1 %vm1131_vm15, %v5465_v39 }
 0x74a   :  { %11213 = vmatmul.mubr.msk.f32.gmra.mrb[128].mxu1 %vm1131_vm15, %v5466_v53  ;;  %v5468_v17 = vmax.f32 %v5170_v20, 0.0 }
 0x74b   :  { %v5467_v11 = vmax.f32 %v5165_v0, 0.0  ;;  %v11108_v9 = vpop.f32.mrb[136].mxu0 }
 0x74c   :  { %v5180_v2 = vadd.f32 %v11108_v9, %v15665_v60  ;;  %v5174_v43 = vpop.f32.mrb[137].mxu0 }
 0x74d   :  { %v5175_v7 = vadd.f32 %v15665_v60, %v5174_v43  ;;  %11215 = vmatprep.mubr.msk.f32.mxu1 %vm1131_vm15, %v5467_v11 }
 0x74e   :  { %11216 = vmatmul.mubr.msk.f32.gmra.mrb[130].mxu1 %vm1131_vm15, %v5468_v17  ;;  %v5470_v58 = vmax.f32 %v5180_v2, 0.0 }
 0x74f   :  { %v5469_v54 = vmax.f32 %v5175_v7, 0.0  ;;  %v11111_v14 = vpop.f32.mrb[138].mxu0 }
 0x750   :  { %v5190_v42 = vadd.f32 %v11111_v14, %v15665_v60  ;;  %v5184_v36 = vpop.f32.mrb[139].mxu0 }
 0x751   :  { %v5185_v37 = vadd.f32 %v15665_v60, %v5184_v36  ;;  %11218 = vmatprep.mubr.msk.f32.mxu1 %vm1131_vm15, %v5469_v54 }
 0x752   :  { %11219 = vmatmul.mubr.msk.f32.gmra.mrb[132].mxu1 %vm1131_vm15, %v5470_v58  ;;  %v5472_v63 = vmax.f32 %v5190_v42, 0.0 }
 0x753   :  { %v5471_v48 = vmax.f32 %v5185_v37, 0.0  ;;  %v11114_v29 = vpop.f32.mrb[140].mxu0 }
 0x754   :  { %v5200_v26 = vadd.f32 %v11114_v29, %v15665_v60  ;;  %v5194_v3 = vpop.f32.mrb[141].mxu0 }
 0x755   :  { %v5195_v16 = vadd.f32 %v15665_v60, %v5194_v3  ;;  %11221 = vmatprep.mubr.msk.f32.mxu1 %vm1131_vm15, %v5471_v48 }
 0x756   :  { %11222 = vmatmul.mubr.msk.f32.gmra.mrb[134].mxu1 %vm1131_vm15, %v5472_v63  ;;  %v5474_v34 = vmax.f32 %v5200_v26, 0.0 }
 0x757   :  { %v5473_v52 = vmax.f32 %v5195_v16, 0.0  ;;  %v11117_v61 = vpop.f32.mrb[142].mxu0 }
 0x758   :  { %v5210_v31 = vadd.f32 %v11117_v61, %v15665_v60  ;;  %v5204_v4 = vpop.f32.mrb[143].mxu0 }
 0x759   :  { %v5205_v59 = vadd.f32 %v15665_v60, %v5204_v4  ;;  %11224 = vmatprep.mubr.msk.f32.mxu1 %vm1131_vm15, %v5473_v52 }
 0x75a   :  { %11225 = vmatmul.mubr.msk.f32.gmra.mrb[136].mxu1 %vm1131_vm15, %v5474_v34  ;;  %v5476_v40 = vmax.f32 %v5210_v31, 0.0 }
 0x75b   :  { %v5475_v22 = vmax.f32 %v5205_v59, 0.0  ;;  %v11120_v32 = vpop.f32.mrb[144].mxu0 }
 0x75c   :  { %v5220_v56 = vadd.f32 %v11120_v32, %v15665_v60  ;;  %v5214_v27 = vpop.f32.mrb[145].mxu0 }
 0x75d   :  { %v5215_v35 = vadd.f32 %v15665_v60, %v5214_v27  ;;  %11227 = vmatprep.mubr.msk.f32.mxu1 %vm1131_vm15, %v5475_v22 }
 0x75e   :  { %11228 = vmatmul.mubr.msk.f32.gmra.mrb[138].mxu1 %vm1131_vm15, %v5476_v40  ;;  %v5478_v62 = vmax.f32 %v5220_v56, 0.0 }
 0x75f   :  { %v5477_v1 = vmax.f32 %v5215_v35, 0.0  ;;  %v11123_v19 = vpop.f32.mrb[146].mxu0 }
 0x760   :  { %v5230_v18 = vadd.f32 %v11123_v19, %v15665_v60  ;;  %v5224_v13 = vpop.f32.mrb[147].mxu0 }
 0x761   :  { %v5225_v50 = vadd.f32 %v15665_v60, %v5224_v13  ;;  %11230 = vmatprep.mubr.msk.f32.mxu1 %vm1131_vm15, %v5477_v1 }
 0x762   :  { %11231 = vmatmul.mubr.msk.f32.gmra.mrb[140].mxu1 %vm1131_vm15, %v5478_v62  ;;  %v5480_v28 = vmax.f32 %v5230_v18, 0.0 }
 0x763   :  { %v5479_v41 = vmax.f32 %v5225_v50, 0.0 }
 0x765   :  { %11233 = vmatprep.mubr.msk.f32.mxu1 %vm1131_vm15, %v5479_v41 }
 0x766   :  { %11234 = vmatmul.mubr.msk.f32.gmra.mrb[142].mxu1 %vm1131_vm15, %v5480_v28 }
 0x767   :  { %v11126_v10 = vpop.f32.mrb[148].mxu0 }
 0x768   :  { %v5240_v21 = vadd.f32 %v11126_v10, %v15665_v60  ;;  %v5234_v25 = vpop.f32.mrb[149].mxu0 }
 0x769   :  { %v5235_v33 = vadd.f32 %v15665_v60, %v5234_v25 }
 0x76a   :  { %v5482_v15 = vmax.f32 %v5240_v21, 0.0 }
 0x76b   :  { %v5481_v24 = vmax.f32 %v5235_v33, 0.0 }
 0x76d   :  { %11236 = vmatprep.mubr.msk.f32.mxu1 %vm1131_vm15, %v5481_v24 }
 0x76e   :  { %11237 = vmatmul.mubr.msk.f32.gmra.mrb[144].mxu1 %vm1131_vm15, %v5482_v15 }
 0x76f   :  { %v11129_v38 = vpop.f32.mrb[150].mxu0 }
 0x770   :  { %v5250_v44 = vadd.f32 %v11129_v38, %v15665_v60  ;;  %v5244_v55 = vpop.f32.mrb[151].mxu0 }
 0x771   :  { %v5245_v45 = vadd.f32 %v15665_v60, %v5244_v55 }
 0x772   :  { %v5484_v23 = vmax.f32 %v5250_v44, 0.0 }
 0x773   :  { %v5483_v57 = vmax.f32 %v5245_v45, 0.0 }
 0x775   :  { %11239 = vmatprep.mubr.msk.f32.mxu1 %vm1131_vm15, %v5483_v57 }
 0x776   :  { %11240 = vmatmul.mubr.msk.f32.gmra.mrb[146].mxu1 %vm1131_vm15, %v5484_v23 }
 0x777   :  { %v11132_v46 = vpop.f32.mrb[152].mxu0 }
 0x778   :  { %v5260_v30 = vadd.f32 %v11132_v46, %v15665_v60  ;;  %v5254_v49 = vpop.f32.mrb[153].mxu0 }
 0x779   :  { %v5255_v12 = vadd.f32 %v15665_v60, %v5254_v49 }
 0x77a   :  { %v5486_v39 = vmax.f32 %v5260_v30, 0.0 }
 0x77b   :  { %v5485_v8 = vmax.f32 %v5255_v12, 0.0  ;;  %v11135_v51 = vpop.f32.mrb[154].mxu0 }
 0x77c   :  { %v5270_v6 = vadd.f32 %v11135_v51, %v15665_v60  ;;  %v5264_v53 = vpop.f32.mrb[155].mxu0 }
 0x77d   :  { %v5265_v20 = vadd.f32 %v15665_v60, %v5264_v53  ;;  %11242 = vmatprep.mubr.msk.f32.mxu1 %vm1131_vm15, %v5485_v8 }
 0x77e   :  { %11243 = vmatmul.mubr.msk.f32.gmra.mrb[148].mxu1 %vm1131_vm15, %v5486_v39  ;;  %v5488_v11 = vmax.f32 %v5270_v6, 0.0 }
 0x77f   :  { %v5487_v5 = vmax.f32 %v5265_v20, 0.0  ;;  %v11138_v0 = vpop.f32.mrb[156].mxu0 }
 0x780   :  { %v5280_v9 = vadd.f32 %v11138_v0, %v15665_v60  ;;  %v5274_v17 = vpop.f32.mrb[157].mxu0 }
 0x781   :  { %v5275_v2 = vadd.f32 %v15665_v60, %v5274_v17  ;;  %11245 = vmatprep.mubr.msk.f32.mxu1 %vm1131_vm15, %v5487_v5 }
 0x782   :  { %11246 = vmatmul.mubr.msk.f32.gmra.mrb[150].mxu1 %vm1131_vm15, %v5488_v11  ;;  %v5490_v54 = vmax.f32 %v5280_v9, 0.0 }
 0x783   :  { %v5489_v43 = vmax.f32 %v5275_v2, 0.0  ;;  %v11141_v7 = vpop.f32.mrb[158].mxu0 }
 0x784   :  { %v5290_v14 = vadd.f32 %v11141_v7, %v15665_v60  ;;  %v5284_v58 = vpop.f32.mrb[159].mxu0 }
 0x785   :  { %v5285_v42 = vadd.f32 %v15665_v60, %v5284_v58  ;;  %11248 = vmatprep.mubr.msk.f32.mxu1 %vm1131_vm15, %v5489_v43 }
 0x786   :  { %11249 = vmatmul.mubr.msk.f32.gmra.mrb[152].mxu1 %vm1131_vm15, %v5490_v54  ;;  %v5492_v48 = vmax.f32 %v5290_v14, 0.0 }
 0x787   :  { %v5491_v36 = vmax.f32 %v5285_v42, 0.0  ;;  %v11144_v37 = vpop.f32.mrb[160].mxu0 }
 0x788   :  { %v5300_v29 = vadd.f32 %v11144_v37, %v15665_v60  ;;  %v5294_v63 = vpop.f32.mrb[161].mxu0 }
 0x789   :  { %v5295_v26 = vadd.f32 %v15665_v60, %v5294_v63  ;;  %11251 = vmatprep.mubr.msk.f32.mxu1 %vm1131_vm15, %v5491_v36 }
 0x78a   :  { %11252 = vmatmul.mubr.msk.f32.gmra.mrb[154].mxu1 %vm1131_vm15, %v5492_v48  ;;  %v5494_v52 = vmax.f32 %v5300_v29, 0.0 }
 0x78b   :  { %v5493_v3 = vmax.f32 %v5295_v26, 0.0  ;;  %v11147_v16 = vpop.f32.mrb[162].mxu0 }
 0x78c   :  { %v5310_v61 = vadd.f32 %v11147_v16, %v15665_v60  ;;  %v5304_v34 = vpop.f32.mrb[163].mxu0 }
 0x78d   :  { %v5305_v31 = vadd.f32 %v15665_v60, %v5304_v34  ;;  %11254 = vmatprep.mubr.msk.f32.mxu1 %vm1131_vm15, %v5493_v3 }
 0x78e   :  { %11255 = vmatmul.mubr.msk.f32.gmra.mrb[156].mxu1 %vm1131_vm15, %v5494_v52  ;;  %v5496_v22 = vmax.f32 %v5310_v61, 0.0 }
 0x78f   :  { %v5495_v4 = vmax.f32 %v5305_v31, 0.0  ;;  %v11150_v59 = vpop.f32.mrb[164].mxu0 }
 0x790   :  { %v5320_v32 = vadd.f32 %v11150_v59, %v15665_v60  ;;  %v5314_v40 = vpop.f32.mrb[165].mxu0 }
 0x791   :  { %v5315_v56 = vadd.f32 %v15665_v60, %v5314_v40  ;;  %11257 = vmatprep.mubr.msk.f32.mxu1 %vm1131_vm15, %v5495_v4 }
 0x792   :  { %11258 = vmatmul.mubr.msk.f32.gmra.mrb[158].mxu1 %vm1131_vm15, %v5496_v22  ;;  %v5498_v1 = vmax.f32 %v5320_v32, 0.0 }
 0x793   :  { %v5497_v27 = vmax.f32 %v5315_v56, 0.0  ;;  %v11153_v35 = vpop.f32.mrb[166].mxu0 }
 0x794   :  { %v5330_v19 = vadd.f32 %v11153_v35, %v15665_v60  ;;  %v5324_v62 = vpop.f32.mrb[167].mxu0 }
 0x795   :  { %v5325_v18 = vadd.f32 %v15665_v60, %v5324_v62  ;;  %11260 = vmatprep.mubr.msk.f32.mxu1 %vm1131_vm15, %v5497_v27  ;;  %v6629_v62 = vld [vmem:[%s18383_s2 + $0x1b0] sm:$0xff] }
 0x796   :  { %11261 = vmatmul.mubr.msk.f32.gmra.mrb[160].mxu1 %vm1131_vm15, %v5498_v1  ;;  %v5500_v41 = vmax.f32 %v5330_v19, 0.0 }
 0x797   :  { %v5499_v13 = vmax.f32 %v5325_v18, 0.0  ;;  %v11156_v50 = vpop.f32.mrb[168].mxu0  ;;  %v6630_v18 = vld [vmem:[%s18383_s2 + $0x1b8] sm:$0xff] }
 0x798   :  { %v5340_v28 = vadd.f32 %v11156_v50, %v15665_v60  ;;  %v5334_v10 = vpop.f32.mrb[169].mxu0 }
 0x799   :  { %v5335_v21 = vadd.f32 %v15665_v60, %v5334_v10  ;;  %11263 = vmatprep.mubr.msk.f32.mxu1 %vm1131_vm15, %v5499_v13  ;;  %v11601_v13 = vpack.c.bf16 %v6630_v18, %v6629_v62 }
 0x79a   :  { %11264 = vmatmul.mubr.msk.f32.gmra.mrb[162].mxu1 %vm1131_vm15, %v5500_v41  ;;  %v5502_v24 = vmax.f32 %v5340_v28, 0.0 }
 0x79b   :  { %v5501_v25 = vmax.f32 %v5335_v21, 0.0  ;;  %v11159_v33 = vpop.f32.mrb[170].mxu0  ;;  %11602 = vmatprep.subr.bf16.mxu0 %v11601_v13 }
 0x79c   :  { %v5350_v15 = vadd.f32 %v11159_v33, %v15665_v60  ;;  %v5344_v38 = vpop.f32.mrb[171].mxu0  ;;  %11604 = vmatpush3.bf16.msra.mxu0 %v11601_v13 }
 0x79d   :  { %v5345_v44 = vadd.f32 %v15665_v60, %v5344_v38  ;;  %11266 = vmatprep.mubr.msk.f32.mxu1 %vm1131_vm15, %v5501_v25 }
 0x79e   :  { %11267 = vmatmul.mubr.msk.f32.gmra.mrb[164].mxu1 %vm1131_vm15, %v5502_v24  ;;  %v5504_v57 = vmax.f32 %v5350_v15, 0.0 }
 0x79f   :  { %v5503_v55 = vmax.f32 %v5345_v44, 0.0  ;;  %v11162_v45 = vpop.f32.mrb[172].mxu0 }
 0x7a0   :  { %v5360_v23 = vadd.f32 %v11162_v45, %v15665_v60  ;;  %v5354_v46 = vpop.f32.mrb[173].mxu0 }
 0x7a1   :  { %v5355_v30 = vadd.f32 %v15665_v60, %v5354_v46  ;;  %11269 = vmatprep.mubr.msk.f32.mxu1 %vm1131_vm15, %v5503_v55 }
 0x7a2   :  { %11270 = vmatmul.mubr.msk.f32.gmra.mrb[166].mxu1 %vm1131_vm15, %v5504_v57  ;;  %v5506_v8 = vmax.f32 %v5360_v23, 0.0 }
 0x7a3   :  { %v5505_v49 = vmax.f32 %v5355_v30, 0.0  ;;  %v11165_v12 = vpop.f32.mrb[174].mxu0 }
 0x7a4   :  { %v5370_v51 = vadd.f32 %v11165_v12, %v15665_v60  ;;  %v5364_v39 = vpop.f32.mrb[175].mxu0 }
 0x7a5   :  { %v5365_v6 = vadd.f32 %v15665_v60, %v5364_v39  ;;  %11272 = vmatprep.mubr.msk.f32.mxu1 %vm1131_vm15, %v5505_v49 }
 0x7a6   :  { %11273 = vmatmul.mubr.msk.f32.gmra.mrb[168].mxu1 %vm1131_vm15, %v5506_v8  ;;  %v5508_v5 = vmax.f32 %v5370_v51, 0.0  ;;  %v15804_v51 = vld [vmem:[%s18383_s2 + $0x1a0] ss:$0 sm:$0xff] }
 0x7a7   :  { %v5507_v53 = vmax.f32 %v5365_v6, 0.0  ;;  %v11168_v20 = vpop.f32.mrb[176].mxu0 }
 0x7a8   :  { %v5380_v0 = vadd.f32 %v11168_v20, %v15665_v60  ;;  %v5374_v11 = vpop.f32.mrb[177].mxu0 }
 0x7a9   :  { %v5375_v9 = vadd.f32 %v15665_v60, %v5374_v11  ;;  %11275 = vmatprep.mubr.msk.f32.mxu1 %vm1131_vm15, %v5507_v53 }
 0x7aa   :  { %11276 = vmatmul.mubr.msk.f32.gmra.mrb[170].mxu1 %vm1131_vm15, %v5508_v5  ;;  %v5510_v43 = vmax.f32 %v5380_v0, 0.0 }
 0x7ab   :  { %v5509_v17 = vmax.f32 %v5375_v9, 0.0  ;;  %v11171_v2 = vpop.f32.mrb[178].mxu0 }
 0x7ac   :  { %v5390_v7 = vadd.f32 %v11171_v2, %v15665_v60  ;;  %v5384_v54 = vpop.f32.mrb[179].mxu0 }
 0x7ad   :  { %v5385_v14 = vadd.f32 %v15665_v60, %v5384_v54  ;;  %11278 = vmatprep.mubr.msk.f32.mxu1 %vm1131_vm15, %v5509_v17 }
 0x7ae   :  { %11279 = vmatmul.mubr.msk.f32.gmra.mrb[172].mxu1 %vm1131_vm15, %v5510_v43  ;;  %v5512_v36 = vmax.f32 %v5390_v7, 0.0 }
 0x7af   :  { %v5511_v58 = vmax.f32 %v5385_v14, 0.0  ;;  %v11174_v42 = vpop.f32.mrb[180].mxu0 }
 0x7b0   :  { %v5400_v37 = vadd.f32 %v11174_v42, %v15665_v60  ;;  %v5394_v48 = vpop.f32.mrb[181].mxu0 }
 0x7b1   :  { %v5395_v29 = vadd.f32 %v15665_v60, %v5394_v48  ;;  %11281 = vmatprep.mubr.msk.f32.mxu1 %vm1131_vm15, %v5511_v58 }
 0x7b2   :  { %11282 = vmatmul.mubr.msk.f32.gmra.mrb[174].mxu1 %vm1131_vm15, %v5512_v36  ;;  %v5514_v3 = vmax.f32 %v5400_v37, 0.0 }
 0x7b3   :  { %v5513_v63 = vmax.f32 %v5395_v29, 0.0  ;;  %v11177_v26 = vpop.f32.mrb[182].mxu0 }
 0x7b4   :  { %v5410_v16 = vadd.f32 %v11177_v26, %v15665_v60  ;;  %v5404_v52 = vpop.f32.mrb[183].mxu0 }
 0x7b5   :  { %v5405_v61 = vadd.f32 %v15665_v60, %v5404_v52  ;;  %11284 = vmatprep.mubr.msk.f32.mxu1 %vm1131_vm15, %v5513_v63 }
 0x7b6   :  { %11285 = vmatmul.mubr.msk.f32.gmra.mrb[176].mxu1 %vm1131_vm15, %v5514_v3  ;;  %v5516_v4 = vmax.f32 %v5410_v16, 0.0 }
 0x7b7   :  { %v5515_v34 = vmax.f32 %v5405_v61, 0.0  ;;  %v11180_v31 = vpop.f32.mrb[184].mxu0 }
 0x7b8   :  { %v5420_v59 = vadd.f32 %v11180_v31, %v15665_v60  ;;  %v5414_v22 = vpop.f32.mrb[185].mxu0 }
 0x7b9   :  { %v5415_v32 = vadd.f32 %v15665_v60, %v5414_v22  ;;  %11287 = vmatprep.mubr.msk.f32.mxu1 %vm1131_vm15, %v5515_v34 }
 0x7ba   :  { %11288 = vmatmul.mubr.msk.f32.gmra.mrb[178].mxu1 %vm1131_vm15, %v5516_v4  ;;  %v5518_v27 = vmax.f32 %v5420_v59, 0.0 }
 0x7bb   :  { %v5517_v40 = vmax.f32 %v5415_v32, 0.0  ;;  %v11183_v56 = vpop.f32.mrb[186].mxu0 }
 0x7bc   :  { %v5430_v35 = vadd.f32 %v11183_v56, %v15665_v60  ;;  %v5424_v1 = vpop.f32.mrb[187].mxu0 }
 0x7bd   :  { %v5425_v19 = vadd.f32 %v15665_v60, %v5424_v1  ;;  %11290 = vmatprep.mubr.msk.f32.mxu1 %vm1131_vm15, %v5517_v40 }
 0x7be   :  { %11291 = vmatmul.mubr.msk.f32.gmra.mrb[180].mxu1 %vm1131_vm15, %v5518_v27  ;;  %v5520_v28 = vmax.f32 %v5430_v35, 0.0 }
 0x7bf   :  { %v5519_v50 = vmax.f32 %v5425_v19, 0.0  ;;  %v11186_v41 = vpop.f32.mrb[188].mxu0 }
 0x7c0   :  { %v5440_v10 = vadd.f32 %v11186_v41, %v15665_v60  ;;  %v5434_v21 = vpop.f32.mrb[189].mxu0 }
 0x7c1   :  { %v5435_v25 = vadd.f32 %v15665_v60, %v5434_v21  ;;  %11293 = vmatprep.mubr.msk.f32.mxu1 %vm1131_vm15, %v5519_v50 }
 0x7c2   :  { %11294 = vmatmul.mubr.msk.f32.gmra.mrb[182].mxu1 %vm1131_vm15, %v5520_v28  ;;  %v5522_v15 = vmax.f32 %v5440_v10, 0.0 }
 0x7c3   :  { %v5521_v33 = vmax.f32 %v5435_v25, 0.0  ;;  %v11189_v24 = vpop.f32.mrb[190].mxu0 }
 0x7c4   :  { %v5450_v38 = vadd.f32 %v11189_v24, %v15665_v60  ;;  %v5444_v44 = vpop.f32.mrb[191].mxu0 }
 0x7c5   :  { %v5445_v55 = vadd.f32 %v15665_v60, %v5444_v44  ;;  %11296 = vmatprep.mubr.msk.f32.mxu1 %vm1131_vm15, %v5521_v33 }
 0x7c6   :  { %11297 = vmatmul.mubr.msk.f32.gmra.mrb[184].mxu1 %vm1131_vm15, %v5522_v15  ;;  %v5524_v57 = vmax.f32 %v5450_v38, 0.0 }
 0x7c7   :  { %v5523_v45 = vmax.f32 %v5445_v55, 0.0 }
 0x7c9   :  { %11299 = vmatprep.mubr.msk.f32.mxu1 %vm1131_vm15, %v5523_v45 }
 0x7ca   :  { %11300 = vmatmul.mubr.msk.f32.gmra.mrb[186].mxu1 %vm1131_vm15, %v5524_v57 }
 0x7cb   :  { %v11192_v23 = vpop.f32.mrb[192].mxu0 }
 0x7cc   :  { %v5460_v46 = vadd.f32 %v11192_v23, %v15665_v60  ;;  %v5454_v30 = vpop.f32.mrb[193].mxu0 }
 0x7cd   :  { %v5455_v49 = vadd.f32 %v15665_v60, %v5454_v30 }
 0x7ce   :  { %v5526_v8 = vmax.f32 %v5460_v46, 0.0 }
 0x7cf   :  { %v5525_v12 = vmax.f32 %v5455_v49, 0.0 }
 0x7d1   :  { %11302 = vmatprep.mubr.msk.f32.mxu1 %vm1131_vm15, %v5525_v12 }
 0x7d2   :  { %11303 = vmatmul.mubr.msk.f32.gmra.mrb[188].mxu1 %vm1131_vm15, %v5526_v8 }
 0x819   :  { %v11211_v39 = vpop.f32.mrb[126].mxu1 }
 0x81a   :  { %v15807_v6 = vadd.f32 %v11211_v39, %v15804_v51  ;;  %v5798_v53 = vpop.f32.mrb[127].mxu1 }
 0x81b   :  { %v15810_v20 = vadd.f32 %v15804_v51, %v5798_v53 }
 0x81c   :  { %v6118_v60 = vmul.f32 %v15807_v6, %v15807_v6 }
 0x81d   :  { %v6117_v5 = vmul.f32 %v15810_v20, %v15810_v20  ;;  %v11214_v0 = vpop.f32.mrb[128].mxu1 }
 0x81e   :  { %v15817_v11 = vadd.f32 %v11214_v0, %v15804_v51  ;;  %v5808_v9 = vpop.f32.mrb[129].mxu1  ;;  %v6184_v17 = vsel %vm1773_vm11, %v6118_v60, 0.0 }
 0x81f   :  { %v15821_v2 = vadd.f32 %v15804_v51, %v5808_v9  ;;  %6185 = vadd.xlane.f32.xlu0 %v6184_v17  ;;  %v6181_v43 = vsel %vm1773_vm11, %v6117_v5, 0.0 }
 0x820   :  { %v6120_v7 = vmul.f32 %v15817_v11, %v15817_v11  ;;  %6182 = vadd.xlane.f32.xlu1 %v6181_v43 }
 0x821   :  { %v6119_v54 = vmul.f32 %v15821_v2, %v15821_v2  ;;  %v11217_v14 = vpop.f32.mrb[130].mxu1 }
 0x822   :  { %v15829_v58 = vadd.f32 %v11217_v14, %v15804_v51  ;;  %v5818_v42 = vpop.f32.mrb[131].mxu1  ;;  %v6190_v36 = vsel %vm1773_vm11, %v6120_v7, 0.0 }
 0x823   :  { %v15833_v37 = vadd.f32 %v15804_v51, %v5818_v42  ;;  %6191 = vadd.xlane.f32.xlu0 %v6190_v36  ;;  %v6187_v48 = vsel %vm1773_vm11, %v6119_v54, 0.0 }
 0x824   :  { %v6122_v29 = vmul.f32 %v15829_v58, %v15829_v58  ;;  %6188 = vadd.xlane.f32.xlu1 %v6187_v48 }
 0x825   :  { %v6121_v63 = vmul.f32 %v15833_v37, %v15833_v37  ;;  %v11220_v26 = vpop.f32.mrb[132].mxu1 }
 0x826   :  { %v15841_v3 = vadd.f32 %v11220_v26, %v15804_v51  ;;  %v5828_v16 = vpop.f32.mrb[133].mxu1  ;;  %v6196_v52 = vsel %vm1773_vm11, %v6122_v29, 0.0 }
 0x827   :  { %v15845_v61 = vadd.f32 %v15804_v51, %v5828_v16  ;;  %6197 = vadd.xlane.f32.xlu0 %v6196_v52  ;;  %v6193_v34 = vsel %vm1773_vm11, %v6121_v63, 0.0 }
 0x828   :  { %v6124_v31 = vmul.f32 %v15841_v3, %v15841_v3  ;;  %6194 = vadd.xlane.f32.xlu1 %v6193_v34 }
 0x829   :  { %v6123_v4 = vmul.f32 %v15845_v61, %v15845_v61  ;;  %v11223_v59 = vpop.f32.mrb[134].mxu1 }
 0x82a   :  { %v15853_v22 = vadd.f32 %v11223_v59, %v15804_v51  ;;  %v5838_v32 = vpop.f32.mrb[135].mxu1  ;;  %v6202_v40 = vsel %vm1773_vm11, %v6124_v31, 0.0 }
 0x82b   :  { %v15857_v56 = vadd.f32 %v15804_v51, %v5838_v32  ;;  %6203 = vadd.xlane.f32.xlu0 %v6202_v40  ;;  %v6199_v27 = vsel %vm1773_vm11, %v6123_v4, 0.0 }
 0x82c   :  { %v6126_v35 = vmul.f32 %v15853_v22, %v15853_v22  ;;  %6200 = vadd.xlane.f32.xlu1 %v6199_v27 }
 0x82d   :  { %v6125_v1 = vmul.f32 %v15857_v56, %v15857_v56  ;;  %v11226_v19 = vpop.f32.mrb[136].mxu1 }
 0x82e   :  { %v15865_v62 = vadd.f32 %v11226_v19, %v15804_v51  ;;  %v5848_v18 = vpop.f32.mrb[137].mxu1  ;;  %v6208_v13 = vsel %vm1773_vm11, %v6126_v35, 0.0 }
 0x82f   :  { %v15869_v50 = vadd.f32 %v15804_v51, %v5848_v18  ;;  %6209 = vadd.xlane.f32.xlu0 %v6208_v13  ;;  %v6205_v41 = vsel %vm1773_vm11, %v6125_v1, 0.0 }
 0x830   :  { %v6128_v28 = vmul.f32 %v15865_v62, %v15865_v62  ;;  %6206 = vadd.xlane.f32.xlu1 %v6205_v41 }
 0x831   :  { %v6127_v10 = vmul.f32 %v15869_v50, %v15869_v50  ;;  %v11229_v21 = vpop.f32.mrb[138].mxu1 }
 0x832   :  { %v15877_v25 = vadd.f32 %v11229_v21, %v15804_v51  ;;  %v5858_v33 = vpop.f32.mrb[139].mxu1  ;;  %v6214_v24 = vsel %vm1773_vm11, %v6128_v28, 0.0 }
 0x833   :  { %v15881_v15 = vadd.f32 %v15804_v51, %v5858_v33  ;;  %6215 = vadd.xlane.f32.xlu0 %v6214_v24  ;;  %v6211_v38 = vsel %vm1773_vm11, %v6127_v10, 0.0 }
 0x834   :  { %v6130_v44 = vmul.f32 %v15877_v25, %v15877_v25  ;;  %6212 = vadd.xlane.f32.xlu1 %v6211_v38 }
 0x835   :  { %v6129_v55 = vmul.f32 %v15881_v15, %v15881_v15  ;;  %v11232_v45 = vpop.f32.mrb[140].mxu1 }
 0x836   :  { %v15889_v57 = vadd.f32 %v11232_v45, %v15804_v51  ;;  %v5868_v23 = vpop.f32.mrb[141].mxu1  ;;  %v6220_v46 = vsel %vm1773_vm11, %v6130_v44, 0.0 }
 0x837   :  { %v15893_v30 = vadd.f32 %v15804_v51, %v5868_v23  ;;  %6221 = vadd.xlane.f32.xlu0 %v6220_v46  ;;  %v6217_v49 = vsel %vm1773_vm11, %v6129_v55, 0.0 }
 0x838   :  { %v6132_v12 = vmul.f32 %v15889_v57, %v15889_v57  ;;  %6218 = vadd.xlane.f32.xlu1 %v6217_v49 }
 0x839   :  { %v6131_v8 = vmul.f32 %v15893_v30, %v15893_v30  ;;  %v11235_v39 = vpop.f32.mrb[142].mxu1 }
 0x83a   :  { %v15901_v53 = vadd.f32 %v11235_v39, %v15804_v51  ;;  %v6226_v60 = vsel %vm1773_vm11, %v6132_v12, 0.0  ;;  %v5878_v5 = vpop.f32.mrb[143].mxu1 }
 0x83b   :  { %6227 = vadd.xlane.f32.xlu0 %v6226_v60  ;;  %v15905_v0 = vadd.f32 %v15804_v51, %v5878_v5  ;;  %v6223_v9 = vsel %vm1773_vm11, %v6131_v8, 0.0 }
 0x83c   :  { %v6134_v17 = vmul.f32 %v15901_v53, %v15901_v53  ;;  %6224 = vadd.xlane.f32.xlu1 %v6223_v9 }
 0x83d   :  { %v6133_v43 = vmul.f32 %v15905_v0, %v15905_v0 }
 0x83e   :  { %v6232_v7 = vsel %vm1773_vm11, %v6134_v17, 0.0 }
 0x83f   :  { %6233 = vadd.xlane.f32.xlu0 %v6232_v7  ;;  %v6229_v54 = vsel %vm1773_vm11, %v6133_v43, 0.0 }
 0x840   :  { %6230 = vadd.xlane.f32.xlu1 %v6229_v54 }
 0x841   :  { %v11238_v14 = vpop.f32.mrb[144].mxu1 }
 0x842   :  { %v15915_v42 = vadd.f32 %v11238_v14, %v15804_v51  ;;  %v5888_v36 = vpop.f32.mrb[145].mxu1 }
 0x843   :  { %v15918_v48 = vadd.f32 %v15804_v51, %v5888_v36 }
 0x844   :  { %v6136_v29 = vmul.f32 %v15915_v42, %v15915_v42 }
 0x845   :  { %v6135_v63 = vmul.f32 %v15918_v48, %v15918_v48 }
 0x846   :  { %v6238_v26 = vsel %vm1773_vm11, %v6136_v29, 0.0 }
 0x847   :  { %6239 = vadd.xlane.f32.xlu0 %v6238_v26  ;;  %v6235_v16 = vsel %vm1773_vm11, %v6135_v63, 0.0 }
 0x848   :  { %6236 = vadd.xlane.f32.xlu1 %v6235_v16 }
 0x849   :  { %v11241_v52 = vpop.f32.mrb[146].mxu1 }
 0x84a   :  { %v15927_v34 = vadd.f32 %v11241_v52, %v15804_v51  ;;  %v5898_v31 = vpop.f32.mrb[147].mxu1 }
 0x84b   :  { %v15930_v4 = vadd.f32 %v15804_v51, %v5898_v31 }
 0x84c   :  { %v6138_v59 = vmul.f32 %v15927_v34, %v15927_v34 }
 0x84d   :  { %v6137_v32 = vmul.f32 %v15930_v4, %v15930_v4 }
 0x84e   :  { %v6244_v40 = vsel %vm1773_vm11, %v6138_v59, 0.0 }
 0x84f   :  { %6245 = vadd.xlane.f32.xlu0 %v6244_v40  ;;  %v6241_v27 = vsel %vm1773_vm11, %v6137_v32, 0.0 }
 0x850   :  { %6242 = vadd.xlane.f32.xlu1 %v6241_v27 }
 0x851   :  { %v11244_v35 = vpop.f32.mrb[148].mxu1 }
 0x852   :  { %v15939_v1 = vadd.f32 %v11244_v35, %v15804_v51  ;;  %v5908_v19 = vpop.f32.mrb[149].mxu1 }
 0x853   :  { %v15942_v18 = vadd.f32 %v15804_v51, %v5908_v19 }
 0x854   :  { %v6140_v13 = vmul.f32 %v15939_v1, %v15939_v1 }
 0x855   :  { %v6139_v41 = vmul.f32 %v15942_v18, %v15942_v18  ;;  %v11247_v28 = vpop.f32.mrb[150].mxu1 }
 0x856   :  { %v15949_v10 = vadd.f32 %v11247_v28, %v15804_v51  ;;  %v5918_v21 = vpop.f32.mrb[151].mxu1  ;;  %v6250_v33 = vsel %vm1773_vm11, %v6140_v13, 0.0 }
 0x857   :  { %v15953_v24 = vadd.f32 %v15804_v51, %v5918_v21  ;;  %6251 = vadd.xlane.f32.xlu0 %v6250_v33  ;;  %v6247_v38 = vsel %vm1773_vm11, %v6139_v41, 0.0 }
 0x858   :  { %v6142_v44 = vmul.f32 %v15949_v10, %v15949_v10  ;;  %6248 = vadd.xlane.f32.xlu1 %v6247_v38 }
 0x859   :  { %v6141_v55 = vmul.f32 %v15953_v24, %v15953_v24  ;;  %v11250_v45 = vpop.f32.mrb[152].mxu1 }
 0x85a   :  { %v15961_v23 = vadd.f32 %v11250_v45, %v15804_v51  ;;  %v5928_v46 = vpop.f32.mrb[153].mxu1  ;;  %v6256_v49 = vsel %vm1773_vm11, %v6142_v44, 0.0 }
 0x85b   :  { %v15965_v12 = vadd.f32 %v15804_v51, %v5928_v46  ;;  %6257 = vadd.xlane.f32.xlu0 %v6256_v49  ;;  %v6253_v8 = vsel %vm1773_vm11, %v6141_v55, 0.0 }
 0x85c   :  { %v6144_v39 = vmul.f32 %v15961_v23, %v15961_v23  ;;  %6254 = vadd.xlane.f32.xlu1 %v6253_v8 }
 0x85d   :  { %v6143_v60 = vmul.f32 %v15965_v12, %v15965_v12  ;;  %v11253_v5 = vpop.f32.mrb[154].mxu1 }
 0x85e   :  { %v15973_v9 = vadd.f32 %v11253_v5, %v15804_v51  ;;  %v5938_v17 = vpop.f32.mrb[155].mxu1  ;;  %v6262_v43 = vsel %vm1773_vm11, %v6144_v39, 0.0 }
 0x85f   :  { %v15977_v7 = vadd.f32 %v15804_v51, %v5938_v17  ;;  %6263 = vadd.xlane.f32.xlu0 %v6262_v43  ;;  %v6259_v54 = vsel %vm1773_vm11, %v6143_v60, 0.0 }
 0x860   :  { %v6146_v14 = vmul.f32 %v15973_v9, %v15973_v9  ;;  %6260 = vadd.xlane.f32.xlu1 %v6259_v54 }
 0x861   :  { %v6145_v36 = vmul.f32 %v15977_v7, %v15977_v7  ;;  %v11256_v29 = vpop.f32.mrb[156].mxu1 }
 0x862   :  { %v15985_v63 = vadd.f32 %v11256_v29, %v15804_v51  ;;  %v5948_v26 = vpop.f32.mrb[157].mxu1  ;;  %v6268_v16 = vsel %vm1773_vm11, %v6146_v14, 0.0 }
 0x863   :  { %v15989_v52 = vadd.f32 %v15804_v51, %v5948_v26  ;;  %6269 = vadd.xlane.f32.xlu0 %v6268_v16  ;;  %v6265_v31 = vsel %vm1773_vm11, %v6145_v36, 0.0 }
 0x864   :  { %v6148_v59 = vmul.f32 %v15985_v63, %v15985_v63  ;;  %6266 = vadd.xlane.f32.xlu1 %v6265_v31 }
 0x865   :  { %v6147_v32 = vmul.f32 %v15989_v52, %v15989_v52  ;;  %v11259_v40 = vpop.f32.mrb[158].mxu1 }
 0x866   :  { %v15997_v27 = vadd.f32 %v11259_v40, %v15804_v51  ;;  %v5958_v35 = vpop.f32.mrb[159].mxu1  ;;  %v6274_v19 = vsel %vm1773_vm11, %v6148_v59, 0.0 }
 0x867   :  { %v16001_v13 = vadd.f32 %v15804_v51, %v5958_v35  ;;  %6275 = vadd.xlane.f32.xlu0 %v6274_v19  ;;  %v6271_v41 = vsel %vm1773_vm11, %v6147_v32, 0.0 }
 0x868   :  { %v6150_v28 = vmul.f32 %v15997_v27, %v15997_v27  ;;  %6272 = vadd.xlane.f32.xlu1 %v6271_v41 }
 0x869   :  { %v6149_v21 = vmul.f32 %v16001_v13, %v16001_v13  ;;  %v11262_v33 = vpop.f32.mrb[160].mxu1 }
 0x86a   :  { %v16009_v38 = vadd.f32 %v11262_v33, %v15804_v51  ;;  %v5968_v44 = vpop.f32.mrb[161].mxu1  ;;  %v6280_v55 = vsel %vm1773_vm11, %v6150_v28, 0.0 }
 0x86b   :  { %v16013_v45 = vadd.f32 %v15804_v51, %v5968_v44  ;;  %6281 = vadd.xlane.f32.xlu0 %v6280_v55  ;;  %v6277_v46 = vsel %vm1773_vm11, %v6149_v21, 0.0 }
 0x86c   :  { %v6152_v49 = vmul.f32 %v16009_v38, %v16009_v38  ;;  %6278 = vadd.xlane.f32.xlu1 %v6277_v46 }
 0x86d   :  { %v6151_v8 = vmul.f32 %v16013_v45, %v16013_v45  ;;  %v11265_v39 = vpop.f32.mrb[162].mxu1 }
 0x86e   :  { %v16021_v60 = vadd.f32 %v11265_v39, %v15804_v51  ;;  %v5978_v5 = vpop.f32.mrb[163].mxu1  ;;  %v6286_v17 = vsel %vm1773_vm11, %v6152_v49, 0.0 }
 0x86f   :  { %v16025_v43 = vadd.f32 %v15804_v51, %v5978_v5  ;;  %6287 = vadd.xlane.f32.xlu0 %v6286_v17  ;;  %v6283_v54 = vsel %vm1773_vm11, %v6151_v8, 0.0 }
 0x870   :  { %v6154_v14 = vmul.f32 %v16021_v60, %v16021_v60  ;;  %6284 = vadd.xlane.f32.xlu1 %v6283_v54 }
 0x871   :  { %v6153_v36 = vmul.f32 %v16025_v43, %v16025_v43  ;;  %v11268_v29 = vpop.f32.mrb[164].mxu1 }
 0x872   :  { %v16033_v26 = vadd.f32 %v11268_v29, %v15804_v51  ;;  %v5988_v16 = vpop.f32.mrb[165].mxu1  ;;  %v6292_v31 = vsel %vm1773_vm11, %v6154_v14, 0.0 }
 0x873   :  { %v16037_v59 = vadd.f32 %v15804_v51, %v5988_v16  ;;  %6293 = vadd.xlane.f32.xlu0 %v6292_v31  ;;  %v6289_v32 = vsel %vm1773_vm11, %v6153_v36, 0.0 }
 0x874   :  { %v6156_v40 = vmul.f32 %v16033_v26, %v16033_v26  ;;  %6290 = vadd.xlane.f32.xlu1 %v6289_v32 }
 0x875   :  { %v6155_v35 = vmul.f32 %v16037_v59, %v16037_v59  ;;  %v11271_v19 = vpop.f32.mrb[166].mxu1 }
 0x876   :  { %v16045_v41 = vadd.f32 %v11271_v19, %v15804_v51  ;;  %v5998_v28 = vpop.f32.mrb[167].mxu1  ;;  %v6298_v21 = vsel %vm1773_vm11, %v6156_v40, 0.0 }
 0x877   :  { %v16049_v33 = vadd.f32 %v15804_v51, %v5998_v28  ;;  %6299 = vadd.xlane.f32.xlu0 %v6298_v21  ;;  %v6295_v44 = vsel %vm1773_vm11, %v6155_v35, 0.0 }
 0x878   :  { %v6158_v55 = vmul.f32 %v16045_v41, %v16045_v41  ;;  %6296 = vadd.xlane.f32.xlu1 %v6295_v44 }
 0x879   :  { %v6157_v46 = vmul.f32 %v16049_v33, %v16049_v33  ;;  %v11274_v49 = vpop.f32.mrb[168].mxu1 }
 0x87a   :  { %v16057_v8 = vadd.f32 %v11274_v49, %v15804_v51  ;;  %v6008_v39 = vpop.f32.mrb[169].mxu1  ;;  %v6304_v5 = vsel %vm1773_vm11, %v6158_v55, 0.0 }
 0x87b   :  { %v16061_v17 = vadd.f32 %v15804_v51, %v6008_v39  ;;  %6305 = vadd.xlane.f32.xlu0 %v6304_v5  ;;  %v6301_v54 = vsel %vm1773_vm11, %v6157_v46, 0.0 }
 0x87c   :  { %v6160_v14 = vmul.f32 %v16057_v8, %v16057_v8  ;;  %6302 = vadd.xlane.f32.xlu1 %v6301_v54 }
 0x87d   :  { %v6159_v36 = vmul.f32 %v16061_v17, %v16061_v17  ;;  %v11277_v29 = vpop.f32.mrb[170].mxu1 }
 0x87e   :  { %v16069_v16 = vadd.f32 %v11277_v29, %v15804_v51  ;;  %v6018_v31 = vpop.f32.mrb[171].mxu1  ;;  %v6310_v32 = vsel %vm1773_vm11, %v6160_v14, 0.0 }
 0x87f   :  { %v16073_v40 = vadd.f32 %v15804_v51, %v6018_v31  ;;  %6311 = vadd.xlane.f32.xlu0 %v6310_v32  ;;  %v6307_v35 = vsel %vm1773_vm11, %v6159_v36, 0.0 }
 0x880   :  { %v6162_v19 = vmul.f32 %v16069_v16, %v16069_v16  ;;  %6308 = vadd.xlane.f32.xlu1 %v6307_v35 }
 0x881   :  { %v6161_v28 = vmul.f32 %v16073_v40, %v16073_v40  ;;  %v11280_v21 = vpop.f32.mrb[172].mxu1 }
 0x882   :  { %v16081_v44 = vadd.f32 %v11280_v21, %v15804_v51  ;;  %v6028_v55 = vpop.f32.mrb[173].mxu1  ;;  %v6316_v46 = vsel %vm1773_vm11, %v6162_v19, 0.0 }
 0x883   :  { %v16085_v49 = vadd.f32 %v15804_v51, %v6028_v55  ;;  %6317 = vadd.xlane.f32.xlu0 %v6316_v46  ;;  %v6313_v39 = vsel %vm1773_vm11, %v6161_v28, 0.0 }
 0x884   :  { %19184 = vst [vmem:[#allocation164_spill] sm:$0xff] %v16081_v44  ;;  %v6164_v5 = vmul.f32 %v16081_v44, %v16081_v44  ;;  %6314 = vadd.xlane.f32.xlu1 %v6313_v39 }
 0x885   :  { %v6163_v54 = vmul.f32 %v16085_v49, %v16085_v49  ;;  %v11283_v14 = vpop.f32.mrb[174].mxu1 }
 0x886   :  { %v16093_v36 = vadd.f32 %v11283_v14, %v15804_v51  ;;  %v6038_v29 = vpop.f32.mrb[175].mxu1  ;;  %v6322_v31 = vsel %vm1773_vm11, %v6164_v5, 0.0 }
 0x887   :  { %v16097_v32 = vadd.f32 %v15804_v51, %v6038_v29  ;;  %6323 = vadd.xlane.f32.xlu0 %v6322_v31  ;;  %v6319_v35 = vsel %vm1773_vm11, %v6163_v54, 0.0 }
 0x888   :  { %19185 = vst [vmem:[#allocation165_spill] sm:$0xff] %v16093_v36  ;;  %v6166_v19 = vmul.f32 %v16093_v36, %v16093_v36  ;;  %6320 = vadd.xlane.f32.xlu1 %v6319_v35 }
 0x889   :  { %19186 = vst [vmem:[#allocation166_spill] sm:$0xff] %v16097_v32  ;;  %v6165_v28 = vmul.f32 %v16097_v32, %v16097_v32  ;;  %v11286_v21 = vpop.f32.mrb[176].mxu1 }
 0x88a   :  { %v16105_v55 = vadd.f32 %v11286_v21, %v15804_v51  ;;  %v6048_v46 = vpop.f32.mrb[177].mxu1  ;;  %v6328_v39 = vsel %vm1773_vm11, %v6166_v19, 0.0 }
 0x88b   :  { %v16109_v5 = vadd.f32 %v15804_v51, %v6048_v46  ;;  %6329 = vadd.xlane.f32.xlu0 %v6328_v39  ;;  %v6325_v54 = vsel %vm1773_vm11, %v6165_v28, 0.0 }
 0x88c   :  { %19187 = vst [vmem:[#allocation167_spill] sm:$0xff] %v16105_v55  ;;  %v6168_v14 = vmul.f32 %v16105_v55, %v16105_v55  ;;  %6326 = vadd.xlane.f32.xlu1 %v6325_v54 }
 0x88d   :  { %19188 = vst [vmem:[#allocation183_spill] sm:$0xff] %v16109_v5  ;;  %v6167_v29 = vmul.f32 %v16109_v5, %v16109_v5  ;;  %v11289_v31 = vpop.f32.mrb[178].mxu1 }
 0x88e   :  { %v16117_v35 = vadd.f32 %v11289_v31, %v15804_v51  ;;  %v6058_v21 = vpop.f32.mrb[179].mxu1  ;;  %v6334_v19 = vsel %vm1773_vm11, %v6168_v14, 0.0 }
 0x88f   :  { %v16121_v46 = vadd.f32 %v15804_v51, %v6058_v21  ;;  %6335 = vadd.xlane.f32.xlu0 %v6334_v19  ;;  %v6331_v28 = vsel %vm1773_vm11, %v6167_v29, 0.0 }
 0x890   :  { %19189 = vst [vmem:[#allocation168_spill] sm:$0xff] %v16117_v35  ;;  %v6170_v39 = vmul.f32 %v16117_v35, %v16117_v35  ;;  %6332 = vadd.xlane.f32.xlu1 %v6331_v28 }
 0x891   :  { %19190 = vst [vmem:[#allocation169_spill] sm:$0xff] %v16121_v46  ;;  %v6169_v54 = vmul.f32 %v16121_v46, %v16121_v46  ;;  %v11292_v47 = vpop.f32.mrb[180].mxu1 }
 0x892   :  { %v16129_v31 = vadd.f32 %v11292_v47, %v15804_v51  ;;  %v6068_v55 = vpop.f32.mrb[181].mxu1  ;;  %v6340_v14 = vsel %vm1773_vm11, %v6170_v39, 0.0 }
 0x893   :  { %v16133_v21 = vadd.f32 %v15804_v51, %v6068_v55  ;;  %6341 = vadd.xlane.f32.xlu0 %v6340_v14  ;;  %v6337_v29 = vsel %vm1773_vm11, %v6169_v54, 0.0 }
 0x894   :  { %19191 = vst [vmem:[#allocation170_spill] sm:$0xff] %v16129_v31  ;;  %v6172_v19 = vmul.f32 %v16129_v31, %v16129_v31  ;;  %6338 = vadd.xlane.f32.xlu1 %v6337_v29  ;;  %v7277_v29 = vld [vmem:[%s18383_s2 + $0x1d0] sm:$0xff] }
 0x895   :  { %19192 = vst [vmem:[#allocation171_spill] sm:$0xff] %v16133_v21  ;;  %v6171_v28 = vmul.f32 %v16133_v21, %v16133_v21  ;;  %v11295_v35 = vpop.f32.mrb[182].mxu1 }
 0x896   :  { %v16141_v47 = vadd.f32 %v11295_v35, %v15804_v51  ;;  %v6078_v46 = vpop.f32.mrb[183].mxu1  ;;  %v6346_v39 = vsel %vm1773_vm11, %v6172_v19, 0.0  ;;  %v7278_v35 = vld [vmem:[%s18383_s2 + $0x1d8] sm:$0xff] }
 0x897   :  { %v16145_v55 = vadd.f32 %v15804_v51, %v6078_v46  ;;  %6347 = vadd.xlane.f32.xlu0 %v6346_v39  ;;  %v6343_v54 = vsel %vm1773_vm11, %v6171_v28, 0.0  ;;  %v11605_v31 = vpack.c.bf16 %v7278_v35, %v7277_v29 }
 0x898   :  { %19193 = vst [vmem:[#allocation186_spill] sm:$0xff] %v16141_v47  ;;  %v6174_v14 = vmul.f32 %v16141_v47, %v16141_v47  ;;  %6344 = vadd.xlane.f32.xlu1 %v6343_v54 }
 0x899   :  { %19194 = vst [vmem:[#allocation187_spill] sm:$0xff] %v16145_v55  ;;  %v6173_v19 = vmul.f32 %v16145_v55, %v16145_v55  ;;  %v11298_v46 = vpop.f32.mrb[184].mxu1  ;;  %11606 = vmatprep.subr.bf16.mxu1 %v11605_v31 }
 0x89a   :  { %v16159_v39 = vadd.f32 %v11298_v46, %v15804_v51  ;;  %v6088_v28 = vpop.f32.mrb[185].mxu1  ;;  %v6352_v47 = vsel %vm1773_vm11, %v6174_v14, 0.0  ;;  %11608 = vmatpush3.bf16.msra.mxu1 %v11605_v31 }
 0x89b   :  { %v16163_v54 = vadd.f32 %v15804_v51, %v6088_v28  ;;  %6353 = vadd.xlane.f32.xlu0 %v6352_v47  ;;  %v6349_v21 = vsel %vm1773_vm11, %v6173_v19, 0.0 }
 0x89c   :  { %19195 = vst [vmem:[#allocation172_spill] sm:$0xff] %v16159_v39  ;;  %v6176_v5 = vmul.f32 %v16159_v39, %v16159_v39  ;;  %6350 = vadd.xlane.f32.xlu1 %v6349_v21 }
 0x89d   :  { %19196 = vst [vmem:[#allocation173_spill] sm:$0xff] %v16163_v54  ;;  %v6175_v29 = vmul.f32 %v16163_v54, %v16163_v54  ;;  %v11301_v35 = vpop.f32.mrb[186].mxu1 }
 0x89e   :  { %v16171_v46 = vadd.f32 %v11301_v35, %v15804_v51  ;;  %v6098_v14 = vpop.f32.mrb[187].mxu1  ;;  %v6358_v28 = vsel %vm1773_vm11, %v6176_v5, 0.0 }
 0x89f   :  { %v16175_v47 = vadd.f32 %v15804_v51, %v6098_v14  ;;  %6359 = vadd.xlane.f32.xlu0 %v6358_v28  ;;  %v6355_v19 = vsel %vm1773_vm11, %v6175_v29, 0.0 }
 0x8a0   :  { %19197 = vst [vmem:[#allocation188_spill] sm:$0xff] %v16171_v46  ;;  %v6178_v21 = vmul.f32 %v16171_v46, %v16171_v46  ;;  %6356 = vadd.xlane.f32.xlu1 %v6355_v19 }
 0x8a1   :  { %19198 = vst [vmem:[#allocation174_spill] sm:$0xff] %v16175_v47  ;;  %v6177_v31 = vmul.f32 %v16175_v47, %v16175_v47 }
 0x8a2   :  { %v6364_v39 = vsel %vm1773_vm11, %v6178_v21, 0.0 }
 0x8a3   :  { %6365 = vadd.xlane.f32.xlu0 %v6364_v39  ;;  %v6361_v35 = vsel %vm1773_vm11, %v6177_v31, 0.0 }
 0x8a4   :  { %6362 = vadd.xlane.f32.xlu1 %v6361_v35 }
 0x8a5   :  { %v11304_v5 = vpop.f32.mrb[188].mxu1 }
 0x8a6   :  { %v16185_v14 = vadd.f32 %v11304_v5, %v15804_v51  ;;  %v6108_v28 = vpop.f32.mrb[189].mxu1 }
 0x8a7   :  { %v16188_v29 = vadd.f32 %v15804_v51, %v6108_v28 }
 0x8a8   :  { %19199 = vst [vmem:[#allocation175_spill] sm:$0xff] %v16185_v14  ;;  %v6180_v19 = vmul.f32 %v16185_v14, %v16185_v14 }
 0x8a9   :  { %19200 = vst [vmem:[#allocation191_spill] sm:$0xff] %v16188_v29  ;;  %v6179_v46 = vmul.f32 %v16188_v29, %v16188_v29 }
 0x8aa   :  { %v6370_v21 = vsel %vm1773_vm11, %v6180_v19, 0.0 }
 0x8ab   :  { %6371 = vadd.xlane.f32.xlu0 %v6370_v21  ;;  %v6367_v39 = vsel %vm1773_vm11, %v6179_v46, 0.0  ;;  %v7279_v46 = vld [vmem:[%s18383_s2 + $0x1e0] sm:$0xff]  ;;  %v7280_v21 = vld [vmem:[%s18383_s2 + $0x1e8] sm:$0xff] }
 0x8ac   :  { %v6186_v31 = vpop.xlane.xlu0 %6185  ;;  %6368 = vadd.xlane.f32.xlu1 %v6367_v39 }
 0x8ad   :  { %v6438_v35 = vmax.f32 %v6186_v31, 1e-24  ;;  %v6183_v5 = vpop.xlane.xlu1 %6182 }
 0x8ae   :  { %v6437_v47 = vmax.f32 %v6183_v5, 1e-24 }
 0x8af   :  { %11764 = vrsqrt.f32 %v6438_v35 }
 0x8b0   :  { %11766 = vrsqrt.f32 %v6437_v47  ;;  %v6192_v51 = vpop.xlane.xlu0 %6191  ;;  %v11609_v47 = vpack.c.bf16 %v7280_v21, %v7279_v46 }
 0x8b1   :  { %v6440_v28 = vmax.f32 %v6192_v51, 1e-24  ;;  %v6189_v54 = vpop.xlane.xlu1 %6188 }
 0x8b2   :  { %v6439_v55 = vmax.f32 %v6189_v54, 1e-24  ;;  %v6373_v54 = vmul.f32 2.828427, %v15810_v20  ;;  %11610 = vmatprep.subr.bf16.mxu1 %v11609_v47 }
 0x8b3   :  { %11768 = vrsqrt.f32 %v6440_v28  ;;  %11612 = vmatpush3.bf16.msra.mxu1 %v11609_v47 }
 0x8b4   :  { %11770 = vrsqrt.f32 %v6439_v55  ;;  %v6198_v14 = vpop.xlane.xlu0 %6197 }
 0x8b5   :  { %v6442_v29 = vmax.f32 %v6198_v14, 1e-24  ;;  %v6195_v36 = vpop.xlane.xlu1 %6194 }
 0x8b6   :  { %v6441_v19 = vmax.f32 %v6195_v36, 1e-24  ;;  %v6374_v36 = vmul.f32 2.828427, %v15807_v6 }
 0x8b7   :  { %11772 = vrsqrt.f32 %v6442_v29 }
 0x8b8   :  { %11774 = vrsqrt.f32 %v6441_v19  ;;  %v6204_v39 = vpop.xlane.xlu0 %6203  ;;  %v6375_v19 = vmul.f32 2.828427, %v15821_v2 }
 0x8b9   :  { %v11765_v31 = vpop.eup %11764  ;;  %v6444_v55 = vmax.f32 %v6204_v39, 1e-24  ;;  %v6201_v35 = vpop.xlane.xlu1 %6200  ;;  %v6376_v39 = vmul.f32 2.828427, %v15817_v11 }
 0x8ba   :  { %v11767_v14 = vpop.eup %11766  ;;  %v6443_v5 = vmax.f32 %v6201_v35, 1e-24  ;;  %v6566_v28 = vmul.f32 %v11765_v31, %v6374_v36 }
 0x8bb   :  { %11776 = vrsqrt.f32 %v6444_v55  ;;  %v6565_v51 = vmul.f32 %v11767_v14, %v6373_v54  ;;  %v6377_v55 = vmul.f32 2.828427, %v15833_v37  ;;  %v6378_v14 = vmul.f32 2.828427, %v15829_v58 }
 0x8bc   :  { %11778 = vrsqrt.f32 %v6443_v5  ;;  %v6210_v32 = vpop.xlane.xlu0 %6209 }
 0x8bd   :  { %v11769_v29 = vpop.eup %11768  ;;  %v6446_v46 = vmax.f32 %v6210_v32, 1e-24  ;;  %11309 = vmatprep.mubr.msk.f32.mxu0 %vm1773_vm11, %v6565_v51  ;;  %v6207_v20 = vpop.xlane.xlu1 %6206 }
 0x8be   :  { %v11771_v21 = vpop.eup %11770  ;;  %v6445_v44 = vmax.f32 %v6207_v20, 1e-24  ;;  %11310 = vmatmul.mubr.msk.f32.vlgmr.msra.gmra.mrb[194].mxu0 %vm1773_vm11, %v6566_v28  ;;  %v6568_v31 = vmul.f32 %v11769_v29, %v6376_v39  ;;  %v6379_v28 = vmul.f32 2.828427, %v15845_v61  ;;  %v6381_v61 = vmul.f32 2.828427, %v15857_v56 }
 0x8bf   :  { %11780 = vrsqrt.f32 %v6446_v46  ;;  %v6567_v6 = vmul.f32 %v11771_v21, %v6375_v19  ;;  %v6380_v46 = vmul.f32 2.828427, %v15841_v3  ;;  %v7281_v3 = vld [vmem:[%s18383_s2 + $0x1f0] sm:$0xff] }
 0x8c0   :  { %11782 = vrsqrt.f32 %v6445_v44  ;;  %v6216_v47 = vpop.xlane.xlu0 %6215 }
 0x8c1   :  { %v11773_v54 = vpop.eup %11772  ;;  %v6448_v35 = vmax.f32 %v6216_v47, 1e-24  ;;  %11312 = vmatprep.mubr.msk.f32.mxu0 %vm1773_vm11, %v6567_v6  ;;  %v6213_v2 = vpop.xlane.xlu1 %6212  ;;  %v6382_v47 = vmul.f32 2.828427, %v15853_v22  ;;  %v7283_v22 = vld [vmem:[%s18383_s2 + $0x200] sm:$0xff] }
 0x8c2   :  { %v11775_v32 = vpop.eup %11774  ;;  %v6447_v36 = vmax.f32 %v6213_v2, 1e-24  ;;  %11313 = vmatmul.mubr.msk.f32.gmra.mrb[196].mxu0 %vm1773_vm11, %v6568_v31  ;;  %v6570_v44 = vmul.f32 %v11773_v54, %v6378_v14  ;;  %v7282_v2 = vld [vmem:[%s18383_s2 + $0x1f8] sm:$0xff]  ;;  %v7284_v14 = vld [vmem:[%s18383_s2 + $0x208] sm:$0xff] }
 0x8c3   :  { %11784 = vrsqrt.f32 %v6448_v35  ;;  %v6569_v11 = vmul.f32 %v11775_v32, %v6377_v55  ;;  %v11613_v32 = vpack.c.bf16 %v7282_v2, %v7281_v3 }
 0x8c4   :  { %11786 = vrsqrt.f32 %v6447_v36  ;;  %v6222_v5 = vpop.xlane.xlu0 %6221 }
 0x8c5   :  { %v11777_v51 = vpop.eup %11776  ;;  %v6450_v29 = vmax.f32 %v6222_v5, 1e-24  ;;  %11315 = vmatprep.mubr.msk.f32.mxu0 %vm1773_vm11, %v6569_v11  ;;  %v6219_v37 = vpop.xlane.xlu1 %6218  ;;  %v11617_v5 = vpack.c.bf16 %v7284_v14, %v7283_v22  ;;  %11614 = vmatprep.subr.bf16.mxu1 %v11613_v32  ;;  %v6390_v14 = vmul.f32 2.828427, %v15901_v53  ;;  %v6392_v53 = vmul.f32 2.828427, %v15915_v42 }
 0x8c6   :  { %v11779_v19 = vpop.eup %11778  ;;  %v6449_v20 = vmax.f32 %v6219_v37, 1e-24  ;;  %11316 = vmatmul.mubr.msk.f32.gmra.mrb[198].mxu0 %vm1773_vm11, %v6570_v44  ;;  %v6572_v39 = vmul.f32 %v11777_v51, %v6380_v46  ;;  %v6383_v51 = vmul.f32 2.828427, %v15869_v50  ;;  %11616 = vmatpush3.bf16.msra.mxu1 %v11613_v32  ;;  %v6385_v50 = vmul.f32 2.828427, %v15881_v15 }
 0x8c7   :  { %11788 = vrsqrt.f32 %v6450_v29  ;;  %v6571_v58 = vmul.f32 %v11779_v19, %v6379_v28  ;;  %v6384_v19 = vmul.f32 2.828427, %v15865_v62  ;;  %11618 = vmatprep.subr.bf16.mxu1 %v11617_v5  ;;  %v6388_v15 = vmul.f32 2.828427, %v15889_v57 }
 0x8c8   :  { %11790 = vrsqrt.f32 %v6449_v20  ;;  %v6228_v21 = vpop.xlane.xlu0 %6227  ;;  %v6389_v32 = vmul.f32 2.828427, %v15905_v0  ;;  %v6394_v42 = vmul.f32 2.828427, %v15927_v34 }
 0x8c9   :  { %v11781_v6 = vpop.eup %11780  ;;  %v6452_v31 = vmax.f32 %v6228_v21, 1e-24  ;;  %11318 = vmatprep.mubr.msk.f32.mxu0 %vm1773_vm11, %v6571_v58  ;;  %v6225_v54 = vpop.xlane.xlu1 %6224 }
 0x8ca   :  { %v11783_v55 = vpop.eup %11782  ;;  %v6451_v35 = vmax.f32 %v6225_v54, 1e-24  ;;  %11319 = vmatmul.mubr.msk.f32.gmra.mrb[200].mxu0 %vm1773_vm11, %v6572_v39  ;;  %v6574_v11 = vmul.f32 %v11781_v6, %v6382_v47  ;;  %v6386_v6 = vmul.f32 2.828427, %v15877_v25  ;;  %11620 = vmatpush3.bf16.msra.mxu1 %v11617_v5  ;;  %v6387_v54 = vmul.f32 2.828427, %v15893_v30 }
 0x8cb   :  { %11792 = vrsqrt.f32 %v6452_v31  ;;  %v6573_v56 = vmul.f32 %v11783_v55, %v6381_v61 }
 0x8cc   :  { %11794 = vrsqrt.f32 %v6451_v35  ;;  %v6234_v36 = vpop.xlane.xlu0 %6233 }
 0x8cd   :  { %v11785_v44 = vpop.eup %11784  ;;  %v6454_v28 = vmax.f32 %v6234_v36, 1e-24  ;;  %11321 = vmatprep.mubr.msk.f32.mxu0 %vm1773_vm11, %v6573_v56  ;;  %v6231_v29 = vpop.xlane.xlu1 %6230 }
 0x8ce   :  { %v11787_v37 = vpop.eup %11786  ;;  %11322 = vmatmul.mubr.msk.f32.gmra.mrb[202].mxu0 %vm1773_vm11, %v6574_v11  ;;  %v6453_v46 = vmax.f32 %v6231_v29, 1e-24  ;;  %v6576_v58 = vmul.f32 %v11785_v44, %v6384_v19 }
 0x8cf   :  { %11796 = vrsqrt.f32 %v6454_v28  ;;  %v6575_v20 = vmul.f32 %v11787_v37, %v6383_v51  ;;  %v6391_v28 = vmul.f32 2.828427, %v15918_v48 }
 0x8d0   :  { %11798 = vrsqrt.f32 %v6453_v46 }
 0x8d1   :  { %v11789_v21 = vpop.eup %11788  ;;  %11324 = vmatprep.mubr.msk.f32.mxu0 %vm1773_vm11, %v6575_v20 }
 0x8d2   :  { %v11791_v39 = vpop.eup %11790  ;;  %11325 = vmatmul.mubr.msk.f32.gmra.mrb[204].mxu0 %vm1773_vm11, %v6576_v58  ;;  %v6578_v61 = vmul.f32 %v11789_v21, %v6386_v6  ;;  %v6393_v6 = vmul.f32 2.828427, %v15930_v4 }
 0x8d3   :  { %v6577_v62 = vmul.f32 %v11791_v39, %v6385_v50 }
 0x8d4   :  { %v6240_v47 = vpop.xlane.xlu0 %6239 }
 0x8d5   :  { %v11793_v31 = vpop.eup %11792  ;;  %v6456_v55 = vmax.f32 %v6240_v47, 1e-24  ;;  %11327 = vmatprep.mubr.msk.f32.mxu0 %vm1773_vm11, %v6577_v62  ;;  %v6237_v35 = vpop.xlane.xlu1 %6236 }
 0x8d6   :  { %v11795_v3 = vpop.eup %11794  ;;  %11328 = vmatmul.mubr.msk.f32.gmra.mrb[206].mxu0 %vm1773_vm11, %v6578_v61  ;;  %v6455_v2 = vmax.f32 %v6237_v35, 1e-24  ;;  %v6580_v22 = vmul.f32 %v11793_v31, %v6388_v15 }
 0x8d7   :  { %11800 = vrsqrt.f32 %v6456_v55  ;;  %v6579_v25 = vmul.f32 %v11795_v3, %v6387_v54 }
 0x8d8   :  { %11802 = vrsqrt.f32 %v6455_v2 }
 0x8d9   :  { %v11797_v56 = vpop.eup %11796  ;;  %11330 = vmatprep.mubr.msk.f32.mxu0 %vm1773_vm11, %v6579_v25  ;;  %v6395_v25 = vmul.f32 2.828427, %v15942_v18  ;;  %v6398_v18 = vmul.f32 2.828427, %v15949_v10 }
 0x8da   :  { %v11799_v30 = vpop.eup %11798  ;;  %11331 = vmatmul.mubr.msk.f32.gmra.mrb[208].mxu0 %vm1773_vm11, %v6580_v22  ;;  %v6582_v57 = vmul.f32 %v11797_v56, %v6390_v14 }
 0x8db   :  { %v6581_v36 = vmul.f32 %v11799_v30, %v6389_v32  ;;  %v6396_v32 = vmul.f32 2.828427, %v15939_v1 }
 0x8dc   :  { %v6246_v11 = vpop.xlane.xlu0 %6245 }
 0x8dd   :  { %v6458_v5 = vmax.f32 %v6246_v11, 1e-24  ;;  %11333 = vmatprep.mubr.msk.f32.mxu0 %vm1773_vm11, %v6581_v36  ;;  %v6243_v44 = vpop.xlane.xlu1 %6242 }
 0x8de   :  { %v6457_v51 = vmax.f32 %v6243_v44, 1e-24  ;;  %11334 = vmatmul.mubr.msk.f32.gmra.mrb[210].mxu0 %vm1773_vm11, %v6582_v57 }
 0x8df   :  { %11804 = vrsqrt.f32 %v6458_v5  ;;  %v6397_v5 = vmul.f32 2.828427, %v15953_v24 }
 0x8e0   :  { %11806 = vrsqrt.f32 %v6457_v51 }
 0x8e1   :  { %v11801_v0 = vpop.eup %11800 }
 0x8e2   :  { %v11803_v29 = vpop.eup %11802  ;;  %v6584_v46 = vmul.f32 %v11801_v0, %v6392_v53 }
 0x8e3   :  { %v6583_v37 = vmul.f32 %v11803_v29, %v6391_v28 }
 0x8e4   :  { %v6252_v19 = vpop.xlane.xlu0 %6251 }
 0x8e5   :  { %v6460_v20 = vmax.f32 %v6252_v19, 1e-24  ;;  %11336 = vmatprep.mubr.msk.f32.mxu0 %vm1773_vm11, %v6583_v37  ;;  %v6249_v58 = vpop.xlane.xlu1 %6248  ;;  %v6399_v19 = vmul.f32 2.828427, %v15965_v12 }
 0x8e6   :  { %v6459_v21 = vmax.f32 %v6249_v58, 1e-24  ;;  %11337 = vmatmul.mubr.msk.f32.gmra.mrb[212].mxu0 %vm1773_vm11, %v6584_v46  ;;  %v6400_v58 = vmul.f32 2.828427, %v15961_v23 }
 0x8e7   :  { %11808 = vrsqrt.f32 %v6460_v20 }
 0x8e8   :  { %11810 = vrsqrt.f32 %v6459_v21  ;;  %v6258_v50 = vpop.xlane.xlu0 %6257 }
 0x8e9   :  { %v11805_v39 = vpop.eup %11804  ;;  %v6462_v48 = vmax.f32 %v6258_v50, 1e-24  ;;  %v6255_v62 = vpop.xlane.xlu1 %6254 }
 0x8ea   :  { %v11807_v47 = vpop.eup %11806  ;;  %v6461_v61 = vmax.f32 %v6255_v62, 1e-24  ;;  %v6586_v55 = vmul.f32 %v11805_v39, %v6394_v42  ;;  %v6402_v42 = vmul.f32 2.828427, %v15973_v9 }
 0x8eb   :  { %11812 = vrsqrt.f32 %v6462_v48  ;;  %v6585_v31 = vmul.f32 %v11807_v47, %v6393_v6  ;;  %v6401_v48 = vmul.f32 2.828427, %v15977_v7 }
 0x8ec   :  { %11814 = vrsqrt.f32 %v6461_v61  ;;  %v6264_v54 = vpop.xlane.xlu0 %6263 }
 0x8ed   :  { %v6464_v35 = vmax.f32 %v6264_v54, 1e-24  ;;  %11339 = vmatprep.mubr.msk.f32.mxu0 %vm1773_vm11, %v6585_v31  ;;  %v6261_v3 = vpop.xlane.xlu1 %6260 }
 0x8ee   :  { %v6463_v15 = vmax.f32 %v6261_v3, 1e-24  ;;  %11340 = vmatmul.mubr.msk.f32.gmra.mrb[214].mxu0 %vm1773_vm11, %v6586_v55 }
 0x8ef   :  { %11816 = vrsqrt.f32 %v6464_v35  ;;  %v6403_v35 = vmul.f32 2.828427, %v15989_v52 }
 0x8f0   :  { %11818 = vrsqrt.f32 %v6463_v15  ;;  %v6270_v4 = vpop.xlane.xlu0 %6269 }
 0x8f1   :  { %v11809_v2 = vpop.eup %11808  ;;  %v6466_v34 = vmax.f32 %v6270_v4, 1e-24  ;;  %v6267_v22 = vpop.xlane.xlu1 %6266  ;;  %v6404_v4 = vmul.f32 2.828427, %v15985_v63 }
 0x8f2   :  { %v11811_v56 = vpop.eup %11810  ;;  %v6465_v30 = vmax.f32 %v6267_v22, 1e-24  ;;  %v6588_v11 = vmul.f32 %v11809_v2, %v6396_v32 }
 0x8f3   :  { %11820 = vrsqrt.f32 %v6466_v34  ;;  %v6587_v14 = vmul.f32 %v11811_v56, %v6395_v25  ;;  %v6405_v56 = vmul.f32 2.828427, %v16001_v13 }
 0x8f4   :  { %11822 = vrsqrt.f32 %v6465_v30  ;;  %v6276_v36 = vpop.xlane.xlu0 %6275 }
 0x8f5   :  { %v11813_v57 = vpop.eup %11812  ;;  %v6468_v44 = vmax.f32 %v6276_v36, 1e-24  ;;  %11342 = vmatprep.mubr.msk.f32.mxu0 %vm1773_vm11, %v6587_v14  ;;  %v6273_v51 = vpop.xlane.xlu1 %6272  ;;  %v6406_v14 = vmul.f32 2.828427, %v15997_v27 }
 0x8f6   :  { %v11815_v0 = vpop.eup %11814  ;;  %v6467_v28 = vmax.f32 %v6273_v51, 1e-24  ;;  %11343 = vmatmul.mubr.msk.f32.gmra.mrb[216].mxu0 %vm1773_vm11, %v6588_v11  ;;  %v6590_v53 = vmul.f32 %v11813_v57, %v6398_v18  ;;  %v6408_v18 = vmul.f32 2.828427, %v16009_v38 }
 0x8f7   :  { %11824 = vrsqrt.f32 %v6468_v44  ;;  %v6589_v1 = vmul.f32 %v11815_v0, %v6397_v5  ;;  %v6407_v44 = vmul.f32 2.828427, %v16013_v45 }
 0x8f8   :  { %11826 = vrsqrt.f32 %v6467_v28  ;;  %v6282_v29 = vpop.xlane.xlu0 %6281 }
 0x8f9   :  { %v11817_v37 = vpop.eup %11816  ;;  %v6470_v46 = vmax.f32 %v6282_v29, 1e-24  ;;  %11345 = vmatprep.mubr.msk.f32.mxu0 %vm1773_vm11, %v6589_v1  ;;  %v6279_v24 = vpop.xlane.xlu1 %6278 }
 0x8fa   :  { %v11819_v20 = vpop.eup %11818  ;;  %v6469_v21 = vmax.f32 %v6279_v24, 1e-24  ;;  %11346 = vmatmul.mubr.msk.f32.gmra.mrb[218].mxu0 %vm1773_vm11, %v6590_v53  ;;  %v6592_v39 = vmul.f32 %v11817_v37, %v6400_v58  ;;  %v6409_v37 = vmul.f32 2.828427, %v16025_v43  ;;  %v6410_v24 = vmul.f32 2.828427, %v16021_v60 }
 0x8fb   :  { %11828 = vrsqrt.f32 %v6470_v46  ;;  %v6591_v10 = vmul.f32 %v11819_v20, %v6399_v19 }
 0x8fc   :  { %11830 = vrsqrt.f32 %v6469_v21  ;;  %v6288_v50 = vpop.xlane.xlu0 %6287 }
 0x8fd   :  { %v11821_v6 = vpop.eup %11820  ;;  %v6472_v62 = vmax.f32 %v6288_v50, 1e-24  ;;  %11348 = vmatprep.mubr.msk.f32.mxu0 %vm1773_vm11, %v6591_v10  ;;  %v6285_v12 = vpop.xlane.xlu1 %6284  ;;  %v6411_v50 = vmul.f32 2.828427, %v16037_v59 }
 0x8fe   :  { %v11823_v47 = vpop.eup %11822  ;;  %v6471_v61 = vmax.f32 %v6285_v12, 1e-24  ;;  %11349 = vmatmul.mubr.msk.f32.gmra.mrb[220].mxu0 %vm1773_vm11, %v6592_v39  ;;  %v6594_v54 = vmul.f32 %v11821_v6, %v6402_v42 }
 0x8ff   :  { %11832 = vrsqrt.f32 %v6472_v62  ;;  %v6593_v23 = vmul.f32 %v11823_v47, %v6401_v48  ;;  %v6412_v48 = vmul.f32 2.828427, %v16033_v26 }
 0x900   :  { %11834 = vrsqrt.f32 %v6471_v61  ;;  %v6294_v31 = vpop.xlane.xlu0 %6293  ;;  %v6413_v61 = vmul.f32 2.828427, %v16049_v33 }
 0x901   :  { %v11825_v55 = vpop.eup %11824  ;;  %v6474_v3 = vmax.f32 %v6294_v31, 1e-24  ;;  %11351 = vmatprep.mubr.msk.f32.mxu0 %vm1773_vm11, %v6593_v23  ;;  %v6291_v7 = vpop.xlane.xlu1 %6290 }
 0x902   :  { %v11827_v15 = vpop.eup %11826  ;;  %v6473_v2 = vmax.f32 %v6291_v7, 1e-24  ;;  %11352 = vmatmul.mubr.msk.f32.gmra.mrb[222].mxu0 %vm1773_vm11, %v6594_v54  ;;  %v6596_v34 = vmul.f32 %v11825_v55, %v6404_v4  ;;  %v6414_v54 = vmul.f32 2.828427, %v16045_v41 }
 0x903   :  { %11836 = vrsqrt.f32 %v6474_v3  ;;  %v6595_v9 = vmul.f32 %v11827_v15, %v6403_v35  ;;  %v6415_v15 = vmul.f32 2.828427, %v16061_v17 }
 0x904   :  { %11838 = vrsqrt.f32 %v6473_v2  ;;  %v6300_v25 = vpop.xlane.xlu0 %6299 }
 0x905   :  { %v11829_v22 = vpop.eup %11828  ;;  %v6476_v32 = vmax.f32 %v6300_v25, 1e-24  ;;  %11354 = vmatprep.mubr.msk.f32.mxu0 %vm1773_vm11, %v6595_v9  ;;  %v6297_v52 = vpop.xlane.xlu1 %6296  ;;  %v6416_v9 = vmul.f32 2.828427, %v16057_v8 }
 0x906   :  { %v11831_v30 = vpop.eup %11830  ;;  %v6475_v36 = vmax.f32 %v6297_v52, 1e-24  ;;  %11355 = vmatmul.mubr.msk.f32.gmra.mrb[224].mxu0 %vm1773_vm11, %v6596_v34  ;;  %v6598_v57 = vmul.f32 %v11829_v22, %v6406_v14  ;;  %v6418_v14 = vmul.f32 2.828427, %v16069_v16 }
 0x907   :  { %11840 = vrsqrt.f32 %v6476_v32  ;;  %v6597_v63 = vmul.f32 %v11831_v30, %v6405_v56  ;;  %v6417_v32 = vmul.f32 2.828427, %v16073_v40 }
 0x908   :  { %11842 = vrsqrt.f32 %v6475_v36  ;;  %v6306_v11 = vpop.xlane.xlu0 %6305 }
 0x909   :  { %v11833_v5 = vpop.eup %11832  ;;  %v6478_v51 = vmax.f32 %v6306_v11, 1e-24  ;;  %11357 = vmatprep.mubr.msk.f32.mxu0 %vm1773_vm11, %v6597_v63  ;;  %v6303_v13 = vpop.xlane.xlu1 %6302 }
 0x90a   :  { %v11835_v0 = vpop.eup %11834  ;;  %v6477_v28 = vmax.f32 %v6303_v13, 1e-24  ;;  %11358 = vmatmul.mubr.msk.f32.gmra.mrb[226].mxu0 %vm1773_vm11, %v6598_v57  ;;  %v6600_v29 = vmul.f32 %v11833_v5, %v6408_v18  ;;  %v6419_v5 = vmul.f32 2.828427, %v16085_v49  ;;  %v19201_v13 = vld [vmem:[#allocation164_spill] sm:$0xff] }
 0x90b   :  { %11844 = vrsqrt.f32 %v6478_v51  ;;  %v6599_v27 = vmul.f32 %v11835_v0, %v6407_v44  ;;  %v6420_v0 = vmul.f32 2.828427, %v19201_v13 }
 0x90c   :  { %11846 = vrsqrt.f32 %v6477_v28  ;;  %v6312_v1 = vpop.xlane.xlu0 %6311 }
 0x90d   :  { %v11837_v53 = vpop.eup %11836  ;;  %v6480_v19 = vmax.f32 %v6312_v1, 1e-24  ;;  %11360 = vmatprep.mubr.msk.f32.mxu0 %vm1773_vm11, %v6599_v27  ;;  %v6309_v45 = vpop.xlane.xlu1 %6308 }
 0x90e   :  { %v11839_v46 = vpop.eup %11838  ;;  %v6479_v20 = vmax.f32 %v6309_v45, 1e-24  ;;  %11361 = vmatmul.mubr.msk.f32.gmra.mrb[228].mxu0 %vm1773_vm11, %v6600_v29  ;;  %v6602_v21 = vmul.f32 %v11837_v53, %v6410_v24  ;;  %v19202_v29 = vld [vmem:[#allocation166_spill] sm:$0xff]  ;;  %v19203_v45 = vld [vmem:[#allocation165_spill] sm:$0xff] }
 0x90f   :  { %11848 = vrsqrt.f32 %v6480_v19  ;;  %v6601_v38 = vmul.f32 %v11839_v46, %v6409_v37  ;;  %v6421_v53 = vmul.f32 2.828427, %v19202_v29  ;;  %v6422_v46 = vmul.f32 2.828427, %v19203_v45 }
 0x910   :  { %11850 = vrsqrt.f32 %v6479_v20  ;;  %v6318_v58 = vpop.xlane.xlu0 %6317 }
 0x911   :  { %v11841_v10 = vpop.eup %11840  ;;  %v6482_v39 = vmax.f32 %v6318_v58, 1e-24  ;;  %11363 = vmatprep.mubr.msk.f32.mxu0 %vm1773_vm11, %v6601_v38  ;;  %v6315_v43 = vpop.xlane.xlu1 %6314 }
 0x912   :  { %v11843_v6 = vpop.eup %11842  ;;  %v6481_v62 = vmax.f32 %v6315_v43, 1e-24  ;;  %11364 = vmatmul.mubr.msk.f32.gmra.mrb[230].mxu0 %vm1773_vm11, %v6602_v21  ;;  %v6604_v47 = vmul.f32 %v11841_v10, %v6412_v48  ;;  %v19204_v10 = vld [vmem:[#allocation183_spill] sm:$0xff] }
 0x913   :  { %11852 = vrsqrt.f32 %v6482_v39  ;;  %v6603_v60 = vmul.f32 %v11843_v6, %v6411_v50  ;;  %v6423_v50 = vmul.f32 2.828427, %v19204_v10  ;;  %v19205_v48 = vld [vmem:[#allocation167_spill] sm:$0xff] }
 0x914   :  { %11854 = vrsqrt.f32 %v6481_v62  ;;  %v6324_v12 = vpop.xlane.xlu0 %6323  ;;  %v6424_v62 = vmul.f32 2.828427, %v19205_v48 }
 0x915   :  { %v11845_v42 = vpop.eup %11844  ;;  %v6484_v23 = vmax.f32 %v6324_v12, 1e-24  ;;  %11366 = vmatprep.mubr.msk.f32.mxu0 %vm1773_vm11, %v6603_v60  ;;  %v6321_v59 = vpop.xlane.xlu1 %6320 }
 0x916   :  { %v11847_v31 = vpop.eup %11846  ;;  %v6483_v55 = vmax.f32 %v6321_v59, 1e-24  ;;  %11367 = vmatmul.mubr.msk.f32.gmra.mrb[232].mxu0 %vm1773_vm11, %v6604_v47  ;;  %v6606_v3 = vmul.f32 %v11845_v42, %v6414_v54 }
 0x917   :  { %11856 = vrsqrt.f32 %v6484_v23  ;;  %v6605_v26 = vmul.f32 %v11847_v31, %v6413_v61  ;;  %v19206_v23 = vld [vmem:[#allocation169_spill] sm:$0xff] }
 0x918   :  { %11858 = vrsqrt.f32 %v6483_v55  ;;  %v6330_v35 = vpop.xlane.xlu0 %6329  ;;  %v6425_v59 = vmul.f32 2.828427, %v19206_v23 }
 0x919   :  { %v11849_v7 = vpop.eup %11848  ;;  %v6486_v4 = vmax.f32 %v6330_v35, 1e-24  ;;  %11369 = vmatprep.mubr.msk.f32.mxu0 %vm1773_vm11, %v6605_v26  ;;  %v6327_v33 = vpop.xlane.xlu1 %6326  ;;  %v19207_v26 = vld [vmem:[#allocation168_spill] sm:$0xff] }
 0x91a   :  { %v11851_v2 = vpop.eup %11850  ;;  %v6485_v25 = vmax.f32 %v6327_v33, 1e-24  ;;  %11370 = vmatmul.mubr.msk.f32.gmra.mrb[234].mxu0 %vm1773_vm11, %v6606_v3  ;;  %v6608_v22 = vmul.f32 %v11849_v7, %v6416_v9  ;;  %v6426_v35 = vmul.f32 2.828427, %v19207_v26 }
 0x91b   :  { %11860 = vrsqrt.f32 %v6486_v4  ;;  %v6607_v41 = vmul.f32 %v11851_v2, %v6415_v15  ;;  %v19208_v2 = vld [vmem:[#allocation171_spill] sm:$0xff] }
 0x91c   :  { %11862 = vrsqrt.f32 %v6485_v25  ;;  %v6336_v34 = vpop.xlane.xlu0 %6335  ;;  %v6427_v9 = vmul.f32 2.828427, %v19208_v2 }
 0x91d   :  { %v11853_v56 = vpop.eup %11852  ;;  %v6488_v52 = vmax.f32 %v6336_v34, 1e-24  ;;  %11372 = vmatprep.mubr.msk.f32.mxu0 %vm1773_vm11, %v6607_v41  ;;  %v6333_v17 = vpop.xlane.xlu1 %6332 }
 0x91e   :  { %v11855_v30 = vpop.eup %11854  ;;  %v6487_v36 = vmax.f32 %v6333_v17, 1e-24  ;;  %11373 = vmatmul.mubr.msk.f32.gmra.mrb[236].mxu0 %vm1773_vm11, %v6608_v22  ;;  %v6610_v11 = vmul.f32 %v11853_v56, %v6418_v14  ;;  %v19209_v22 = vld [vmem:[#allocation170_spill] sm:$0xff]  ;;  %v19210_v14 = vld [vmem:[#allocation187_spill] sm:$0xff] }
 0x91f   :  { %11864 = vrsqrt.f32 %v6488_v52  ;;  %v6609_v8 = vmul.f32 %v11855_v30, %v6417_v32  ;;  %v6428_v56 = vmul.f32 2.828427, %v19209_v22 }
 0x920   :  { %11866 = vrsqrt.f32 %v6487_v36  ;;  %v6342_v63 = vpop.xlane.xlu0 %6341  ;;  %v6429_v36 = vmul.f32 2.828427, %v19210_v14 }
 0x921   :  { %v11857_v57 = vpop.eup %11856  ;;  %v6490_v44 = vmax.f32 %v6342_v63, 1e-24  ;;  %11375 = vmatprep.mubr.msk.f32.mxu0 %vm1773_vm11, %v6609_v8  ;;  %v6339_v40 = vpop.xlane.xlu1 %6338  ;;  %v19211_v63 = vld [vmem:[#allocation186_spill] sm:$0xff] }
 0x922   :  { %v11859_v51 = vpop.eup %11858  ;;  %v6489_v18 = vmax.f32 %v6339_v40, 1e-24  ;;  %11376 = vmatmul.mubr.msk.f32.gmra.mrb[238].mxu0 %vm1773_vm11, %v6610_v11  ;;  %v6612_v27 = vmul.f32 %v11857_v57, %v6420_v0  ;;  %v6430_v11 = vmul.f32 2.828427, %v19211_v63 }
 0x923   :  { %11868 = vrsqrt.f32 %v6490_v44  ;;  %v6611_v16 = vmul.f32 %v11859_v51, %v6419_v5  ;;  %v19212_v51 = vld [vmem:[#allocation173_spill] sm:$0xff] }
 0x924   :  { %11870 = vrsqrt.f32 %v6489_v18  ;;  %v6348_v28 = vpop.xlane.xlu0 %6347  ;;  %v6431_v13 = vmul.f32 2.828427, %v19212_v51 }
 0x925   :  { %v11861_v1 = vpop.eup %11860  ;;  %v6492_v37 = vmax.f32 %v6348_v28, 1e-24  ;;  %11378 = vmatprep.mubr.msk.f32.mxu0 %vm1773_vm11, %v6611_v16  ;;  %v6345_v49 = vpop.xlane.xlu1 %6344  ;;  %v19213_v28 = vld [vmem:[#allocation172_spill] sm:$0xff] }
 0x926   :  { %v11863_v19 = vpop.eup %11862  ;;  %v6491_v24 = vmax.f32 %v6345_v49, 1e-24  ;;  %11379 = vmatmul.mubr.msk.f32.gmra.mrb[240].mxu0 %vm1773_vm11, %v6612_v27  ;;  %v6614_v58 = vmul.f32 %v11861_v1, %v6422_v46  ;;  %v6432_v27 = vmul.f32 2.828427, %v19213_v28  ;;  %v19214_v49 = vld [vmem:[#allocation174_spill] sm:$0xff]  ;;  %v19215_v46 = vld [vmem:[#allocation188_spill] sm:$0xff] }
 0x927   :  { %11872 = vrsqrt.f32 %v6492_v37  ;;  %v6613_v20 = vmul.f32 %v11863_v19, %v6421_v53  ;;  %v6433_v19 = vmul.f32 2.828427, %v19214_v49 }
 0x928   :  { %11874 = vrsqrt.f32 %v6491_v24  ;;  %v6354_v38 = vpop.xlane.xlu0 %6353  ;;  %v6434_v24 = vmul.f32 2.828427, %v19215_v46 }
 0x929   :  { %v11865_v21 = vpop.eup %11864  ;;  %v6494_v39 = vmax.f32 %v6354_v38, 1e-24  ;;  %11381 = vmatprep.mubr.msk.f32.mxu0 %vm1773_vm11, %v6613_v20  ;;  %v6351_v43 = vpop.xlane.xlu1 %6350 }
 0x92a   :  { %v11867_v6 = vpop.eup %11866  ;;  %v6493_v60 = vmax.f32 %v6351_v43, 1e-24  ;;  %11382 = vmatmul.mubr.msk.f32.gmra.mrb[242].mxu0 %vm1773_vm11, %v6614_v58  ;;  %v6616_v42 = vmul.f32 %v11865_v21, %v6424_v62  ;;  %v19216_v21 = vld [vmem:[#allocation191_spill] sm:$0xff]  ;;  %v16345_v62 = vld [vmem:[%s18383_s2 + $0x1c0] ss:$0 sm:$0xff] }
 0x92b   :  { %11876 = vrsqrt.f32 %v6494_v39  ;;  %v6615_v12 = vmul.f32 %v11867_v6, %v6423_v50  ;;  %v6435_v10 = vmul.f32 2.828427, %v19216_v21  ;;  %v19217_v39 = vld [vmem:[#allocation175_spill] sm:$0xff] }
 0x92c   :  { %11878 = vrsqrt.f32 %v6493_v60  ;;  %v6360_v47 = vpop.xlane.xlu0 %6359  ;;  %v6436_v43 = vmul.f32 2.828427, %v19217_v39 }
 0x92d   :  { %v11869_v61 = vpop.eup %11868  ;;  %v6496_v31 = vmax.f32 %v6360_v47, 1e-24  ;;  %11384 = vmatprep.mubr.msk.f32.mxu0 %vm1773_vm11, %v6615_v12  ;;  %v6357_v54 = vpop.xlane.xlu1 %6356 }
 0x92e   :  { %v11871_v55 = vpop.eup %11870  ;;  %v6495_v3 = vmax.f32 %v6357_v54, 1e-24  ;;  %11385 = vmatmul.mubr.msk.f32.gmra.mrb[244].mxu0 %vm1773_vm11, %v6616_v42  ;;  %v6618_v4 = vmul.f32 %v11869_v61, %v6426_v35 }
 0x92f   :  { %11880 = vrsqrt.f32 %v6496_v31  ;;  %v6617_v7 = vmul.f32 %v11871_v55, %v6425_v59 }
 0x930   :  { %11882 = vrsqrt.f32 %v6495_v3  ;;  %v6366_v15 = vpop.xlane.xlu0 %6365 }
 0x931   :  { %v11873_v33 = vpop.eup %11872  ;;  %v6498_v25 = vmax.f32 %v6366_v15, 1e-24  ;;  %11387 = vmatprep.mubr.msk.f32.mxu0 %vm1773_vm11, %v6617_v7  ;;  %v6363_v41 = vpop.xlane.xlu1 %6362 }
 0x932   :  { %v11875_v34 = vpop.eup %11874  ;;  %v6497_v32 = vmax.f32 %v6363_v41, 1e-24  ;;  %11388 = vmatmul.mubr.msk.f32.gmra.mrb[246].mxu0 %vm1773_vm11, %v6618_v4  ;;  %v6620_v17 = vmul.f32 %v11873_v33, %v6428_v56 }
 0x933   :  { %11884 = vrsqrt.f32 %v6498_v25  ;;  %v6619_v52 = vmul.f32 %v11875_v34, %v6427_v9 }
 0x934   :  { %11886 = vrsqrt.f32 %v6497_v32 }
 0x935   :  { %v11877_v30 = vpop.eup %11876  ;;  %11390 = vmatprep.mubr.msk.f32.mxu0 %vm1773_vm11, %v6619_v52 }
 0x936   :  { %v11879_v8 = vpop.eup %11878  ;;  %11391 = vmatmul.mubr.msk.f32.gmra.mrb[248].mxu0 %vm1773_vm11, %v6620_v17  ;;  %v6622_v44 = vmul.f32 %v11877_v30, %v6430_v11 }
 0x937   :  { %v6621_v57 = vmul.f32 %v11879_v8, %v6429_v36 }
 0x938   :  { %v6372_v5 = vpop.xlane.xlu0 %6371 }
 0x939   :  { %v11881_v40 = vpop.eup %11880  ;;  %v6500_v0 = vmax.f32 %v6372_v5, 1e-24  ;;  %v6369_v18 = vpop.xlane.xlu1 %6368  ;;  %11393 = vmatprep.mubr.msk.f32.mxu0 %vm1773_vm11, %v6621_v57 }
 0x93a   :  { %v11883_v16 = vpop.eup %11882  ;;  %v6499_v1 = vmax.f32 %v6369_v18, 1e-24  ;;  %11394 = vmatmul.mubr.msk.f32.gmra.mrb[250].mxu0 %vm1773_vm11, %v6622_v44  ;;  %v6624_v53 = vmul.f32 %v11881_v40, %v6432_v27 }
 0x93b   :  { %11888 = vrsqrt.f32 %v6500_v0  ;;  %v6623_v29 = vmul.f32 %v11883_v16, %v6431_v13 }
 0x93c   :  { %11890 = vrsqrt.f32 %v6499_v1 }
 0x93d   :  { %v11885_v37 = vpop.eup %11884  ;;  %11396 = vmatprep.mubr.msk.f32.mxu0 %vm1773_vm11, %v6623_v29 }
 0x93e   :  { %v11887_v45 = vpop.eup %11886  ;;  %11397 = vmatmul.mubr.msk.f32.gmra.mrb[252].mxu0 %vm1773_vm11, %v6624_v53  ;;  %v6626_v38 = vmul.f32 %v11885_v37, %v6434_v24 }
 0x93f   :  { %v6625_v20 = vmul.f32 %v11887_v45, %v6433_v19 }
 0x941   :  { %11399 = vmatprep.mubr.msk.f32.mxu0 %vm1773_vm11, %v6625_v20 }
 0x942   :  { %11400 = vmatmul.mubr.msk.f32.gmra.mrb[254].mxu0 %vm1773_vm11, %v6626_v38 }
 0x945   :  { %v11889_v58 = vpop.eup %11888 }
 0x946   :  { %v11891_v50 = vpop.eup %11890  ;;  %v6628_v48 = vmul.f32 %v11889_v58, %v6436_v43 }
 0x947   :  { %v6627_v6 = vmul.f32 %v11891_v50, %v6435_v10 }
 0x949   :  { %11402 = vmatprep.mubr.msk.f32.mxu0 %vm1773_vm11, %v6627_v6 }
 0x94a   :  { %11403 = vmatmul.mubr.msk.f32.gmra.mrb[0].mxu0 %vm1773_vm11, %v6628_v48 }
 0x991   :  { %v11311_v60 = vpop.f32.mrb[194].mxu0 }
 0x992   :  { %v6900_v12 = vadd.f32 %v11311_v60, %v16345_v62  ;;  %v6894_v47 = vpop.f32.mrb[195].mxu0 }
 0x993   :  { %v6895_v42 = vadd.f32 %v16345_v62, %v6894_v47 }
 0x994   :  { %v7214_v59 = vmax.f32 %v6900_v12, 0.0 }
 0x995   :  { %v7213_v61 = vmax.f32 %v6895_v42, 0.0  ;;  %v11314_v23 = vpop.f32.mrb[196].mxu0 }
 0x996   :  { %v6910_v31 = vadd.f32 %v11314_v23, %v16345_v62  ;;  %v6904_v54 = vpop.f32.mrb[197].mxu0 }
 0x997   :  { %v6905_v55 = vadd.f32 %v16345_v62, %v6904_v54  ;;  %11421 = vmatprep.mubr.msk.f32.mxu1 %vm1131_vm15, %v7213_v61 }
 0x998   :  { %11422 = vmatmul.mubr.msk.f32.vlgmr.msra.gmra.mrb[190].mxu1 %vm1131_vm15, %v7214_v59  ;;  %v7216_v3 = vmax.f32 %v6910_v31, 0.0 }
 0x999   :  { %v7215_v26 = vmax.f32 %v6905_v55, 0.0  ;;  %v11317_v35 = vpop.f32.mrb[198].mxu0 }
 0x99a   :  { %v6920_v7 = vadd.f32 %v11317_v35, %v16345_v62  ;;  %v6914_v15 = vpop.f32.mrb[199].mxu0 }
 0x99b   :  { %v6915_v4 = vadd.f32 %v16345_v62, %v6914_v15  ;;  %11424 = vmatprep.mubr.msk.f32.mxu1 %vm1131_vm15, %v7215_v26 }
 0x99c   :  { %11425 = vmatmul.mubr.msk.f32.gmra.mrb[192].mxu1 %vm1131_vm15, %v7216_v3  ;;  %v7218_v9 = vmax.f32 %v6920_v7, 0.0 }
 0x99d   :  { %v7217_v33 = vmax.f32 %v6915_v4, 0.0  ;;  %v11320_v2 = vpop.f32.mrb[200].mxu0 }
 0x99e   :  { %v6930_v25 = vadd.f32 %v11320_v2, %v16345_v62  ;;  %v6924_v41 = vpop.f32.mrb[201].mxu0 }
 0x99f   :  { %v6925_v34 = vadd.f32 %v16345_v62, %v6924_v41  ;;  %11427 = vmatprep.mubr.msk.f32.mxu1 %vm1131_vm15, %v7217_v33 }
 0x9a0   :  { %11428 = vmatmul.mubr.msk.f32.gmra.mrb[194].mxu1 %vm1131_vm15, %v7218_v9  ;;  %v7220_v32 = vmax.f32 %v6930_v25, 0.0 }
 0x9a1   :  { %v7219_v22 = vmax.f32 %v6925_v34, 0.0  ;;  %v11323_v56 = vpop.f32.mrb[202].mxu0 }
 0x9a2   :  { %v6940_v52 = vadd.f32 %v11323_v56, %v16345_v62  ;;  %v6934_v17 = vpop.f32.mrb[203].mxu0 }
 0x9a3   :  { %v6935_v30 = vadd.f32 %v16345_v62, %v6934_v17  ;;  %11430 = vmatprep.mubr.msk.f32.mxu1 %vm1131_vm15, %v7219_v22 }
 0x9a4   :  { %11431 = vmatmul.mubr.msk.f32.gmra.mrb[196].mxu1 %vm1131_vm15, %v7220_v32  ;;  %v7222_v8 = vmax.f32 %v6940_v52, 0.0 }
 0x9a5   :  { %v7221_v14 = vmax.f32 %v6935_v30, 0.0  ;;  %v11326_v36 = vpop.f32.mrb[204].mxu0 }
 0x9a6   :  { %v6950_v63 = vadd.f32 %v11326_v36, %v16345_v62  ;;  %v6944_v11 = vpop.f32.mrb[205].mxu0 }
 0x9a7   :  { %v6945_v57 = vadd.f32 %v16345_v62, %v6944_v11  ;;  %11433 = vmatprep.mubr.msk.f32.mxu1 %vm1131_vm15, %v7221_v14 }
 0x9a8   :  { %11434 = vmatmul.mubr.msk.f32.gmra.mrb[198].mxu1 %vm1131_vm15, %v7222_v8  ;;  %v7224_v40 = vmax.f32 %v6950_v63, 0.0 }
 0x9a9   :  { %v7223_v5 = vmax.f32 %v6945_v57, 0.0  ;;  %v11329_v44 = vpop.f32.mrb[206].mxu0 }
 0x9aa   :  { %v6960_v51 = vadd.f32 %v11329_v44, %v16345_v62  ;;  %v6954_v13 = vpop.f32.mrb[207].mxu0 }
 0x9ab   :  { %v6955_v0 = vadd.f32 %v16345_v62, %v6954_v13  ;;  %11436 = vmatprep.mubr.msk.f32.mxu1 %vm1131_vm15, %v7223_v5 }
 0x9ac   :  { %11437 = vmatmul.mubr.msk.f32.gmra.mrb[200].mxu1 %vm1131_vm15, %v7224_v40  ;;  %v7226_v28 = vmax.f32 %v6960_v51, 0.0 }
 0x9ad   :  { %v7225_v18 = vmax.f32 %v6955_v0, 0.0  ;;  %v11332_v16 = vpop.f32.mrb[208].mxu0 }
 0x9ae   :  { %v6970_v27 = vadd.f32 %v11332_v16, %v16345_v62  ;;  %v6964_v1 = vpop.f32.mrb[209].mxu0 }
 0x9af   :  { %v6965_v29 = vadd.f32 %v16345_v62, %v6964_v1  ;;  %11439 = vmatprep.mubr.msk.f32.mxu1 %vm1131_vm15, %v7225_v18 }
 0x9b0   :  { %11440 = vmatmul.mubr.msk.f32.gmra.mrb[202].mxu1 %vm1131_vm15, %v7226_v28  ;;  %v7228_v49 = vmax.f32 %v6970_v27, 0.0 }
 0x9b1   :  { %v7227_v53 = vmax.f32 %v6965_v29, 0.0  ;;  %v11335_v37 = vpop.f32.mrb[210].mxu0 }
 0x9b2   :  { %v6980_v19 = vadd.f32 %v11335_v37, %v16345_v62  ;;  %v6974_v45 = vpop.f32.mrb[211].mxu0 }
 0x9b3   :  { %v6975_v46 = vadd.f32 %v16345_v62, %v6974_v45  ;;  %11442 = vmatprep.mubr.msk.f32.mxu1 %vm1131_vm15, %v7227_v53 }
 0x9b4   :  { %11443 = vmatmul.mubr.msk.f32.gmra.mrb[204].mxu1 %vm1131_vm15, %v7228_v49  ;;  %v7230_v20 = vmax.f32 %v6980_v19, 0.0 }
 0x9b5   :  { %v7229_v24 = vmax.f32 %v6975_v46, 0.0 }
 0x9b7   :  { %11445 = vmatprep.mubr.msk.f32.mxu1 %vm1131_vm15, %v7229_v24 }
 0x9b8   :  { %11446 = vmatmul.mubr.msk.f32.gmra.mrb[206].mxu1 %vm1131_vm15, %v7230_v20 }
 0x9b9   :  { %v11338_v38 = vpop.f32.mrb[212].mxu0 }
 0x9ba   :  { %v6990_v58 = vadd.f32 %v11338_v38, %v16345_v62  ;;  %v6984_v21 = vpop.f32.mrb[213].mxu0 }
 0x9bb   :  { %v6985_v10 = vadd.f32 %v16345_v62, %v6984_v21 }
 0x9bc   :  { %v7232_v39 = vmax.f32 %v6990_v58, 0.0 }
 0x9bd   :  { %v7231_v50 = vmax.f32 %v6985_v10, 0.0 }
 0x9bf   :  { %11448 = vmatprep.mubr.msk.f32.mxu1 %vm1131_vm15, %v7231_v50 }
 0x9c0   :  { %11449 = vmatmul.mubr.msk.f32.gmra.mrb[208].mxu1 %vm1131_vm15, %v7232_v39 }
 0x9c1   :  { %v11341_v43 = vpop.f32.mrb[214].mxu0 }
 0x9c2   :  { %v7000_v6 = vadd.f32 %v11341_v43, %v16345_v62  ;;  %v6994_v48 = vpop.f32.mrb[215].mxu0 }
 0x9c3   :  { %v6995_v60 = vadd.f32 %v16345_v62, %v6994_v48 }
 0x9c4   :  { %v7234_v47 = vmax.f32 %v7000_v6, 0.0 }
 0x9c5   :  { %v7233_v12 = vmax.f32 %v6995_v60, 0.0 }
 0x9c7   :  { %11451 = vmatprep.mubr.msk.f32.mxu1 %vm1131_vm15, %v7233_v12 }
 0x9c8   :  { %11452 = vmatmul.mubr.msk.f32.gmra.mrb[210].mxu1 %vm1131_vm15, %v7234_v47 }
 0x9c9   :  { %v11344_v42 = vpop.f32.mrb[216].mxu0 }
 0x9ca   :  { %v7010_v61 = vadd.f32 %v11344_v42, %v16345_v62  ;;  %v7004_v23 = vpop.f32.mrb[217].mxu0 }
 0x9cb   :  { %v7005_v59 = vadd.f32 %v16345_v62, %v7004_v23 }
 0x9cc   :  { %v7236_v55 = vmax.f32 %v7010_v61, 0.0 }
 0x9cd   :  { %v7235_v31 = vmax.f32 %v7005_v59, 0.0  ;;  %v11347_v54 = vpop.f32.mrb[218].mxu0 }
 0x9ce   :  { %v7020_v26 = vadd.f32 %v11347_v54, %v16345_v62  ;;  %v7014_v35 = vpop.f32.mrb[219].mxu0 }
 0x9cf   :  { %v7015_v3 = vadd.f32 %v16345_v62, %v7014_v35  ;;  %11454 = vmatprep.mubr.msk.f32.mxu1 %vm1131_vm15, %v7235_v31 }
 0x9d0   :  { %11455 = vmatmul.mubr.msk.f32.gmra.mrb[212].mxu1 %vm1131_vm15, %v7236_v55  ;;  %v7238_v4 = vmax.f32 %v7020_v26, 0.0 }
 0x9d1   :  { %v7237_v7 = vmax.f32 %v7015_v3, 0.0  ;;  %v11350_v15 = vpop.f32.mrb[220].mxu0 }
 0x9d2   :  { %v7030_v33 = vadd.f32 %v11350_v15, %v16345_v62  ;;  %v7024_v2 = vpop.f32.mrb[221].mxu0 }
 0x9d3   :  { %v7025_v9 = vadd.f32 %v16345_v62, %v7024_v2  ;;  %11457 = vmatprep.mubr.msk.f32.mxu1 %vm1131_vm15, %v7237_v7 }
 0x9d4   :  { %11458 = vmatmul.mubr.msk.f32.gmra.mrb[214].mxu1 %vm1131_vm15, %v7238_v4  ;;  %v7240_v34 = vmax.f32 %v7030_v33, 0.0 }
 0x9d5   :  { %v7239_v25 = vmax.f32 %v7025_v9, 0.0  ;;  %v11353_v41 = vpop.f32.mrb[222].mxu0 }
 0x9d6   :  { %v7040_v22 = vadd.f32 %v11353_v41, %v16345_v62  ;;  %v7034_v56 = vpop.f32.mrb[223].mxu0 }
 0x9d7   :  { %v7035_v32 = vadd.f32 %v16345_v62, %v7034_v56  ;;  %11460 = vmatprep.mubr.msk.f32.mxu1 %vm1131_vm15, %v7239_v25 }
 0x9d8   :  { %11461 = vmatmul.mubr.msk.f32.gmra.mrb[216].mxu1 %vm1131_vm15, %v7240_v34  ;;  %v7242_v30 = vmax.f32 %v7040_v22, 0.0 }
 0x9d9   :  { %v7241_v52 = vmax.f32 %v7035_v32, 0.0  ;;  %v11356_v17 = vpop.f32.mrb[224].mxu0 }
 0x9da   :  { %v7050_v14 = vadd.f32 %v11356_v17, %v16345_v62  ;;  %v7044_v36 = vpop.f32.mrb[225].mxu0 }
 0x9db   :  { %v7045_v8 = vadd.f32 %v16345_v62, %v7044_v36  ;;  %11463 = vmatprep.mubr.msk.f32.mxu1 %vm1131_vm15, %v7241_v52 }
 0x9dc   :  { %11464 = vmatmul.mubr.msk.f32.gmra.mrb[218].mxu1 %vm1131_vm15, %v7242_v30  ;;  %v7244_v57 = vmax.f32 %v7050_v14, 0.0 }
 0x9dd   :  { %v7243_v63 = vmax.f32 %v7045_v8, 0.0  ;;  %v11359_v11 = vpop.f32.mrb[226].mxu0 }
 0x9de   :  { %v7060_v5 = vadd.f32 %v11359_v11, %v16345_v62  ;;  %v7054_v44 = vpop.f32.mrb[227].mxu0 }
 0x9df   :  { %v7055_v40 = vadd.f32 %v16345_v62, %v7054_v44  ;;  %11466 = vmatprep.mubr.msk.f32.mxu1 %vm1131_vm15, %v7243_v63 }
 0x9e0   :  { %11467 = vmatmul.mubr.msk.f32.gmra.mrb[220].mxu1 %vm1131_vm15, %v7244_v57  ;;  %v7246_v0 = vmax.f32 %v7060_v5, 0.0 }
 0x9e1   :  { %v7245_v51 = vmax.f32 %v7055_v40, 0.0  ;;  %v11362_v13 = vpop.f32.mrb[228].mxu0 }
 0x9e2   :  { %v7070_v18 = vadd.f32 %v11362_v13, %v16345_v62  ;;  %v7064_v16 = vpop.f32.mrb[229].mxu0 }
 0x9e3   :  { %v7065_v28 = vadd.f32 %v16345_v62, %v7064_v16  ;;  %11469 = vmatprep.mubr.msk.f32.mxu1 %vm1131_vm15, %v7245_v51 }
 0x9e4   :  { %11470 = vmatmul.mubr.msk.f32.gmra.mrb[222].mxu1 %vm1131_vm15, %v7246_v0  ;;  %v7248_v29 = vmax.f32 %v7070_v18, 0.0 }
 0x9e5   :  { %v7247_v27 = vmax.f32 %v7065_v28, 0.0  ;;  %v11365_v1 = vpop.f32.mrb[230].mxu0 }
 0x9e6   :  { %v7080_v53 = vadd.f32 %v11365_v1, %v16345_v62  ;;  %v7074_v37 = vpop.f32.mrb[231].mxu0 }
 0x9e7   :  { %v7075_v49 = vadd.f32 %v16345_v62, %v7074_v37  ;;  %11472 = vmatprep.mubr.msk.f32.mxu1 %vm1131_vm15, %v7247_v27 }
 0x9e8   :  { %11473 = vmatmul.mubr.msk.f32.gmra.mrb[224].mxu1 %vm1131_vm15, %v7248_v29  ;;  %v7250_v46 = vmax.f32 %v7080_v53, 0.0 }
 0x9e9   :  { %v7249_v19 = vmax.f32 %v7075_v49, 0.0  ;;  %v11368_v45 = vpop.f32.mrb[232].mxu0 }
 0x9ea   :  { %v7090_v24 = vadd.f32 %v11368_v45, %v16345_v62  ;;  %v7084_v20 = vpop.f32.mrb[233].mxu0 }
 0x9eb   :  { %v7085_v38 = vadd.f32 %v16345_v62, %v7084_v20  ;;  %11475 = vmatprep.mubr.msk.f32.mxu1 %vm1131_vm15, %v7249_v19 }
 0x9ec   :  { %11476 = vmatmul.mubr.msk.f32.gmra.mrb[226].mxu1 %vm1131_vm15, %v7250_v46  ;;  %v7252_v10 = vmax.f32 %v7090_v24, 0.0 }
 0x9ed   :  { %v7251_v58 = vmax.f32 %v7085_v38, 0.0  ;;  %v11371_v21 = vpop.f32.mrb[234].mxu0 }
 0x9ee   :  { %v7100_v50 = vadd.f32 %v11371_v21, %v16345_v62  ;;  %v7094_v39 = vpop.f32.mrb[235].mxu0 }
 0x9ef   :  { %v7095_v43 = vadd.f32 %v16345_v62, %v7094_v39  ;;  %11478 = vmatprep.mubr.msk.f32.mxu1 %vm1131_vm15, %v7251_v58 }
 0x9f0   :  { %11479 = vmatmul.mubr.msk.f32.gmra.mrb[228].mxu1 %vm1131_vm15, %v7252_v10  ;;  %v7254_v60 = vmax.f32 %v7100_v50, 0.0 }
 0x9f1   :  { %v7253_v6 = vmax.f32 %v7095_v43, 0.0  ;;  %v11374_v48 = vpop.f32.mrb[236].mxu0 }
 0x9f2   :  { %v7110_v12 = vadd.f32 %v11374_v48, %v16345_v62  ;;  %v7104_v47 = vpop.f32.mrb[237].mxu0 }
 0x9f3   :  { %v7105_v42 = vadd.f32 %v16345_v62, %v7104_v47  ;;  %11481 = vmatprep.mubr.msk.f32.mxu1 %vm1131_vm15, %v7253_v6 }
 0x9f4   :  { %11482 = vmatmul.mubr.msk.f32.gmra.mrb[230].mxu1 %vm1131_vm15, %v7254_v60  ;;  %v7256_v59 = vmax.f32 %v7110_v12, 0.0 }
 0x9f5   :  { %v7255_v61 = vmax.f32 %v7105_v42, 0.0  ;;  %v11377_v23 = vpop.f32.mrb[238].mxu0 }
 0x9f6   :  { %v7120_v31 = vadd.f32 %v11377_v23, %v16345_v62  ;;  %v7114_v54 = vpop.f32.mrb[239].mxu0  ;;  %v19218_v23 = vld [vmem:[#allocation70_spill] sm:$0xff] }
 0x9f7   :  { %v7115_v55 = vadd.f32 %v16345_v62, %v7114_v54  ;;  %11484 = vmatprep.mubr.msk.f32.mxu1 %vm1131_vm15, %v7255_v61  ;;  %v16478_v61 = vld [vmem:[%s18383_s2 + $0x210] ss:$0 sm:$0xff]  ;;  %v19219_v54 = vld [vmem:[#allocation73_spill] sm:$0xff] }
 0x9f8   :  { %11485 = vmatmul.mubr.msk.f32.gmra.mrb[232].mxu1 %vm1131_vm15, %v7256_v59  ;;  %v7258_v3 = vmax.f32 %v7120_v31, 0.0 }
 0x9f9   :  { %v7257_v26 = vmax.f32 %v7115_v55, 0.0  ;;  %v11380_v35 = vpop.f32.mrb[240].mxu0 }
 0x9fa   :  { %v7130_v7 = vadd.f32 %v11380_v35, %v16345_v62  ;;  %v7124_v15 = vpop.f32.mrb[241].mxu0 }
 0x9fb   :  { %v7125_v4 = vadd.f32 %v16345_v62, %v7124_v15  ;;  %11487 = vmatprep.mubr.msk.f32.mxu1 %vm1131_vm15, %v7257_v26 }
 0x9fc   :  { %11488 = vmatmul.mubr.msk.f32.gmra.mrb[234].mxu1 %vm1131_vm15, %v7258_v3  ;;  %v7260_v9 = vmax.f32 %v7130_v7, 0.0  ;;  %v19220_v3 = vld [vmem:[#allocation71_spill] sm:$0xff] }
 0x9fd   :  { %v7259_v33 = vmax.f32 %v7125_v4, 0.0  ;;  %v11383_v2 = vpop.f32.mrb[242].mxu0 }
 0x9fe   :  { %v7140_v25 = vadd.f32 %v11383_v2, %v16345_v62  ;;  %v7134_v41 = vpop.f32.mrb[243].mxu0 }
 0x9ff   :  { %v7135_v34 = vadd.f32 %v16345_v62, %v7134_v41  ;;  %11490 = vmatprep.mubr.msk.f32.mxu1 %vm1131_vm15, %v7259_v33  ;;  %v19221_v33 = vld [vmem:[#allocation75_spill] sm:$0xff]  ;;  %v19223_v41 = vld [vmem:[#allocation5_spill] sm:$0xff] }
 0xa00   :  { %11491 = vmatmul.mubr.msk.f32.gmra.mrb[236].mxu1 %vm1131_vm15, %v7260_v9  ;;  %v7262_v32 = vmax.f32 %v7140_v25, 0.0 }
 0xa01   :  { %v7261_v22 = vmax.f32 %v7135_v34, 0.0  ;;  %v11386_v56 = vpop.f32.mrb[244].mxu0 }
 0xa02   :  { %v7150_v52 = vadd.f32 %v11386_v56, %v16345_v62  ;;  %v7144_v17 = vpop.f32.mrb[245].mxu0 }
 0xa03   :  { %v7145_v30 = vadd.f32 %v16345_v62, %v7144_v17  ;;  %11493 = vmatprep.mubr.msk.f32.mxu1 %vm1131_vm15, %v7261_v22 }
 0xa04   :  { %11494 = vmatmul.mubr.msk.f32.gmra.mrb[238].mxu1 %vm1131_vm15, %v7262_v32  ;;  %v7264_v8 = vmax.f32 %v7150_v52, 0.0 }
 0xa05   :  { %v7263_v14 = vmax.f32 %v7145_v30, 0.0  ;;  %v11389_v36 = vpop.f32.mrb[246].mxu0  ;;  %v19225_v30 = vld [vmem:[#allocation72_spill] sm:$0xff] }
 0xa06   :  { %v7160_v63 = vadd.f32 %v11389_v36, %v16345_v62  ;;  %v7154_v11 = vpop.f32.mrb[247].mxu0 }
 0xa07   :  { %v7155_v57 = vadd.f32 %v16345_v62, %v7154_v11  ;;  %11496 = vmatprep.mubr.msk.f32.mxu1 %vm1131_vm15, %v7263_v14 }
 0xa08   :  { %11497 = vmatmul.mubr.msk.f32.gmra.mrb[240].mxu1 %vm1131_vm15, %v7264_v8  ;;  %v7266_v40 = vmax.f32 %v7160_v63, 0.0  ;;  %v19226_v63 = vld [vmem:[#allocation77_spill] sm:$0xff] }
 0xa09   :  { %v7265_v5 = vmax.f32 %v7155_v57, 0.0  ;;  %v11392_v44 = vpop.f32.mrb[248].mxu0 }
 0xa0a   :  { %v7170_v51 = vadd.f32 %v11392_v44, %v16345_v62  ;;  %v7164_v13 = vpop.f32.mrb[249].mxu0 }
 0xa0b   :  { %v7165_v0 = vadd.f32 %v16345_v62, %v7164_v13  ;;  %11499 = vmatprep.mubr.msk.f32.mxu1 %vm1131_vm15, %v7265_v5 }
 0xa0c   :  { %11500 = vmatmul.mubr.msk.f32.gmra.mrb[242].mxu1 %vm1131_vm15, %v7266_v40  ;;  %v7268_v28 = vmax.f32 %v7170_v51, 0.0  ;;  %v19227_v51 = vld [vmem:[#allocation74_spill] sm:$0xff] }
 0xa0d   :  { %v7267_v18 = vmax.f32 %v7165_v0, 0.0  ;;  %v11395_v16 = vpop.f32.mrb[250].mxu0 }
 0xa0e   :  { %v7180_v27 = vadd.f32 %v11395_v16, %v16345_v62  ;;  %v7174_v1 = vpop.f32.mrb[251].mxu0  ;;  %v19228_v16 = vld [vmem:[#allocation79_spill] sm:$0xff] }
 0xa0f   :  { %v7175_v29 = vadd.f32 %v16345_v62, %v7174_v1  ;;  %11502 = vmatprep.mubr.msk.f32.mxu1 %vm1131_vm15, %v7267_v18 }
 0xa10   :  { %11503 = vmatmul.mubr.msk.f32.gmra.mrb[244].mxu1 %vm1131_vm15, %v7268_v28  ;;  %v7270_v49 = vmax.f32 %v7180_v27, 0.0 }
 0xa11   :  { %v7269_v53 = vmax.f32 %v7175_v29, 0.0  ;;  %v11398_v37 = vpop.f32.mrb[252].mxu0 }
 0xa12   :  { %v7190_v19 = vadd.f32 %v11398_v37, %v16345_v62  ;;  %v7184_v45 = vpop.f32.mrb[253].mxu0 }
 0xa13   :  { %v7185_v46 = vadd.f32 %v16345_v62, %v7184_v45  ;;  %11505 = vmatprep.mubr.msk.f32.mxu1 %vm1131_vm15, %v7269_v53 }
 0xa14   :  { %11506 = vmatmul.mubr.msk.f32.gmra.mrb[246].mxu1 %vm1131_vm15, %v7270_v49  ;;  %v7272_v38 = vmax.f32 %v7190_v19, 0.0 }
 0xa15   :  { %v7271_v24 = vmax.f32 %v7185_v46, 0.0  ;;  %v11401_v20 = vpop.f32.mrb[254].mxu0  ;;  %v19231_v46 = vld [vmem:[#allocation76_spill] sm:$0xff] }
 0xa16   :  { %v7200_v58 = vadd.f32 %v11401_v20, %v16345_v62  ;;  %v7194_v21 = vpop.f32.mrb[255].mxu0 }
 0xa17   :  { %v7195_v10 = vadd.f32 %v16345_v62, %v7194_v21  ;;  %11508 = vmatprep.mubr.msk.f32.mxu1 %vm1131_vm15, %v7271_v24 }
 0xa18   :  { %11509 = vmatmul.mubr.msk.f32.gmra.mrb[248].mxu1 %vm1131_vm15, %v7272_v38  ;;  %v7274_v39 = vmax.f32 %v7200_v58, 0.0  ;;  %v19232_v58 = vld [vmem:[#allocation81_spill] sm:$0xff] }
 0xa19   :  { %v7273_v50 = vmax.f32 %v7195_v10, 0.0 }
 0xa1b   :  { %11511 = vmatprep.mubr.msk.f32.mxu1 %vm1131_vm15, %v7273_v50 }
 0xa1c   :  { %11512 = vmatmul.mubr.msk.f32.gmra.mrb[250].mxu1 %vm1131_vm15, %v7274_v39 }
 0xa1d   :  { %v11404_v43 = vpop.f32.mrb[0].mxu0 }
 0xa1e   :  { %v7210_v6 = vadd.f32 %v11404_v43, %v16345_v62  ;;  %v7204_v48 = vpop.f32.mrb[1].mxu0 }
 0xa1f   :  { %v7205_v60 = vadd.f32 %v16345_v62, %v7204_v48 }
 0xa20   :  { %v7276_v47 = vmax.f32 %v7210_v6, 0.0  ;;  %v19233_v6 = vld [vmem:[#allocation78_spill] sm:$0xff] }
 0xa21   :  { %v7275_v12 = vmax.f32 %v7205_v60, 0.0 }
 0xa23   :  { %11514 = vmatprep.mubr.msk.f32.mxu1 %vm1131_vm15, %v7275_v12 }
 0xa24   :  { %11515 = vmatmul.mubr.msk.f32.gmra.mrb[252].mxu1 %vm1131_vm15, %v7276_v47  ;;  %v19234_v47 = vld [vmem:[#allocation83_spill] sm:$0xff] }
 0xa6b   :  { %v11423_v42 = vpop.f32.mrb[190].mxu1 }
 0xa6c   :  { %v7863_v59 = vadd.f32 %v11423_v42, %v19218_v23  ;;  %v7543_v31 = vpop.f32.mrb[191].mxu1 }
 0xa6d   :  { %v7862_v55 = vadd.f32 %v7543_v31, %v19219_v54 }
 0xa6e   :  { %v16483_v26 = vadd.f32 %v16478_v61, %v7863_v59 }
 0xa6f   :  { %v16486_v62 = vadd.f32 %v16478_v61, %v7862_v55  ;;  %v11426_v35 = vpop.f32.mrb[192].mxu1 }
 0xa70   :  { %7996 = vst.msk [vmem:[%s18384_s3 + $0x8] sm:$0xff] %vm476_vm0, %v16483_v26  ;;  %v7865_v7 = vadd.f32 %v11426_v35, %v19220_v3  ;;  %v7553_v15 = vpop.f32.mrb[193].mxu1  ;;  %v8062_v4 = vsel %vm476_vm0, %v16483_v26, -inf  ;;  %v8828_v34 = vsel %vm276_vm3, %v16483_v26, 0.0 }
 0xa71   :  { %7995 = vst.msk [vmem:[%s18384_s3] sm:$0xff] %vm476_vm0, %v16486_v62  ;;  %v7864_v2 = vadd.f32 %v7553_v15, %v19221_v33  ;;  %8063 = vmax.xlane.f32.xlu0 %v8062_v4  ;;  %v8059_v9 = vsel %vm476_vm0, %v16486_v62, -inf  ;;  %v8827_v32 = vsel %vm275_vm1, %v16486_v62, 0.0  ;;  %v8894_v8 = vsel %vm476_vm0, %v8828_v34, 0.0  ;;  %v19237_v15 = vld [vmem:[#allocation80_spill] sm:$0xff] }
 0xa72   :  { %v16509_v22 = vadd.f32 %v16478_v61, %v7865_v7  ;;  %8060 = vmax.xlane.f32.xlu1 %v8059_v9  ;;  %v8891_v57 = vsel %vm476_vm0, %v8827_v32, 0.0  ;;  %v19238_v9 = vld [vmem:[#allocation82_spill] sm:$0xff] }
 0xa73   :  { %v16516_v52 = vadd.f32 %v16478_v61, %v7864_v2  ;;  %v11429_v17 = vpop.f32.mrb[194].mxu1 }
 0xa74   :  { %7998 = vst.msk [vmem:[%s18384_s3 + $0x18] sm:$0xff] %vm476_vm0, %v16509_v22  ;;  %v7867_v14 = vadd.f32 %v11429_v17, %v19225_v30  ;;  %v7563_v36 = vpop.f32.mrb[195].mxu1  ;;  %v8068_v18 = vsel %vm476_vm0, %v16509_v22, -inf  ;;  %v8830_v29 = vsel %vm278_vm4, %v16509_v22, 0.0  ;;  %v19239_v30 = vld [vmem:[#allocation85_spill] sm:$0xff] }
 0xa75   :  { %7997 = vst.msk [vmem:[%s18384_s3 + $0x10] sm:$0xff] %vm476_vm0, %v16516_v52  ;;  %v7866_v11 = vadd.f32 %v7563_v36, %v19226_v63  ;;  %8895 = vadd.xlane.f32.xlu0 %v8894_v8  ;;  %v8065_v27 = vsel %vm476_vm0, %v16516_v52, -inf  ;;  %v8829_v49 = vsel %vm277_vm2, %v16516_v52, 0.0  ;;  %v8900_v38 = vsel %vm476_vm0, %v8830_v29, 0.0  ;;  %v19240_v63 = vld [vmem:[#allocation84_spill] sm:$0xff] }
 0xa76   :  { %v16533_v5 = vadd.f32 %v16478_v61, %v7867_v14  ;;  %8892 = vadd.xlane.f32.xlu1 %v8891_v57  ;;  %v8897_v10 = vsel %vm476_vm0, %v8829_v49, 0.0  ;;  %v19244_v49 = vld [vmem:[#allocation87_spill] sm:$0xff] }
 0xa77   :  { %v16536_v44 = vadd.f32 %v16478_v61, %v7866_v11  ;;  %v11432_v40 = vpop.f32.mrb[196].mxu1 }
 0xa78   :  { %8000 = vst.msk [vmem:[%s18384_s3 + $0x28] sm:$0xff] %vm476_vm0, %v16533_v5  ;;  %v7869_v13 = vadd.f32 %v11432_v40, %v19227_v51  ;;  %v7573_v0 = vpop.f32.mrb[197].mxu1  ;;  %v8074_v12 = vsel %vm476_vm0, %v16533_v5, -inf  ;;  %v8832_v31 = vsel %vm280_vm6, %v16533_v5, 0.0 }
 0xa79   :  { %7999 = vst.msk [vmem:[%s18384_s3 + $0x20] sm:$0xff] %vm476_vm0, %v16536_v44  ;;  %v7868_v28 = vadd.f32 %v7573_v0, %v19228_v16  ;;  %8069 = vmax.xlane.f32.xlu0 %v8068_v18  ;;  %v8071_v23 = vsel %vm476_vm0, %v16536_v44, -inf  ;;  %v8831_v35 = vsel %vm279_vm5, %v16536_v44, 0.0  ;;  %v8906_v2 = vsel %vm476_vm0, %v8832_v31, 0.0  ;;  %v19257_v0 = vld [vmem:[#allocation18_spill] sm:$0xff] }
 0xa7a   :  { %v16559_v53 = vadd.f32 %v16478_v61, %v7869_v13  ;;  %8066 = vmax.xlane.f32.xlu1 %v8065_v27  ;;  %v8903_v34 = vsel %vm476_vm0, %v8831_v35, 0.0  ;;  %v19243_v27 = vld [vmem:[#allocation86_spill] sm:$0xff]  ;;  %vm19258_vm4 = vcmp.eq.s32.totalorder %v19257_v0, %v19223_v41 }
 0xa7b   :  { %v16566_v19 = vadd.f32 %v16478_v61, %v7868_v28  ;;  %v11435_v45 = vpop.f32.mrb[198].mxu1 }
 0xa7c   :  { %8002 = vst.msk [vmem:[%s18384_s3 + $0x38] sm:$0xff] %vm476_vm0, %v16559_v53  ;;  %v7871_v24 = vadd.f32 %v11435_v45, %v19231_v46  ;;  %v7583_v20 = vpop.f32.mrb[199].mxu1  ;;  %v8080_v8 = vsel %vm476_vm0, %v16559_v53, -inf  ;;  %v8834_v51 = vsel %vm282_vm8, %v16559_v53, 0.0 }
 0xa7d   :  { %8001 = vst.msk [vmem:[%s18384_s3 + $0x30] sm:$0xff] %vm476_vm0, %v16566_v19  ;;  %v7870_v21 = vadd.f32 %v7583_v20, %v19232_v58  ;;  %8901 = vadd.xlane.f32.xlu0 %v8900_v38  ;;  %v8077_v57 = vsel %vm476_vm0, %v16566_v19, -inf  ;;  %v8833_v18 = vsel %vm281_vm7, %v16566_v19, 0.0  ;;  %v8912_v29 = vsel %vm476_vm0, %v8834_v51, 0.0 }
 0xa7e   :  { %v16583_v50 = vadd.f32 %v16478_v61, %v7871_v24  ;;  %8898 = vadd.xlane.f32.xlu1 %v8897_v10  ;;  %v8909_v46 = vsel %vm476_vm0, %v8833_v18, 0.0 }
 0xa7f   :  { %v16586_v39 = vadd.f32 %v16478_v61, %v7870_v21  ;;  %v11438_v43 = vpop.f32.mrb[200].mxu1 }
 0xa80   :  { %8004 = vst.msk [vmem:[%s18384_s3 + $0x48] sm:$0xff] %vm476_vm0, %v16583_v50  ;;  %v7873_v48 = vadd.f32 %v11438_v43, %v19233_v6  ;;  %v7593_v60 = vpop.f32.mrb[201].mxu1  ;;  %v8086_v38 = vsel %vm476_vm0, %v16583_v50, -inf  ;;  %v8836_v10 = vsel %vm284_vm10, %v16583_v50, 0.0  ;;  %v19246_v43 = vld [vmem:[#allocation15_spill] sm:$0xff] }
 0xa81   :  { %8003 = vst.msk [vmem:[%s18384_s3 + $0x40] sm:$0xff] %vm476_vm0, %v16586_v39  ;;  %v7872_v42 = vadd.f32 %v7593_v60, %v19234_v47  ;;  %8075 = vmax.xlane.f32.xlu0 %v8074_v12  ;;  %v8083_v58 = vsel %vm476_vm0, %v16586_v39, -inf  ;;  %vm19247_vm1 = vcmp.eq.s32.totalorder %v19246_v43, %v19223_v41  ;;  %v19248_v60 = vld [vmem:[#allocation88_spill] sm:$0xff]  ;;  %v8918_v47 = vsel %vm476_vm0, %v8836_v10, 0.0 }
 0xa82   :  { %v16609_v54 = vadd.f32 %v16478_v61, %v7873_v48  ;;  %8072 = vmax.xlane.f32.xlu1 %v8071_v23  ;;  %v8835_v6 = vsel %vm19247_vm1, %v16586_v39, 0.0  ;;  %v19249_v23 = vld [vmem:[#allocation89_spill] sm:$0xff] }
 0xa83   :  { %v16616_v3 = vadd.f32 %v16478_v61, %v7872_v42  ;;  %v11441_v7 = vpop.f32.mrb[202].mxu1  ;;  %v8915_v31 = vsel %vm476_vm0, %v8835_v6, 0.0  ;;  %v19263_v6 = vld [vmem:[#allocation94_spill] sm:$0xff] }
 0xa84   :  { %8006 = vst.msk [vmem:[%s18384_s3 + $0x58] sm:$0xff] %vm476_vm0, %v16609_v54  ;;  %v7875_v4 = vadd.f32 %v11441_v7, %v19237_v15  ;;  %v7603_v33 = vpop.f32.mrb[203].mxu1  ;;  %v8092_v7 = vsel %vm476_vm0, %v16609_v54, -inf }
 0xa85   :  { %8005 = vst.msk [vmem:[%s18384_s3 + $0x50] sm:$0xff] %vm476_vm0, %v16616_v3  ;;  %v7874_v25 = vadd.f32 %v7603_v33, %v19238_v9  ;;  %8907 = vadd.xlane.f32.xlu0 %v8906_v2  ;;  %v8089_v15 = vsel %vm476_vm0, %v16616_v3, -inf  ;;  %v19253_v2 = vld [vmem:[#allocation17_spill] sm:$0xff] }
 0xa86   :  { %v16633_v56 = vadd.f32 %v16478_v61, %v7875_v4  ;;  %8904 = vadd.xlane.f32.xlu1 %v8903_v34  ;;  %v19251_v4 = vld [vmem:[#allocation16_spill] sm:$0xff]  ;;  %vm19254_vm3 = vcmp.eq.s32.totalorder %v19253_v2, %v19223_v41  ;;  %v19255_v34 = vld [vmem:[#allocation90_spill] sm:$0xff] }
 0xa87   :  { %v16636_v32 = vadd.f32 %v16478_v61, %v7874_v25  ;;  %v11444_v17 = vpop.f32.mrb[204].mxu1  ;;  %vm19252_vm2 = vcmp.eq.s32.totalorder %v19251_v4, %v19223_v41  ;;  %v8837_v9 = vsel %vm19254_vm3, %v16616_v3, 0.0 }
 0xa88   :  { %8008 = vst.msk [vmem:[%s18384_s3 + $0x68] sm:$0xff] %vm476_vm0, %v16633_v56  ;;  %v7877_v14 = vadd.f32 %v11444_v17, %v19239_v30  ;;  %v7613_v36 = vpop.f32.mrb[205].mxu1  ;;  %v8838_v33 = vsel %vm19252_vm2, %v16609_v54, 0.0  ;;  %v8098_v40 = vsel %vm476_vm0, %v16633_v56, -inf  ;;  %v8840_v18 = vsel %vm19258_vm4, %v16633_v56, 0.0 }
 0xa89   :  { %8007 = vst.msk [vmem:[%s18384_s3 + $0x60] sm:$0xff] %vm476_vm0, %v16636_v32  ;;  %v7876_v11 = vadd.f32 %v7613_v36, %v19240_v63  ;;  %8081 = vmax.xlane.f32.xlu0 %v8080_v8  ;;  %v8924_v30 = vsel %vm476_vm0, %v8838_v33, 0.0  ;;  %v19256_v36 = vld [vmem:[#allocation91_spill] sm:$0xff]  ;;  %v8921_v63 = vsel %vm476_vm0, %v8837_v9, 0.0  ;;  %v8095_v51 = vsel %vm476_vm0, %v16636_v32, -inf  ;;  %v19267_v9 = vld [vmem:[#allocation97_spill] sm:$0xff] }
 0xa8a   :  { %v16659_v13 = vadd.f32 %v16478_v61, %v7877_v14  ;;  %8078 = vmax.xlane.f32.xlu1 %v8077_v57 }
 0xa8b   :  { %v16666_v16 = vadd.f32 %v16478_v61, %v7876_v11  ;;  %v11447_v28 = vpop.f32.mrb[206].mxu1 }
 0xa8c   :  { %8010 = vst.msk [vmem:[%s18384_s3 + $0x78] sm:$0xff] %vm476_vm0, %v16659_v13  ;;  %v7879_v1 = vadd.f32 %v11447_v28, %v19243_v27  ;;  %v7623_v37 = vpop.f32.mrb[207].mxu1  ;;  %v19259_v27 = vld [vmem:[#allocation92_spill] sm:$0xff] }
 0xa8d   :  { %8009 = vst.msk [vmem:[%s18384_s3 + $0x70] sm:$0xff] %vm476_vm0, %v16666_v16  ;;  %8913 = vadd.xlane.f32.xlu0 %v8912_v29  ;;  %v7878_v45 = vadd.f32 %v7623_v37, %v19244_v49  ;;  %v8104_v29 = vsel %vm476_vm0, %v16659_v13, -inf  ;;  %v19260_v49 = vld [vmem:[#allocation93_spill] sm:$0xff] }
 0xa8e   :  { %v16683_v24 = vadd.f32 %v16478_v61, %v7879_v1  ;;  %8910 = vadd.xlane.f32.xlu1 %v8909_v46  ;;  %v8930_v46 = vsel %vm476_vm0, %v8840_v18, 0.0  ;;  %v19271_v18 = vld [vmem:[#allocation99_spill] sm:$0xff] }
 0xa8f   :  { %v16686_v20 = vadd.f32 %v16478_v61, %v7878_v45 }
 0xa90   :  { %8012 = vst.msk [vmem:[%s18384_s3 + $0x88] sm:$0xff] %vm476_vm0, %v16683_v24 }
 0xa91   :  { %8011 = vst.msk [vmem:[%s18384_s3 + $0x80] sm:$0xff] %vm476_vm0, %v16686_v20  ;;  %8087 = vmax.xlane.f32.xlu0 %v8086_v38 }
 0xa92   :  { %8084 = vmax.xlane.f32.xlu1 %v8083_v58  ;;  %v19261_v58 = vld [vmem:[#allocation19_spill] sm:$0xff] }
 0xa93   :  { %v11450_v48 = vpop.f32.mrb[208].mxu1  ;;  %vm19262_vm5 = vcmp.eq.s32.totalorder %v19261_v58, %v19223_v41 }
 0xa94   :  { %v7881_v12 = vadd.f32 %v11450_v48, %v19248_v60  ;;  %v7633_v42 = vpop.f32.mrb[209].mxu1  ;;  %v8839_v21 = vsel %vm19262_vm5, %v16636_v32, 0.0  ;;  %v8110_v60 = vsel %vm476_vm0, %v16683_v24, -inf }
 0xa95   :  { %8919 = vadd.xlane.f32.xlu0 %v8918_v47  ;;  %v7880_v59 = vadd.f32 %v7633_v42, %v19249_v23  ;;  %v19264_v47 = vld [vmem:[#allocation95_spill] sm:$0xff]  ;;  %v8927_v23 = vsel %vm476_vm0, %v8839_v21, 0.0 }
 0xa96   :  { %v16715_v55 = vadd.f32 %v16478_v61, %v7881_v12  ;;  %8916 = vadd.xlane.f32.xlu1 %v8915_v31 }
 0xa97   :  { %v16718_v35 = vadd.f32 %v16478_v61, %v7880_v59 }
 0xa98   :  { %8014 = vst.msk [vmem:[%s18384_s3 + $0x98] sm:$0xff] %vm476_vm0, %v16715_v55  ;;  %v8116_v33 = vsel %vm476_vm0, %v16715_v55, -inf }
 0xa99   :  { %19250 = vst [vmem:[#allocation176_spill] sm:$0xff] %v16718_v35  ;;  %8013 = vst.msk [vmem:[%s18384_s3 + $0x90] sm:$0xff] %vm476_vm0, %v16718_v35  ;;  %8093 = vmax.xlane.f32.xlu0 %v8092_v7 }
 0xa9a   :  { %8090 = vmax.xlane.f32.xlu1 %v8089_v15  ;;  %v19266_v15 = vld [vmem:[#allocation96_spill] sm:$0xff] }
 0xa9b   :  { %v11453_v25 = vpop.f32.mrb[210].mxu1 }
 0xa9c   :  { %v7883_v17 = vadd.f32 %v11453_v25, %v19255_v34  ;;  %v7643_v14 = vpop.f32.mrb[211].mxu1  ;;  %v8101_v34 = vsel %vm476_vm0, %v16666_v16, -inf }
 0xa9d   :  { %8925 = vadd.xlane.f32.xlu0 %v8924_v30  ;;  %v7882_v8 = vadd.f32 %v7643_v14, %v19256_v36  ;;  %v19268_v30 = vld [vmem:[#allocation20_spill] sm:$0xff] }
 0xa9e   :  { %v16747_v11 = vadd.f32 %v16478_v61, %v7883_v17  ;;  %8922 = vadd.xlane.f32.xlu1 %v8921_v63  ;;  %vm19269_vm6 = vcmp.eq.s32.totalorder %v19268_v30, %v19223_v41  ;;  %v19270_v63 = vld [vmem:[#allocation98_spill] sm:$0xff] }
 0xa9f   :  { %v16750_v57 = vadd.f32 %v16478_v61, %v7882_v8  ;;  %v8842_v14 = vsel %vm19269_vm6, %v16659_v13, 0.0 }
 0xaa0   :  { %8016 = vst.msk [vmem:[%s18384_s3 + $0xa8] sm:$0xff] %vm476_vm0, %v16747_v11 }
 0xaa1   :  { %8015 = vst.msk [vmem:[%s18384_s3 + $0xa0] sm:$0xff] %vm476_vm0, %v16750_v57  ;;  %8099 = vmax.xlane.f32.xlu0 %v8098_v40 }
 0xaa2   :  { %8096 = vmax.xlane.f32.xlu1 %v8095_v51  ;;  %v8122_v51 = vsel %vm476_vm0, %v16747_v11, -inf }
 0xaa3   :  { %v11456_v28 = vpop.f32.mrb[212].mxu1 }
 0xaa4   :  { %v7885_v1 = vadd.f32 %v11456_v28, %v19259_v27  ;;  %v7653_v37 = vpop.f32.mrb[213].mxu1  ;;  %v8936_v27 = vsel %vm476_vm0, %v8842_v14, 0.0 }
 0xaa5   :  { %8105 = vmax.xlane.f32.xlu0 %v8104_v29  ;;  %v7884_v45 = vadd.f32 %v7653_v37, %v19260_v49  ;;  %v19272_v29 = vld [vmem:[#allocation21_spill] sm:$0xff] }
 0xaa6   :  { %v16776_v38 = vadd.f32 %v16478_v61, %v7885_v1  ;;  %8931 = vadd.xlane.f32.xlu1 %v8930_v46  ;;  %vm19273_vm7 = vcmp.eq.s32.totalorder %v19272_v29, %v19223_v41  ;;  %v19274_v46 = vld [vmem:[#allocation100_spill] sm:$0xff] }
 0xaa7   :  { %v16783_v10 = vadd.f32 %v16478_v61, %v7884_v45  ;;  %v11459_v43 = vpop.f32.mrb[214].mxu1  ;;  %v8841_v37 = vsel %vm19273_vm7, %v16666_v16, 0.0 }
 0xaa8   :  { %8018 = vst.msk [vmem:[%s18384_s3 + $0xb8] sm:$0xff] %vm476_vm0, %v16776_v38  ;;  %v7887_v48 = vadd.f32 %v11459_v43, %v19263_v6  ;;  %v7663_v12 = vpop.f32.mrb[215].mxu1  ;;  %v8128_v21 = vsel %vm476_vm0, %v16776_v38, -inf  ;;  %v19275_v6 = vld [vmem:[#allocation101_spill] sm:$0xff] }
 0xaa9   :  { %8017 = vst.msk [vmem:[%s18384_s3 + $0xb0] sm:$0xff] %vm476_vm0, %v16783_v10  ;;  %8111 = vmax.xlane.f32.xlu0 %v8110_v60  ;;  %v7886_v42 = vadd.f32 %v7663_v12, %v19264_v47  ;;  %v8933_v60 = vsel %vm476_vm0, %v8841_v37, 0.0  ;;  %v19284_v37 = vld [vmem:[#allocation23_spill] sm:$0xff] }
 0xaaa   :  { %v16801_v59 = vadd.f32 %v16478_v61, %v7887_v48  ;;  %8928 = vadd.xlane.f32.xlu1 %v8927_v23  ;;  %v19276_v23 = vld [vmem:[#allocation102_spill] sm:$0xff]  ;;  %vm19285_vm10 = vcmp.eq.s32.totalorder %v19284_v37, %v19223_v41 }
 0xaab   :  { %v16804_v31 = vadd.f32 %v16478_v61, %v7886_v42  ;;  %v11462_v7 = vpop.f32.mrb[216].mxu1 }
 0xaac   :  { %8020 = vst.msk [vmem:[%s18384_s3 + $0xc8] sm:$0xff] %vm476_vm0, %v16801_v59  ;;  %v7889_v4 = vadd.f32 %v11462_v7, %v19266_v15  ;;  %v7673_v2 = vpop.f32.mrb[217].mxu1  ;;  %v8134_v15 = vsel %vm476_vm0, %v16801_v59, -inf }
 0xaad   :  { %19265 = vst [vmem:[#allocation177_spill] sm:$0xff] %v16804_v31  ;;  %8019 = vst.msk [vmem:[%s18384_s3 + $0xc0] sm:$0xff] %vm476_vm0, %v16804_v31  ;;  %8117 = vmax.xlane.f32.xlu0 %v8116_v33  ;;  %v7888_v25 = vadd.f32 %v7673_v2, %v19267_v9  ;;  %v19277_v33 = vld [vmem:[#allocation103_spill] sm:$0xff]  ;;  %v8107_v9 = vsel %vm476_vm0, %v16686_v20, -inf }
 0xaae   :  { %v16823_v17 = vadd.f32 %v16478_v61, %v7889_v4  ;;  %8102 = vmax.xlane.f32.xlu1 %v8101_v34  ;;  %v19279_v34 = vld [vmem:[#allocation22_spill] sm:$0xff] }
 0xaaf   :  { %v16830_v36 = vadd.f32 %v16478_v61, %v7888_v25  ;;  %v11465_v8 = vpop.f32.mrb[218].mxu1  ;;  %vm19280_vm8 = vcmp.eq.s32.totalorder %v19279_v34, %v19223_v41 }
 0xab0   :  { %8022 = vst.msk [vmem:[%s18384_s3 + $0xd8] sm:$0xff] %vm476_vm0, %v16823_v17  ;;  %v7891_v40 = vadd.f32 %v11465_v8, %v19270_v63  ;;  %v7683_v0 = vpop.f32.mrb[219].mxu1  ;;  %v8844_v30 = vsel %vm19280_vm8, %v16683_v24, 0.0  ;;  %v19281_v63 = vld [vmem:[#allocation104_spill] sm:$0xff] }
 0xab1   :  { %8021 = vst.msk [vmem:[%s18384_s3 + $0xd0] sm:$0xff] %vm476_vm0, %v16830_v36  ;;  %8123 = vmax.xlane.f32.xlu0 %v8122_v51  ;;  %v7890_v28 = vadd.f32 %v7683_v0, %v19271_v18  ;;  %v8140_v51 = vsel %vm476_vm0, %v16823_v17, -inf  ;;  %v19282_v18 = vld [vmem:[#allocation105_spill] sm:$0xff] }
 0xab2   :  { %v16848_v1 = vadd.f32 %v16478_v61, %v7891_v40  ;;  %8937 = vadd.xlane.f32.xlu1 %v8936_v27  ;;  %v8942_v27 = vsel %vm476_vm0, %v8844_v30, 0.0  ;;  %v19290_v30 = vld [vmem:[#allocation109_spill] sm:$0xff] }
 0xab3   :  { %v16855_v49 = vadd.f32 %v16478_v61, %v7890_v28  ;;  %v11468_v45 = vpop.f32.mrb[220].mxu1 }
 0xab4   :  { %8024 = vst.msk [vmem:[%s18384_s3 + $0xe8] sm:$0xff] %vm476_vm0, %v16848_v1  ;;  %v7893_v58 = vadd.f32 %v11468_v45, %v19274_v46  ;;  %v7693_v43 = vpop.f32.mrb[221].mxu1  ;;  %v8843_v45 = vsel %vm19285_vm10, %v16686_v20, 0.0 }
 0xab5   :  { %8023 = vst.msk [vmem:[%s18384_s3 + $0xe0] sm:$0xff] %vm476_vm0, %v16855_v49  ;;  %8129 = vmax.xlane.f32.xlu0 %v8128_v21  ;;  %v7892_v48 = vadd.f32 %v7693_v43, %v19275_v6  ;;  %v19286_v21 = vld [vmem:[#allocation106_spill] sm:$0xff]  ;;  %v8146_v6 = vsel %vm476_vm0, %v16848_v1, -inf }
 0xab6   :  { %v16873_v12 = vadd.f32 %v16478_v61, %v7893_v58  ;;  %8934 = vadd.xlane.f32.xlu1 %v8933_v60  ;;  %v19287_v60 = vld [vmem:[#allocation107_spill] sm:$0xff] }
 0xab7   :  { %v16876_v47 = vadd.f32 %v16478_v61, %v7892_v48  ;;  %v11471_v42 = vpop.f32.mrb[222].mxu1 }
 0xab8   :  { %8026 = vst.msk [vmem:[%s18384_s3 + $0xf8] sm:$0xff] %vm476_vm0, %v16873_v12  ;;  %v7895_v7 = vadd.f32 %v11471_v42, %v19276_v23  ;;  %v7703_v4 = vpop.f32.mrb[223].mxu1  ;;  %v8939_v23 = vsel %vm476_vm0, %v8843_v45, 0.0 }
 0xab9   :  { %8025 = vst.msk [vmem:[%s18384_s3 + $0xf0] sm:$0xff] %vm476_vm0, %v16876_v47  ;;  %8135 = vmax.xlane.f32.xlu0 %v8134_v15  ;;  %v7894_v2 = vadd.f32 %v7703_v4, %v19277_v33  ;;  %v19289_v33 = vld [vmem:[#allocation108_spill] sm:$0xff] }
 0xaba   :  { %v16895_v25 = vadd.f32 %v16478_v61, %v7895_v7  ;;  %8108 = vmax.xlane.f32.xlu1 %v8107_v9  ;;  %v8152_v9 = vsel %vm476_vm0, %v16873_v12, -inf }
 0xabb   :  { %v16902_v14 = vadd.f32 %v16478_v61, %v7894_v2  ;;  %v11474_v8 = vpop.f32.mrb[224].mxu1 }
 0xabc   :  { %19278 = vst [vmem:[#allocation110_spill] sm:$0xff] %v16895_v25  ;;  %8028 = vst.msk [vmem:[%s18384_s3 + $0x108] sm:$0xff] %vm476_vm0, %v16895_v25  ;;  %v7897_v40 = vadd.f32 %v11474_v8, %v19281_v63  ;;  %v7713_v0 = vpop.f32.mrb[225].mxu1  ;;  %v8113_v63 = vsel %vm476_vm0, %v16718_v35, -inf  ;;  %v8158_v45 = vsel %vm476_vm0, %v16895_v25, -inf }
 0xabd   :  { %8027 = vst.msk [vmem:[%s18384_s3 + $0x100] sm:$0xff] %vm476_vm0, %v16902_v14  ;;  %8141 = vmax.xlane.f32.xlu0 %v8140_v51  ;;  %v7896_v28 = vadd.f32 %v7713_v0, %v19282_v18  ;;  %v19292_v51 = vld [vmem:[#allocation24_spill] sm:$0xff] }
 0xabe   :  { %v16920_v29 = vadd.f32 %v16478_v61, %v7897_v40  ;;  %8943 = vadd.xlane.f32.xlu1 %v8942_v27  ;;  %vm19293_vm11 = vcmp.eq.s32.totalorder %v19292_v51, %v19223_v41  ;;  %v19294_v27 = vld [vmem:[#allocation111_spill] sm:$0xff] }
 0xabf   :  { %v16927_v46 = vadd.f32 %v16478_v61, %v7896_v28  ;;  %v11477_v58 = vpop.f32.mrb[226].mxu1  ;;  %v8846_v0 = vsel %vm19293_vm11, %v16715_v55, 0.0 }
 0xac0   :  { %19283 = vst [vmem:[#allocation192_spill] sm:$0xff] %v16920_v29  ;;  %8030 = vst.msk [vmem:[%s18384_s3 + $0x118] sm:$0xff] %vm476_vm0, %v16920_v29  ;;  %v7899_v43 = vadd.f32 %v11477_v58, %v19286_v21  ;;  %v7723_v48 = vpop.f32.mrb[227].mxu1  ;;  %v19295_v21 = vld [vmem:[#allocation112_spill] sm:$0xff] }
 0xac1   :  { %8029 = vst.msk [vmem:[%s18384_s3 + $0x110] sm:$0xff] %vm476_vm0, %v16927_v46  ;;  %8147 = vmax.xlane.f32.xlu0 %v8146_v6  ;;  %v7898_v42 = vadd.f32 %v7723_v48, %v19287_v60  ;;  %v8948_v6 = vsel %vm476_vm0, %v8846_v0, 0.0  ;;  %v19297_v60 = vld [vmem:[#allocation25_spill] sm:$0xff] }
 0xac2   :  { %v16945_v7 = vadd.f32 %v16478_v61, %v7899_v43  ;;  %8940 = vadd.xlane.f32.xlu1 %v8939_v23  ;;  %vm19298_vm15 = vcmp.eq.s32.totalorder %v19297_v60, %v19223_v41 }
 0xac3   :  { %v16948_v15 = vadd.f32 %v16478_v61, %v7898_v42  ;;  %v11480_v4 = vpop.f32.mrb[228].mxu1  ;;  %v8845_v42 = vsel %vm19298_vm15, %v16718_v35, 0.0 }
 0xac4   :  { %19288 = vst [vmem:[#allocation178_spill] sm:$0xff] %v16945_v7  ;;  %8032 = vst.msk [vmem:[%s18384_s3 + $0x128] sm:$0xff] %vm476_vm0, %v16945_v7  ;;  %v7901_v2 = vadd.f32 %v11480_v4, %v19289_v33  ;;  %v7733_v34 = vpop.f32.mrb[229].mxu1  ;;  %v19299_v33 = vld [vmem:[#allocation114_spill] sm:$0xff] }
 0xac5   :  { %8031 = vst.msk [vmem:[%s18384_s3 + $0x120] sm:$0xff] %vm476_vm0, %v16948_v15  ;;  %8153 = vmax.xlane.f32.xlu0 %v8152_v9  ;;  %v7900_v8 = vadd.f32 %v7733_v34, %v19290_v30  ;;  %v8164_v9 = vsel %vm476_vm0, %v16920_v29, -inf  ;;  %v19300_v30 = vld [vmem:[#allocation115_spill] sm:$0xff] }
 0xac6   :  { %v16967_v40 = vadd.f32 %v16478_v61, %v7901_v2  ;;  %8114 = vmax.xlane.f32.xlu1 %v8113_v63  ;;  %v8945_v63 = vsel %vm476_vm0, %v8845_v42, 0.0  ;;  %v19305_v42 = vld [vmem:[#allocation26_spill] sm:$0xff] }
 0xac7   :  { %v16974_v18 = vadd.f32 %v16478_v61, %v7900_v8  ;;  %v11483_v28 = vpop.f32.mrb[230].mxu1  ;;  %vm19306_vm12 = vcmp.eq.s32.totalorder %v19305_v42, %v19223_v41 }
 0xac8   :  { %19291 = vst [vmem:[#allocation179_spill] sm:$0xff] %v16967_v40  ;;  %8034 = vst.msk [vmem:[%s18384_s3 + $0x138] sm:$0xff] %vm476_vm0, %v16967_v40  ;;  %v7903_v37 = vadd.f32 %v11483_v28, %v19294_v27  ;;  %v7743_v58 = vpop.f32.mrb[231].mxu1  ;;  %v19302_v27 = vld [vmem:[#allocation117_spill] sm:$0xff] }
 0xac9   :  { %8033 = vst.msk [vmem:[%s18384_s3 + $0x130] sm:$0xff] %vm476_vm0, %v16974_v18  ;;  %8159 = vmax.xlane.f32.xlu0 %v8158_v45  ;;  %v7902_v43 = vadd.f32 %v7743_v58, %v19295_v21  ;;  %v8170_v45 = vsel %vm476_vm0, %v16945_v7, -inf  ;;  %v19303_v21 = vld [vmem:[#allocation118_spill] sm:$0xff] }
 0xaca   :  { %v16992_v48 = vadd.f32 %v16478_v61, %v7903_v37  ;;  %8949 = vadd.xlane.f32.xlu1 %v8948_v6  ;;  %v8119_v6 = vsel %vm476_vm0, %v16750_v57, -inf }
 0xacb   :  { %v16999_v23 = vadd.f32 %v16478_v61, %v7902_v43  ;;  %v11486_v4 = vpop.f32.mrb[232].mxu1 }
 0xacc   :  { %19296 = vst [vmem:[#allocation193_spill] sm:$0xff] %v16992_v48  ;;  %8036 = vst.msk [vmem:[%s18384_s3 + $0x148] sm:$0xff] %vm476_vm0, %v16992_v48  ;;  %v7905_v2 = vadd.f32 %v11486_v4, %v19299_v33  ;;  %v7753_v34 = vpop.f32.mrb[233].mxu1  ;;  %v8848_v4 = vsel %vm19306_vm12, %v16747_v11, 0.0 }
 0xacd   :  { %8035 = vst.msk [vmem:[%s18384_s3 + $0x140] sm:$0xff] %vm476_vm0, %v16999_v23  ;;  %8165 = vmax.xlane.f32.xlu0 %v8164_v9  ;;  %v7904_v8 = vadd.f32 %v7753_v34, %v19300_v30  ;;  %v19307_v9 = vld [vmem:[#allocation120_spill] sm:$0xff]  ;;  %v8176_v30 = vsel %vm476_vm0, %v16967_v40, -inf }
 0xace   :  { %v17017_v51 = vadd.f32 %v16478_v61, %v7905_v2  ;;  %8946 = vadd.xlane.f32.xlu1 %v8945_v63  ;;  %v19308_v63 = vld [vmem:[#allocation121_spill] sm:$0xff] }
 0xacf   :  { %v17020_v0 = vadd.f32 %v16478_v61, %v7904_v8  ;;  %v11489_v28 = vpop.f32.mrb[234].mxu1 }
 0xad0   :  { %19301 = vst [vmem:[#allocation180_spill] sm:$0xff] %v17017_v51  ;;  %8038 = vst.msk [vmem:[%s18384_s3 + $0x158] sm:$0xff] %vm476_vm0, %v17017_v51  ;;  %v7907_v37 = vadd.f32 %v11489_v28, %v19302_v27  ;;  %v7763_v58 = vpop.f32.mrb[235].mxu1  ;;  %v8954_v27 = vsel %vm476_vm0, %v8848_v4, 0.0  ;;  %v8182_v4 = vsel %vm476_vm0, %v16992_v48, -inf }
 0xad1   :  { %8037 = vst.msk [vmem:[%s18384_s3 + $0x150] sm:$0xff] %vm476_vm0, %v17020_v0  ;;  %8171 = vmax.xlane.f32.xlu0 %v8170_v45  ;;  %v7906_v43 = vadd.f32 %v7763_v58, %v19303_v21  ;;  %v19309_v45 = vld [vmem:[#allocation27_spill] sm:$0xff] }
 0xad2   :  { %v17039_v60 = vadd.f32 %v16478_v61, %v7907_v37  ;;  %8120 = vmax.xlane.f32.xlu1 %v8119_v6  ;;  %vm19310_vm13 = vcmp.eq.s32.totalorder %v19309_v45, %v19223_v41  ;;  %v19311_v6 = vld [vmem:[#allocation123_spill] sm:$0xff] }
 0xad3   :  { %v17046_v33 = vadd.f32 %v16478_v61, %v7906_v43  ;;  %v11492_v2 = vpop.f32.mrb[236].mxu1  ;;  %v8847_v58 = vsel %vm19310_vm13, %v16750_v57, 0.0 }
 0xad4   :  { %19304 = vst [vmem:[#allocation181_spill] sm:$0xff] %v17039_v60  ;;  %8040 = vst.msk [vmem:[%s18384_s3 + $0x168] sm:$0xff] %vm476_vm0, %v17039_v60  ;;  %v7909_v34 = vadd.f32 %v11492_v2, %v19307_v9  ;;  %v7773_v8 = vpop.f32.mrb[237].mxu1  ;;  %v19312_v9 = vld [vmem:[#allocation125_spill] sm:$0xff] }
 0xad5   :  { %8039 = vst.msk [vmem:[%s18384_s3 + $0x160] sm:$0xff] %vm476_vm0, %v17046_v33  ;;  %8177 = vmax.xlane.f32.xlu0 %v8176_v30  ;;  %v7908_v28 = vadd.f32 %v7773_v8, %v19308_v63  ;;  %v8951_v30 = vsel %vm476_vm0, %v8847_v58, 0.0 }
 0xad6   :  { %v17064_v37 = vadd.f32 %v16478_v61, %v7909_v34  ;;  %8955 = vadd.xlane.f32.xlu1 %v8954_v27  ;;  %v19313_v27 = vld [vmem:[#allocation127_spill] sm:$0xff] }
 0xad7   :  { %v17071_v21 = vadd.f32 %v16478_v61, %v7908_v28  ;;  %v11495_v43 = vpop.f32.mrb[238].mxu1 }
 0xad8   :  { %8042 = vst.msk [vmem:[%s18384_s3 + $0x178] sm:$0xff] %vm476_vm0, %v17064_v37  ;;  %v7911_v42 = vadd.f32 %v11495_v43, %v19311_v6  ;;  %v7783_v2 = vpop.f32.mrb[239].mxu1  ;;  %v8188_v43 = vsel %vm476_vm0, %v17017_v51, -inf  ;;  %v19314_v6 = vld [vmem:[#allocation129_spill] sm:$0xff] }
 0xad9   :  { %8041 = vst.msk [vmem:[%s18384_s3 + $0x170] sm:$0xff] %vm476_vm0, %v17071_v21  ;;  %8183 = vmax.xlane.f32.xlu0 %v8182_v4  ;;  %v7910_v34 = vadd.f32 %v7783_v2, %v19312_v9  ;;  %v8125_v4 = vsel %vm476_vm0, %v16783_v10, -inf  ;;  %v19315_v9 = vld [vmem:[#allocation28_spill] sm:$0xff] }
 0xada   :  { %v17089_v8 = vadd.f32 %v16478_v61, %v7911_v42  ;;  %8952 = vadd.xlane.f32.xlu1 %v8951_v30  ;;  %vm19316_vm9 = vcmp.eq.s32.totalorder %v19315_v9, %v19223_v41 }
 0xadb   :  { %v17092_v63 = vadd.f32 %v16478_v61, %v7910_v34  ;;  %v11498_v28 = vpop.f32.mrb[240].mxu1  ;;  %v8850_v34 = vsel %vm19316_vm9, %v16776_v38, 0.0 }
 0xadc   :  { %8044 = vst.msk [vmem:[%s18384_s3 + $0x188] sm:$0xff] %vm476_vm0, %v17089_v8  ;;  %v7913_v45 = vadd.f32 %v11498_v28, %v19313_v27  ;;  %v7793_v58 = vpop.f32.mrb[241].mxu1  ;;  %v19317_v27 = vld [vmem:[#allocation130_spill] sm:$0xff] }
 0xadd   :  { %8043 = vst.msk [vmem:[%s18384_s3 + $0x180] sm:$0xff] %vm476_vm0, %v17092_v63  ;;  %8189 = vmax.xlane.f32.xlu0 %v8188_v43  ;;  %v7912_v42 = vadd.f32 %v7793_v58, %v19314_v6  ;;  %v19318_v6 = vld [vmem:[#allocation131_spill] sm:$0xff] }
 0xade   :  { %v17111_v2 = vadd.f32 %v16478_v61, %v7913_v45  ;;  %8126 = vmax.xlane.f32.xlu1 %v8125_v4  ;;  %v8194_v45 = vsel %vm476_vm0, %v17039_v60, -inf  ;;  %v8960_v4 = vsel %vm476_vm0, %v8850_v34, 0.0  ;;  %v19321_v34 = vld [vmem:[#allocation133_spill] sm:$0xff] }
 0xadf   :  { %v17118_v30 = vadd.f32 %v16478_v61, %v7912_v42  ;;  %v11501_v28 = vpop.f32.mrb[242].mxu1 }
 0xae0   :  { %8046 = vst.msk [vmem:[%s18384_s3 + $0x198] sm:$0xff] %vm476_vm0, %v17111_v2  ;;  %v7915_v43 = vadd.f32 %v11501_v28, %v19317_v27  ;;  %v7803_v58 = vpop.f32.mrb[243].mxu1  ;;  %v19319_v28 = vld [vmem:[#allocation29_spill] sm:$0xff] }
 0xae1   :  { %8045 = vst.msk [vmem:[%s18384_s3 + $0x190] sm:$0xff] %vm476_vm0, %v17118_v30  ;;  %8195 = vmax.xlane.f32.xlu0 %v8194_v45  ;;  %v7914_v42 = vadd.f32 %v7803_v58, %v19318_v6  ;;  %vm19320_vm14 = vcmp.eq.s32.totalorder %v19319_v28, %v19223_v41  ;;  %v19322_v58 = vld [vmem:[#allocation135_spill] sm:$0xff] }
 0xae2   :  { %v17136_v9 = vadd.f32 %v16478_v61, %v7915_v43  ;;  %8961 = vadd.xlane.f32.xlu1 %v8960_v4  ;;  %v8849_v27 = vsel %vm19320_vm14, %v16783_v10, 0.0 }
 0xae3   :  { %v17143_v60 = vadd.f32 %v16478_v61, %v7914_v42  ;;  %v11504_v51 = vpop.f32.mrb[244].mxu1  ;;  %v8957_v42 = vsel %vm476_vm0, %v8849_v27, 0.0  ;;  %v19325_v27 = vld [vmem:[#allocation137_spill] sm:$0xff] }
 0xae4   :  { %8048 = vst.msk [vmem:[%s18384_s3 + $0x1a8] sm:$0xff] %vm476_vm0, %v17136_v9  ;;  %v7917_v45 = vadd.f32 %v11504_v51, %v19321_v34  ;;  %v7813_v43 = vpop.f32.mrb[245].mxu1  ;;  %v19324_v51 = vld [vmem:[#allocation136_spill] sm:$0xff] }
 0xae5   :  { %8047 = vst.msk [vmem:[%s18384_s3 + $0x1a0] sm:$0xff] %vm476_vm0, %v17143_v60  ;;  %v7916_v6 = vadd.f32 %v7813_v43, %v19322_v58  ;;  %v8131_v43 = vsel %vm476_vm0, %v16804_v31, -inf }
 0xae6   :  { %v17159_v4 = vadd.f32 %v16478_v61, %v7917_v45  ;;  %8958 = vadd.xlane.f32.xlu1 %v8957_v42 }
 0xae7   :  { %v17162_v28 = vadd.f32 %v16478_v61, %v7916_v6  ;;  %v11507_v48 = vpop.f32.mrb[246].mxu1 }
 0xae8   :  { %8050 = vst.msk [vmem:[%s18384_s3 + $0x1b8] sm:$0xff] %vm476_vm0, %v17159_v4  ;;  %v7919_v34 = vadd.f32 %v11507_v48, %v19324_v51  ;;  %v7823_v40 = vpop.f32.mrb[247].mxu1  ;;  %v19326_v48 = vld [vmem:[#allocation30_spill] sm:$0xff] }
 0xae9   :  { %19323 = vst [vmem:[#allocation116_spill] sm:$0xff] %v17162_v28  ;;  %8049 = vst.msk [vmem:[%s18384_s3 + $0x1b0] sm:$0xff] %vm476_vm0, %v17162_v28  ;;  %v7918_v45 = vadd.f32 %v7823_v40, %v19325_v27  ;;  %v8221_v58 = vsel %vm476_vm0, %v17162_v28, -inf  ;;  %vm19327_vm1 = vcmp.eq.s32.totalorder %v19326_v48, %v19223_v41  ;;  %v19329_v27 = vld [vmem:[#allocation140_spill] sm:$0xff] }
 0xaea   :  { %v17181_v6 = vadd.f32 %v16478_v61, %v7919_v34  ;;  %8132 = vmax.xlane.f32.xlu1 %v8131_v43  ;;  %8222 = vmax.xlane.f32.xlu0 %v8221_v58  ;;  %v8852_v42 = vsel %vm19327_vm1, %v16801_v59, 0.0  ;;  %v19330_v43 = vld [vmem:[#allocation142_spill] sm:$0xff] }
 0xaeb   :  { %v17188_v51 = vadd.f32 %v16478_v61, %v7918_v45  ;;  %v11510_v40 = vpop.f32.mrb[248].mxu1  ;;  %v8966_v45 = vsel %vm476_vm0, %v8852_v42, 0.0 }
 0xaec   :  { %8052 = vst.msk [vmem:[%s18384_s3 + $0x1c8] sm:$0xff] %vm476_vm0, %v17181_v6  ;;  %v7921_v34 = vadd.f32 %v11510_v40, %v19329_v27  ;;  %v7833_v28 = vpop.f32.mrb[249].mxu1  ;;  %v19331_v40 = vld [vmem:[#allocation31_spill] sm:$0xff] }
 0xaed   :  { %19328 = vst [vmem:[#allocation182_spill] sm:$0xff] %v17188_v51  ;;  %8051 = vst.msk [vmem:[%s18384_s3 + $0x1c0] sm:$0xff] %vm476_vm0, %v17188_v51  ;;  %v7920_v58 = vadd.f32 %v7833_v28, %v19330_v43  ;;  %v8227_v48 = vsel %vm476_vm0, %v17188_v51, -inf  ;;  %vm19332_vm2 = vcmp.eq.s32.totalorder %v19331_v40, %v19223_v41  ;;  %v19334_v28 = vld [vmem:[#allocation144_spill] sm:$0xff]  ;;  %v19335_v43 = vld [vmem:[#allocation146_spill] sm:$0xff] }
 0xaee   :  { %v17206_v7 = vadd.f32 %v16478_v61, %v7921_v34  ;;  %8967 = vadd.xlane.f32.xlu1 %v8966_v45  ;;  %8228 = vmax.xlane.f32.xlu0 %v8227_v48  ;;  %v8851_v27 = vsel %vm19332_vm2, %v16804_v31, 0.0 }
 0xaef   :  { %v17213_v29 = vadd.f32 %v16478_v61, %v7920_v58  ;;  %v11513_v35 = vpop.f32.mrb[250].mxu1  ;;  %v8963_v58 = vsel %vm476_vm0, %v8851_v27, 0.0  ;;  %v8137_v27 = vsel %vm476_vm0, %v16830_v36, -inf }
 0xaf0   :  { %8054 = vst.msk [vmem:[%s18384_s3 + $0x1d8] sm:$0xff] %vm476_vm0, %v17206_v7  ;;  %v7923_v42 = vadd.f32 %v11513_v35, %v19334_v28  ;;  %v7843_v34 = vpop.f32.mrb[251].mxu1 }
 0xaf1   :  { %19333 = vst [vmem:[#allocation184_spill] sm:$0xff] %v17213_v29  ;;  %8053 = vst.msk [vmem:[%s18384_s3 + $0x1d0] sm:$0xff] %vm476_vm0, %v17213_v29  ;;  %v7922_v45 = vadd.f32 %v7843_v34, %v19335_v43  ;;  %v8233_v48 = vsel %vm476_vm0, %v17213_v29, -inf  ;;  %v19339_v29 = vld [vmem:[#allocation152_spill] sm:$0xff] }
 0xaf2   :  { %v17231_v40 = vadd.f32 %v16478_v61, %v7923_v42  ;;  %8964 = vadd.xlane.f32.xlu1 %v8963_v58  ;;  %8234 = vmax.xlane.f32.xlu0 %v8233_v48  ;;  %v19336_v42 = vld [vmem:[#allocation32_spill] sm:$0xff] }
 0xaf3   :  { %v17234_v35 = vadd.f32 %v16478_v61, %v7922_v45  ;;  %vm19337_vm3 = vcmp.eq.s32.totalorder %v19336_v42, %v19223_v41  ;;  %v19338_v45 = vld [vmem:[#allocation149_spill] sm:$0xff] }
 0xaf4   :  { %8056 = vst.msk [vmem:[%s18384_s3 + $0x1e8] sm:$0xff] %vm476_vm0, %v17231_v40  ;;  %v8854_v34 = vsel %vm19337_vm3, %v16823_v17, 0.0 }
 0xaf5   :  { %8055 = vst.msk [vmem:[%s18384_s3 + $0x1e0] sm:$0xff] %vm476_vm0, %v17234_v35  ;;  %v8239_v28 = vsel %vm476_vm0, %v17234_v35, -inf  ;;  %v8972_v31 = vsel %vm476_vm0, %v8854_v34, 0.0 }
 0xaf6   :  { %8138 = vmax.xlane.f32.xlu1 %v8137_v27  ;;  %8240 = vmax.xlane.f32.xlu0 %v8239_v28  ;;  %v19341_v27 = vld [vmem:[#allocation33_spill] sm:$0xff] }
 0xaf7   :  { %v11516_v43 = vpop.f32.mrb[252].mxu1  ;;  %vm19342_vm4 = vcmp.eq.s32.totalorder %v19341_v27, %v19223_v41 }
 0xaf8   :  { %v7925_v58 = vadd.f32 %v11516_v43, %v19338_v45  ;;  %v7853_v48 = vpop.f32.mrb[253].mxu1  ;;  %v8853_v28 = vsel %vm19342_vm4, %v16830_v36, 0.0  ;;  %v8143_v45 = vsel %vm476_vm0, %v16855_v49, -inf }
 0xaf9   :  { %v7924_v51 = vadd.f32 %v7853_v48, %v19339_v29  ;;  %v19345_v48 = vld [vmem:[#allocation34_spill] sm:$0xff] }
 0xafa   :  { %v17258_v25 = vadd.f32 %v16478_v61, %v7925_v58  ;;  %8973 = vadd.xlane.f32.xlu1 %v8972_v31  ;;  %v8969_v31 = vsel %vm476_vm0, %v8853_v28, 0.0  ;;  %vm19346_vm5 = vcmp.eq.s32.totalorder %v19345_v48, %v19223_v41 }
 0xafb   :  { %v17265_v42 = vadd.f32 %v16478_v61, %v7924_v51  ;;  %v8856_v27 = vsel %vm19346_vm5, %v16848_v1, 0.0 }
 0xafc   :  { %19340 = vst [vmem:[#allocation194_spill] sm:$0xff] %v17258_v25  ;;  %8058 = vst.msk [vmem:[%s18384_s3 + $0x1f8] sm:$0xff] %vm476_vm0, %v17258_v25 }
 0xafd   :  { %8057 = vst.msk [vmem:[%s18384_s3 + $0x1f0] sm:$0xff] %vm476_vm0, %v17265_v42  ;;  %v8245_v29 = vsel %vm476_vm0, %v17265_v42, -inf }
 0xafe   :  { %v17280_v34 = vpop.xlane.xlu0 %8063  ;;  %8970 = vadd.xlane.f32.xlu1 %v8969_v31  ;;  %8246 = vmax.xlane.f32.xlu0 %v8245_v29  ;;  %v8978_v31 = vsel %vm476_vm0, %v8856_v27, 0.0  ;;  %v19349_v29 = vld [vmem:[#allocation35_spill] sm:$0xff] }
 0xaff   :  { %19343 = vst [vmem:[#allocation185_spill] sm:$0xff] %v17280_v34  ;;  %v8252_v61 = vsub.f32 %v16483_v26, %v17280_v34  ;;  %v17284_v51 = vpop.xlane.xlu1 %8060  ;;  %vm19350_vm6 = vcmp.eq.s32.totalorder %v19349_v29, %v19223_v41 }
 0xb01   :  { %v8317_v43 = vmul.f32 1.442695, %v8252_v61  ;;  %v8855_v61 = vsel %vm19350_vm6, %v16855_v49, 0.0 }
 0xb02   :  { %v17288_v58 = vpop.xlane.xlu0 %8895  ;;  %8144 = vmax.xlane.f32.xlu1 %v8143_v45 }
 0xb03   :  { %19344 = vst [vmem:[#allocation189_spill] sm:$0xff] %v17288_v58  ;;  %11892 = vpow2.f32 %v8317_v43  ;;  %v17294_v28 = vpop.xlane.xlu1 %8892 }
 0xb04   :  { %19347 = vst [vmem:[#allocation122_spill] sm:$0xff] %v17294_v28  ;;  %v8975_v28 = vsel %vm476_vm0, %v8855_v61, 0.0 }
 0xb06   :  { %v17297_v26 = vpop.xlane.xlu0 %8069  ;;  %8979 = vadd.xlane.f32.xlu1 %v8978_v31 }
 0xb07   :  { %19348 = vst [vmem:[#allocation190_spill] sm:$0xff] %v17297_v26  ;;  %v8254_v45 = vsub.f32 %v16509_v22, %v17297_v26  ;;  %v17305_v58 = vpop.xlane.xlu1 %8066  ;;  %v8149_v22 = vsel %vm476_vm0, %v16876_v47, -inf }
 0xb08   :  { %v8253_v43 = vsub.f32 %v16516_v52, %v17305_v58 }
 0xb09   :  { %v8321_v48 = vmul.f32 1.442695, %v8254_v45 }
 0xb0a   :  { %v8319_v27 = vmul.f32 1.442695, %v8253_v43  ;;  %v17310_v34 = vpop.xlane.xlu0 %8901  ;;  %8976 = vadd.xlane.f32.xlu1 %v8975_v28 }
 0xb0b   :  { %11894 = vpow2.f32 %v8321_v48  ;;  %v17312_v31 = vpop.xlane.xlu1 %8898  ;;  %v8155_v48 = vsel %vm476_vm0, %v16902_v14, -inf }
 0xb0c   :  { %19351 = vst [vmem:[#allocation124_spill] sm:$0xff] %v17312_v31  ;;  %11896 = vpow2.f32 %v8319_v27 }
 0xb0d   :  { %v11893_v29 = vpop.eup %11892 }
 0xb0e   :  { %v17316_v26 = vpop.xlane.xlu0 %8075  ;;  %8150 = vmax.xlane.f32.xlu1 %v8149_v22  ;;  %v8446_v52 = vsel %vm476_vm0, %v11893_v29, 0.0 }
 0xb0f   :  { %19352 = vst [vmem:[#allocation196_spill] sm:$0xff] %v17316_v26  ;;  %v8256_v61 = vsub.f32 %v16533_v5, %v17316_v26  ;;  %8447 = vadd.xlane.f32.xlu0 %v8446_v52  ;;  %v17321_v45 = vpop.xlane.xlu1 %8072  ;;  %v8161_v5 = vsel %vm476_vm0, %v16927_v46, -inf }
 0xb10   :  { %v8255_v28 = vsub.f32 %v16536_v44, %v17321_v45 }
 0xb11   :  { %v8325_v43 = vmul.f32 1.442695, %v8256_v61 }
 0xb12   :  { %v8323_v27 = vmul.f32 1.442695, %v8255_v28  ;;  %v17327_v31 = vpop.xlane.xlu0 %8907  ;;  %8156 = vmax.xlane.f32.xlu1 %v8155_v48 }
 0xb13   :  { %19353 = vst [vmem:[#allocation113_spill] sm:$0xff] %v17327_v31  ;;  %11898 = vpow2.f32 %v8325_v43  ;;  %v17329_v22 = vpop.xlane.xlu1 %8904 }
 0xb14   :  { %19354 = vst [vmem:[#allocation128_spill] sm:$0xff] %v17329_v22  ;;  %11900 = vpow2.f32 %v8323_v27  ;;  %v8167_v27 = vsel %vm476_vm0, %v16948_v15, -inf }
 0xb15   :  { %v11895_v29 = vpop.eup %11894 }
 0xb16   :  { %v17333_v52 = vpop.xlane.xlu0 %8081  ;;  %8162 = vmax.xlane.f32.xlu1 %v8161_v5  ;;  %v8452_v44 = vsel %vm476_vm0, %v11895_v29, 0.0  ;;  %v11897_v61 = vpop.eup %11896 }
 0xb17   :  { %v8258_v28 = vsub.f32 %v16559_v53, %v17333_v52  ;;  %8453 = vadd.xlane.f32.xlu0 %v8452_v44  ;;  %v17338_v31 = vpop.xlane.xlu1 %8078  ;;  %v8449_v29 = vsel %vm476_vm0, %v11897_v61, 0.0  ;;  %v8173_v44 = vsel %vm476_vm0, %v16974_v18, -inf }
 0xb18   :  { %v8257_v43 = vsub.f32 %v16566_v19, %v17338_v31 }
 0xb19   :  { %v8329_v48 = vmul.f32 1.442695, %v8258_v28 }
 0xb1a   :  { %v8327_v22 = vmul.f32 1.442695, %v8257_v43  ;;  %v17344_v26 = vpop.xlane.xlu0 %8913  ;;  %8168 = vmax.xlane.f32.xlu1 %v8167_v27 }
 0xb1b   :  { %19355 = vst [vmem:[#allocation134_spill] sm:$0xff] %v17344_v26  ;;  %11902 = vpow2.f32 %v8329_v48  ;;  %8450 = vadd.xlane.f32.xlu0 %v8449_v29  ;;  %v17347_v5 = vpop.xlane.xlu1 %8910 }
 0xb1c   :  { %19356 = vst [vmem:[#allocation198_spill] sm:$0xff] %v17347_v5  ;;  %11904 = vpow2.f32 %v8327_v22  ;;  %v8179_v22 = vsel %vm476_vm0, %v16999_v23, -inf }
 0xb1d   :  { %v11899_v53 = vpop.eup %11898 }
 0xb1e   :  { %v17351_v19 = vpop.xlane.xlu0 %8087  ;;  %8174 = vmax.xlane.f32.xlu1 %v8173_v44  ;;  %v8458_v28 = vsel %vm476_vm0, %v11899_v53, 0.0  ;;  %v11901_v43 = vpop.eup %11900 }
 0xb1f   :  { %v8260_v27 = vsub.f32 %v16583_v50, %v17351_v19  ;;  %8459 = vadd.xlane.f32.xlu0 %v8458_v28  ;;  %v17356_v61 = vpop.xlane.xlu1 %8084  ;;  %v8455_v53 = vsel %vm476_vm0, %v11901_v43, 0.0  ;;  %v8185_v28 = vsel %vm476_vm0, %v17020_v0, -inf }
 0xb20   :  { %v8259_v48 = vsub.f32 %v16586_v39, %v17356_v61 }
 0xb21   :  { %v8333_v29 = vmul.f32 1.442695, %v8260_v27 }
 0xb22   :  { %v8331_v26 = vmul.f32 1.442695, %v8259_v48  ;;  %v17362_v5 = vpop.xlane.xlu0 %8919  ;;  %8180 = vmax.xlane.f32.xlu1 %v8179_v22 }
 0xb23   :  { %19357 = vst [vmem:[#allocation119_spill] sm:$0xff] %v17362_v5  ;;  %11906 = vpow2.f32 %v8333_v29  ;;  %8456 = vadd.xlane.f32.xlu0 %v8455_v53  ;;  %v17365_v44 = vpop.xlane.xlu1 %8916  ;;  %v8191_v53 = vsel %vm476_vm0, %v17046_v33, -inf }
 0xb24   :  { %19358 = vst [vmem:[#allocation195_spill] sm:$0xff] %v17365_v44  ;;  %11908 = vpow2.f32 %v8331_v26 }
 0xb25   :  { %v11903_v50 = vpop.eup %11902 }
 0xb26   :  { %v17369_v39 = vpop.xlane.xlu0 %8093  ;;  %8186 = vmax.xlane.f32.xlu1 %v8185_v28  ;;  %v8464_v27 = vsel %vm476_vm0, %v11903_v50, 0.0  ;;  %v11905_v48 = vpop.eup %11904 }
 0xb27   :  { %19359 = vst [vmem:[#allocation199_spill] sm:$0xff] %v17369_v39  ;;  %v8262_v22 = vsub.f32 %v16609_v54, %v17369_v39  ;;  %8465 = vadd.xlane.f32.xlu0 %v8464_v27  ;;  %v17374_v43 = vpop.xlane.xlu1 %8090  ;;  %v8461_v5 = vsel %vm476_vm0, %v11905_v48, 0.0  ;;  %v8200_v54 = vsel %vm476_vm0, %v17064_v37, -inf }
 0xb29   :  { %v8337_v29 = vmul.f32 1.442695, %v8262_v22 }
 0xb2a   :  { %v17378_v26 = vpop.xlane.xlu0 %8925  ;;  %8192 = vmax.xlane.f32.xlu1 %v8191_v53 }
 0xb2b   :  { %19360 = vst [vmem:[#allocation126_spill] sm:$0xff] %v17378_v26  ;;  %11910 = vpow2.f32 %v8337_v29  ;;  %8462 = vadd.xlane.f32.xlu0 %v8461_v5  ;;  %v17381_v28 = vpop.xlane.xlu1 %8922  ;;  %v8197_v5 = vsel %vm476_vm0, %v17071_v21, -inf }
 0xb2c   :  { %19361 = vst [vmem:[#allocation197_spill] sm:$0xff] %v17381_v28 }
 0xb2d   :  { %v11907_v50 = vpop.eup %11906 }
 0xb2e   :  { %v17385_v27 = vpop.xlane.xlu0 %8099  ;;  %8201 = vmax.xlane.f32.xlu1 %v8200_v54  ;;  %v8470_v22 = vsel %vm476_vm0, %v11907_v50, 0.0  ;;  %v11909_v39 = vpop.eup %11908 }
 0xb2f   :  { %19362 = vst [vmem:[#allocation203_spill] sm:$0xff] %v17385_v27  ;;  %v8264_v26 = vsub.f32 %v16633_v56, %v17385_v27  ;;  %8471 = vadd.xlane.f32.xlu0 %v8470_v22  ;;  %v17390_v53 = vpop.xlane.xlu1 %8096  ;;  %v8467_v28 = vsel %vm476_vm0, %v11909_v39, 0.0 }
 0xb31   :  { %v8341_v48 = vmul.f32 1.442695, %v8264_v26  ;;  %v8206_v26 = vsel %vm476_vm0, %v17089_v8, -inf }
 0xb32   :  { %v17394_v29 = vpop.xlane.xlu0 %8105  ;;  %8198 = vmax.xlane.f32.xlu1 %v8197_v5 }
 0xb33   :  { %19363 = vst [vmem:[#allocation132_spill] sm:$0xff] %v17394_v29  ;;  %11912 = vpow2.f32 %v8341_v48  ;;  %v8266_v50 = vsub.f32 %v16659_v13, %v17394_v29  ;;  %8468 = vadd.xlane.f32.xlu0 %v8467_v28  ;;  %v17399_v54 = vpop.xlane.xlu1 %8931  ;;  %v8203_v28 = vsel %vm476_vm0, %v17092_v63, -inf  ;;  %v8263_v29 = vsub.f32 %v16636_v32, %v17390_v53 }
 0xb34   :  { %19364 = vst [vmem:[#allocation201_spill] sm:$0xff] %v17399_v54 }
 0xb35   :  { %v11911_v56 = vpop.eup %11910  ;;  %v8345_v22 = vmul.f32 1.442695, %v8266_v50 }
 0xb36   :  { %v17403_v27 = vpop.xlane.xlu0 %8111  ;;  %8207 = vmax.xlane.f32.xlu1 %v8206_v26  ;;  %v8476_v44 = vsel %vm476_vm0, %v11911_v56, 0.0 }
 0xb37   :  { %19365 = vst [vmem:[#allocation204_spill] sm:$0xff] %v17403_v27  ;;  %11914 = vpow2.f32 %v8345_v22  ;;  %v8268_v39 = vsub.f32 %v16683_v24, %v17403_v27  ;;  %8477 = vadd.xlane.f32.xlu0 %v8476_v44  ;;  %v17408_v48 = vpop.xlane.xlu1 %8928  ;;  %v8212_v24 = vsel %vm476_vm0, %v17111_v2, -inf }
 0xb38   :  { %19366 = vst [vmem:[#allocation202_spill] sm:$0xff] %v17408_v48 }
 0xb39   :  { %v8349_v13 = vmul.f32 1.442695, %v8268_v39 }
 0xb3a   :  { %v17412_v5 = vpop.xlane.xlu0 %8117  ;;  %8204 = vmax.xlane.f32.xlu1 %v8203_v28 }
 0xb3b   :  { %19367 = vst [vmem:[#allocation207_spill] sm:$0xff] %v17412_v5  ;;  %11916 = vpow2.f32 %v8349_v13  ;;  %v8270_v50 = vsub.f32 %v16715_v55, %v17412_v5  ;;  %v17416_v26 = vpop.xlane.xlu1 %8102 }
 0xb3d   :  { %v11913_v56 = vpop.eup %11912  ;;  %v8353_v22 = vmul.f32 1.442695, %v8270_v50  ;;  %v8209_v50 = vsel %vm476_vm0, %v17118_v30, -inf }
 0xb3e   :  { %v17420_v44 = vpop.xlane.xlu0 %8123  ;;  %8213 = vmax.xlane.f32.xlu1 %v8212_v24  ;;  %v8482_v39 = vsel %vm476_vm0, %v11913_v56, 0.0 }
 0xb3f   :  { %19368 = vst [vmem:[#allocation206_spill] sm:$0xff] %v17420_v44  ;;  %11918 = vpow2.f32 %v8353_v22  ;;  %v8272_v28 = vsub.f32 %v16747_v11, %v17420_v44  ;;  %8483 = vadd.xlane.f32.xlu0 %v8482_v39  ;;  %v17425_v13 = vpop.xlane.xlu1 %8937  ;;  %v8218_v22 = vsel %vm476_vm0, %v17136_v9, -inf }
 0xb40   :  { %19369 = vst [vmem:[#allocation209_spill] sm:$0xff] %v17425_v13 }
 0xb41   :  { %v11915_v55 = vpop.eup %11914  ;;  %v8357_v5 = vmul.f32 1.442695, %v8272_v28 }
 0xb42   :  { %8210 = vmax.xlane.f32.xlu1 %v8209_v50  ;;  %v8488_v27 = vsel %vm476_vm0, %v11915_v55, 0.0  ;;  %v8215_v50 = vsel %vm476_vm0, %v17143_v60, -inf  ;;  %v8251_v55 = vsub.f32 %v16486_v62, %v17284_v51 }
 0xb43   :  { %11920 = vpow2.f32 %v8357_v5  ;;  %8489 = vadd.xlane.f32.xlu0 %v8488_v27  ;;  %v17430_v24 = vpop.xlane.xlu1 %8934 }
 0xb44   :  { %19370 = vst [vmem:[#allocation208_spill] sm:$0xff] %v17430_v24 }
 0xb45   :  { %v11917_v56 = vpop.eup %11916 }
 0xb46   :  { %8219 = vmax.xlane.f32.xlu1 %v8218_v22  ;;  %v8494_v11 = vsel %vm476_vm0, %v11917_v56, 0.0  ;;  %v17444_v22 = vpop.xlane.xlu0 %8129  ;;  %v8224_v56 = vsel %vm476_vm0, %v17159_v4, -inf }
 0xb47   :  { %8495 = vadd.xlane.f32.xlu0 %v8494_v11  ;;  %v17435_v39 = vpop.xlane.xlu1 %8108  ;;  %19372 = vst [vmem:[#allocation210_spill] sm:$0xff] %v17444_v22 }
 0xb49   :  { %v11919_v28 = vpop.eup %11918 }
 0xb4a   :  { %8216 = vmax.xlane.f32.xlu1 %v8215_v50  ;;  %v8500_v5 = vsel %vm476_vm0, %v11919_v28, 0.0  ;;  %v8315_v50 = vmul.f32 1.442695, %v8251_v55  ;;  %v8230_v28 = vsel %vm476_vm0, %v17181_v6, -inf  ;;  %v8242_v55 = vsel %vm476_vm0, %v17231_v40, -inf }
 0xb4b   :  { %8501 = vadd.xlane.f32.xlu0 %v8500_v5  ;;  %v17440_v27 = vpop.xlane.xlu1 %8943  ;;  %v17453_v5 = vpop.xlane.xlu0 %8135 }
 0xb4c   :  { %19371 = vst [vmem:[#allocation213_spill] sm:$0xff] %v17440_v27  ;;  %19374 = vst [vmem:[#allocation216_spill] sm:$0xff] %v17453_v5  ;;  %11922 = vpow2.f32 %v8315_v50  ;;  %v8236_v27 = vsel %vm476_vm0, %v17206_v7, -inf  ;;  %v8274_v50 = vsub.f32 %v16776_v38, %v17444_v22 }
 0xb4d   :  { %v11921_v44 = vpop.eup %11920 }
 0xb4e   :  { %8225 = vmax.xlane.f32.xlu1 %v8224_v56  ;;  %v8506_v11 = vsel %vm476_vm0, %v11921_v44, 0.0  ;;  %v8361_v13 = vmul.f32 1.442695, %v8274_v50 }
 0xb4f   :  { %8507 = vadd.xlane.f32.xlu0 %v8506_v11  ;;  %v17449_v24 = vpop.xlane.xlu1 %8940  ;;  %v17461_v44 = vpop.xlane.xlu0 %8141 }
 0xb50   :  { %19373 = vst [vmem:[#allocation212_spill] sm:$0xff] %v17449_v24  ;;  %19376 = vst [vmem:[#allocation215_spill] sm:$0xff] %v17461_v44 }
 0xb52   :  { %8231 = vmax.xlane.f32.xlu1 %v8230_v28  ;;  %v8248_v28 = vsel %vm476_vm0, %v17258_v25, -inf  ;;  %v19379_v25 = vld [vmem:[#allocation37_spill] sm:$0xff] }
 0xb53   :  { %v17455_v62 = vpop.xlane.xlu1 %8114  ;;  %v17471_v48 = vpop.xlane.xlu0 %8147  ;;  %vm19380_vm7 = vcmp.eq.s32.totalorder %v19379_v25, %v19223_v41  ;;  %v8265_v25 = vsub.f32 %v16666_v16, %v17416_v26  ;;  %v8267_v16 = vsub.f32 %v16686_v20, %v17435_v39 }
 0xb54   :  { %19378 = vst [vmem:[#allocation217_spill] sm:$0xff] %v17471_v48  ;;  %v8857_v38 = vsel %vm19380_vm7, %v16876_v47, 0.0 }
 0xb56   :  { %8237 = vmax.xlane.f32.xlu1 %v8236_v27  ;;  %v11923_v24 = vpop.eup %11922 }
 0xb57   :  { %v17459_v56 = vpop.xlane.xlu1 %8949 }
 0xb58   :  { %19375 = vst [vmem:[#allocation214_spill] sm:$0xff] %v17459_v56  ;;  %v8261_v56 = vsub.f32 %v16616_v3, %v17374_v43  ;;  %v17488_v3 = vpop.xlane.xlu0 %8153 }
 0xb59   :  { %19382 = vst [vmem:[#allocation200_spill] sm:$0xff] %v17488_v3 }
 0xb5a   :  { %8243 = vmax.xlane.f32.xlu1 %v8242_v55  ;;  %v8335_v22 = vmul.f32 1.442695, %v8261_v56  ;;  %v8339_v56 = vmul.f32 1.442695, %v8263_v29 }
 0xb5b   :  { %v17465_v11 = vpop.xlane.xlu1 %8946 }
 0xb5c   :  { %19377 = vst [vmem:[#allocation218_spill] sm:$0xff] %v17465_v11  ;;  %v8443_v11 = vsel %vm476_vm0, %v11923_v24, 0.0  ;;  %v19383_v24 = vld [vmem:[#allocation36_spill] sm:$0xff] }
 0xb5d   :  { %vm19384_vm8 = vcmp.eq.s32.totalorder %v19383_v24, %v19223_v41 }
 0xb5e   :  { %8249 = vmax.xlane.f32.xlu1 %v8248_v28 }
 0xb5f   :  { %v17473_v27 = vpop.xlane.xlu1 %8120 }
 0xb60   :  { %v8271_v55 = vsub.f32 %v16750_v57, %v17473_v27  ;;  %v8981_v57 = vsel %vm476_vm0, %v8857_v38, 0.0  ;;  %v8343_v38 = vmul.f32 1.442695, %v8265_v25 }
 0xb62   :  { %v8355_v54 = vmul.f32 1.442695, %v8271_v55  ;;  %8444 = vadd.xlane.f32.xlu1 %v8443_v11  ;;  %v8858_v11 = vsel %vm19384_vm8, %v16873_v12, 0.0 }
 0xb63   :  { %v17484_v28 = vpop.xlane.xlu1 %8955  ;;  %v8984_v32 = vsel %vm476_vm0, %v8858_v11, 0.0 }
 0xb64   :  { %19381 = vst [vmem:[#allocation219_spill] sm:$0xff] %v17484_v28  ;;  %11924 = vpow2.f32 %v8355_v54  ;;  %v8276_v54 = vsub.f32 %v16801_v59, %v17453_v5  ;;  %v19391_v5 = vld [vmem:[#allocation38_spill] sm:$0xff] }
 0xb65   :  { %11926 = vpow2.f32 %v8361_v13  ;;  %v19386_v13 = vld [vmem:[#allocation39_spill] sm:$0xff]  ;;  %vm19392_vm11 = vcmp.eq.s32.totalorder %v19391_v5, %v19223_v41 }
 0xb66   :  { %8982 = vadd.xlane.f32.xlu1 %v8981_v57  ;;  %11928 = vpow2.f32 %v8335_v22  ;;  %vm19387_vm10 = vcmp.eq.s32.totalorder %v19386_v13, %v19223_v41  ;;  %v17506_v57 = vpop.xlane.xlu0 %8159  ;;  %v8365_v11 = vmul.f32 1.442695, %v8276_v54  ;;  %v19390_v13 = vld [vmem:[#allocation110_spill] sm:$0xff] }
 0xb67   :  { %v17497_v50 = vpop.xlane.xlu1 %8952  ;;  %v8859_v55 = vsel %vm19387_vm10, %v16902_v14, 0.0  ;;  %19388 = vst [vmem:[#allocation205_spill] sm:$0xff] %v17506_v57  ;;  %11930 = vpow2.f32 %v8339_v56  ;;  %v8860_v25 = vsel %vm19392_vm11, %v19390_v13, 0.0 }
 0xb68   :  { %19385 = vst [vmem:[#allocation138_spill] sm:$0xff] %v17497_v50  ;;  %v8987_v59 = vsel %vm476_vm0, %v8859_v55, 0.0  ;;  %11932 = vpow2.f32 %v8343_v38  ;;  %v8347_v50 = vmul.f32 1.442695, %v8267_v16  ;;  %v8990_v55 = vsel %vm476_vm0, %v8860_v25, 0.0 }
 0xb6a   :  { %8985 = vadd.xlane.f32.xlu1 %v8984_v32  ;;  %v17524_v54 = vpop.xlane.xlu0 %8165 }
 0xb6b   :  { %v17508_v24 = vpop.xlane.xlu1 %8126  ;;  %19395 = vst [vmem:[#allocation139_spill] sm:$0xff] %v17524_v54 }
 0xb6c   :  { %19389 = vst [vmem:[#allocation141_spill] sm:$0xff] %v17508_v24  ;;  %v8273_v29 = vsub.f32 %v16783_v10, %v17508_v24  ;;  %v19394_v10 = vld [vmem:[#allocation176_spill] sm:$0xff] }
 0xb6d   :  { %v8269_v24 = vsub.f32 %v19394_v10, %v17455_v62 }
 0xb6e   :  { %v11925_v22 = vpop.eup %11924  ;;  %v8359_v32 = vmul.f32 1.442695, %v8273_v29  ;;  %8988 = vadd.xlane.f32.xlu1 %v8987_v59 }
 0xb6f   :  { %v17519_v28 = vpop.xlane.xlu1 %8961  ;;  %v8503_v56 = vsel %vm476_vm0, %v11925_v22, 0.0  ;;  %v11927_v20 = vpop.eup %11926  ;;  %v8351_v59 = vmul.f32 1.442695, %v8269_v24 }
 0xb70   :  { %19393 = vst [vmem:[#allocation211_spill] sm:$0xff] %v17519_v28  ;;  %11934 = vpow2.f32 %v8359_v32  ;;  %8504 = vadd.xlane.f32.xlu0 %v8503_v56  ;;  %v11929_v29 = vpop.eup %11928  ;;  %v8512_v38 = vsel %vm476_vm0, %v11927_v20, 0.0  ;;  %v8278_v32 = vsub.f32 %v16823_v17, %v17461_v44  ;;  %v17533_v56 = vpop.xlane.xlu0 %8171 }
 0xb71   :  { %11936 = vpow2.f32 %v8365_v11  ;;  %v8473_v16 = vsel %vm476_vm0, %v11929_v29, 0.0  ;;  %v11931_v22 = vpop.eup %11930  ;;  %19396 = vst [vmem:[#allocation145_spill] sm:$0xff] %v17533_v56  ;;  %v19398_v11 = vld [vmem:[#allocation177_spill] sm:$0xff] }
 0xb72   :  { %8991 = vadd.xlane.f32.xlu1 %v8990_v55  ;;  %11938 = vpow2.f32 %v8347_v50  ;;  %v11933_v55 = vpop.eup %11932  ;;  %v8479_v50 = vsel %vm476_vm0, %v11931_v22, 0.0  ;;  %v8369_v20 = vmul.f32 1.442695, %v8278_v32 }
 0xb73   :  { %v17527_v5 = vpop.xlane.xlu1 %8958  ;;  %11940 = vpow2.f32 %v8351_v59  ;;  %v8485_v59 = vsel %vm476_vm0, %v11933_v55, 0.0 }
 0xb74   :  { %8513 = vadd.xlane.f32.xlu0 %v8512_v38  ;;  %v17543_v44 = vpop.xlane.xlu0 %8177 }
 0xb75   :  { %19400 = vst [vmem:[#allocation148_spill] sm:$0xff] %v17543_v44 }
 0xb76   :  { %8474 = vadd.xlane.f32.xlu1 %v8473_v16 }
 0xb77   :  { %v17535_v25 = vpop.xlane.xlu1 %8132 }
 0xb78   :  { %19397 = vst [vmem:[#allocation143_spill] sm:$0xff] %v17535_v25  ;;  %v8275_v10 = vsub.f32 %v19398_v11, %v17535_v25 }
 0xb7a   :  { %v11935_v24 = vpop.eup %11934  ;;  %v8363_v38 = vmul.f32 1.442695, %v8275_v10  ;;  %8480 = vadd.xlane.f32.xlu1 %v8479_v50  ;;  %v8280_v50 = vsub.f32 %v16848_v1, %v17471_v48 }
 0xb7b   :  { %v17540_v29 = vpop.xlane.xlu1 %8967  ;;  %v8509_v17 = vsel %vm476_vm0, %v11935_v24, 0.0  ;;  %v11937_v16 = vpop.eup %11936 }
 0xb7c   :  { %19399 = vst [vmem:[#allocation147_spill] sm:$0xff] %v17540_v29  ;;  %11942 = vpow2.f32 %v8363_v38  ;;  %8510 = vadd.xlane.f32.xlu0 %v8509_v17  ;;  %v11939_v28 = vpop.eup %11938  ;;  %v8518_v22 = vsel %vm476_vm0, %v11937_v16, 0.0  ;;  %v17552_v24 = vpop.xlane.xlu0 %8183 }
 0xb7d   :  { %11944 = vpow2.f32 %v8369_v20  ;;  %v8491_v32 = vsel %vm476_vm0, %v11939_v28, 0.0  ;;  %v11941_v10 = vpop.eup %11940  ;;  %19402 = vst [vmem:[#allocation150_spill] sm:$0xff] %v17552_v24  ;;  %v19404_v28 = vld [vmem:[#allocation41_spill] sm:$0xff] }
 0xb7e   :  { %8486 = vadd.xlane.f32.xlu1 %v8485_v59  ;;  %v8497_v20 = vsel %vm476_vm0, %v11941_v10, 0.0  ;;  %v8373_v59 = vmul.f32 1.442695, %v8280_v50  ;;  %vm19405_vm15 = vcmp.eq.s32.totalorder %v19404_v28, %v19223_v41  ;;  %v19408_v10 = vld [vmem:[#allocation192_spill] sm:$0xff] }
 0xb7f   :  { %v17546_v11 = vpop.xlane.xlu1 %8964  ;;  %v19409_v50 = vld [vmem:[#allocation40_spill] sm:$0xff] }
 0xb80   :  { %19401 = vst [vmem:[#allocation151_spill] sm:$0xff] %v17546_v11  ;;  %8519 = vadd.xlane.f32.xlu0 %v8518_v22  ;;  %v8861_v22 = vsel %vm19405_vm15, %v16927_v46, 0.0  ;;  %v17566_v29 = vpop.xlane.xlu0 %8189  ;;  %vm19410_vm12 = vcmp.eq.s32.totalorder %v19409_v50, %v19223_v41 }
 0xb81   :  { %19407 = vst [vmem:[#allocation157_spill] sm:$0xff] %v17566_v29 }
 0xb82   :  { %8492 = vadd.xlane.f32.xlu1 %v8491_v32 }
 0xb83   :  { %v17554_v38 = vpop.xlane.xlu1 %8138 }
 0xb84   :  { %19403 = vst [vmem:[#allocation153_spill] sm:$0xff] %v17554_v38  ;;  %v8277_v55 = vsub.f32 %v16830_v36, %v17554_v38  ;;  %v8993_v36 = vsel %vm476_vm0, %v8861_v22, 0.0  ;;  %v19412_v22 = vld [vmem:[#allocation43_spill] sm:$0xff] }
 0xb85   :  { %vm19413_vm13 = vcmp.eq.s32.totalorder %v19412_v22, %v19223_v41 }
 0xb86   :  { %v11943_v17 = vpop.eup %11942  ;;  %v8367_v16 = vmul.f32 1.442695, %v8277_v55  ;;  %8498 = vadd.xlane.f32.xlu1 %v8497_v20  ;;  %v8862_v55 = vsel %vm19410_vm12, %v19408_v10, 0.0 }
 0xb87   :  { %v17563_v1 = vpop.xlane.xlu1 %8973  ;;  %v8515_v32 = vsel %vm476_vm0, %v11943_v17, 0.0  ;;  %v11945_v48 = vpop.eup %11944  ;;  %v8996_v17 = vsel %vm476_vm0, %v8862_v55, 0.0 }
 0xb88   :  { %19406 = vst [vmem:[#allocation154_spill] sm:$0xff] %v17563_v1  ;;  %11946 = vpow2.f32 %v8367_v16  ;;  %8516 = vadd.xlane.f32.xlu0 %v8515_v32  ;;  %v8524_v28 = vsel %vm476_vm0, %v11945_v48, 0.0  ;;  %v8282_v16 = vsub.f32 %v16873_v12, %v17488_v3  ;;  %v17583_v32 = vpop.xlane.xlu0 %8195  ;;  %v19416_v12 = vld [vmem:[#allocation178_spill] sm:$0xff] }
 0xb89   :  { %11948 = vpow2.f32 %v8373_v59  ;;  %v8863_v59 = vsel %vm19413_vm13, %v16948_v15, 0.0  ;;  %19414 = vst [vmem:[#allocation158_spill] sm:$0xff] %v17583_v32 }
 0xb8a   :  { %8994 = vadd.xlane.f32.xlu1 %v8993_v36  ;;  %v8999_v48 = vsel %vm476_vm0, %v8863_v59, 0.0  ;;  %v8377_v55 = vmul.f32 1.442695, %v8282_v16  ;;  %v19421_v16 = vld [vmem:[#allocation45_spill] sm:$0xff] }
 0xb8b   :  { %v17573_v20 = vpop.xlane.xlu1 %8970  ;;  %vm19422_vm14 = vcmp.eq.s32.totalorder %v19421_v16, %v19223_v41 }
 0xb8c   :  { %19411 = vst [vmem:[#allocation155_spill] sm:$0xff] %v17573_v20  ;;  %8525 = vadd.xlane.f32.xlu0 %v8524_v28  ;;  %v17594_v22 = vpop.xlane.xlu0 %8222  ;;  %v8865_v59 = vsel %vm19422_vm14, %v16974_v18, 0.0 }
 0xb8d   :  { %19419 = vst [vmem:[#allocation160_spill] sm:$0xff] %v17594_v22 }
 0xb8e   :  { %8997 = vadd.xlane.f32.xlu1 %v8996_v17  ;;  %v19417_v17 = vld [vmem:[#allocation42_spill] sm:$0xff] }
 0xb8f   :  { %v17585_v36 = vpop.xlane.xlu1 %8144  ;;  %vm19418_vm9 = vcmp.eq.s32.totalorder %v19417_v17, %v19223_v41 }
 0xb90   :  { %19415 = vst [vmem:[#allocation156_spill] sm:$0xff] %v17585_v36  ;;  %v8279_v50 = vsub.f32 %v16855_v49, %v17585_v36  ;;  %v8864_v3 = vsel %vm19418_vm9, %v19416_v12, 0.0  ;;  %v17607_v17 = vpop.xlane.xlu0 %8228 }
 0xb91   :  { %v9002_v49 = vsel %vm476_vm0, %v8864_v3, 0.0  ;;  %19424 = vst [vmem:[#allocation162_spill] sm:$0xff] %v17607_v17  ;;  %v19425_v3 = vld [vmem:[#allocation179_spill] sm:$0xff] }
 0xb92   :  { %v11947_v28 = vpop.eup %11946  ;;  %v8371_v20 = vmul.f32 1.442695, %v8279_v50  ;;  %9000 = vadd.xlane.f32.xlu1 %v8999_v48 }
 0xb93   :  { %v17596_v1 = vpop.xlane.xlu1 %8979  ;;  %v8521_v38 = vsel %vm476_vm0, %v11947_v28, 0.0  ;;  %v11949_v11 = vpop.eup %11948  ;;  %v9005_v28 = vsel %vm476_vm0, %v8865_v59, 0.0  ;;  %v19429_v59 = vld [vmem:[#allocation47_spill] sm:$0xff] }
 0xb94   :  { %19420 = vst [vmem:[#allocation159_spill] sm:$0xff] %v17596_v1  ;;  %11950 = vpow2.f32 %v8371_v20  ;;  %8522 = vadd.xlane.f32.xlu0 %v8521_v38  ;;  %v8530_v48 = vsel %vm476_vm0, %v11949_v11, 0.0  ;;  %v8284_v38 = vsub.f32 %v19390_v13, %v17506_v57  ;;  %v19426_v20 = vld [vmem:[#allocation44_spill] sm:$0xff]  ;;  %vm19430_vm2 = vcmp.eq.s32.totalorder %v19429_v59, %v19223_v41  ;;  %v19434_v59 = vld [vmem:[#allocation46_spill] sm:$0xff] }
 0xb95   :  { %11952 = vpow2.f32 %v8377_v55  ;;  %vm19427_vm1 = vcmp.eq.s32.totalorder %v19426_v20, %v19223_v41  ;;  %v8867_v13 = vsel %vm19430_vm2, %v16999_v23, 0.0  ;;  %vm19435_vm3 = vcmp.eq.s32.totalorder %v19434_v59, %v19223_v41 }
 0xb96   :  { %9003 = vadd.xlane.f32.xlu1 %v9002_v49  ;;  %v8866_v55 = vsel %vm19427_vm1, %v19425_v3, 0.0 }
 0xb97   :  { %v17604_v50 = vpop.xlane.xlu1 %8976  ;;  %v9008_v11 = vsel %vm476_vm0, %v8866_v55, 0.0  ;;  %v8286_v55 = vsub.f32 %v19408_v10, %v17524_v54 }
 0xb98   :  { %19423 = vst [vmem:[#allocation161_spill] sm:$0xff] %v17604_v50  ;;  %8531 = vadd.xlane.f32.xlu0 %v8530_v48  ;;  %v8381_v50 = vmul.f32 1.442695, %v8284_v38  ;;  %v9011_v38 = vsel %vm476_vm0, %v8867_v13, 0.0  ;;  %v19437_v13 = vld [vmem:[#allocation49_spill] sm:$0xff] }
 0xb99   :  { %vm19438_vm4 = vcmp.eq.s32.totalorder %v19437_v13, %v19223_v41 }
 0xb9a   :  { %9006 = vadd.xlane.f32.xlu1 %v9005_v28  ;;  %v17625_v28 = vpop.xlane.xlu0 %8234 }
 0xb9b   :  { %v17616_v49 = vpop.xlane.xlu1 %8150  ;;  %19431 = vst [vmem:[#allocation164_spill] sm:$0xff] %v17625_v28 }
 0xb9c   :  { %19428 = vst [vmem:[#allocation163_spill] sm:$0xff] %v17616_v49  ;;  %v8281_v16 = vsub.f32 %v16876_v47, %v17616_v49 }
 0xb9e   :  { %v11951_v48 = vpop.eup %11950  ;;  %v8375_v36 = vmul.f32 1.442695, %v8281_v16  ;;  %9009 = vadd.xlane.f32.xlu1 %v9008_v11  ;;  %v19433_v11 = vld [vmem:[#allocation193_spill] sm:$0xff] }
 0xb9f   :  { %v17627_v20 = vpop.xlane.xlu1 %8156  ;;  %v8527_v57 = vsel %vm476_vm0, %v11951_v48, 0.0  ;;  %v11953_v1 = vpop.eup %11952  ;;  %v8868_v49 = vsel %vm19435_vm3, %v19433_v11, 0.0 }
 0xba0   :  { %19432 = vst [vmem:[#allocation166_spill] sm:$0xff] %v17627_v20  ;;  %11954 = vpow2.f32 %v8375_v36  ;;  %v8283_v47 = vsub.f32 %v16902_v14, %v17627_v20  ;;  %8528 = vadd.xlane.f32.xlu0 %v8527_v57  ;;  %v8536_v36 = vsel %vm476_vm0, %v11953_v1, 0.0  ;;  %v17642_v14 = vpop.xlane.xlu0 %8240  ;;  %v9014_v57 = vsel %vm476_vm0, %v8868_v49, 0.0 }
 0xba1   :  { %11956 = vpow2.f32 %v8381_v50  ;;  %v8385_v50 = vmul.f32 1.442695, %v8286_v55  ;;  %v8288_v49 = vsub.f32 %v19416_v12, %v17533_v56 }
 0xba2   :  { %v8379_v16 = vmul.f32 1.442695, %v8283_v47  ;;  %9012 = vadd.xlane.f32.xlu1 %v9011_v38  ;;  %v8869_v47 = vsel %vm19438_vm4, %v17020_v0, 0.0 }
 0xba3   :  { %v17639_v48 = vpop.xlane.xlu1 %8162  ;;  %v9017_v1 = vsel %vm476_vm0, %v8869_v47, 0.0  ;;  %v8389_v47 = vmul.f32 1.442695, %v8288_v49 }
 0xba4   :  { %19436 = vst [vmem:[#allocation165_spill] sm:$0xff] %v17639_v48  ;;  %8537 = vadd.xlane.f32.xlu0 %v8536_v36  ;;  %11958 = vpow2.f32 %v8379_v16  ;;  %v8285_v10 = vsub.f32 %v16927_v46, %v17639_v48  ;;  %v17653_v59 = vpop.xlane.xlu0 %8246  ;;  %v19440_v46 = vld [vmem:[#allocation180_spill] sm:$0xff] }
 0xba5   :  { %11960 = vpow2.f32 %v8385_v50  ;;  %v19441_v16 = vld [vmem:[#allocation48_spill] sm:$0xff] }
 0xba6   :  { %9015 = vadd.xlane.f32.xlu1 %v9014_v57  ;;  %v8383_v55 = vmul.f32 1.442695, %v8285_v10  ;;  %vm19442_vm5 = vcmp.eq.s32.totalorder %v19441_v16, %v19223_v41  ;;  %v19443_v10 = vld [vmem:[#allocation51_spill] sm:$0xff] }
 0xba7   :  { %v17651_v38 = vpop.xlane.xlu1 %8168  ;;  %v8870_v57 = vsel %vm19442_vm5, %v19440_v46, 0.0  ;;  %vm19444_vm6 = vcmp.eq.s32.totalorder %v19443_v10, %v19223_v41 }
 0xba8   :  { %19439 = vst [vmem:[#allocation183_spill] sm:$0xff] %v17651_v38  ;;  %v17665_v20 = vpop.xlane.xlu0 %8447  ;;  %v9020_v50 = vsel %vm476_vm0, %v8870_v57, 0.0  ;;  %11962 = vpow2.f32 %v8383_v55  ;;  %v8287_v12 = vsub.f32 %v16948_v15, %v17651_v38  ;;  %v8290_v15 = vsub.f32 %v19425_v3, %v17543_v44  ;;  %v19445_v57 = vld [vmem:[#allocation181_spill] sm:$0xff] }
 0xba9   :  { %11964 = vpow2.f32 %v8389_v47  ;;  %v19449_v47 = vld [vmem:[#allocation53_spill] sm:$0xff] }
 0xbaa   :  { %v11955_v36 = vpop.eup %11954  ;;  %9018 = vadd.xlane.f32.xlu1 %v9017_v1  ;;  %v8871_v1 = vsel %vm19444_vm6, %v17046_v33, 0.0  ;;  %v8387_v55 = vmul.f32 1.442695, %v8287_v12  ;;  %vm19450_vm8 = vcmp.eq.s32.totalorder %v19449_v47, %v19223_v41 }
 0xbab   :  { %v17662_v13 = vpop.xlane.xlu1 %8174  ;;  %v8533_v54 = vsel %vm476_vm0, %v11955_v36, 0.0  ;;  %v11957_v48 = vpop.eup %11956  ;;  %v9023_v49 = vsel %vm476_vm0, %v8871_v1, 0.0  ;;  %v8393_v1 = vmul.f32 1.442695, %v8290_v15  ;;  %v8873_v12 = vsel %vm19450_vm8, %v17071_v21, 0.0 }
 0xbac   :  { %8534 = vadd.xlane.f32.xlu0 %v8533_v54  ;;  %v8542_v36 = vsel %vm476_vm0, %v11957_v48, 0.0  ;;  %v17677_v56 = vpop.xlane.xlu0 %8453  ;;  %11966 = vpow2.f32 %v8387_v55  ;;  %v8289_v3 = vsub.f32 %v16974_v18, %v17662_v13  ;;  %v9029_v15 = vsel %vm476_vm0, %v8873_v12, 0.0  ;;  %v19452_v55 = vld [vmem:[#allocation52_spill] sm:$0xff] }
 0xbad   :  { %11968 = vpow2.f32 %v8393_v1  ;;  %v8292_v18 = vsub.f32 %v19433_v11, %v17552_v24  ;;  %vm19453_vm10 = vcmp.eq.s32.totalorder %v19452_v55, %v19223_v41 }
 0xbae   :  { %9021 = vadd.xlane.f32.xlu1 %v9020_v50  ;;  %v11959_v54 = vpop.eup %11958  ;;  %v19446_v50 = vld [vmem:[#allocation50_spill] sm:$0xff] }
 0xbaf   :  { %v17674_v16 = vpop.xlane.xlu1 %8180  ;;  %vm19447_vm7 = vcmp.eq.s32.totalorder %v19446_v50, %v19223_v41  ;;  %v8539_v48 = vsel %vm476_vm0, %v11959_v54, 0.0  ;;  %v8397_v12 = vmul.f32 1.442695, %v8292_v18  ;;  %v8294_v18 = vsub.f32 %v19440_v46, %v17566_v29  ;;  %v19461_v46 = vld [vmem:[#allocation57_spill] sm:$0xff] }
 0xbb0   :  { %8543 = vadd.xlane.f32.xlu0 %v8542_v36  ;;  %v8872_v10 = vsel %vm19447_vm7, %v19445_v57, 0.0  ;;  %v11961_v36 = vpop.eup %11960  ;;  %v8291_v11 = vsub.f32 %v16999_v23, %v17674_v16  ;;  %v19458_v23 = vld [vmem:[#allocation54_spill] sm:$0xff]  ;;  %vm19462_vm12 = vcmp.eq.s32.totalorder %v19461_v46, %v19223_v41  ;;  %vm9275_vm7 = vcmask 7168  }
 0xbb1   :  { %v9026_v25 = vsel %vm476_vm0, %v8872_v10, 0.0  ;;  %v8548_v54 = vsel %vm476_vm0, %v11961_v36, 0.0  ;;  %v8874_v10 = vsel %vm19453_vm10, %v17064_v37, 0.0  ;;  %vm19459_vm15 = vcmp.eq.s32.totalorder %v19458_v23, %v19223_v41 }
 0xbb2   :  { %9024 = vadd.xlane.f32.xlu1 %v9023_v49  ;;  %v17696_v49 = vpop.xlane.xlu0 %8450  ;;  %v9032_v1 = vsel %vm476_vm0, %v8874_v10, 0.0  ;;  %v8876_v10 = vsel %vm19459_vm15, %v17089_v8, 0.0 }
 0xbb3   :  { %v17686_v38 = vpop.xlane.xlu1 %8186 }
 0xbb4   :  { %19448 = vst [vmem:[#allocation167_spill] sm:$0xff] %v17686_v38  ;;  %8540 = vadd.xlane.f32.xlu0 %v8539_v48  ;;  %v11963_v48 = vpop.eup %11962 }
 0xbb5   :  { %v8545_v44 = vsel %vm476_vm0, %v11963_v48, 0.0  ;;  %v11965_v36 = vpop.eup %11964 }
 0xbb6   :  { %9027 = vadd.xlane.f32.xlu1 %v9026_v25  ;;  %v8391_v25 = vmul.f32 1.442695, %v8289_v3  ;;  %v19455_v3 = vld [vmem:[#allocation55_spill] sm:$0xff]  ;;  %v8554_v48 = vsel %vm476_vm0, %v11965_v36, 0.0 }
 0xbb7   :  { %v17698_v50 = vpop.xlane.xlu1 %8192  ;;  %vm19456_vm11 = vcmp.eq.s32.totalorder %v19455_v3, %v19223_v41 }
 0xbb8   :  { %19451 = vst [vmem:[#allocation169_spill] sm:$0xff] %v17698_v50  ;;  %8549 = vadd.xlane.f32.xlu0 %v8548_v54  ;;  %v17711_v54 = vpop.xlane.xlu0 %8459  ;;  %11970 = vpow2.f32 %v8391_v25  ;;  %v8395_v25 = vmul.f32 1.442695, %v8291_v11  ;;  %v8877_v11 = vsel %vm19462_vm12, %v17118_v30, 0.0 }
 0xbb9   :  { %11972 = vpow2.f32 %v8397_v12  ;;  %v9038_v12 = vsel %vm476_vm0, %v8876_v10, 0.0  ;;  %v19464_v10 = vld [vmem:[#allocation56_spill] sm:$0xff] }
 0xbba   :  { %9030 = vadd.xlane.f32.xlu1 %v9029_v15  ;;  %v8875_v15 = vsel %vm19456_vm11, %v17092_v63, 0.0  ;;  %11974 = vpow2.f32 %v8395_v25  ;;  %vm19465_vm13 = vcmp.eq.s32.totalorder %v19464_v10, %v19223_v41 }
 0xbbb   :  { %v17708_v47 = vpop.xlane.xlu1 %8201  ;;  %v9035_v24 = vsel %vm476_vm0, %v8875_v15, 0.0  ;;  %v8401_v15 = vmul.f32 1.442695, %v8294_v18  ;;  %v9041_v18 = vsel %vm476_vm0, %v8877_v11, 0.0 }
 0xbbc   :  { %19454 = vst [vmem:[#allocation168_spill] sm:$0xff] %v17708_v47  ;;  %8546 = vadd.xlane.f32.xlu0 %v8545_v44  ;;  %v11967_v44 = vpop.eup %11966 }
 0xbbd   :  { %v8551_v36 = vsel %vm476_vm0, %v11967_v44, 0.0  ;;  %11976 = vpow2.f32 %v8401_v15  ;;  %v19466_v15 = vld [vmem:[#allocation59_spill] sm:$0xff] }
 0xbbe   :  { %9033 = vadd.xlane.f32.xlu1 %v9032_v1  ;;  %v17730_v1 = vpop.xlane.xlu0 %8456  ;;  %vm19467_vm9 = vcmp.eq.s32.totalorder %v19466_v15, %v19223_v41 }
 0xbbf   :  { %v17720_v55 = vpop.xlane.xlu1 %8198 }
 0xbc0   :  { %19457 = vst [vmem:[#allocation171_spill] sm:$0xff] %v17720_v55  ;;  %8555 = vadd.xlane.f32.xlu0 %v8554_v48  ;;  %v11969_v48 = vpop.eup %11968 }
 0xbc1   :  { %v8560_v29 = vsel %vm476_vm0, %v11969_v48, 0.0 }
 0xbc2   :  { %9036 = vadd.xlane.f32.xlu1 %v9035_v24  ;;  %v8293_v24 = vsub.f32 %v17020_v0, %v17686_v38  ;;  %v11971_v44 = vpop.eup %11970  ;;  %v8296_v0 = vsub.f32 %v19445_v57, %v17583_v32  ;;  %v8295_v57 = vsub.f32 %v17046_v33, %v17698_v50  ;;  %v8298_v33 = vsub.f32 %v17064_v37, %v17708_v47 }
 0xbc3   :  { %v17732_v3 = vpop.xlane.xlu1 %8207  ;;  %v8557_v48 = vsel %vm476_vm0, %v11971_v44, 0.0  ;;  %v8297_v37 = vsub.f32 %v17071_v21, %v17720_v55  ;;  %v19474_v21 = vld [vmem:[#allocation60_spill] sm:$0xff] }
 0xbc4   :  { %19460 = vst [vmem:[#allocation170_spill] sm:$0xff] %v17732_v3  ;;  %8552 = vadd.xlane.f32.xlu0 %v8551_v36  ;;  %v17745_v36 = vpop.xlane.xlu0 %8465  ;;  %v8399_v25 = vmul.f32 1.442695, %v8293_v24  ;;  %v8405_v11 = vmul.f32 1.442695, %v8296_v0  ;;  %v8879_v24 = vsel %vm19467_vm9, %v17143_v60, 0.0  ;;  %vm19475_vm2 = vcmp.eq.s32.totalorder %v19474_v21, %v19223_v41 }
 0xbc5   :  { %v9047_v0 = vsel %vm476_vm0, %v8879_v24, 0.0  ;;  %v19471_v24 = vld [vmem:[#allocation116_spill] sm:$0xff] }
 0xbc6   :  { %9039 = vadd.xlane.f32.xlu1 %v9038_v12  ;;  %v8878_v12 = vsel %vm19465_vm13, %v17111_v2, 0.0  ;;  %11978 = vpow2.f32 %v8399_v25  ;;  %v8403_v25 = vmul.f32 1.442695, %v8295_v57  ;;  %v8409_v57 = vmul.f32 1.442695, %v8298_v33 }
 0xbc7   :  { %v17742_v23 = vpop.xlane.xlu1 %8204  ;;  %v9044_v38 = vsel %vm476_vm0, %v8878_v12, 0.0  ;;  %11980 = vpow2.f32 %v8405_v11  ;;  %v8300_v33 = vsub.f32 %v17089_v8, %v17732_v3 }
 0xbc8   :  { %19463 = vst [vmem:[#allocation187_spill] sm:$0xff] %v17742_v23  ;;  %8561 = vadd.xlane.f32.xlu0 %v8560_v29  ;;  %v11973_v29 = vpop.eup %11972  ;;  %11982 = vpow2.f32 %v8403_v25  ;;  %v8407_v25 = vmul.f32 1.442695, %v8297_v37  ;;  %v8299_v8 = vsub.f32 %v17092_v63, %v17742_v23 }
 0xbc9   :  { %v8566_v44 = vsel %vm476_vm0, %v11973_v29, 0.0  ;;  %11984 = vpow2.f32 %v8409_v57  ;;  %v8413_v37 = vmul.f32 1.442695, %v8300_v33 }
 0xbca   :  { %9042 = vadd.xlane.f32.xlu1 %v9041_v18  ;;  %v17764_v18 = vpop.xlane.xlu0 %8462  ;;  %11986 = vpow2.f32 %v8407_v25  ;;  %v8411_v33 = vmul.f32 1.442695, %v8299_v8 }
 0xbcb   :  { %v17754_v46 = vpop.xlane.xlu1 %8213  ;;  %11988 = vpow2.f32 %v8413_v37 }
 0xbcc   :  { %8558 = vadd.xlane.f32.xlu0 %v8557_v48  ;;  %v11975_v48 = vpop.eup %11974  ;;  %v8302_v63 = vsub.f32 %v17111_v2, %v17754_v46  ;;  %11990 = vlog2.f32 %v17665_v20 }
 0xbcd   :  { %v8563_v32 = vsel %vm476_vm0, %v11975_v48, 0.0  ;;  %v11977_v29 = vpop.eup %11976  ;;  %11992 = vpow2.f32 %v8411_v33 }
 0xbce   :  { %9045 = vadd.xlane.f32.xlu1 %v9044_v38  ;;  %v19468_v38 = vld [vmem:[#allocation58_spill] sm:$0xff]  ;;  %v8572_v48 = vsel %vm476_vm0, %v11977_v29, 0.0  ;;  %v8417_v2 = vmul.f32 1.442695, %v8302_v63  ;;  %11994 = vlog2.f32 %v17677_v56 }
 0xbcf   :  { %v17766_v10 = vpop.xlane.xlu1 %8210  ;;  %vm19469_vm14 = vcmp.eq.s32.totalorder %v19468_v38, %v19223_v41  ;;  %11996 = vlog2.f32 %v17696_v49 }
 0xbd0   :  { %8567 = vadd.xlane.f32.xlu0 %v8566_v44  ;;  %v8880_v12 = vsel %vm19469_vm14, %v17136_v9, 0.0  ;;  %v17779_v44 = vpop.xlane.xlu0 %8471  ;;  %v8301_v8 = vsub.f32 %v17118_v30, %v17766_v10  ;;  %11998 = vpow2.f32 %v8417_v2 }
 0xbd1   :  { %v9050_v11 = vsel %vm476_vm0, %v8880_v12, 0.0  ;;  %v8882_v12 = vsel %vm19475_vm2, %v17159_v4, 0.0  ;;  %12000 = vlog2.f32 %v17730_v1 }
 0xbd2   :  { %9048 = vadd.xlane.f32.xlu1 %v9047_v0  ;;  %v19472_v0 = vld [vmem:[#allocation61_spill] sm:$0xff]  ;;  %v9056_v57 = vsel %vm476_vm0, %v8882_v12, 0.0  ;;  %v19480_v12 = vld [vmem:[#allocation184_spill] sm:$0xff]  ;;  %v8415_v30 = vmul.f32 1.442695, %v8301_v8  ;;  %12002 = vlog2.f32 %v17711_v54 }
 0xbd3   :  { %v17776_v15 = vpop.xlane.xlu1 %8219  ;;  %vm19473_vm1 = vcmp.eq.s32.totalorder %v19472_v0, %v19223_v41 }
 0xbd4   :  { %19470 = vst [vmem:[#allocation186_spill] sm:$0xff] %v17776_v15  ;;  %8564 = vadd.xlane.f32.xlu0 %v8563_v32  ;;  %v8881_v38 = vsel %vm19473_vm1, %v19471_v24, 0.0  ;;  %v11979_v32 = vpop.eup %11978  ;;  %v8304_v63 = vsub.f32 %v17136_v9, %v17776_v15  ;;  %12004 = vpow2.f32 %v8415_v30 }
 0xbd5   :  { %v9053_v50 = vsel %vm476_vm0, %v8881_v38, 0.0  ;;  %v8569_v29 = vsel %vm476_vm0, %v11979_v32, 0.0  ;;  %v19478_v38 = vld [vmem:[#allocation63_spill] sm:$0xff]  ;;  %12006 = vlog2.f32 %v17764_v18  ;;  %v8305_v18 = vsub.f32 %v19471_v24, %v17594_v22 }
 0xbd6   :  { %9051 = vadd.xlane.f32.xlu1 %v9050_v11  ;;  %v17798_v11 = vpop.xlane.xlu0 %8468  ;;  %vm19479_vm3 = vcmp.eq.s32.totalorder %v19478_v38, %v19223_v41  ;;  %v8421_v2 = vmul.f32 1.442695, %v8304_v63 }
 0xbd7   :  { %v17788_v47 = vpop.xlane.xlu1 %8216 }
 0xbd8   :  { %8573 = vadd.xlane.f32.xlu0 %v8572_v48  ;;  %v11981_v48 = vpop.eup %11980  ;;  %v8303_v8 = vsub.f32 %v17143_v60, %v17788_v47 }
 0xbd9   :  { %v8578_v55 = vsel %vm476_vm0, %v11981_v48, 0.0  ;;  %v11983_v32 = vpop.eup %11982 }
 0xbda   :  { %9054 = vadd.xlane.f32.xlu1 %v9053_v50  ;;  %v19477_v50 = vld [vmem:[#allocation182_spill] sm:$0xff]  ;;  %v8575_v48 = vsel %vm476_vm0, %v11983_v32, 0.0  ;;  %v8419_v30 = vmul.f32 1.442695, %v8303_v8 }
 0xbdb   :  { %v17800_v0 = vpop.xlane.xlu1 %8225  ;;  %v8883_v21 = vsel %vm19479_vm3, %v19477_v50, 0.0 }
 0xbdc   :  { %19476 = vst [vmem:[#allocation173_spill] sm:$0xff] %v17800_v0  ;;  %8570 = vadd.xlane.f32.xlu0 %v8569_v29  ;;  %v17813_v29 = vpop.xlane.xlu0 %8477  ;;  %v9059_v25 = vsel %vm476_vm0, %v8883_v21, 0.0  ;;  %v8306_v63 = vsub.f32 %v17159_v4, %v17800_v0 }
 0xbde   :  { %9057 = vadd.xlane.f32.xlu1 %v9056_v57  ;;  %v19481_v57 = vld [vmem:[#allocation65_spill] sm:$0xff] }
 0xbdf   :  { %v17810_v3 = vpop.xlane.xlu1 %8231  ;;  %vm19482_vm4 = vcmp.eq.s32.totalorder %v19481_v57, %v19223_v41 }
 0xbe0   :  { %8579 = vadd.xlane.f32.xlu0 %v8578_v55  ;;  %v8885_v38 = vsel %vm19482_vm4, %v19480_v12, 0.0  ;;  %v11985_v55 = vpop.eup %11984  ;;  %v17826_v21 = vpop.xlane.xlu0 %8483 }
 0xbe1   :  { %v9065_v37 = vsel %vm476_vm0, %v8885_v38, 0.0  ;;  %v8584_v20 = vsel %vm476_vm0, %v11985_v55, 0.0  ;;  %v19485_v38 = vld [vmem:[#allocation69_spill] sm:$0xff] }
 0xbe2   :  { %9060 = vadd.xlane.f32.xlu1 %v9059_v25  ;;  %v19483_v25 = vld [vmem:[#allocation67_spill] sm:$0xff]  ;;  %vm19486_vm6 = vcmp.eq.s32.totalorder %v19485_v38, %v19223_v41 }
 0xbe3   :  { %v17822_v23 = vpop.xlane.xlu1 %8237  ;;  %vm19484_vm5 = vcmp.eq.s32.totalorder %v19483_v25, %v19223_v41  ;;  %v8889_v56 = vsel %vm19486_vm6, %v17265_v42, 0.0 }
 0xbe4   :  { %8576 = vadd.xlane.f32.xlu0 %v8575_v48  ;;  %v8887_v57 = vsel %vm19484_vm5, %v17234_v35, 0.0  ;;  %v11987_v48 = vpop.eup %11986  ;;  %v9077_v9 = vsel %vm476_vm0, %v8889_v56, 0.0 }
 0xbe5   :  { %v9071_v33 = vsel %vm476_vm0, %v8887_v57, 0.0  ;;  %v8581_v49 = vsel %vm476_vm0, %v11987_v48, 0.0  ;;  %v11989_v25 = vpop.eup %11988 }
 0xbe6   :  { %9066 = vadd.xlane.f32.xlu1 %v9065_v37  ;;  %v17847_v37 = vpop.xlane.xlu0 %8489  ;;  %v11991_v57 = vpop.eup %11990 }
 0xbe7   :  { %v17836_v32 = vpop.xlane.xlu1 %8243  ;;  %v11993_v38 = vpop.eup %11992  ;;  %v8638_v60 = vmul.f32 0.6931472, %v11991_v57  ;;  %v8425_v57 = vmul.f32 1.442695, %v8306_v63 }
 0xbe8   :  { %8585 = vadd.xlane.f32.xlu0 %v8584_v20  ;;  %v11995_v1 = vpop.eup %11994 }
 0xbe9   :  { %v11997_v54 = vpop.eup %11996 }
 0xbea   :  { %9072 = vadd.xlane.f32.xlu1 %v9071_v33  ;;  %v8590_v33 = vsel %vm476_vm0, %v11989_v25, 0.0  ;;  %v17859_v48 = vpop.xlane.xlu0 %8495  ;;  %v11999_v25 = vpop.eup %11998  ;;  %v8640_v8 = vmul.f32 0.6931472, %v11997_v54 }
 0xbeb   :  { %v17849_v55 = vpop.xlane.xlu1 %8249  ;;  %v12001_v4 = vpop.eup %12000 }
 0xbec   :  { %8582 = vadd.xlane.f32.xlu0 %v8581_v49  ;;  %v8587_v49 = vsel %vm476_vm0, %v11993_v38, 0.0 }
 0xbee   :  { %9078 = vadd.xlane.f32.xlu1 %v9077_v9  ;;  %v8642_v9 = vmul.f32 0.6931472, %v11995_v1  ;;  %v17876_v24 = vpop.xlane.xlu0 %8501 }
 0xbef   :  { %v8445_v20 = vpop.xlane.xlu1 %8444 }
 0xbf0   :  { %8591 = vadd.xlane.f32.xlu0 %v8590_v33  ;;  %12008 = vlog2.f32 %v8445_v20  ;;  %v12003_v20 = vpop.eup %12002  ;;  %v19487_v33 = vld [vmem:[#allocation185_spill] sm:$0xff] }
 0xbf1   :  { %12010 = vpow2.f32 %v8421_v2  ;;  %v8307_v2 = vsub.f32 %v19477_v50, %v17607_v17  ;;  %v8764_v38 = vadd.f32 %v8638_v60, %v19487_v33  ;;  %v8596_v50 = vsel %vm476_vm0, %v11999_v25, 0.0  ;;  %v12005_v54 = vpop.eup %12004  ;;  %v19489_v33 = vld [vmem:[#allocation189_spill] sm:$0xff] }
 0xbf2   :  { %12012 = vlog2.f32 %v17745_v36  ;;  %v8309_v36 = vsub.f32 %v19480_v12, %v17625_v28  ;;  %v8765_v12 = vadd.f32 %v8640_v8, %v17305_v58  ;;  %v12007_v63 = vpop.eup %12006  ;;  %v8646_v15 = vmul.f32 0.6931472, %v12003_v20  ;;  %v9148_v58 = vld [vmem:[%s18382_s1 + $0x8] sm:$0xff] }
 0xbf3   :  { %v17864_v56 = vpop.xlane.xlu1 %8982  ;;  %12014 = vlog2.f32 %v17798_v11  ;;  %v19488_v11 = vld [vmem:[#allocation190_spill] sm:$0xff]  ;;  %v8427_v0 = vmul.f32 1.442695, %v8307_v2  ;;  %v9084_v22 = vsub.f32 %v8764_v38, %v19489_v33  ;;  %v8648_v38 = vmul.f32 0.6931472, %v12007_v63 }
 0xbf4   :  { %8588 = vadd.xlane.f32.xlu0 %v8587_v49  ;;  %12016 = vpow2.f32 %v8419_v30  ;;  %v8423_v49 = vmul.f32 1.442695, %v8305_v18  ;;  %v8766_v17 = vadd.f32 %v8642_v9, %v19488_v11  ;;  %v8644_v30 = vmul.f32 0.6931472, %v12001_v4 }
 0xbf5   :  { %12018 = vlog2.f32 %v17779_v44  ;;  %v8431_v28 = vmul.f32 1.442695, %v8309_v36  ;;  %v8308_v44 = vsub.f32 %v17181_v6, %v17810_v3  ;;  %v8593_v18 = vsel %vm476_vm0, %v12005_v54, 0.0  ;;  %v19490_v36 = vld [vmem:[#allocation124_spill] sm:$0xff] }
 0xbf6   :  { %12020 = vpow2.f32 %v8425_v57  ;;  %v9086_v2 = vsub.f32 %v8766_v17, %v17310_v34  ;;  %v9085_v57 = vsub.f32 %v8765_v12, %v19490_v36  ;;  %v8767_v20 = vadd.f32 %v8644_v30, %v17321_v45  ;;  %v9149_v34 = vld [vmem:[%s18382_s1 + $0x10] sm:$0xff]  ;;  %v19491_v12 = vld [vmem:[#allocation196_spill] sm:$0xff] }
 0xbf7   :  { %v17878_v1 = vpop.xlane.xlu1 %8985  ;;  %12022 = vlog2.f32 %v17813_v29  ;;  %v9150_v29 = vld [vmem:[%s18382_s1 + $0x18] sm:$0xff]  ;;  %v8429_v17 = vmul.f32 1.442695, %v8308_v44  ;;  %v9212_v11 = vmul.f32 %v9148_v58, %v9084_v22  ;;  %v9147_v45 = vld [vmem:[%s18382_s1] sm:$0xff] }
 0xbf8   :  { %8597 = vadd.xlane.f32.xlu0 %v8596_v50  ;;  %12024 = vpow2.f32 %v8423_v49  ;;  %v17899_v50 = vpop.xlane.xlu0 %8507  ;;  %v8311_v49 = vsub.f32 %v17234_v35, %v17642_v14  ;;  %v9214_v33 = vmul.f32 %v9150_v29, %v9086_v2  ;;  %v9213_v22 = vmul.f32 %v9149_v34, %v9085_v57  ;;  %v19493_v58 = vld [vmem:[#allocation128_spill] sm:$0xff]  ;;  %v19494_v29 = vld [vmem:[#allocation113_spill] sm:$0xff] }
 0xbf9   :  { %12026 = vpow2.f32 %v8427_v0  ;;  %v9151_v57 = vld [vmem:[%s18382_s1 + $0x20] sm:$0xff] }
 0xbfa   :  { %v12009_v60 = vpop.eup %12008  ;;  %12028 = vpow2.f32 %v8431_v28 }
 0xbfb   :  { %v17887_v25 = vpop.xlane.xlu1 %8988  ;;  %v12011_v9 = vpop.eup %12010  ;;  %v8636_v8 = vmul.f32 0.6931472, %v12009_v60  ;;  %v8768_v60 = vadd.f32 %v8646_v15, %v19491_v12  ;;  %12030 = vlog2.f32 %v17826_v21  ;;  %v9087_v15 = vsub.f32 %v8767_v20, %v19493_v58 }
 0xbfc   :  { %8594 = vadd.xlane.f32.xlu0 %v8593_v18  ;;  %v12013_v4 = vpop.eup %12012  ;;  %v8602_v30 = vsel %vm476_vm0, %v12011_v9, 0.0  ;;  %12032 = vlog2.f32 %v17847_v37  ;;  %v8310_v9 = vsub.f32 %v17206_v7, %v17822_v23  ;;  %v8435_v21 = vmul.f32 1.442695, %v8311_v49 }
 0xbfd   :  { %v8763_v0 = vadd.f32 %v8636_v8, %v17284_v51  ;;  %v12015_v54 = vpop.eup %12014  ;;  %v8650_v44 = vmul.f32 0.6931472, %v12013_v4  ;;  %v19492_v51 = vld [vmem:[#allocation122_spill] sm:$0xff]  ;;  %v8769_v8 = vadd.f32 %v8648_v38, %v17338_v31  ;;  %v17919_v36 = vpop.xlane.xlu0 %8504  ;;  %12034 = vpow2.f32 %v8429_v17 }
 0xbfe   :  { %v12017_v63 = vpop.eup %12016  ;;  %v8652_v12 = vmul.f32 0.6931472, %v12015_v54  ;;  %v9277_v4 = vsel %vm9275_vm7, %v9212_v11, 0.0  ;;  %v9152_v38 = vld [vmem:[%s18382_s1 + $0x28] sm:$0xff]  ;;  %v8313_v11 = vsub.f32 %v17265_v42, %v17653_v59 }
 0xbff   :  { %v17911_v28 = vpop.xlane.xlu1 %8991  ;;  %v9083_v18 = vsub.f32 %v8763_v0, %v19492_v51  ;;  %v12019_v35 = vpop.eup %12018  ;;  %v9088_v0 = vsub.f32 %v8768_v60, %v19494_v29  ;;  %v8599_v37 = vsel %vm476_vm0, %v12017_v63, 0.0  ;;  %v8770_v34 = vadd.f32 %v8650_v44, %v17333_v52  ;;  %v9153_v29 = vld [vmem:[%s18382_s1 + $0x30] sm:$0xff] }
 0xc00   :  { %8603 = vadd.xlane.f32.xlu0 %v8602_v30  ;;  %v12021_v20 = vpop.eup %12020  ;;  %v8654_v17 = vmul.f32 0.6931472, %v12019_v35  ;;  %v9281_v60 = vsel %vm9275_vm7, %v9214_v33, 0.0  ;;  %v9215_v51 = vmul.f32 %v9151_v57, %v9087_v15  ;;  %v8771_v52 = vadd.f32 %v8652_v12, %v17356_v61 }
 0xc01   :  { %v9211_v2 = vmul.f32 %v9147_v45, %v9083_v18  ;;  %v12023_v49 = vpop.eup %12022  ;;  %v9279_v45 = vsel %vm9275_vm7, %v9213_v22, 0.0  ;;  %v19495_v18 = vld [vmem:[#allocation198_spill] sm:$0xff]  ;;  %v8433_v44 = vmul.f32 1.442695, %v8310_v9  ;;  %v17946_v33 = vpop.xlane.xlu0 %8513  ;;  %v8608_v15 = vsel %vm476_vm0, %v12021_v20, 0.0 }
 0xc02   :  { %v12025_v63 = vpop.eup %12024  ;;  %v9089_v58 = vsub.f32 %v8769_v8, %v19495_v18  ;;  %v19496_v8 = vld [vmem:[#allocation134_spill] sm:$0xff]  ;;  %v8772_v12 = vadd.f32 %v8654_v17, %v17351_v19  ;;  %v8658_v9 = vmul.f32 0.6931472, %v12023_v49  ;;  %v8312_v57 = vsub.f32 %v17231_v40, %v17836_v32  ;;  %v19498_v18 = vld [vmem:[#allocation119_spill] sm:$0xff] }
 0xc03   :  { %v8475_v31 = vpop.xlane.xlu1 %8474  ;;  %v9276_v54 = vsel %vm9275_vm7, %v9211_v2, 0.0  ;;  %v17940_v35 = vpop.eup %12026  ;;  %v9216_v2 = vmul.f32 %v9152_v38, %v9088_v0  ;;  %v9090_v61 = vsub.f32 %v8770_v34, %v19496_v8  ;;  %v8439_v0 = vmul.f32 1.442695, %v8313_v11  ;;  %v19497_v34 = vld [vmem:[#allocation195_spill] sm:$0xff] }
 0xc04   :  { %12036 = vlog2.f32 %v8475_v31  ;;  %8600 = vadd.xlane.f32.xlu0 %v8599_v37  ;;  %v9278_v30 = vadd.f32 %v9277_v4, %v9276_v54  ;;  %v17949_v4 = vpop.eup %12028  ;;  %v9283_v20 = vsel %vm9275_vm7, %v9215_v51, 0.0  ;;  %v9217_v38 = vmul.f32 %v9153_v29, %v9089_v58 }
 0xc05   :  { %12038 = vlog2.f32 %v17859_v48  ;;  %v9154_v48 = vld [vmem:[%s18382_s1 + $0x38] sm:$0xff]  ;;  %v12031_v37 = vpop.eup %12030  ;;  %v9091_v54 = vsub.f32 %v8771_v52, %v19497_v34  ;;  %v9285_v17 = vsel %vm9275_vm7, %v9216_v2, 0.0  ;;  %v9092_v58 = vsub.f32 %v8772_v12, %v19498_v18  ;;  %v9156_v2 = vld [vmem:[%s18382_s1 + $0x48] sm:$0xff] }
 0xc06   :  { %v9280_v42 = vadd.f32 %v9279_v45, %v9278_v30  ;;  %v12033_v19 = vpop.eup %12032  ;;  %v9218_v51 = vmul.f32 %v9154_v48, %v9090_v61  ;;  %v19499_v52 = vld [vmem:[#allocation199_spill] sm:$0xff]  ;;  %v8662_v29 = vmul.f32 0.6931472, %v12031_v37 }
 0xc07   :  { %v8481_v22 = vpop.xlane.xlu1 %8480  ;;  %v12035_v30 = vpop.eup %12034  ;;  %v8666_v8 = vmul.f32 0.6931472, %v12033_v19  ;;  %v9220_v37 = vmul.f32 %v9156_v2, %v9092_v58 }
 0xc08   :  { %12040 = vlog2.f32 %v8481_v22  ;;  %8609 = vadd.xlane.f32.xlu0 %v8608_v15  ;;  %v9282_v31 = vadd.f32 %v9281_v60, %v9280_v42  ;;  %v8605_v60 = vsel %vm476_vm0, %v12025_v63, 0.0  ;;  %v8437_v42 = vmul.f32 1.442695, %v8312_v57  ;;  %v19500_v57 = vld [vmem:[#allocation126_spill] sm:$0xff] }
 0xc09   :  { %12042 = vpow2.f32 %v8435_v21  ;;  %v9155_v21 = vld [vmem:[%s18382_s1 + $0x40] sm:$0xff]  ;;  %v8511_v11 = vpop.xlane.xlu0 %8510  ;;  %v9287_v63 = vsel %vm9275_vm7, %v9217_v38, 0.0  ;;  %v8614_v48 = vsel %vm476_vm0, %v12035_v30, 0.0  ;;  %v19501_v38 = vld [vmem:[#allocation203_spill] sm:$0xff]  ;;  %v8611_v30 = vsel %vm476_vm0, %v17940_v35, 0.0 }
 0xc0a   :  { %12044 = vpow2.f32 %v8433_v44  ;;  %v9284_v49 = vadd.f32 %v9283_v20, %v9282_v31  ;;  %v8774_v44 = vadd.f32 %v8658_v9, %v19499_v52  ;;  %v9219_v15 = vmul.f32 %v9155_v21, %v9091_v54 }
 0xc0b   :  { %12046 = vlog2.f32 %v17876_v24  ;;  %v8487_v45 = vpop.xlane.xlu1 %8486  ;;  %v9289_v31 = vsel %vm9275_vm7, %v9218_v51, 0.0  ;;  %v8776_v34 = vadd.f32 %v8662_v29, %v19501_v38 }
 0xc0c   :  { %12048 = vlog2.f32 %v8487_v45  ;;  %8606 = vadd.xlane.f32.xlu0 %v8605_v60  ;;  %v9286_v24 = vadd.f32 %v9285_v17, %v9284_v49  ;;  %v9094_v20 = vsub.f32 %v8774_v44, %v19500_v57  ;;  %v9291_v21 = vsel %vm9275_vm7, %v9219_v15, 0.0  ;;  %v19502_v49 = vld [vmem:[#allocation132_spill] sm:$0xff]  ;;  %v9157_v60 = vld [vmem:[%s18382_s1 + $0x50] sm:$0xff] }
 0xc0d   :  { %12050 = vlog2.f32 %v17919_v36  ;;  %v8520_v19 = vpop.xlane.xlu0 %8519  ;;  %v8778_v45 = vadd.f32 %v8666_v8, %v19502_v49 }
 0xc0e   :  { %v12037_v22 = vpop.eup %12036  ;;  %12052 = vpow2.f32 %v8439_v0  ;;  %v9288_v61 = vadd.f32 %v9287_v63, %v9286_v24  ;;  %v9158_v0 = vld [vmem:[%s18382_s1 + $0x58] sm:$0xff] }
 0xc0f   :  { %12054 = vlog2.f32 %v17899_v50  ;;  %v8656_v12 = vmul.f32 0.6931472, %v12037_v22  ;;  %v8493_v9 = vpop.xlane.xlu1 %8492  ;;  %v12039_v36 = vpop.eup %12038  ;;  %v9222_v29 = vmul.f32 %v9158_v0, %v9094_v20  ;;  %v19504_v22 = vld [vmem:[#allocation201_spill] sm:$0xff] }
 0xc10   :  { %12056 = vlog2.f32 %v8493_v9  ;;  %8615 = vadd.xlane.f32.xlu0 %v8614_v48  ;;  %v9290_v50 = vadd.f32 %v9289_v31, %v9288_v61  ;;  %v9096_v63 = vsub.f32 %v8776_v34, %v19504_v22  ;;  %v9160_v61 = vld [vmem:[%s18382_s1 + $0x68] sm:$0xff]  ;;  %v9161_v22 = vld [vmem:[%s18382_s1 + $0x70] sm:$0xff] }
 0xc11   :  { %12058 = vpow2.f32 %v8437_v42  ;;  %v8773_v54 = vadd.f32 %v8656_v12, %v17374_v43  ;;  %v19503_v43 = vld [vmem:[#allocation197_spill] sm:$0xff]  ;;  %v8670_v42 = vmul.f32 0.6931472, %v12039_v36  ;;  %v19506_v48 = vld [vmem:[#allocation194_spill] sm:$0xff] }
 0xc12   :  { %v12041_v17 = vpop.eup %12040  ;;  %12060 = vlog2.f32 %v8511_v11  ;;  %v9292_v18 = vadd.f32 %v9291_v21, %v9290_v50  ;;  %v9293_v11 = vsel %vm9275_vm7, %v9220_v37, 0.0  ;;  %v19505_v12 = vld [vmem:[#allocation209_spill] sm:$0xff]  ;;  %v8314_v31 = vsub.f32 %v19506_v48, %v17849_v55  ;;  %v19507_v36 = vld [vmem:[#allocation202_spill] sm:$0xff]  ;;  %v19508_v21 = vld [vmem:[#allocation204_spill] sm:$0xff] }
 0xc13   :  { %v17989_v51 = vpop.eup %12042  ;;  %12062 = vlog2.f32 %v17946_v33  ;;  %v9093_v58 = vsub.f32 %v8773_v54, %v19503_v43  ;;  %v8660_v52 = vmul.f32 0.6931472, %v12041_v17  ;;  %v8499_v44 = vpop.xlane.xlu1 %8498  ;;  %v9098_v9 = vsub.f32 %v8778_v45, %v19505_v12  ;;  %v9159_v37 = vld [vmem:[%s18382_s1 + $0x60] sm:$0xff]  ;;  %v9162_v17 = vld [vmem:[%s18382_s1 + $0x78] sm:$0xff] }
 0xc14   :  { %v12045_v2 = vpop.eup %12044  ;;  %12064 = vlog2.f32 %v8499_v44  ;;  %8612 = vadd.xlane.f32.xlu0 %v8611_v30  ;;  %v9294_v57 = vadd.f32 %v9293_v11, %v9292_v18  ;;  %v9297_v54 = vsel %vm9275_vm7, %v9222_v29, 0.0  ;;  %v8780_v49 = vadd.f32 %v8670_v42, %v19508_v21 }
 0xc15   :  { %v12047_v24 = vpop.eup %12046  ;;  %v9221_v35 = vmul.f32 %v9157_v60, %v9093_v58  ;;  %v8775_v15 = vadd.f32 %v8660_v52, %v17390_v53  ;;  %v8517_v8 = vpop.xlane.xlu0 %8516  ;;  %v8620_v34 = vsel %vm476_vm0, %v12045_v2, 0.0  ;;  %v9224_v30 = vmul.f32 %v9160_v61, %v9096_v63 }
 0xc16   :  { %v12049_v33 = vpop.eup %12048  ;;  %12066 = vlog2.f32 %v8517_v8  ;;  %v8674_v18 = vmul.f32 0.6931472, %v12047_v24  ;;  %v8441_v2 = vmul.f32 1.442695, %v8314_v31  ;;  %v8617_v42 = vsel %vm476_vm0, %v17949_v4, 0.0  ;;  %v19509_v24 = vld [vmem:[#allocation208_spill] sm:$0xff] }
 0xc17   :  { %v12051_v20 = vpop.eup %12050  ;;  %v9295_v53 = vsel %vm9275_vm7, %v9221_v35, 0.0  ;;  %v9095_v0 = vsub.f32 %v8775_v15, %v19507_v36  ;;  %v8664_v38 = vmul.f32 0.6931472, %v12049_v33  ;;  %12068 = vlog2.f32 %v8520_v19  ;;  %v19510_v33 = vld [vmem:[#allocation213_spill] sm:$0xff] }
 0xc18   :  { %v18008_v50 = vpop.eup %12052  ;;  %v9296_v45 = vadd.f32 %v9295_v53, %v9294_v57  ;;  %8621 = vadd.xlane.f32.xlu0 %v8620_v34  ;;  %v8676_v11 = vmul.f32 0.6931472, %v12051_v20  ;;  %v9226_v35 = vmul.f32 %v9162_v17, %v9098_v9  ;;  %v9100_v61 = vsub.f32 %v8780_v49, %v19510_v33  ;;  %v9164_v4 = vld [vmem:[%s18382_s1 + $0x88] sm:$0xff]  ;;  %v19511_v9 = vld [vmem:[#allocation207_spill] sm:$0xff] }
 0xc19   :  { %v12055_v60 = vpop.eup %12054  ;;  %v9223_v43 = vmul.f32 %v9159_v37, %v9095_v0  ;;  %v8777_v58 = vadd.f32 %v8664_v38, %v17416_v26  ;;  %v8526_v52 = vpop.xlane.xlu0 %8525  ;;  %v9301_v37 = vsel %vm9275_vm7, %v9224_v30, 0.0  ;;  %v8782_v20 = vadd.f32 %v8674_v18, %v19511_v9  ;;  %v19516_v33 = vld [vmem:[#allocation141_spill] sm:$0xff] }
 0xc1a   :  { %v12057_v44 = vpop.eup %12056  ;;  %v9298_v29 = vadd.f32 %v9297_v54, %v9296_v45  ;;  %v8678_v12 = vmul.f32 0.6931472, %v12055_v60  ;;  %12070 = vlog2.f32 %v8526_v52  ;;  %v8783_v38 = vadd.f32 %v8676_v11, %v17473_v27  ;;  %v9163_v54 = vld [vmem:[%s18382_s1 + $0x80] sm:$0xff] }
 0xc1b   :  { %v12059_v19 = vpop.eup %12058  ;;  %v9299_v63 = vsel %vm9275_vm7, %v9223_v43, 0.0  ;;  %v9097_v15 = vsub.f32 %v8777_v58, %v19509_v24  ;;  %v8668_v8 = vmul.f32 0.6931472, %v12057_v44  ;;  %12072 = vpow2.f32 %v8441_v2  ;;  %v19512_v45 = vld [vmem:[#allocation212_spill] sm:$0xff]  ;;  %v19513_v58 = vld [vmem:[#allocation206_spill] sm:$0xff] }
 0xc1c   :  { %v12061_v26 = vpop.eup %12060  ;;  %v9300_v31 = vadd.f32 %v9299_v63, %v9298_v29  ;;  %8618 = vadd.xlane.f32.xlu0 %v8617_v42  ;;  %v8626_v17 = vsel %vm476_vm0, %v12059_v19, 0.0  ;;  %v9228_v43 = vmul.f32 %v9164_v4, %v9100_v61  ;;  %v8784_v52 = vadd.f32 %v8678_v12, %v19513_v58  ;;  %v19514_v44 = vld [vmem:[#allocation214_spill] sm:$0xff]  ;;  %v9166_v63 = vld [vmem:[%s18382_s1 + $0x98] sm:$0xff] }
 0xc1d   :  { %v12063_v57 = vpop.eup %12062  ;;  %v9225_v53 = vmul.f32 %v9161_v22, %v9097_v15  ;;  %v8779_v36 = vadd.f32 %v8668_v8, %v17435_v39  ;;  %v8680_v21 = vmul.f32 0.6931472, %v12061_v26  ;;  %v9305_v39 = vsel %vm9275_vm7, %v9226_v35, 0.0  ;;  %v19515_v24 = vld [vmem:[#allocation138_spill] sm:$0xff]  ;;  %v19518_v4 = vld [vmem:[#allocation219_spill] sm:$0xff] }
 0xc1e   :  { %v12065_v0 = vpop.eup %12064  ;;  %v9302_v34 = vadd.f32 %v9301_v37, %v9300_v31  ;;  %v9102_v2 = vsub.f32 %v8782_v20, %v19514_v44  ;;  %v8682_v11 = vmul.f32 0.6931472, %v12063_v57  ;;  %v9103_v15 = vsub.f32 %v8783_v38, %v19515_v24  ;;  %v9165_v8 = vld [vmem:[%s18382_s1 + $0x90] sm:$0xff]  ;;  %v9167_v20 = vld [vmem:[%s18382_s1 + $0xa0] sm:$0xff] }
 0xc1f   :  { %v9303_v49 = vsel %vm9275_vm7, %v9225_v53, 0.0  ;;  %v9099_v60 = vsub.f32 %v8779_v36, %v19512_v45  ;;  %v8672_v30 = vmul.f32 0.6931472, %v12065_v0  ;;  %v8623_v26 = vsel %vm476_vm0, %v17989_v51, 0.0  ;;  %v19517_v12 = vld [vmem:[#allocation218_spill] sm:$0xff] }
 0xc20   :  { %v12067_v18 = vpop.eup %12066  ;;  %v9304_v27 = vadd.f32 %v9303_v49, %v9302_v34  ;;  %8627 = vadd.xlane.f32.xlu0 %v8626_v17  ;;  %v8785_v61 = vadd.f32 %v8680_v21, %v19516_v33  ;;  %v9309_v37 = vsel %vm9275_vm7, %v9228_v43, 0.0  ;;  %v9104_v9 = vsub.f32 %v8784_v52, %v19518_v4  ;;  %v9168_v51 = vld [vmem:[%s18382_s1 + $0xa8] sm:$0xff] }
 0xc21   :  { %v9227_v29 = vmul.f32 %v9163_v54, %v9099_v60  ;;  %v8781_v22 = vadd.f32 %v8672_v30, %v17455_v62  ;;  %v8523_v42 = vpop.xlane.xlu0 %8522  ;;  %v12069_v19 = vpop.eup %12068  ;;  %v8684_v57 = vmul.f32 0.6931472, %v12067_v18  ;;  %v9230_v36 = vmul.f32 %v9166_v63, %v9102_v2  ;;  %v19519_v0 = vld [vmem:[#allocation210_spill] sm:$0xff] }
 0xc22   :  { %v9306_v35 = vadd.f32 %v9305_v39, %v9304_v27  ;;  %12074 = vlog2.f32 %v8523_v42  ;;  %v8786_v38 = vadd.f32 %v8682_v11, %v19519_v0  ;;  %v8686_v34 = vmul.f32 0.6931472, %v12069_v19  ;;  %v19520_v39 = vld [vmem:[#allocation143_spill] sm:$0xff] }
 0xc23   :  { %v9307_v62 = vsel %vm9275_vm7, %v9227_v29, 0.0  ;;  %v9101_v31 = vsub.f32 %v8781_v22, %v19517_v12  ;;  %v8629_v45 = vsel %vm476_vm0, %v18008_v50, 0.0  ;;  %v9231_v60 = vmul.f32 %v9167_v20, %v9103_v15  ;;  %v9169_v27 = vld [vmem:[%s18382_s1 + $0xb0] sm:$0xff]  ;;  %v19522_v50 = vld [vmem:[#allocation216_spill] sm:$0xff] }
 0xc24   :  { %v9308_v53 = vadd.f32 %v9307_v62, %v9306_v35  ;;  %8624 = vadd.xlane.f32.xlu0 %v8623_v26  ;;  %v12071_v21 = vpop.eup %12070  ;;  %v9105_v30 = vsub.f32 %v8785_v61, %v17527_v5  ;;  %v8787_v43 = vadd.f32 %v8684_v57, %v19520_v39  ;;  %v9232_v52 = vmul.f32 %v9168_v51, %v9104_v9  ;;  %v19521_v11 = vld [vmem:[#allocation211_spill] sm:$0xff]  ;;  %v9171_v62 = vld [vmem:[%s18382_s1 + $0xc0] sm:$0xff]  ;;  %v19524_v12 = vld [vmem:[#allocation62_spill] sm:$0xff] }
 0xc25   :  { %v9229_v54 = vmul.f32 %v9165_v8, %v9101_v31  ;;  %v8532_v17 = vpop.xlane.xlu0 %8531  ;;  %v12073_v58 = vpop.eup %12072  ;;  %v9313_v2 = vsel %vm9275_vm7, %v9230_v36, 0.0  ;;  %v9106_v29 = vsub.f32 %v8786_v38, %v19521_v11  ;;  %v8788_v22 = vadd.f32 %v8686_v34, %v19522_v50  ;;  %v9170_v5 = vld [vmem:[%s18382_s1 + $0xb8] sm:$0xff]  ;;  %v9172_v51 = vld [vmem:[%s18382_s1 + $0xc8] sm:$0xff] }
 0xc26   :  { %v9310_v49 = vadd.f32 %v9309_v37, %v9308_v53  ;;  %12076 = vlog2.f32 %v8532_v17  ;;  %v8690_v42 = vmul.f32 0.6931472, %v12071_v21  ;;  %v9315_v63 = vsel %vm9275_vm7, %v9231_v60, 0.0  ;;  %v19523_v15 = vld [vmem:[#allocation151_spill] sm:$0xff]  ;;  %v18092_v38 = vpop.xlane.xlu1 %8994  ;;  %v19528_v17 = vld [vmem:[#allocation153_spill] sm:$0xff] }
 0xc27   :  { %v9311_v18 = vsel %vm9275_vm7, %v9229_v54, 0.0  ;;  %v9233_v24 = vmul.f32 %v9169_v27, %v9105_v30  ;;  %v9107_v35 = vsub.f32 %v8787_v43, %v19523_v15  ;;  %v8632_v8 = vsel %vm476_vm0, %v12073_v58, 0.0  ;;  %v19526_v37 = vld [vmem:[#allocation147_spill] sm:$0xff]  ;;  %v19529_v30 = vld [vmem:[#allocation64_spill] sm:$0xff]  ;;  %v19531_v58 = vld [vmem:[#allocation154_spill] sm:$0xff] }
 0xc28   :  { %v9312_v44 = vadd.f32 %v9311_v18, %v9310_v49  ;;  %8630 = vadd.xlane.f32.xlu0 %v8629_v45  ;;  %v9317_v33 = vsel %vm9275_vm7, %v9232_v52, 0.0  ;;  %vm19525_vm8 = vcmp.eq.s32.totalorder %v19524_v12, %v19223_v41  ;;  %v9234_v57 = vmul.f32 %v9170_v5, %v9106_v29  ;;  %v19527_v9 = vld [vmem:[#allocation215_spill] sm:$0xff] }
 0xc29   :  { %v8884_v31 = vsel %vm19525_vm8, %v17181_v6, 0.0  ;;  %v9108_v4 = vsub.f32 %v8788_v22, %v19526_v37  ;;  %v8790_v20 = vadd.f32 %v8690_v42, %v19527_v9  ;;  %v9319_v34 = vsel %vm9275_vm7, %v9233_v24, 0.0  ;;  %v9173_v60 = vld [vmem:[%s18382_s1 + $0xd0] sm:$0xff]  ;;  %v9174_v29 = vld [vmem:[%s18382_s1 + $0xd8] sm:$0xff] }
 0xc2a   :  { %v9314_v19 = vadd.f32 %v9313_v2, %v9312_v44  ;;  %v9235_v54 = vmul.f32 %v9171_v62, %v9107_v35  ;;  %v9062_v21 = vsel %vm476_vm0, %v8884_v31, 0.0  ;;  %vm19530_vm10 = vcmp.eq.s32.totalorder %v19529_v30, %v19223_v41  ;;  %v19532_v27 = vld [vmem:[#allocation155_spill] sm:$0xff] }
 0xc2b   :  { %v8886_v18 = vsel %vm19530_vm10, %v17206_v7, 0.0  ;;  %v9321_v39 = vsel %vm9275_vm7, %v9234_v57, 0.0  ;;  %v9236_v43 = vmul.f32 %v9172_v51, %v9108_v4  ;;  %v9110_v52 = vsub.f32 %v8790_v20, %v19531_v58  ;;  %v19536_v57 = vld [vmem:[#allocation68_spill] sm:$0xff] }
 0xc2c   :  { %v12075_v26 = vpop.eup %12074  ;;  %v9316_v61 = vadd.f32 %v9315_v63, %v9314_v19  ;;  %8633 = vadd.xlane.f32.xlu0 %v8632_v8  ;;  %v9323_v50 = vsel %vm9275_vm7, %v9235_v54, 0.0  ;;  %v9068_v7 = vsel %vm476_vm0, %v8886_v18, 0.0  ;;  %v18112_v19 = vpop.xlane.xlu1 %8997  ;;  %v19533_v63 = vld [vmem:[#allocation66_spill] sm:$0xff]  ;;  %vm19537_vm15 = vcmp.eq.s32.totalorder %v19536_v57, %v19223_v41 }
 0xc2d   :  { %v8688_v53 = vmul.f32 0.6931472, %v12075_v26  ;;  %v8529_v36 = vpop.xlane.xlu0 %8528  ;;  %vm19534_vm11 = vcmp.eq.s32.totalorder %v19533_v63, %v19223_v41  ;;  %v9325_v15 = vsel %vm9275_vm7, %v9236_v43, 0.0  ;;  %v9238_v35 = vmul.f32 %v9174_v29, %v9110_v52  ;;  %v9176_v41 = vld [vmem:[%s18382_s1 + $0xe8] sm:$0xff] }
 0xc2e   :  { %v9318_v0 = vadd.f32 %v9317_v33, %v9316_v61  ;;  %12078 = vlog2.f32 %v8529_v36  ;;  %v8888_v24 = vsel %vm19534_vm11, %v17231_v40, 0.0  ;;  %v19535_v33 = vld [vmem:[#allocation217_spill] sm:$0xff]  ;;  %v8890_v37 = vsel %vm19537_vm15, %v19506_v48, 0.0  ;;  %v19538_v36 = vld [vmem:[#allocation159_spill] sm:$0xff] }
 0xc2f   :  { %v8789_v6 = vadd.f32 %v8688_v53, %v19528_v17  ;;  %v9074_v62 = vsel %vm476_vm0, %v8888_v24, 0.0  ;;  %v9329_v40 = vsel %vm9275_vm7, %v9238_v35, 0.0  ;;  %v9080_v54 = vsel %vm476_vm0, %v8890_v37, 0.0  ;;  %v9175_v48 = vld [vmem:[%s18382_s1 + $0xe0] sm:$0xff]  ;;  %v9178_v24 = vld [vmem:[%s18382_s1 + $0xf8] sm:$0xff] }
 0xc30   :  { %v12077_v49 = vpop.eup %12076  ;;  %v9320_v45 = vadd.f32 %v9319_v34, %v9318_v0  ;;  %9063 = vadd.xlane.f32.xlu0 %v9062_v21  ;;  %v18127_v20 = vpop.xlane.xlu1 %9000  ;;  %v19539_v0 = vld [vmem:[#allocation156_spill] sm:$0xff]  ;;  %vm9413_vm0 = vcmask 0  }
 0xc31   :  { %v9109_v44 = vsub.f32 %v8789_v6, %v19532_v27  ;;  %v8538_v2 = vpop.xlane.xlu0 %8537  ;;  %v8694_v42 = vmul.f32 0.6931472, %v12077_v49  ;;  %v19540_v6 = vld [vmem:[#allocation161_spill] sm:$0xff]  ;;  %v19541_v27 = vld [vmem:[#allocation200_spill] sm:$0xff] }
 0xc32   :  { %v9322_v11 = vadd.f32 %v9321_v39, %v9320_v45  ;;  %12080 = vlog2.f32 %v8538_v2 }
 0xc33   :  { %v9237_v22 = vmul.f32 %v9173_v60, %v9109_v44  ;;  %v8792_v61 = vadd.f32 %v8694_v42, %v19535_v33 }
 0xc34   :  { %v9324_v5 = vadd.f32 %v9323_v50, %v9322_v11  ;;  %9069 = vadd.xlane.f32.xlu0 %v9068_v7  ;;  %v18139_v18 = vpop.xlane.xlu1 %9003  ;;  %v19542_v7 = vld [vmem:[#allocation163_spill] sm:$0xff] }
 0xc35   :  { %v9327_v26 = vsel %vm9275_vm7, %v9237_v22, 0.0  ;;  %v9112_v51 = vsub.f32 %v8792_v61, %v19538_v36  ;;  %v19544_v36 = vld [vmem:[#allocation166_spill] sm:$0xff] }
 0xc36   :  { %v9326_v8 = vadd.f32 %v9325_v15, %v9324_v5  ;;  %v9177_v15 = vld [vmem:[%s18382_s1 + $0xf0] sm:$0xff] }
 0xc37   :  { %v9240_v45 = vmul.f32 %v9176_v41, %v9112_v51  ;;  %v9180_v51 = vld [vmem:[%s18382_s1 + $0x108] sm:$0xff] }
 0xc38   :  { %v12079_v12 = vpop.eup %12078  ;;  %v9328_v31 = vadd.f32 %v9327_v26, %v9326_v8  ;;  %9075 = vadd.xlane.f32.xlu0 %v9074_v62  ;;  %v18144_v22 = vpop.xlane.xlu1 %9006  ;;  %v19543_v62 = vld [vmem:[#allocation205_spill] sm:$0xff] }
 0xc39   :  { %v8692_v4 = vmul.f32 0.6931472, %v12079_v12  ;;  %v8535_v9 = vpop.xlane.xlu0 %8534  ;;  %v9333_v52 = vsel %vm9275_vm7, %v9240_v45, 0.0 }
 0xc3a   :  { %v9330_v53 = vadd.f32 %v9329_v40, %v9328_v31  ;;  %12082 = vlog2.f32 %v8535_v9 }
 0xc3b   :  { %v8791_v34 = vadd.f32 %v8692_v4, %v19539_v0  ;;  %v9179_v0 = vld [vmem:[%s18382_s1 + $0x100] sm:$0xff] }
 0xc3c   :  { %v12081_v17 = vpop.eup %12080  ;;  %9081 = vadd.xlane.f32.xlu0 %v9080_v54  ;;  %v18156_v31 = vpop.xlane.xlu1 %9009 }
 0xc3d   :  { %v9111_v21 = vsub.f32 %v8791_v34, %v19540_v6  ;;  %v8544_v49 = vpop.xlane.xlu0 %8543  ;;  %v8698_v30 = vmul.f32 0.6931472, %v12081_v17 }
 0xc3e   :  { %12084 = vlog2.f32 %v8544_v49 }
 0xc3f   :  { %v9239_v60 = vmul.f32 %v9175_v48, %v9111_v21  ;;  %v8794_v44 = vadd.f32 %v8698_v30, %v19541_v27 }
 0xc41   :  { %v9331_v39 = vsel %vm9275_vm7, %v9239_v60, 0.0  ;;  %v8541_v43 = vpop.xlane.xlu0 %8540  ;;  %v9114_v42 = vsub.f32 %v8794_v44, %v17878_v1 }
 0xc42   :  { %v9332_v58 = vadd.f32 %v9331_v39, %v9330_v53  ;;  %12086 = vlog2.f32 %v8541_v43 }
 0xc43   :  { %v9242_v33 = vmul.f32 %v9178_v24, %v9114_v42  ;;  %v19545_v24 = vld [vmem:[#allocation165_spill] sm:$0xff] }
 0xc44   :  { %v12083_v2 = vpop.eup %12082  ;;  %v9334_v11 = vadd.f32 %v9333_v52, %v9332_v58 }
 0xc45   :  { %v8696_v29 = vmul.f32 0.6931472, %v12083_v2  ;;  %v8550_v50 = vpop.xlane.xlu0 %8549  ;;  %v9337_v53 = vsel %vm9275_vm7, %v9242_v33, 0.0 }
 0xc47   :  { %v8793_v5 = vadd.f32 %v8696_v29, %v19542_v7 }
 0xc48   :  { %v12085_v63 = vpop.eup %12084 }
 0xc49   :  { %v9113_v35 = vsub.f32 %v8793_v5, %v17864_v56  ;;  %v8702_v8 = vmul.f32 0.6931472, %v12085_v63  ;;  %v8547_v26 = vpop.xlane.xlu0 %8546 }
 0xc4a   :  { %12088 = vlog2.f32 %v8547_v26 }
 0xc4b   :  { %v9241_v61 = vmul.f32 %v9177_v15, %v9113_v35  ;;  %v8796_v12 = vadd.f32 %v8702_v8, %v19543_v62  ;;  %12090 = vlog2.f32 %v8550_v50  ;;  %v19546_v62 = vld [vmem:[#allocation139_spill] sm:$0xff] }
 0xc4c   :  { %v12087_v1 = vpop.eup %12086 }
 0xc4d   :  { %v9335_v57 = vsel %vm9275_vm7, %v9241_v61, 0.0  ;;  %v9116_v37 = vsub.f32 %v8796_v12, %v17911_v28  ;;  %v8700_v40 = vmul.f32 0.6931472, %v12087_v1  ;;  %v8556_v4 = vpop.xlane.xlu0 %8555  ;;  %v18169_v28 = vpop.xlane.xlu1 %9012  ;;  %v9181_v1 = vld [vmem:[%s18382_s1 + $0x110] sm:$0xff] }
 0xc4e   :  { %v9336_v9 = vadd.f32 %v9335_v57, %v9334_v11 }
 0xc4f   :  { %v8795_v56 = vadd.f32 %v8700_v40, %v19544_v36  ;;  %v9244_v41 = vmul.f32 %v9180_v51, %v9116_v37  ;;  %v19547_v40 = vld [vmem:[#allocation183_spill] sm:$0xff] }
 0xc50   :  { %v9338_v34 = vadd.f32 %v9337_v53, %v9336_v9 }
 0xc51   :  { %v9115_v54 = vsub.f32 %v8795_v56, %v17887_v25  ;;  %v8553_v17 = vpop.xlane.xlu0 %8552  ;;  %v9341_v45 = vsel %vm9275_vm7, %v9244_v41, 0.0  ;;  %v18173_v60 = vpop.xlane.xlu1 %9015 }
 0xc52   :  { %12092 = vlog2.f32 %v8553_v17  ;;  %v9183_v17 = vld [vmem:[%s18382_s1 + $0x120] sm:$0xff] }
 0xc53   :  { %v9243_v48 = vmul.f32 %v9179_v0, %v9115_v54  ;;  %12094 = vlog2.f32 %v8556_v4  ;;  %v9182_v0 = vld [vmem:[%s18382_s1 + $0x118] sm:$0xff] }
 0xc54   :  { %v12089_v44 = vpop.eup %12088 }
 0xc55   :  { %v9339_v6 = vsel %vm9275_vm7, %v9243_v48, 0.0  ;;  %v8562_v21 = vpop.xlane.xlu0 %8561  ;;  %v18175_v58 = vpop.xlane.xlu1 %9018  ;;  %v8704_v29 = vmul.f32 0.6931472, %v12089_v44 }
 0xc56   :  { %v9340_v49 = vadd.f32 %v9339_v6, %v9338_v34  ;;  %v12091_v7 = vpop.eup %12090  ;;  %v19548_v6 = vld [vmem:[#allocation145_spill] sm:$0xff] }
 0xc57   :  { %v8797_v15 = vadd.f32 %v8704_v29, %v19545_v24  ;;  %v8706_v35 = vmul.f32 0.6931472, %v12091_v7 }
 0xc58   :  { %v9342_v30 = vadd.f32 %v9341_v45, %v9340_v49 }
 0xc59   :  { %v8559_v39 = vpop.xlane.xlu0 %8558  ;;  %v18177_v52 = vpop.xlane.xlu1 %9021  ;;  %v9117_v33 = vsub.f32 %v8797_v15, %v18092_v38  ;;  %v8798_v12 = vadd.f32 %v8706_v35, %v19546_v62  ;;  %v19549_v35 = vld [vmem:[#allocation148_spill] sm:$0xff] }
 0xc5a   :  { %12096 = vlog2.f32 %v8559_v39 }
 0xc5b   :  { %12098 = vlog2.f32 %v8562_v21  ;;  %v9245_v9 = vmul.f32 %v9181_v1, %v9117_v33  ;;  %v9118_v56 = vsub.f32 %v8798_v12, %v18112_v19 }
 0xc5c   :  { %v12093_v5 = vpop.eup %12092 }
 0xc5d   :  { %v8568_v43 = vpop.xlane.xlu0 %8567  ;;  %v18179_v11 = vpop.xlane.xlu1 %9024  ;;  %v8708_v8 = vmul.f32 0.6931472, %v12093_v5  ;;  %v9343_v41 = vsel %vm9275_vm7, %v9245_v9, 0.0  ;;  %v9246_v49 = vmul.f32 %v9182_v0, %v9118_v56 }
 0xc5e   :  { %v12095_v26 = vpop.eup %12094 }
 0xc5f   :  { %v8799_v4 = vadd.f32 %v8708_v8, %v19547_v40  ;;  %v8710_v53 = vmul.f32 0.6931472, %v12095_v26  ;;  %v9345_v5 = vsel %vm9275_vm7, %v9246_v49, 0.0 }
 0xc61   :  { %v8565_v25 = vpop.xlane.xlu0 %8564  ;;  %v18181_v63 = vpop.xlane.xlu1 %9027  ;;  %v9119_v34 = vsub.f32 %v8799_v4, %v18127_v20  ;;  %v8800_v21 = vadd.f32 %v8710_v53, %v19548_v6  ;;  %v9186_v53 = vld [vmem:[%s18382_s1 + $0x138] sm:$0xff] }
 0xc62   :  { %12100 = vlog2.f32 %v8565_v25  ;;  %v9344_v25 = vadd.f32 %v9343_v41, %v9342_v30 }
 0xc63   :  { %12102 = vlog2.f32 %v8568_v43  ;;  %v9247_v39 = vmul.f32 %v9183_v17, %v9119_v34 }
 0xc64   :  { %v12097_v61 = vpop.eup %12096 }
 0xc65   :  { %v8574_v27 = vpop.xlane.xlu0 %8573  ;;  %v18189_v37 = vpop.xlane.xlu1 %9030  ;;  %v8712_v36 = vmul.f32 0.6931472, %v12097_v61  ;;  %v9347_v30 = vsel %vm9275_vm7, %v9247_v39, 0.0  ;;  %v9188_v39 = vld [vmem:[%s18382_s1 + $0x148] sm:$0xff] }
 0xc66   :  { %v12099_v51 = vpop.eup %12098 }
 0xc67   :  { %v8801_v19 = vadd.f32 %v8712_v36, %v17662_v13  ;;  %v8714_v43 = vmul.f32 0.6931472, %v12099_v51  ;;  %v9184_v13 = vld [vmem:[%s18382_s1 + $0x128] sm:$0xff]  ;;  %v9187_v36 = vld [vmem:[%s18382_s1 + $0x140] sm:$0xff] }
 0xc69   :  { %v8571_v2 = vpop.xlane.xlu0 %8570  ;;  %v18201_v48 = vpop.xlane.xlu1 %9033  ;;  %v9121_v29 = vsub.f32 %v8801_v19, %v18144_v22 }
 0xc6a   :  { %12104 = vlog2.f32 %v8571_v2  ;;  %v9120_v2 = vsub.f32 %v8800_v21, %v18139_v18  ;;  %v8802_v18 = vadd.f32 %v8714_v43, %v19549_v35 }
 0xc6b   :  { %12106 = vlog2.f32 %v8574_v27  ;;  %v9185_v27 = vld [vmem:[%s18382_s1 + $0x130] sm:$0xff] }
 0xc6c   :  { %v12101_v54 = vpop.eup %12100  ;;  %v9248_v26 = vmul.f32 %v9184_v13, %v9120_v2  ;;  %v9249_v33 = vmul.f32 %v9185_v27, %v9121_v29  ;;  %v9122_v40 = vsub.f32 %v8802_v18, %v18156_v31  ;;  %v19551_v31 = vld [vmem:[#allocation167_spill] sm:$0xff] }
 0xc6d   :  { %v8580_v42 = vpop.xlane.xlu0 %8579  ;;  %v8716_v20 = vmul.f32 0.6931472, %v12101_v54  ;;  %v12103_v44 = vpop.eup %12102 }
 0xc6e   :  { %v18214_v15 = vpop.xlane.xlu1 %9036  ;;  %v8718_v8 = vmul.f32 0.6931472, %v12103_v44  ;;  %v9349_v56 = vsel %vm9275_vm7, %v9248_v26, 0.0  ;;  %v9351_v51 = vsel %vm9275_vm7, %v9249_v33, 0.0  ;;  %v9250_v17 = vmul.f32 %v9186_v53, %v9122_v40  ;;  %v9189_v44 = vld [vmem:[%s18382_s1 + $0x150] sm:$0xff]  ;;  %v9190_v26 = vld [vmem:[%s18382_s1 + $0x158] sm:$0xff] }
 0xc6f   :  { %v8803_v22 = vadd.f32 %v8716_v20, %v17674_v16  ;;  %v19550_v16 = vld [vmem:[#allocation150_spill] sm:$0xff] }
 0xc70   :  { %v9353_v29 = vsel %vm9275_vm7, %v9250_v17, 0.0 }
 0xc71   :  { %v8577_v50 = vpop.xlane.xlu0 %8576  ;;  %v9123_v4 = vsub.f32 %v8803_v22, %v18169_v28 }
 0xc72   :  { %12108 = vlog2.f32 %v8577_v50  ;;  %v9346_v50 = vadd.f32 %v9345_v5, %v9344_v25  ;;  %v19552_v25 = vld [vmem:[#allocation157_spill] sm:$0xff] }
 0xc73   :  { %12110 = vlog2.f32 %v8580_v42  ;;  %v8804_v42 = vadd.f32 %v8718_v8, %v19550_v16  ;;  %v9251_v41 = vmul.f32 %v9187_v36, %v9123_v4  ;;  %v19553_v5 = vld [vmem:[#allocation169_spill] sm:$0xff] }
 0xc74   :  { %v12105_v7 = vpop.eup %12104  ;;  %v9348_v62 = vadd.f32 %v9347_v30, %v9346_v50 }
 0xc75   :  { %v8586_v57 = vpop.xlane.xlu0 %8585  ;;  %v8720_v61 = vmul.f32 0.6931472, %v12105_v7  ;;  %v12107_v1 = vpop.eup %12106  ;;  %v9124_v19 = vsub.f32 %v8804_v42, %v18173_v60  ;;  %v9355_v60 = vsel %vm9275_vm7, %v9251_v41, 0.0  ;;  %v9193_v41 = vld [vmem:[%s18382_s1 + $0x170] sm:$0xff] }
 0xc76   :  { %v9350_v28 = vadd.f32 %v9349_v56, %v9348_v62  ;;  %v8722_v34 = vmul.f32 0.6931472, %v12107_v1  ;;  %v9191_v62 = vld [vmem:[%s18382_s1 + $0x160] sm:$0xff] }
 0xc77   :  { %v8805_v0 = vadd.f32 %v8720_v61, %v19551_v31  ;;  %v9252_v27 = vmul.f32 %v9188_v39, %v9124_v19  ;;  %v19557_v39 = vld [vmem:[#allocation187_spill] sm:$0xff] }
 0xc78   :  { %v9352_v21 = vadd.f32 %v9351_v51, %v9350_v28 }
 0xc79   :  { %v8583_v38 = vpop.xlane.xlu0 %8582  ;;  %v9125_v43 = vsub.f32 %v8805_v0, %v18175_v58 }
 0xc7a   :  { %12112 = vlog2.f32 %v8583_v38  ;;  %v18229_v38 = vpop.xlane.xlu1 %9039 }
 0xc7b   :  { %12114 = vlog2.f32 %v8586_v57  ;;  %v8806_v57 = vadd.f32 %v8722_v34, %v19552_v25  ;;  %v9253_v58 = vmul.f32 %v9189_v44, %v9125_v43 }
 0xc7c   :  { %v12109_v9 = vpop.eup %12108 }
 0xc7d   :  { %v8592_v45 = vpop.xlane.xlu0 %8591  ;;  %v8724_v6 = vmul.f32 0.6931472, %v12109_v9  ;;  %v12111_v49 = vpop.eup %12110  ;;  %v9126_v22 = vsub.f32 %v8806_v57, %v18177_v52  ;;  %v9359_v40 = vsel %vm9275_vm7, %v9253_v58, 0.0  ;;  %v19554_v52 = vld [vmem:[#allocation158_spill] sm:$0xff]  ;;  %v19555_v9 = vld [vmem:[#allocation171_spill] sm:$0xff] }
 0xc7e   :  { %v18243_v7 = vpop.xlane.xlu1 %9042  ;;  %v8726_v30 = vmul.f32 0.6931472, %v12111_v49  ;;  %v19556_v49 = vld [vmem:[#allocation168_spill] sm:$0xff] }
 0xc7f   :  { %v8807_v13 = vadd.f32 %v8724_v6, %v19553_v5  ;;  %v9254_v16 = vmul.f32 %v9190_v26, %v9126_v22  ;;  %v9194_v58 = vld [vmem:[%s18382_s1 + $0x178] sm:$0xff]  ;;  %v19558_v22 = vld [vmem:[#allocation170_spill] sm:$0xff] }
 0xc80   :  { %v8808_v4 = vadd.f32 %v8726_v30, %v19554_v52 }
 0xc81   :  { %v8589_v24 = vpop.xlane.xlu0 %8588  ;;  %v9127_v33 = vsub.f32 %v8807_v13, %v18179_v11  ;;  %v9361_v17 = vsel %vm9275_vm7, %v9254_v16, 0.0  ;;  %v9197_v16 = vld [vmem:[%s18382_s1 + $0x190] sm:$0xff] }
 0xc82   :  { %12116 = vlog2.f32 %v8589_v24  ;;  %v9354_v24 = vadd.f32 %v9353_v29, %v9352_v21  ;;  %v18256_v1 = vpop.xlane.xlu1 %9045  ;;  %v9128_v28 = vsub.f32 %v8808_v4, %v18181_v63 }
 0xc83   :  { %12118 = vlog2.f32 %v8592_v45  ;;  %v9357_v45 = vsel %vm9275_vm7, %v9252_v27, 0.0  ;;  %v9255_v36 = vmul.f32 %v9191_v62, %v9127_v33 }
 0xc84   :  { %v12113_v20 = vpop.eup %12112  ;;  %v9356_v18 = vadd.f32 %v9355_v60, %v9354_v24 }
 0xc85   :  { %v8598_v12 = vpop.xlane.xlu0 %8597  ;;  %v8728_v35 = vmul.f32 0.6931472, %v12113_v20  ;;  %v12115_v8 = vpop.eup %12114  ;;  %v9363_v19 = vsel %vm9275_vm7, %v9255_v36, 0.0 }
 0xc86   :  { %v9358_v42 = vadd.f32 %v9357_v45, %v9356_v18  ;;  %v8730_v56 = vmul.f32 0.6931472, %v12115_v8  ;;  %v18270_v21 = vpop.xlane.xlu1 %9048 }
 0xc87   :  { %v8809_v53 = vadd.f32 %v8728_v35, %v19555_v9 }
 0xc88   :  { %v9360_v31 = vadd.f32 %v9359_v40, %v9358_v42  ;;  %v8810_v63 = vadd.f32 %v8730_v56, %v19556_v49 }
 0xc89   :  { %v8595_v54 = vpop.xlane.xlu0 %8594  ;;  %v9129_v34 = vsub.f32 %v8809_v53, %v18189_v37  ;;  %v9196_v53 = vld [vmem:[%s18382_s1 + $0x188] sm:$0xff] }
 0xc8a   :  { %12120 = vlog2.f32 %v8595_v54  ;;  %v9362_v43 = vadd.f32 %v9361_v17, %v9360_v31  ;;  %v9130_v13 = vsub.f32 %v8810_v63, %v18201_v48  ;;  %v18283_v30 = vpop.xlane.xlu1 %9051  ;;  %v9198_v17 = vld [vmem:[%s18382_s1 + $0x198] sm:$0xff]  ;;  %v19559_v63 = vld [vmem:[#allocation186_spill] sm:$0xff] }
 0xc8b   :  { %12122 = vlog2.f32 %v8598_v12  ;;  %v9192_v12 = vld [vmem:[%s18382_s1 + $0x168] sm:$0xff]  ;;  %v9257_v25 = vmul.f32 %v9193_v41, %v9129_v34 }
 0xc8c   :  { %v12117_v61 = vpop.eup %12116  ;;  %v9256_v20 = vmul.f32 %v9192_v12, %v9128_v28  ;;  %v9364_v29 = vadd.f32 %v9363_v19, %v9362_v43  ;;  %v9258_v33 = vmul.f32 %v9194_v58, %v9130_v13  ;;  %v9201_v58 = vld [vmem:[%s18382_s1 + $0x1b0] sm:$0xff] }
 0xc8d   :  { %v8604_v2 = vpop.xlane.xlu0 %8603  ;;  %v8732_v51 = vmul.f32 0.6931472, %v12117_v61  ;;  %v12119_v0 = vpop.eup %12118  ;;  %v9367_v18 = vsel %vm9275_vm7, %v9257_v25, 0.0 }
 0xc8e   :  { %v8734_v57 = vmul.f32 0.6931472, %v12119_v0  ;;  %v9365_v35 = vsel %vm9275_vm7, %v9256_v20, 0.0  ;;  %v9369_v36 = vsel %vm9275_vm7, %v9258_v33, 0.0 }
 0xc8f   :  { %v8811_v37 = vadd.f32 %v8732_v51, %v19557_v39 }
 0xc91   :  { %v8601_v50 = vpop.xlane.xlu0 %8600  ;;  %v9131_v27 = vsub.f32 %v8811_v37, %v18214_v15  ;;  %v9366_v15 = vadd.f32 %v9365_v35, %v9364_v29  ;;  %v19560_v37 = vld [vmem:[#allocation160_spill] sm:$0xff] }
 0xc92   :  { %12124 = vlog2.f32 %v8601_v50  ;;  %v8812_v50 = vadd.f32 %v8734_v57, %v19558_v22  ;;  %v19561_v22 = vld [vmem:[#allocation173_spill] sm:$0xff] }
 0xc93   :  { %12126 = vlog2.f32 %v8604_v2  ;;  %v9195_v2 = vld [vmem:[%s18382_s1 + $0x180] sm:$0xff]  ;;  %v9368_v62 = vadd.f32 %v9367_v18, %v9366_v15 }
 0xc94   :  { %v12121_v54 = vpop.eup %12120  ;;  %v9259_v61 = vmul.f32 %v9195_v2, %v9131_v27  ;;  %v9132_v52 = vsub.f32 %v8812_v50, %v18229_v38 }
 0xc95   :  { %v8610_v11 = vpop.xlane.xlu0 %8609  ;;  %v8736_v44 = vmul.f32 0.6931472, %v12121_v54  ;;  %v12123_v5 = vpop.eup %12122 }
 0xc96   :  { %v8738_v8 = vmul.f32 0.6931472, %v12123_v5  ;;  %v9371_v56 = vsel %vm9275_vm7, %v9259_v61, 0.0  ;;  %v9260_v51 = vmul.f32 %v9196_v53, %v9132_v52  ;;  %v9203_v53 = vld [vmem:[%s18382_s1 + $0x1c0] sm:$0xff] }
 0xc97   :  { %v8813_v48 = vadd.f32 %v8736_v44, %v17766_v10 }
 0xc98   :  { %v8814_v10 = vadd.f32 %v8738_v8, %v17754_v46  ;;  %v9373_v49 = vsel %vm9275_vm7, %v9260_v51, 0.0 }
 0xc99   :  { %v8607_v6 = vpop.xlane.xlu0 %8606  ;;  %v9133_v4 = vsub.f32 %v8813_v48, %v18243_v7  ;;  %v9370_v7 = vadd.f32 %v9369_v36, %v9368_v62  ;;  %v19562_v48 = vld [vmem:[#allocation162_spill] sm:$0xff]  ;;  %v19563_v36 = vld [vmem:[#allocation164_spill] sm:$0xff] }
 0xc9a   :  { %12128 = vlog2.f32 %v8607_v6  ;;  %v9134_v46 = vsub.f32 %v8814_v10, %v18256_v1 }
 0xc9b   :  { %12130 = vlog2.f32 %v8610_v11  ;;  %v9055_v11 = vpop.xlane.xlu1 %9054  ;;  %v9261_v31 = vmul.f32 %v9197_v16, %v9133_v4  ;;  %v9372_v34 = vadd.f32 %v9371_v56, %v9370_v7 }
 0xc9c   :  { %v12125_v24 = vpop.eup %12124  ;;  %v9262_v20 = vmul.f32 %v9198_v17, %v9134_v46 }
 0xc9d   :  { %v8616_v60 = vpop.xlane.xlu0 %8615  ;;  %v8740_v45 = vmul.f32 0.6931472, %v12125_v24  ;;  %v12127_v40 = vpop.eup %12126  ;;  %v9375_v1 = vsel %vm9275_vm7, %v9261_v31, 0.0  ;;  %v9374_v25 = vadd.f32 %v9373_v49, %v9372_v34  ;;  %v9200_v24 = vld [vmem:[%s18382_s1 + $0x1a8] sm:$0xff] }
 0xc9e   :  { %v8742_v0 = vmul.f32 0.6931472, %v12127_v40  ;;  %v9377_v27 = vsel %vm9275_vm7, %v9262_v20, 0.0 }
 0xc9f   :  { %v8815_v38 = vadd.f32 %v8740_v45, %v17788_v47  ;;  %v9199_v47 = vld [vmem:[%s18382_s1 + $0x1a0] sm:$0xff]  ;;  %v9058_v19 = vpop.xlane.xlu1 %9057  ;;  %v9376_v5 = vadd.f32 %v9375_v1, %v9374_v25 }
 0xca0   :  { %v8816_v39 = vadd.f32 %v8742_v0, %v19559_v63 }
 0xca1   :  { %v8613_v26 = vpop.xlane.xlu0 %8612  ;;  %v9135_v12 = vsub.f32 %v8815_v38, %v18270_v21 }
 0xca2   :  { %12132 = vlog2.f32 %v8613_v26 }
 0xca3   :  { %v9263_v57 = vmul.f32 %v9199_v47, %v9135_v12  ;;  %v9061_v35 = vpop.xlane.xlu1 %9060 }
 0xca4   :  { %v12129_v9 = vpop.eup %12128 }
 0xca5   :  { %v8622_v42 = vpop.xlane.xlu0 %8621  ;;  %v8744_v28 = vmul.f32 0.6931472, %v12129_v9  ;;  %v12131_v41 = vpop.eup %12130  ;;  %v9379_v18 = vsel %vm9275_vm7, %v9263_v57, 0.0  ;;  %v9202_v9 = vld [vmem:[%s18382_s1 + $0x1b8] sm:$0xff] }
 0xca6   :  { %v8746_v44 = vmul.f32 0.6931472, %v12131_v41  ;;  %v9205_v41 = vld [vmem:[%s18382_s1 + $0x1d0] sm:$0xff] }
 0xca7   :  { %v8817_v43 = vadd.f32 %v8744_v28, %v19560_v37  ;;  %v9067_v10 = vpop.xlane.xlu1 %9066 }
 0xca8   :  { %v8818_v50 = vadd.f32 %v8746_v44, %v19561_v22  ;;  %v9207_v44 = vld [vmem:[%s18382_s1 + $0x1e0] sm:$0xff] }
 0xca9   :  { %v8619_v54 = vpop.xlane.xlu0 %8618  ;;  %v9137_v13 = vsub.f32 %v8817_v43, %v9055_v11 }
 0xcaa   :  { %12134 = vlog2.f32 %v8619_v54  ;;  %v9138_v52 = vsub.f32 %v8818_v50, %v9058_v19 }
 0xcab   :  { %12136 = vlog2.f32 %v8616_v60  ;;  %v9136_v60 = vsub.f32 %v8816_v39, %v18283_v30  ;;  %v9378_v30 = vadd.f32 %v9377_v27, %v9376_v5  ;;  %v9265_v33 = vmul.f32 %v9201_v58, %v9137_v13  ;;  %v9073_v49 = vpop.xlane.xlu1 %9072  ;;  %v9206_v13 = vld [vmem:[%s18382_s1 + $0x1d8] sm:$0xff] }
 0xcac   :  { %v12133_v6 = vpop.eup %12132  ;;  %12138 = vlog2.f32 %v8622_v42  ;;  %v9266_v31 = vmul.f32 %v9202_v9, %v9138_v52 }
 0xcad   :  { %v8628_v21 = vpop.xlane.xlu0 %8627  ;;  %v8748_v29 = vmul.f32 0.6931472, %v12133_v6  ;;  %v9264_v26 = vmul.f32 %v9200_v24, %v9136_v60  ;;  %v9380_v45 = vadd.f32 %v9379_v18, %v9378_v30  ;;  %v9383_v42 = vsel %vm9275_vm7, %v9265_v33, 0.0  ;;  %v9204_v6 = vld [vmem:[%s18382_s1 + $0x1c8] sm:$0xff] }
 0xcae   :  { %v9385_v63 = vsel %vm9275_vm7, %v9266_v31, 0.0 }
 0xcaf   :  { %v8819_v15 = vadd.f32 %v8748_v29, %v19562_v48  ;;  %v9381_v16 = vsel %vm9275_vm7, %v9264_v26, 0.0  ;;  %v9208_v26 = vld [vmem:[%s18382_s1 + $0x1e8] sm:$0xff] }
 0xcb0   :  { %v9382_v51 = vadd.f32 %v9381_v16, %v9380_v45 }
 0xcb1   :  { %v8625_v2 = vpop.xlane.xlu0 %8624  ;;  %v9139_v4 = vsub.f32 %v8819_v15, %v9061_v35 }
 0xcb2   :  { %12140 = vlog2.f32 %v8625_v2  ;;  %v9384_v28 = vadd.f32 %v9383_v42, %v9382_v51 }
 0xcb3   :  { %12142 = vlog2.f32 %v8628_v21  ;;  %v9267_v0 = vmul.f32 %v9203_v53, %v9139_v4  ;;  %v9210_v53 = vld [vmem:[%s18382_s1 + $0x1f8] sm:$0xff] }
 0xcb4   :  { %v12135_v8 = vpop.eup %12134 }
 0xcb5   :  { %v12137_v61 = vpop.eup %12136  ;;  %v8752_v62 = vmul.f32 0.6931472, %v12135_v8  ;;  %v8631_v40 = vpop.xlane.xlu0 %8630  ;;  %v9387_v39 = vsel %vm9275_vm7, %v9267_v0, 0.0 }
 0xcb6   :  { %12144 = vlog2.f32 %v8631_v40  ;;  %v8750_v11 = vmul.f32 0.6931472, %v12137_v61  ;;  %v12139_v38 = vpop.eup %12138 }
 0xcb7   :  { %v8821_v56 = vadd.f32 %v8752_v62, %v19563_v36  ;;  %v8754_v46 = vmul.f32 0.6931472, %v12139_v38 }
 0xcb8   :  { %v8820_v17 = vadd.f32 %v8750_v11, %v17810_v3  ;;  %v9386_v3 = vadd.f32 %v9385_v63, %v9384_v28 }
 0xcb9   :  { %v8634_v7 = vpop.xlane.xlu0 %8633  ;;  %v9141_v54 = vsub.f32 %v8821_v56, %v9067_v10  ;;  %v8822_v57 = vadd.f32 %v8754_v46, %v17822_v23  ;;  %v9079_v23 = vpop.xlane.xlu1 %9078 }
 0xcba   :  { %12146 = vlog2.f32 %v8634_v7  ;;  %v9388_v60 = vadd.f32 %v9387_v39, %v9386_v3 }
 0xcbb   :  { %v9269_v20 = vmul.f32 %v9205_v41, %v9141_v54 }
 0xcbc   :  { %v12141_v34 = vpop.eup %12140 }
 0xcbd   :  { %v12143_v12 = vpop.eup %12142  ;;  %v8756_v47 = vmul.f32 0.6931472, %v12141_v34  ;;  %v9064_v19 = vpop.xlane.xlu0 %9063  ;;  %v9391_v50 = vsel %vm9275_vm7, %v9269_v20, 0.0 }
 0xcbe   :  { %v9140_v1 = vsub.f32 %v8820_v17, %v9064_v19  ;;  %v8758_v25 = vmul.f32 0.6931472, %v12143_v12 }
 0xcbf   :  { %v8823_v37 = vadd.f32 %v8756_v47, %v17642_v14 }
 0xcc0   :  { %v12145_v43 = vpop.eup %12144  ;;  %v9268_v21 = vmul.f32 %v9204_v6, %v9140_v1  ;;  %v8824_v48 = vadd.f32 %v8758_v25, %v17836_v32 }
 0xcc1   :  { %v9143_v29 = vsub.f32 %v8823_v37, %v9073_v49  ;;  %v8760_v5 = vmul.f32 0.6931472, %v12145_v43  ;;  %v9070_v27 = vpop.xlane.xlu0 %9069 }
 0xcc2   :  { %v9389_v14 = vsel %vm9275_vm7, %v9268_v21, 0.0  ;;  %v9142_v24 = vsub.f32 %v8822_v57, %v9070_v27 }
 0xcc3   :  { %v8825_v58 = vadd.f32 %v8760_v5, %v17653_v59  ;;  %v9390_v2 = vadd.f32 %v9389_v14, %v9388_v60  ;;  %v9271_v18 = vmul.f32 %v9207_v44, %v9143_v29  ;;  %v9209_v59 = vld [vmem:[%s18382_s1 + $0x1f0] sm:$0xff]  ;;  %s12174_s1 = smov [#allocation2]  }
 0xcc4   :  { %v12147_v35 = vpop.eup %12146  ;;  %v9270_v22 = vmul.f32 %v9206_v13, %v9142_v24  ;;  %s9423_s24 = sshll.u32 %s12174_s1, 4  ;;  %s9424_s24 = int_to_ptr.vmem [resolvable:$true] %s9423_s24 }
 0xcc5   :  { %v9145_v15 = vsub.f32 %v8825_v58, %v9079_v23  ;;  %v8762_v30 = vmul.f32 0.6931472, %v12147_v35  ;;  %v9392_v8 = vadd.f32 %v9391_v50, %v9390_v2  ;;  %v9076_v33 = vpop.xlane.xlu0 %9075  ;;  %v9395_v32 = vsel %vm9275_vm7, %v9271_v18, 0.0  ;;  %s12148_s26 = scalar_lea.vmem %s9424_s24, 16  ;;  %s12152_s2 = scalar_lea.vmem %s9424_s24, 32 }
 0xcc6   :  { %v9393_v61 = vsel %vm9275_vm7, %v9270_v22, 0.0  ;;  %v9144_v45 = vsub.f32 %v8824_v48, %v9076_v33  ;;  %p12149_p0 = scmp.ne.s32.totalorder %s9424_s24, %s12148_s26  ;;  %p12153_p1 = scmp.lt.s32.totalorder %s9424_s24, %s9424_s24 }
 0xcc7   :  { %v9394_v62 = vadd.f32 %v9393_v61, %v9392_v8  ;;  %v8826_v40 = vadd.f32 %v8762_v30, %v17849_v55  ;;  %v9273_v4 = vmul.f32 %v9209_v59, %v9145_v15  ;;  %p12154_p2 = scmp.lt.s32.totalorder %s12152_s2, %s12148_s26 }
 0xcc8   :  { %v9272_v52 = vmul.f32 %v9208_v26, %v9144_v45 }
 0xcc9   :  { %v9396_v9 = vadd.f32 %v9395_v32, %v9394_v62  ;;  %v9082_v10 = vpop.xlane.xlu0 %9081  ;;  %v9399_v56 = vsel %vm9275_vm7, %v9273_v4, 0.0  ;;  %p12155_p3 = por %p12154_p2, %p12153_p1 }
 0xcca   :  { %v9397_v16 = vsel %vm9275_vm7, %v9272_v52, 0.0  ;;  %v9146_v42 = vsub.f32 %v8826_v40, %v9082_v10 }
 0xccb   :  { %v9398_v11 = vadd.f32 %v9397_v16, %v9396_v9  ;;  %p12156_p4 = pnand %p12155_p3, %p12149_p0 }
 0xccc   :  { %v9274_v36 = vmul.f32 %v9210_v53, %v9146_v42 }
 0xccd   :  { %v9400_v38 = vadd.f32 %v9399_v56, %v9398_v11 }
 0xcce   :  { %v9401_v55 = vsel %vm9275_vm7, %v9274_v36, 0.0 }
 0xccf   :  { %v9402_v7 = vadd.f32 %v9401_v55, %v9400_v38 }
 0xcd1   :  { %9403 = vadd.xlane.f32.xlu1 %v9402_v7 }
 0xd5e   :  { %v9404_v51 = vpop.xlane.xlu1 %9403 }
 0xd5f   :  { %v9405_v31 = vrot.slane %v9404_v51, 4 }
 0xd61   :  { %v9406_v0 = vadd.f32 %v9405_v31, %v9404_v51 }
 0xd63   :  { %v9407_v28 = vrot.slane %v9406_v0, 2 }
 0xd65   :  { %v9408_v34 = vadd.f32 %v9407_v28, %v9406_v0 }
 0xd67   :  { %v9409_v46 = vrot.slane %v9408_v34, 1 }
 0xd69   :  { %v9410_v54 = vadd.f32 %v9409_v46, %v9408_v34 }
 0xd6b   :  { %11629 = vpush %v9410_v54 }
 0xd9c   :  { %s11630_s25 = spop %11629 }
 0xd9d   :  { %v9412_v17 = vstv %s11630_s25 }
 0xd9e   :  { %9414 = vst.msk [vmem:[#allocation2] sm:$0x1] %vm9413_vm0, %v9412_v17 }
 0xd9f   :  { %12159 = shalt.err (!%p12156_p4)
}
 0xda0   :  { %s12160_s0 = scalar_lea.hbm %s18385_s4, 16 }
 0xda1   :  { %p12161_p5 = scmp.ne.s32.totalorder %s18385_s4, %s12160_s0  ;;  %p12164_p6 = scmp.lt.u32.totalorder %s12160_s0, %s18385_s4 }
 0xda3   :  { %p12166_p7 = pnand %p12164_p6, %p12161_p5 }
 0xda5   :  { %12169 = shalt.err (!%p12166_p7)
}
 0xda6   :  { %9426 = dma.vmem_to_hbm [thread:$0]  %s9424_s24, 16, %s18385_s4, [#allocation3]  }
 0xda7   :  { %12170 = dma.done.wait [#allocation3], 16  }
 0xda8   :  { %12171 = vsyncadd [#allocation3], 4294967280 }
 0xda9   :  { %9432 = vsyncpa [#allocation3], 1 }

</bundles_post_ra>
